<compile_context>
chip_gen: v6e
topology: v6e:2x2x1
jax: 0.10.0
libtpu: 0.0.40
codegen_flags: <defaults>
</compile_context>

<pallas_src>
import functools

import jax
import jax.numpy as jnp
from jax import lax
from jax.experimental import pallas as pl
from jax.experimental.pallas import tpu as pltpu

LANE = 128


def _round_up(v, m):
    return ((v + m - 1) // m) * m


def _pad2(a, rows, cols):
    return jnp.pad(a, ((0, rows - a.shape[0]), (0, cols - a.shape[1])))


def _pick_tile(n_pad, cap):
    """Largest (8,128)-aligned tile <= cap that divides n_pad."""
    for t in (512, 384, 256, 128):
        if t <= cap and n_pad % t == 0:
            return t
    return LANE


# ---------------------------------------------------------------------------
# Kernel 1: fused SGC encoder + projection head + L2-normalize (both branches)
# ---------------------------------------------------------------------------
def encode_kernel(x_ref, wt_ref, b_ref, a_ref, w1t_ref, b1_ref, w2t_ref, b2_ref,
                  out_ref, hbuf, acc, *, nlayers, rt, kt, n_pad):
    t = pl.program_id(1)          # propagation layer index (0..nlayers-1)
    i = pl.program_id(2)          # output row tile
    k = pl.program_id(3)          # reduction tile (A columns == h rows)
    nk = pl.num_programs(3)

    # Layer 0, first row tile: materialize h0 = relu(x W^T + b) one k-tile per
    # grid step into hbuf slot 0 (computed exactly once per branch; no dead
    # k-steps anywhere in the grid).
    @pl.when(jnp.logical_and(t == 0, i == 0))
    def _():
        h0 = jnp.dot(x_ref[...], wt_ref[...], preferred_element_type=jnp.float32)
        hbuf[pl.ds(pl.multiple_of(k * kt, kt), kt), :] = \
            jnp.maximum(h0 + b_ref[...], 0.0)

    @pl.when(k == 0)
    def _():
        acc[...] = jnp.zeros_like(acc)

    # h_{t+1}[i] += A[i, k] @ h_t[k]   (h_t lives in ping-pong slot t % 2)
    roff = pl.multiple_of((t % 2) * n_pad + k * kt, kt)
    acc[...] += jnp.dot(a_ref[...], hbuf[pl.ds(roff, kt), :],
                        preferred_element_type=jnp.float32)

    @pl.when(k == nk - 1)
    def _():
        # Store h_{t+1} only if another propagation layer still needs it
        # (gates the redundant last-layer VMEM store).
        @pl.when(t < nlayers - 1)
        def _():
            woff = pl.multiple_of(((t + 1) % 2) * n_pad + i * rt, rt)
            hbuf[pl.ds(woff, rt), :] = acc[...]

        # Last layer: fused projection head + L2 normalize, stream result out.
        @pl.when(t == nlayers - 1)
        def _():
            h = acc[...]
            z = jnp.dot(h, w1t_ref[...], preferred_element_type=jnp.float32)
            z = jnp.maximum(z + b1_ref[...], 0.0)
            p = jnp.dot(z, w2t_ref[...], preferred_element_type=jnp.float32) + b2_ref[...]
            ss = jnp.sum(p * p, axis=-1, keepdims=True)
            inv = lax.rsqrt(jnp.maximum(ss, 1e-24))   # == 1 / max(||p||, 1e-12)
            out_ref[...] = (p * inv).astype(out_ref.dtype)


def encode_both(xs, adjs, wts, bs, w1ts, b1s, w2ts, b2s, *, nlayers, rt, kt):
    n_pad, f_pad = xs.shape[1], xs.shape[2]
    e_pad = wts.shape[2]
    p_pad = w2ts.shape[2]
    L = nlayers
    ni, nk = n_pad // rt, n_pad // kt
    n_slots = 1 if L == 1 else 2

    # x is consumed only during layer 0 on row-tile 0 (as h0 source blocks);
    # pin its block index elsewhere so it is not re-fetched.
    def xmap(b, t, i, k):
        return (b, jnp.where(jnp.logical_and(t == 0, i == 0), k, 0), 0)

    def amap(b, t, i, k):
        return (b, i, k)

    def wmap(b, t, i, k):
        return (b, 0, 0)

    def omap(b, t, i, k):
        return (b, jnp.where(t == L - 1, i, 0), 0)

    # VMEM budget (scratch + double-buffered blocks); never below the default.
    est = 4 * (n_slots * n_pad * e_pad + rt * e_pad)                    # scratch
    est += 8 * (rt * kt + kt * f_pad + rt * p_pad                       # A, x, out
                + f_pad * e_pad + e_pad * p_pad + p_pad * p_pad         # weights
                + e_pad + 2 * p_pad)                                    # biases
    vmem_limit = max(32 << 20, min(est * 2 + (2 << 20), 100 << 20))

    return pl.pallas_call(
        functools.partial(encode_kernel, nlayers=L, rt=rt, kt=kt, n_pad=n_pad),
        out_shape=jax.ShapeDtypeStruct((2, n_pad, p_pad), jnp.float32),
        grid=(2, L, ni, nk),
        in_specs=[
            pl.BlockSpec((None, kt, f_pad), xmap),      # x (h0 source row blocks)
            pl.BlockSpec((None, f_pad, e_pad), wmap),   # W^T
            pl.BlockSpec((None, 1, e_pad), wmap),       # b
            pl.BlockSpec((None, rt, kt), amap),         # A
            pl.BlockSpec((None, e_pad, p_pad), wmap),   # W1^T
            pl.BlockSpec((None, 1, p_pad), wmap),       # b1
            pl.BlockSpec((None, p_pad, p_pad), wmap),   # W2^T
            pl.BlockSpec((None, 1, p_pad), wmap),       # b2
        ],
        out_specs=pl.BlockSpec((None, rt, p_pad), omap),
        scratch_shapes=[
            pltpu.VMEM((n_slots * n_pad, e_pad), jnp.float32),  # h ping-pong (flat)
            pltpu.VMEM((rt, e_pad), jnp.float32),               # row-tile accumulator
        ],
        compiler_params=pltpu.CompilerParams(
            dimension_semantics=("parallel", "arbitrary", "arbitrary", "arbitrary"),
            vmem_limit_bytes=vmem_limit),
    )(xs, wts, bs, adjs, w1ts, b1s, w2ts, b2s)


# ---------------------------------------------------------------------------
# Kernel 2: tiled symmetric InfoNCE statistics (both directions from one tile)
# ---------------------------------------------------------------------------
def nce_kernel(*refs, inv_tau, symmetric):
    if symmetric:
        (n1_ref, n2_ref, pos_ref, neg_ref,
         l0_ref, s0_ref, l1_ref, s1_ref) = refs
    else:
        (n1_ref, n2_ref, pos_ref, neg_ref, posc_ref, negc_ref,
         l0_ref, s0_ref, l1_ref, s1_ref) = refs
    j = pl.program_id(1)

    @pl.when(j == 0)
    def _():
        l0_ref[...] = jnp.zeros_like(l0_ref)
        s0_ref[...] = jnp.zeros_like(s0_ref)

    # One sim tile + ONE exp feed both InfoNCE directions.  Inputs are
    # L2-normalized so |sim| <= 1/tau and the unstabilized form (matching the
    # torch reference) cannot overflow in f32.
    sim = lax.dot_general(n1_ref[...], n2_ref[...], (((1,), (1,)), ((), ())),
                          preferred_element_type=jnp.float32) * inv_tau
    e = jnp.exp(sim)
    pos = pos_ref[...].astype(jnp.float32)
    neg = neg_ref[...].astype(jnp.float32)

    # direction z1 -> z2: per-anchor-row stats, accumulated across j in the
    # resident output block (reduced over the lane axis).
    l0_ref[...] += jnp.sum(e * neg, axis=1, keepdims=True)
    s0_ref[...] += jnp.sum(sim * pos, axis=1, keepdims=True)

    # direction z2 -> z1: per-anchor-column partial stats for this row tile.
    # weight[row, col] must be mask[col, row]; with symmetric masks that is the
    # already-loaded [I,J] tile (no transposed mask stream, no XLU transpose).
    if symmetric:
        posc, negc = pos, neg
    else:
        posc = posc_ref[...].astype(jnp.float32)
        negc = negc_ref[...].astype(jnp.float32)
    l1_ref[...] = jnp.sum(e * negc, axis=0, keepdims=True)
    s1_ref[...] = jnp.sum(sim * posc, axis=0, keepdims=True)


def nce_stats(nproj, pos, neg, pos_t=None, neg_t=None, *, tau, tq, tc):
    symmetric = pos_t is None
    n_pad, p_pad = nproj.shape[1], nproj.shape[2]
    ni, nj = n_pad // tq, n_pad // tc

    in_specs = [
        pl.BlockSpec((None, tq, p_pad), lambda i, j: (0, i, 0)),   # z1 rows
        pl.BlockSpec((None, tc, p_pad), lambda i, j: (1, j, 0)),   # z2 rows
        pl.BlockSpec((tq, tc), lambda i, j: (i, j)),               # pos[I, J]
        pl.BlockSpec((tq, tc), lambda i, j: (i, j)),               # neg[I, J]
    ]
    args = [nproj, nproj, pos, neg]
    if not symmetric:
        in_specs += [pl.BlockSpec((tq, tc), lambda i, j: (i, j)),  # pos^T[I, J]
                     pl.BlockSpec((tq, tc), lambda i, j: (i, j))]  # neg^T[I, J]
        args += [pos_t, neg_t]

    n_masks = 2 if symmetric else 4
    est = 8 * (tq + tc) * p_pad              # z tiles (double-buffered, f32)
    est += 4 * n_masks * tq * tc             # mask tiles (double-buffered, bf16)
    est += 16 * tq * tc                      # sim / exp / weighted temporaries
    est += 16 * (tq + tc)                    # O(N) outputs
    vmem_limit = max(32 << 20, min(est * 2 + (2 << 20), 100 << 20))

    return pl.pallas_call(
        functools.partial(nce_kernel, inv_tau=1.0 / tau, symmetric=symmetric),
        out_shape=(
            jax.ShapeDtypeStruct((n_pad, 1), jnp.float32),       # l0 per anchor row
            jax.ShapeDtypeStruct((n_pad, 1), jnp.float32),       # s0 per anchor row
            jax.ShapeDtypeStruct((ni, 1, n_pad), jnp.float32),   # l1 partials per row tile
            jax.ShapeDtypeStruct((ni, 1, n_pad), jnp.float32),   # s1 partials per row tile
        ),
        grid=(ni, nj),
        in_specs=in_specs,
        out_specs=(
            pl.BlockSpec((tq, 1), lambda i, j: (i, 0)),
            pl.BlockSpec((tq, 1), lambda i, j: (i, 0)),
            pl.BlockSpec((None, 1, tc), lambda i, j: (i, 0, j)),
            pl.BlockSpec((None, 1, tc), lambda i, j: (i, 0, j)),
        ),
        # No state carried across the row axis -> it can shard across v7x cores.
        compiler_params=pltpu.CompilerParams(
            dimension_semantics=("parallel", "arbitrary"),
            vmem_limit_bytes=vmem_limit),
    )(*args)


# ---------------------------------------------------------------------------
# DC_contrastive forward
# ---------------------------------------------------------------------------
def dc_contrastive_forward(params, x1, a1, x2, a2, nlayers, tau=0.2,
                           masks_symmetric=True):
    assert nlayers >= 1
    n, f = x1.shape
    e = params["enc1_w"].shape[0]
    p = params["p1_w2"].shape[0]
    n_pad = _round_up(max(n, 256), 256)
    f_pad = _round_up(max(f, LANE), LANE)
    e_pad = _round_up(max(e, LANE), LANE)
    p_pad = _round_up(max(p, LANE), LANE)

    rt = _pick_tile(n_pad, 256)   # encoder output-row tile
    kt = _pick_tile(n_pad, 512)   # encoder reduction (A-column / h-row) tile
    tq = _pick_tile(n_pad, 256)   # InfoNCE anchor-row tile
    tc = _pick_tile(n_pad, 512)   # InfoNCE column tile

    # Stack the two branches along a leading axis (v7x megacore "parallel").
    # In a training loop these padded/stacked arrays are built once and reused.
    xs = jnp.stack([_pad2(x1, n_pad, f_pad), _pad2(x2, n_pad, f_pad)])
    adjs = jnp.stack([_pad2(a1, n_pad, n_pad), _pad2(a2, n_pad, n_pad)])
    wts = jnp.stack([_pad2(params["enc1_w"].T, f_pad, e_pad),
                     _pad2(params["enc2_w"].T, f_pad, e_pad)])
    bs = jnp.stack([_pad2(params["enc1_b"][None, :], 1, e_pad),
                    _pad2(params["enc2_b"][None, :], 1, e_pad)])
    w1ts = jnp.stack([_pad2(params["p1_w1"].T, e_pad, p_pad),
                      _pad2(params["p2_w1"].T, e_pad, p_pad)])
    b1s = jnp.stack([_pad2(params["p1_b1"][None, :], 1, p_pad),
                     _pad2(params["p2_b1"][None, :], 1, p_pad)])
    w2ts = jnp.stack([_pad2(params["p1_w2"].T, p_pad, p_pad),
                      _pad2(params["p2_w2"].T, p_pad, p_pad)])
    b2s = jnp.stack([_pad2(params["p1_b2"][None, :], 1, p_pad),
                     _pad2(params["p2_b2"][None, :], 1, p_pad)])

    nproj = encode_both(xs, adjs, wts, bs, w1ts, b1s, w2ts, b2s,
                        nlayers=nlayers, rt=rt, kt=kt)

    # 0/1 masks are exactly representable in bf16 -> lossless, half the bytes.
    pos = params["pos_mask"].astype(jnp.float32)
    neg = params["neg_mask"].astype(jnp.float32)
    pos_p = _pad2(pos, n_pad, n_pad).astype(jnp.bfloat16)
    neg_p = _pad2(neg, n_pad, n_pad).astype(jnp.bfloat16)
    if masks_symmetric:
        pos_t = neg_t = None     # symmetric masks: single mask stream (default)
    else:
        pos_t = _pad2(pos.T, n_pad, n_pad).astype(jnp.bfloat16)
        neg_t = _pad2(neg.T, n_pad, n_pad).astype(jnp.bfloat16)

    l0, s0, l1p, s1p = nce_stats(nproj, pos_p, neg_p, pos_t, neg_t,
                                 tau=tau, tq=tq, tc=tc)

    # Tiny O(N) epilogue: finalize both InfoNCE directions.
    p_row = jnp.sum(pos, axis=1)               # |positives| per anchor (both dirs)
    l0v, s0v = l0[:n, 0], s0[:n, 0]
    l1v = jnp.sum(l1p, axis=0)[0, :n]
    s1v = jnp.sum(s1p, axis=0)[0, :n]
    loss0 = -jnp.mean(s0v / p_row - jnp.log(l0v))
    loss1 = -jnp.mean(s1v / p_row - jnp.log(l1v))
    return 0.5 * (loss0 + loss1)


# ---------------------------------------------------------------------------
# pure-JAX reference (torch-faithful, f32 highest-precision matmuls)
# ---------------------------------------------------------------------------
def dc_contrastive_reference(params, x1, a1, x2, a2, nlayers, tau=0.2):
    prec = lax.Precision.HIGHEST

    def sgc(x, w, b, a):
        h = jax.nn.relu(jnp.matmul(x, w.T, precision=prec) + b)
        for _ in range(nlayers):
            h = jnp.matmul(a, h, precision=prec)
        return h

    def proj(e_, w1, b1, w2, b2):
        h = jax.nn.relu(jnp.matmul(e_, w1.T, precision=prec) + b1)
        return jnp.matmul(h, w2.T, precision=prec) + b2

    def norm(z):
        return z / jnp.maximum(jnp.linalg.norm(z, axis=-1, keepdims=True), 1e-12)

    def infonce(a_, s_, pos, neg):
        sim = jnp.matmul(norm(a_), norm(s_).T, precision=prec) / tau
        exp_sim = jnp.exp(sim) * neg
        log_prob = sim - jnp.log(exp_sim.sum(1, keepdims=True))
        loss = (log_prob * pos).sum(1) / pos.sum(1)
        return -loss.mean()

    e1 = sgc(x1, params["enc1_w"], params["enc1_b"], a1)
    e2 = sgc(x2, params["enc2_w"], params["enc2_b"], a2)
    p1 = proj(e1, params["p1_w1"], params["p1_b1"], params["p1_w2"], params["p1_b2"])
    p2 = proj(e2, params["p2_w1"], params["p2_b1"], params["p2_w2"], params["p2_b2"])
    pos, neg = params["pos_mask"], params["neg_mask"]
    return 0.5 * (infonce(p1, p2, pos, neg) + infonce(p2, p1, pos, neg))


def _linear_init(key, out_dim, in_dim):
    kw, kb = jax.random.split(key)
    bound = 1.0 / jnp.sqrt(in_dim)
    w = jax.random.uniform(kw, (out_dim, in_dim), jnp.float32, -bound, bound)
    b = jax.random.uniform(kb, (out_dim,), jnp.float32, -bound, bound)
    return w, b


if __name__ == "__main__":
    # N=600 -> N_pad=768: encoder uses 256x384 A blocks (3x2 grid per layer),
    # InfoNCE uses 256x384 sim tiles (3x2 grid) -> real multi-tile coverage.
    N, IN_DIM, EMB_DIM, PROJ_DIM = 600, 48, 64, 32
    NLAYERS = 2          # SGC propagation depth; proj head = Linear-ReLU-Linear
    TAU = 0.2            # batch_size = 0 -> full-batch NCE branch

    key = jax.random.PRNGKey(0)
    ks = jax.random.split(key, 10)

    params = {}
    params["enc1_w"], params["enc1_b"] = _linear_init(ks[0], EMB_DIM, IN_DIM)
    params["enc2_w"], params["enc2_b"] = _linear_init(ks[1], EMB_DIM, IN_DIM)
    params["p1_w1"], params["p1_b1"] = _linear_init(ks[2], PROJ_DIM, EMB_DIM)
    params["p1_w2"], params["p1_b2"] = _linear_init(ks[3], PROJ_DIM, PROJ_DIM)
    params["p2_w1"], params["p2_b1"] = _linear_init(ks[4], PROJ_DIM, EMB_DIM)
    params["p2_w2"], params["p2_b2"] = _linear_init(ks[5], PROJ_DIM, PROJ_DIM)

    # set_mask_knn with k=0: pos_mask = I, neg_mask = 1 - I (symmetric)
    params["pos_mask"] = jnp.eye(N, dtype=jnp.float32)
    params["neg_mask"] = 1.0 - params["pos_mask"]

    x1 = jax.random.normal(ks[6], (N, IN_DIM), jnp.float32)
    x2 = jax.random.normal(ks[7], (N, IN_DIM), jnp.float32)
    a1 = jax.random.uniform(ks[8], (N, N), jnp.float32)
    a1 = a1 / a1.sum(axis=1, keepdims=True)
    a2 = jax.random.uniform(ks[9], (N, N), jnp.float32)
    a2 = a2 / a2.sum(axis=1, keepdims=True)

    forward = jax.jit(dc_contrastive_forward,
                      static_argnames=("nlayers", "tau", "masks_symmetric"))
    loss = forward(params, x1, a1, x2, a2, nlayers=NLAYERS, tau=TAU)
    loss = jax.block_until_ready(loss)

    ref = dc_contrastive_reference(params, x1, a1, x2, a2, NLAYERS, TAU)
    assert jnp.allclose(loss, ref, rtol=1e-4, atol=1e-4), (loss, ref)

    print("KERNEL_OK")
</pallas_src>

<mosaic_0001>
module attributes {stable_mosaic.version = 11 : i64} {
  func.func @encode_kernel(%arg0: i32, %arg1: i32, %arg2: i32, %arg3: i32, %arg4: memref<1x384x128xf32, #tpu.memory_space<vmem>>, %arg5: memref<1x128x128xf32, #tpu.memory_space<vmem>>, %arg6: memref<1x1x128xf32, #tpu.memory_space<vmem>>, %arg7: memref<1x256x384xf32, #tpu.memory_space<vmem>>, %arg8: memref<1x128x128xf32, #tpu.memory_space<vmem>>, %arg9: memref<1x1x128xf32, #tpu.memory_space<vmem>>, %arg10: memref<1x128x128xf32, #tpu.memory_space<vmem>>, %arg11: memref<1x1x128xf32, #tpu.memory_space<vmem>>, %arg12: memref<1x256x128xf32, #tpu.memory_space<vmem>>, %arg13: memref<1536x128xf32, #tpu.memory_space<vmem>>, %arg14: memref<256x128xf32, #tpu.memory_space<vmem>>) attributes {dimension_semantics = [#tpu.dimension_semantics<parallel>, #tpu.dimension_semantics<arbitrary>, #tpu.dimension_semantics<arbitrary>, #tpu.dimension_semantics<arbitrary>], iteration_bounds = array<i64: 2, 2, 3, 2>, scalar_prefetch = 0 : i64, scratch_operands = 2 : i64, tpu.core_type = #tpu.core_type<tc>, window_params = [{transform_indices = @transform_0, window_bounds = array<i64: 1, 384, 128>}, {transform_indices = @transform_1, window_bounds = array<i64: 1, 128, 128>}, {transform_indices = @transform_2, window_bounds = array<i64: 1, 1, 128>}, {transform_indices = @transform_3, window_bounds = array<i64: 1, 256, 384>}, {transform_indices = @transform_4, window_bounds = array<i64: 1, 128, 128>}, {transform_indices = @transform_5, window_bounds = array<i64: 1, 1, 128>}, {transform_indices = @transform_6, window_bounds = array<i64: 1, 128, 128>}, {transform_indices = @transform_7, window_bounds = array<i64: 1, 1, 128>}, {transform_indices = @transform_8, window_bounds = array<i64: 1, 256, 128>}]} {
    %c0_i32 = arith.constant 0 : i32
    %0 = arith.cmpi eq, %arg1, %c0_i32 : i32
    %c0_i32_0 = arith.constant 0 : i32
    %1 = arith.cmpi eq, %arg2, %c0_i32_0 : i32
    %2 = arith.andi %0, %1 : i1
    %3 = arith.extui %2 : i1 to i32
    %c0_i32_1 = arith.constant 0 : i32
    %4 = arith.cmpi ne, %3, %c0_i32_1 : i32
    scf.if %4 {
      %c0_17 = arith.constant 0 : index
      %c0_18 = arith.constant 0 : index
      %c0_19 = arith.constant 0 : index
      %33 = vector.load %arg4[%c0_17, %c0_18, %c0_19] : memref<1x384x128xf32, #tpu.memory_space<vmem>>, vector<1x384x128xf32>
      %34 = vector.shape_cast %33 : vector<1x384x128xf32> to vector<384x128xf32>
      %c0_20 = arith.constant 0 : index
      %c0_21 = arith.constant 0 : index
      %c0_22 = arith.constant 0 : index
      %35 = vector.load %arg5[%c0_20, %c0_21, %c0_22] : memref<1x128x128xf32, #tpu.memory_space<vmem>>, vector<1x128x128xf32>
      %36 = vector.shape_cast %35 : vector<1x128x128xf32> to vector<128x128xf32>
      %cst_23 = arith.constant dense<0.000000e+00> : vector<384x128xf32>
      %37 = tpu.matmul %34, %36, %cst_23 {dimension_numbers = #tpu.dot_dimension_numbers<[1], [0], [0], [1], [0, 0, 1, 1], [], []>} : vector<384x128xf32>, vector<128x128xf32>, vector<384x128xf32> -> vector<384x128xf32>
      %c0_24 = arith.constant 0 : index
      %c0_25 = arith.constant 0 : index
      %c0_26 = arith.constant 0 : index
      %38 = vector.load %arg6[%c0_24, %c0_25, %c0_26] : memref<1x1x128xf32, #tpu.memory_space<vmem>>, vector<1x1x128xf32>
      %39 = vector.shape_cast %38 : vector<1x1x128xf32> to vector<1x128xf32>
      %40 = vector.broadcast %39 : vector<1x128xf32> to vector<384x128xf32>
      %41 = arith.addf %37, %40 : vector<384x128xf32>
      %cst_27 = arith.constant 0.000000e+00 : f32
      %42 = vector.broadcast %cst_27 : f32 to vector<384x128xf32>
      %43 = arith.maximumf %41, %42 : vector<384x128xf32>
      %c384_i32_28 = arith.constant 384 : i32
      %44 = arith.muli %arg3, %c384_i32_28 : i32
      %45 = tpu.assume_multiple %44, 384 : i32
      %46 = arith.index_cast %45 : i32 to index
      %c0_29 = arith.constant 0 : index
      %47 = vector.load %arg13[%46, %c0_29] : memref<1536x128xf32, #tpu.memory_space<vmem>>, vector<384x128xf32>
      tpu.vector_store %arg13[%46, %c0_29], %43 {strides = array<i32>} : memref<1536x128xf32, #tpu.memory_space<vmem>>, vector<384x128xf32>,
    } else {
    }
    %c0_i32_2 = arith.constant 0 : i32
    %5 = arith.cmpi eq, %arg3, %c0_i32_2 : i32
    %6 = arith.extui %5 : i1 to i32
    %c0_i32_3 = arith.constant 0 : i32
    %7 = arith.cmpi ne, %6, %c0_i32_3 : i32
    scf.if %7 {
      %cst_17 = arith.constant 0.000000e+00 : f32
      %33 = vector.broadcast %cst_17 : f32 to vector<256x128xf32>
      %c0_18 = arith.constant 0 : index
      %c0_19 = arith.constant 0 : index
      %34 = vector.load %arg14[%c0_18, %c0_19] : memref<256x128xf32, #tpu.memory_space<vmem>>, vector<256x128xf32>
      tpu.vector_store %arg14[%c0_18, %c0_19], %33 {strides = array<i32>} : memref<256x128xf32, #tpu.memory_space<vmem>>, vector<256x128xf32>,
    } else {
    }
    %c2_i32 = arith.constant 2 : i32
    %c0_i32_4 = arith.constant 0 : i32
    %8 = arith.cmpi eq, %c2_i32, %c0_i32_4 : i32
    %c1_i32 = arith.constant 1 : i32
    %9 = arith.select %8, %c1_i32, %c2_i32 : i32
    %10 = arith.remsi %arg1, %9 : i32
    %c0_i32_5 = arith.constant 0 : i32
    %11 = arith.cmpi ne, %10, %c0_i32_5 : i32
    %c0_i32_6 = arith.constant 0 : i32
    %12 = arith.cmpi slt, %10, %c0_i32_6 : i32
    %c0_i32_7 = arith.constant 0 : i32
    %13 = arith.cmpi slt, %9, %c0_i32_7 : i32
    %14 = arith.xori %12, %13 : i1
    %15 = arith.andi %14, %11 : i1
    %16 = arith.addi %10, %9 : i32
    %17 = arith.select %15, %16, %10 : i32
    %c768_i32 = arith.constant 768 : i32
    %18 = arith.muli %17, %c768_i32 : i32
    %c384_i32 = arith.constant 384 : i32
    %19 = arith.muli %arg3, %c384_i32 : i32
    %20 = arith.addi %18, %19 : i32
    %21 = tpu.assume_multiple %20, 384 : i32
    %c0 = arith.constant 0 : index
    %c0_8 = arith.constant 0 : index
    %22 = vector.load %arg14[%c0, %c0_8] : memref<256x128xf32, #tpu.memory_space<vmem>>, vector<256x128xf32>
    %c0_9 = arith.constant 0 : index
    %c0_10 = arith.constant 0 : index
    %c0_11 = arith.constant 0 : index
    %23 = vector.load %arg7[%c0_9, %c0_10, %c0_11] : memref<1x256x384xf32, #tpu.memory_space<vmem>>, vector<1x256x384xf32>
    %24 = vector.shape_cast %23 : vector<1x256x384xf32> to vector<256x384xf32>
    %25 = arith.index_cast %21 : i32 to index
    %c0_12 = arith.constant 0 : index
    %26 = vector.load %arg13[%25, %c0_12] : memref<1536x128xf32, #tpu.memory_space<vmem>>, vector<384x128xf32>
    %cst = arith.constant dense<0.000000e+00> : vector<256x128xf32>
    %27 = tpu.matmul %24, %26, %cst {dimension_numbers = #tpu.dot_dimension_numbers<[1], [0], [0], [1], [0, 0, 1, 1], [], []>} : vector<256x384xf32>, vector<384x128xf32>, vector<256x128xf32> -> vector<256x128xf32>
    %28 = arith.addf %22, %27 : vector<256x128xf32>
    %c0_13 = arith.constant 0 : index
    %c0_14 = arith.constant 0 : index
    %29 = vector.load %arg14[%c0_13, %c0_14] : memref<256x128xf32, #tpu.memory_space<vmem>>, vector<256x128xf32>
    tpu.vector_store %arg14[%c0_13, %c0_14], %28 {strides = array<i32>} : memref<256x128xf32, #tpu.memory_space<vmem>>, vector<256x128xf32>,
    %c1_i32_15 = arith.constant 1 : i32
    %30 = arith.cmpi eq, %arg3, %c1_i32_15 : i32
    %31 = arith.extui %30 : i1 to i32
    %c0_i32_16 = arith.constant 0 : i32
    %32 = arith.cmpi ne, %31, %c0_i32_16 : i32
    scf.if %32 {
      %c1_i32_17 = arith.constant 1 : i32
      %33 = arith.cmpi slt, %arg1, %c1_i32_17 : i32
      %34 = arith.extui %33 : i1 to i32
      %c0_i32_18 = arith.constant 0 : i32
      %35 = arith.cmpi ne, %34, %c0_i32_18 : i32
      scf.if %35 {
        %c1_i32_21 = arith.constant 1 : i32
        %39 = arith.addi %arg1, %c1_i32_21 : i32
        %c2_i32_22 = arith.constant 2 : i32
        %c0_i32_23 = arith.constant 0 : i32
        %40 = arith.cmpi eq, %c2_i32_22, %c0_i32_23 : i32
        %c1_i32_24 = arith.constant 1 : i32
        %41 = arith.select %40, %c1_i32_24, %c2_i32_22 : i32
        %42 = arith.remsi %39, %41 : i32
        %c0_i32_25 = arith.constant 0 : i32
        %43 = arith.cmpi ne, %42, %c0_i32_25 : i32
        %c0_i32_26 = arith.constant 0 : i32
        %44 = arith.cmpi slt, %42, %c0_i32_26 : i32
        %c0_i32_27 = arith.constant 0 : i32
        %45 = arith.cmpi slt, %41, %c0_i32_27 : i32
        %46 = arith.xori %44, %45 : i1
        %47 = arith.andi %46, %43 : i1
        %48 = arith.addi %42, %41 : i32
        %49 = arith.select %47, %48, %42 : i32
        %c768_i32_28 = arith.constant 768 : i32
        %50 = arith.muli %49, %c768_i32_28 : i32
        %c256_i32 = arith.constant 256 : i32
        %51 = arith.muli %arg2, %c256_i32 : i32
        %52 = arith.addi %50, %51 : i32
        %53 = tpu.assume_multiple %52, 256 : i32
        %c0_29 = arith.constant 0 : index
        %c0_30 = arith.constant 0 : index
        %54 = vector.load %arg14[%c0_29, %c0_30] : memref<256x128xf32, #tpu.memory_space<vmem>>, vector<256x128xf32>
        %55 = arith.index_cast %53 : i32 to index
        %c0_31 = arith.constant 0 : index
        %56 = vector.load %arg13[%55, %c0_31] : memref<1536x128xf32, #tpu.memory_space<vmem>>, vector<256x128xf32>
        tpu.vector_store %arg13[%55, %c0_31], %54 {strides = array<i32>} : memref<1536x128xf32, #tpu.memory_space<vmem>>, vector<256x128xf32>,
      } else {
      }
      %c1_i32_19 = arith.constant 1 : i32
      %36 = arith.cmpi eq, %arg1, %c1_i32_19 : i32
      %37 = arith.extui %36 : i1 to i32
      %c0_i32_20 = arith.constant 0 : i32
      %38 = arith.cmpi ne, %37, %c0_i32_20 : i32
      scf.if %38 {
        %c0_21 = arith.constant 0 : index
        %c0_22 = arith.constant 0 : index
        %39 = vector.load %arg14[%c0_21, %c0_22] : memref<256x128xf32, #tpu.memory_space<vmem>>, vector<256x128xf32>
        %c0_23 = arith.constant 0 : index
        %c0_24 = arith.constant 0 : index
        %c0_25 = arith.constant 0 : index
        %40 = vector.load %arg8[%c0_23, %c0_24, %c0_25] : memref<1x128x128xf32, #tpu.memory_space<vmem>>, vector<1x128x128xf32>
        %41 = vector.shape_cast %40 : vector<1x128x128xf32> to vector<128x128xf32>
        %cst_26 = arith.constant dense<0.000000e+00> : vector<256x128xf32>
        %42 = tpu.matmul %39, %41, %cst_26 {dimension_numbers = #tpu.dot_dimension_numbers<[1], [0], [0], [1], [0, 0, 1, 1], [], []>} : vector<256x128xf32>, vector<128x128xf32>, vector<256x128xf32> -> vector<256x128xf32>
        %c0_27 = arith.constant 0 : index
        %c0_28 = arith.constant 0 : index
        %c0_29 = arith.constant 0 : index
        %43 = vector.load %arg9[%c0_27, %c0_28, %c0_29] : memref<1x1x128xf32, #tpu.memory_space<vmem>>, vector<1x1x128xf32>
        %44 = vector.shape_cast %43 : vector<1x1x128xf32> to vector<1x128xf32>
        %45 = vector.broadcast %44 : vector<1x128xf32> to vector<256x128xf32>
        %46 = arith.addf %42, %45 : vector<256x128xf32>
        %cst_30 = arith.constant 0.000000e+00 : f32
        %47 = vector.broadcast %cst_30 : f32 to vector<256x128xf32>
        %48 = arith.maximumf %46, %47 : vector<256x128xf32>
        %c0_31 = arith.constant 0 : index
        %c0_32 = arith.constant 0 : index
        %c0_33 = arith.constant 0 : index
        %49 = vector.load %arg10[%c0_31, %c0_32, %c0_33] : memref<1x128x128xf32, #tpu.memory_space<vmem>>, vector<1x128x128xf32>
        %50 = vector.shape_cast %49 : vector<1x128x128xf32> to vector<128x128xf32>
        %cst_34 = arith.constant dense<0.000000e+00> : vector<256x128xf32>
        %51 = tpu.matmul %48, %50, %cst_34 {dimension_numbers = #tpu.dot_dimension_numbers<[1], [0], [0], [1], [0, 0, 1, 1], [], []>} : vector<256x128xf32>, vector<128x128xf32>, vector<256x128xf32> -> vector<256x128xf32>
        %c0_35 = arith.constant 0 : index
        %c0_36 = arith.constant 0 : index
        %c0_37 = arith.constant 0 : index
        %52 = vector.load %arg11[%c0_35, %c0_36, %c0_37] : memref<1x1x128xf32, #tpu.memory_space<vmem>>, vector<1x1x128xf32>
        %53 = vector.shape_cast %52 : vector<1x1x128xf32> to vector<1x128xf32>
        %54 = vector.broadcast %53 : vector<1x128xf32> to vector<256x128xf32>
        %55 = arith.addf %51, %54 : vector<256x128xf32>
        %56 = arith.mulf %55, %55 : vector<256x128xf32>
        %cst_38 = arith.constant dense<0.000000e+00> : vector<256xf32>
        %57 = vector.multi_reduction <add>, %56, %cst_38 [1] : vector<256x128xf32> to vector<256xf32>
        %58 = vector.shape_cast %57 : vector<256xf32> to vector<256x1xf32>
        %cst_39 = arith.constant 1.000000e-24 : f32
        %59 = vector.broadcast %cst_39 : f32 to vector<256x1xf32>
        %60 = arith.maximumf %58, %59 : vector<256x1xf32>
        %61 = math.rsqrt %60 : vector<256x1xf32>
        %62 = vector.broadcast %61 : vector<256x1xf32> to vector<256x128xf32>
        %63 = arith.mulf %55, %62 : vector<256x128xf32>
        %c0_40 = arith.constant 0 : index
        %c0_41 = arith.constant 0 : index
        %c0_42 = arith.constant 0 : index
        %64 = vector.load %arg12[%c0_40, %c0_41, %c0_42] : memref<1x256x128xf32, #tpu.memory_space<vmem>>, vector<1x256x128xf32>
        %65 = vector.shape_cast %64 : vector<1x256x128xf32> to vector<256x128xf32>
        %66 = vector.shape_cast %63 : vector<256x128xf32> to vector<1x256x128xf32>
        tpu.vector_store %arg12[%c0_40, %c0_41, %c0_42], %66 {strides = array<i32>} : memref<1x256x128xf32, #tpu.memory_space<vmem>>, vector<1x256x128xf32>,
      } else {
      }
    } else {
    }
    return
  }
  func.func @transform_0(%arg0: i32, %arg1: i32, %arg2: i32, %arg3: i32) -> (i32, i32, i32) {
    %c0_i32 = arith.constant 0 : i32
    %0 = arith.cmpi eq, %arg1, %c0_i32 : i32
    %c0_i32_0 = arith.constant 0 : i32
    %1 = arith.cmpi eq, %arg2, %c0_i32_0 : i32
    %2 = arith.andi %0, %1 : i1
    %c0_i32_1 = arith.constant 0 : i32
    %3 = arith.select %2, %arg3, %c0_i32_1 : i32
    %c0_i32_2 = arith.constant 0 : i32
    %c0_i32_3 = arith.constant 0 : i32
    return %arg0, %3, %c0_i32_2 : i32, i32, i32
  }
  func.func @transform_1(%arg0: i32, %arg1: i32, %arg2: i32, %arg3: i32) -> (i32, i32, i32) {
    %c0_i32 = arith.constant 0 : i32
    %c0_i32_0 = arith.constant 0 : i32
    %c0_i32_1 = arith.constant 0 : i32
    return %arg0, %c0_i32, %c0_i32_0 : i32, i32, i32
  }
  func.func @transform_2(%arg0: i32, %arg1: i32, %arg2: i32, %arg3: i32) -> (i32, i32, i32) {
    %c0_i32 = arith.constant 0 : i32
    %c0_i32_0 = arith.constant 0 : i32
    %c0_i32_1 = arith.constant 0 : i32
    return %arg0, %c0_i32, %c0_i32_0 : i32, i32, i32
  }
  func.func @transform_3(%arg0: i32, %arg1: i32, %arg2: i32, %arg3: i32) -> (i32, i32, i32) {
    %c0_i32 = arith.constant 0 : i32
    return %arg0, %arg2, %arg3 : i32, i32, i32
  }
  func.func @transform_4(%arg0: i32, %arg1: i32, %arg2: i32, %arg3: i32) -> (i32, i32, i32) {
    %c0_i32 = arith.constant 0 : i32
    %c0_i32_0 = arith.constant 0 : i32
    %c0_i32_1 = arith.constant 0 : i32
    return %arg0, %c0_i32, %c0_i32_0 : i32, i32, i32
  }
  func.func @transform_5(%arg0: i32, %arg1: i32, %arg2: i32, %arg3: i32) -> (i32, i32, i32) {
    %c0_i32 = arith.constant 0 : i32
    %c0_i32_0 = arith.constant 0 : i32
    %c0_i32_1 = arith.constant 0 : i32
    return %arg0, %c0_i32, %c0_i32_0 : i32, i32, i32
  }
  func.func @transform_6(%arg0: i32, %arg1: i32, %arg2: i32, %arg3: i32) -> (i32, i32, i32) {
    %c0_i32 = arith.constant 0 : i32
    %c0_i32_0 = arith.constant 0 : i32
    %c0_i32_1 = arith.constant 0 : i32
    return %arg0, %c0_i32, %c0_i32_0 : i32, i32, i32
  }
  func.func @transform_7(%arg0: i32, %arg1: i32, %arg2: i32, %arg3: i32) -> (i32, i32, i32) {
    %c0_i32 = arith.constant 0 : i32
    %c0_i32_0 = arith.constant 0 : i32
    %c0_i32_1 = arith.constant 0 : i32
    return %arg0, %c0_i32, %c0_i32_0 : i32, i32, i32
  }
  func.func @transform_8(%arg0: i32, %arg1: i32, %arg2: i32, %arg3: i32) -> (i32, i32, i32) {
    %c1_i32 = arith.constant 1 : i32
    %0 = arith.cmpi eq, %arg1, %c1_i32 : i32
    %c0_i32 = arith.constant 0 : i32
    %1 = arith.select %0, %arg2, %c0_i32 : i32
    %c0_i32_0 = arith.constant 0 : i32
    %c0_i32_1 = arith.constant 0 : i32
    return %arg0, %1, %c0_i32_0 : i32, i32, i32
  }
}

module attributes {stable_mosaic.version = 11 : i64} {
  func.func @nce_kernel(%arg0: i32, %arg1: i32, %arg2: memref<1x256x128xf32, #tpu.memory_space<vmem>>, %arg3: memref<1x384x128xf32, #tpu.memory_space<vmem>>, %arg4: memref<256x384xbf16, #tpu.memory_space<vmem>>, %arg5: memref<256x384xbf16, #tpu.memory_space<vmem>>, %arg6: memref<256x1xf32, #tpu.memory_space<vmem>>, %arg7: memref<256x1xf32, #tpu.memory_space<vmem>>, %arg8: memref<1x1x384xf32, #tpu.memory_space<vmem>>, %arg9: memref<1x1x384xf32, #tpu.memory_space<vmem>>) attributes {dimension_semantics = [#tpu.dimension_semantics<parallel>, #tpu.dimension_semantics<arbitrary>], iteration_bounds = array<i64: 3, 2>, scalar_prefetch = 0 : i64, scratch_operands = 0 : i64, tpu.core_type = #tpu.core_type<tc>, window_params = [{transform_indices = @transform_0, window_bounds = array<i64: 1, 256, 128>}, {transform_indices = @transform_1, window_bounds = array<i64: 1, 384, 128>}, {transform_indices = @transform_2, window_bounds = array<i64: 256, 384>}, {transform_indices = @transform_3, window_bounds = array<i64: 256, 384>}, {transform_indices = @transform_4, window_bounds = array<i64: 256, 1>}, {transform_indices = @transform_5, window_bounds = array<i64: 256, 1>}, {transform_indices = @transform_6, window_bounds = array<i64: 1, 1, 384>}, {transform_indices = @transform_7, window_bounds = array<i64: 1, 1, 384>}]} {
    %c0_i32 = arith.constant 0 : i32
    %0 = arith.cmpi eq, %arg1, %c0_i32 : i32
    %1 = arith.extui %0 : i1 to i32
    %c0_i32_0 = arith.constant 0 : i32
    %2 = arith.cmpi ne, %1, %c0_i32_0 : i32
    scf.if %2 {
      %cst_29 = arith.constant 0.000000e+00 : f32
      %39 = vector.broadcast %cst_29 : f32 to vector<256x1xf32>
      %c0_30 = arith.constant 0 : index
      %c0_31 = arith.constant 0 : index
      %40 = vector.load %arg6[%c0_30, %c0_31] : memref<256x1xf32, #tpu.memory_space<vmem>>, vector<256x1xf32>
      tpu.vector_store %arg6[%c0_30, %c0_31], %39 {strides = array<i32>} : memref<256x1xf32, #tpu.memory_space<vmem>>, vector<256x1xf32>,
      %cst_32 = arith.constant 0.000000e+00 : f32
      %41 = vector.broadcast %cst_32 : f32 to vector<256x1xf32>
      %c0_33 = arith.constant 0 : index
      %c0_34 = arith.constant 0 : index
      %42 = vector.load %arg7[%c0_33, %c0_34] : memref<256x1xf32, #tpu.memory_space<vmem>>, vector<256x1xf32>
      tpu.vector_store %arg7[%c0_33, %c0_34], %41 {strides = array<i32>} : memref<256x1xf32, #tpu.memory_space<vmem>>, vector<256x1xf32>,
    } else {
    }
    %c0 = arith.constant 0 : index
    %c0_1 = arith.constant 0 : index
    %c0_2 = arith.constant 0 : index
    %3 = vector.load %arg2[%c0, %c0_1, %c0_2] : memref<1x256x128xf32, #tpu.memory_space<vmem>>, vector<1x256x128xf32>
    %4 = vector.shape_cast %3 : vector<1x256x128xf32> to vector<256x128xf32>
    %c0_3 = arith.constant 0 : index
    %c0_4 = arith.constant 0 : index
    %c0_5 = arith.constant 0 : index
    %5 = vector.load %arg3[%c0_3, %c0_4, %c0_5] : memref<1x384x128xf32, #tpu.memory_space<vmem>>, vector<1x384x128xf32>
    %6 = vector.shape_cast %5 : vector<1x384x128xf32> to vector<384x128xf32>
    %cst = arith.constant dense<0.000000e+00> : vector<256x384xf32>
    %7 = tpu.matmul %4, %6, %cst {dimension_numbers = #tpu.dot_dimension_numbers<[1], [1], [0], [0], [0, 0, 1, 0], [], []>} : vector<256x128xf32>, vector<384x128xf32>, vector<256x384xf32> -> vector<256x384xf32>
    %cst_6 = arith.constant 5.000000e+00 : f32
    %8 = vector.broadcast %cst_6 : f32 to vector<256x384xf32>
    %9 = arith.mulf %7, %8 : vector<256x384xf32>
    %10 = math.exp %9 : vector<256x384xf32>
    %c0_7 = arith.constant 0 : index
    %c0_8 = arith.constant 0 : index
    %11 = vector.load %arg4[%c0_7, %c0_8] : memref<256x384xbf16, #tpu.memory_space<vmem>>, vector<256x384xbf16>
    %12 = arith.extf %11 : vector<256x384xbf16> to vector<256x384xf32>
    %c0_9 = arith.constant 0 : index
    %c0_10 = arith.constant 0 : index
    %13 = vector.load %arg5[%c0_9, %c0_10] : memref<256x384xbf16, #tpu.memory_space<vmem>>, vector<256x384xbf16>
    %14 = arith.extf %13 : vector<256x384xbf16> to vector<256x384xf32>
    %c0_11 = arith.constant 0 : index
    %c0_12 = arith.constant 0 : index
    %15 = vector.load %arg6[%c0_11, %c0_12] : memref<256x1xf32, #tpu.memory_space<vmem>>, vector<256x1xf32>
    %16 = arith.mulf %10, %14 : vector<256x384xf32>
    %cst_13 = arith.constant dense<0.000000e+00> : vector<256xf32>
    %17 = vector.multi_reduction <add>, %16, %cst_13 [1] : vector<256x384xf32> to vector<256xf32>
    %18 = vector.shape_cast %17 : vector<256xf32> to vector<256x1xf32>
    %19 = arith.addf %15, %18 : vector<256x1xf32>
    %c0_14 = arith.constant 0 : index
    %c0_15 = arith.constant 0 : index
    %20 = vector.load %arg6[%c0_14, %c0_15] : memref<256x1xf32, #tpu.memory_space<vmem>>, vector<256x1xf32>
    tpu.vector_store %arg6[%c0_14, %c0_15], %19 {strides = array<i32>} : memref<256x1xf32, #tpu.memory_space<vmem>>, vector<256x1xf32>,
    %c0_16 = arith.constant 0 : index
    %c0_17 = arith.constant 0 : index
    %21 = vector.load %arg7[%c0_16, %c0_17] : memref<256x1xf32, #tpu.memory_space<vmem>>, vector<256x1xf32>
    %22 = arith.mulf %9, %12 : vector<256x384xf32>
    %cst_18 = arith.constant dense<0.000000e+00> : vector<256xf32>
    %23 = vector.multi_reduction <add>, %22, %cst_18 [1] : vector<256x384xf32> to vector<256xf32>
    %24 = vector.shape_cast %23 : vector<256xf32> to vector<256x1xf32>
    %25 = arith.addf %21, %24 : vector<256x1xf32>
    %c0_19 = arith.constant 0 : index
    %c0_20 = arith.constant 0 : index
    %26 = vector.load %arg7[%c0_19, %c0_20] : memref<256x1xf32, #tpu.memory_space<vmem>>, vector<256x1xf32>
    tpu.vector_store %arg7[%c0_19, %c0_20], %25 {strides = array<i32>} : memref<256x1xf32, #tpu.memory_space<vmem>>, vector<256x1xf32>,
    %27 = arith.mulf %10, %14 : vector<256x384xf32>
    %cst_21 = arith.constant dense<0.000000e+00> : vector<384xf32>
    %28 = vector.multi_reduction <add>, %27, %cst_21 [0] : vector<256x384xf32> to vector<384xf32>
    %29 = vector.shape_cast %28 : vector<384xf32> to vector<1x384xf32>
    %c0_22 = arith.constant 0 : index
    %c0_23 = arith.constant 0 : index
    %c0_24 = arith.constant 0 : index
    %30 = vector.load %arg8[%c0_22, %c0_23, %c0_24] : memref<1x1x384xf32, #tpu.memory_space<vmem>>, vector<1x1x384xf32>
    %31 = vector.shape_cast %30 : vector<1x1x384xf32> to vector<1x384xf32>
    %32 = vector.shape_cast %29 : vector<1x384xf32> to vector<1x1x384xf32>
    tpu.vector_store %arg8[%c0_22, %c0_23, %c0_24], %32 {strides = array<i32>} : memref<1x1x384xf32, #tpu.memory_space<vmem>>, vector<1x1x384xf32>,
    %33 = arith.mulf %9, %12 : vector<256x384xf32>
    %cst_25 = arith.constant dense<0.000000e+00> : vector<384xf32>
    %34 = vector.multi_reduction <add>, %33, %cst_25 [0] : vector<256x384xf32> to vector<384xf32>
    %35 = vector.shape_cast %34 : vector<384xf32> to vector<1x384xf32>
    %c0_26 = arith.constant 0 : index
    %c0_27 = arith.constant 0 : index
    %c0_28 = arith.constant 0 : index
    %36 = vector.load %arg9[%c0_26, %c0_27, %c0_28] : memref<1x1x384xf32, #tpu.memory_space<vmem>>, vector<1x1x384xf32>
    %37 = vector.shape_cast %36 : vector<1x1x384xf32> to vector<1x384xf32>
    %38 = vector.shape_cast %35 : vector<1x384xf32> to vector<1x1x384xf32>
    tpu.vector_store %arg9[%c0_26, %c0_27, %c0_28], %38 {strides = array<i32>} : memref<1x1x384xf32, #tpu.memory_space<vmem>>, vector<1x1x384xf32>,
    return
  }
  func.func @transform_0(%arg0: i32, %arg1: i32) -> (i32, i32, i32) {
    %c0_i32 = arith.constant 0 : i32
    %c0_i32_0 = arith.constant 0 : i32
    %c0_i32_1 = arith.constant 0 : i32
    return %c0_i32, %arg0, %c0_i32_0 : i32, i32, i32
  }
  func.func @transform_1(%arg0: i32, %arg1: i32) -> (i32, i32, i32) {
    %c1_i32 = arith.constant 1 : i32
    %c0_i32 = arith.constant 0 : i32
    %c0_i32_0 = arith.constant 0 : i32
    return %c1_i32, %arg1, %c0_i32 : i32, i32, i32
  }
  func.func @transform_2(%arg0: i32, %arg1: i32) -> (i32, i32) {
    %c0_i32 = arith.constant 0 : i32
    return %arg0, %arg1 : i32, i32
  }
  func.func @transform_3(%arg0: i32, %arg1: i32) -> (i32, i32) {
    %c0_i32 = arith.constant 0 : i32
    return %arg0, %arg1 : i32, i32
  }
  func.func @transform_4(%arg0: i32, %arg1: i32) -> (i32, i32) {
    %c0_i32 = arith.constant 0 : i32
    %c0_i32_0 = arith.constant 0 : i32
    return %arg0, %c0_i32 : i32, i32
  }
  func.func @transform_5(%arg0: i32, %arg1: i32) -> (i32, i32) {
    %c0_i32 = arith.constant 0 : i32
    %c0_i32_0 = arith.constant 0 : i32
    return %arg0, %c0_i32 : i32, i32
  }
  func.func @transform_6(%arg0: i32, %arg1: i32) -> (i32, i32, i32) {
    %c0_i32 = arith.constant 0 : i32
    %c0_i32_0 = arith.constant 0 : i32
    return %arg0, %c0_i32, %arg1 : i32, i32, i32
  }
  func.func @transform_7(%arg0: i32, %arg1: i32) -> (i32, i32, i32) {
    %c0_i32 = arith.constant 0 : i32
    %c0_i32_0 = arith.constant 0 : i32
    return %arg0, %c0_i32, %arg1 : i32, i32, i32
  }
}

</mosaic_0001>

<bundles_post_ra>
// kernel: dc_contrastive_forward.2
= control target key start
LH: loop header
LB: loop body
LE: loop exit
PB: predicated region body
PF: predicated region fallthrough
CT: control target
= control target key end

     0   :  { %s5183_s0 = inlined_call_operand.vmem [shape: f32[2,768,128], index: 0, kind: input, shape index: {}]   ;;  %s5184_s1 = inlined_call_operand.vmem [shape: f32[2,128,128], index: 1, kind: input, shape index: {}]   ;;  %s5185_s2 = inlined_call_operand.vmem [shape: f32[2,1,128], index: 2, kind: input, shape index: {}]   ;;  %s5186_s3 = inlined_call_operand.vmem [shape: f32[2,768,768], index: 3, kind: input, shape index: {}]   ;;  %s5187_s4 = inlined_call_operand.vmem [shape: f32[2,128,128], index: 4, kind: input, shape index: {}]   ;;  %s5188_s5 = inlined_call_operand.vmem [shape: f32[2,1,128], index: 5, kind: input, shape index: {}]   ;;  %s5189_s6 = inlined_call_operand.vmem [shape: f32[2,128,128], index: 6, kind: input, shape index: {}]   ;;  %s5190_s7 = inlined_call_operand.vmem [shape: f32[2,1,128], index: 7, kind: input, shape index: {}]   ;;  %s5191_s8 = inlined_call_operand.vmem [shape: f32[2,768,128], index: 8, kind: output, shape index: {}]  }
   0x1   :  { %5201 = sst [smem:[#allocation16_spill]] %s5184_s1 }
   0x2   :  { %5202 = sst [smem:[#allocation17_spill]] %s5186_s3 }
   0x3   :  { %5203 = sst [smem:[#allocation18_spill]] %s5187_s4 }
   0x4   :  { %5204 = sst [smem:[#allocation19_spill]] %s5191_s8 }
   0x5   :  { %s4031_s27 = smov 0   ;;  %s4033_s28 = smov 0  }
   0x6   :  { %s4035_s29 = smov 0   ;;  %s4037_s30 = smov 0  }
   0x7   :  { %s4039_s9 = smov 0   ;;  %s4041_s10 = smov 0  }
   0x8   :  { %s4043_s11 = smov 0   ;;  %s4045_s12 = smov 0  }
   0x9   :  { %s4047_s13 = smov 0   ;;  %s4049_s14 = smov 0  }
   0xa   :  { %s4051_s15 = smov 0  }
   0xb LB: > { %5205 = sst [smem:[#allocation5_spill]] %s3946_s28  ;;  %s33_s16 = sadd.s32 1, %s3966_s11  ;;  %s3982_s15 = sphi %s4051_s15, %s18_s15   ;;  %s3978_s14 = sphi %s4049_s14, %s5235_s14   ;;  %s3974_s13 = sphi %s4047_s13, %s5234_s13   ;;  %s3970_s12 = sphi %s4045_s12, %s5233_s12   ;;  %s3966_s11 = sphi %s4043_s11, %s5232_s11   ;;  %s3962_s10 = sphi %s4041_s10, %s5231_s10   ;;  %s3958_s9 = sphi %s4039_s9, %s5230_s9   ;;  %s3954_s30 = sphi %s4037_s30, %s5229_s30   ;;  %s3950_s29 = sphi %s4035_s29, %s5228_s29   ;;  %s3946_s28 = sphi %s4033_s28, %s5227_s28   ;;  %s3942_s27 = sphi %s4031_s27, %s5226_s27  }
   0xc   : > { %5206 = sst [smem:[#allocation6_spill]] %s3966_s11  ;;  %p4087_p0 = scmp.ge.s32.totalorder %s33_s16, 2 }
   0xd   : > { %5207 = sst [smem:[#allocation7_spill]] %s3970_s12  ;;  %s36_s18 = sadd.s32 1, %s3970_s12 }
   0xe   : > { %5208 = sst [smem:[#allocation8_spill]] %s3974_s13  ;;  %s5237_s18 = smov (!%p4087_p0, %s36_s18), %s3970_s12 }
   0xf   : > { %5209 = sst [smem:[#allocation9_spill]] %s3978_s14  ;;  %s40_s19 = sadd.s32 1, %s3974_s13 }
  0x10   : > { %5210 = sst [smem:[#allocation10_spill]] %s3982_s15  ;;  %p152_p1 = scmp.ne.s32.totalorder %s3946_s28, %s3942_s27 }
  0x11   : > { %p38_p2 = scmp.ge.s32.totalorder %s5237_s18, 3  ;;  %p153_p3 = scmp.eq.s32.totalorder %s3982_s15, 0 }
  0x12   : > { %s44_s21 = sadd.s32 1, %s3978_s14  ;;  %s5247_s16 = smov (%p4087_p0, %s33_s16), 0 }
  0x13   : > { %s5239_s19 = smov (!%p38_p2, %s40_s19), %s3974_s13  ;;  %p4100_p4 = por %p153_p3, %p152_p1 }
  0x14   : > { %p42_p5 = scmp.ge.s32.totalorder %s5239_s19, 2  ;;  %s5241_s18 = smov (%p38_p2, %s5237_s18), 0 }
  0x15   : > { %5213 = sst [smem:[#allocation11_spill]] %s5241_s18  ;;  %s139_s22 = ssub.s32 %s3970_s12, %s5241_s18 }
  0x16   : > { %s5243_s19 = smov (%p42_p5, %s5239_s19), 0  ;;  %s5245_s21 = smov (!%p42_p5, %s44_s21), %s3978_s14 }
  0x17   : > { %5214 = sst [smem:[#allocation12_spill]] %s5243_s19  ;;  %p46_p6 = scmp.ge.s32.totalorder %s5245_s21, 2 }
  0x18   : > { %5215 = sst [smem:[#allocation13_spill]] %s5247_s16  ;;  %s141_s23 = ssub.s32 %s3966_s11, %s5247_s16 }
  0x19   : > { %s5249_s21 = smov (%p46_p6, %s5245_s21), 0  ;;  %s145_s13 = sadd.s32 1, %s3946_s28 }
  0x1a   : > { %5216 = sst [smem:[#allocation14_spill]] %s5249_s21  ;;  %s138_s24 = ssub.s32 %s3978_s14, %s5249_s21 }
  0x1b   : > { %s140_s25 = sor.u32 %s139_s22, %s138_s24  ;;  %p3055_p8 = scmp.ge.s32.totalorder %s3982_s15, 24 }
  0x1c   : > { %s142_s26 = sor.u32 %s141_s23, %s140_s25 }
  0x1d   : > { %p143_p7 = scmp.eq.s32.totalorder %s142_s26, 0  ;;  %314 = sbr.rel (%p3055_p8) target bundleno = 92 (0x5c), region = 16 }
  0x1f   : > { %s4124_s8 = scalar_select %p143_p7, %s3946_s28, %s145_s13  }
  0x21   : > { %5217 = sst [smem:[#allocation15_spill]] %s4124_s8 }
  0x22   : > { %354 = sbr.rel (!%p4100_p4) target bundleno = 92 (0x5c), region = 32  ;;  %s356_s17 = sand.u32 (%p4100_p4), 1, %s3946_s28  }
  0x23   : > { %s360_s19 = smul.u32 (%p4100_p4), 3, %s3966_s11  ;;  %s5218_s3 = sld [smem:[#allocation17_spill]] (%p4100_p4) }
  0x24   : > { %s3737_s18 = smul.u32 (%p4100_p4), 768, %s356_s17 }
  0x25   : > { %s3738_s21 = smul.u32 (%p4100_p4), 192, %s3970_s12 }
  0x26   : > { %s3739_s22 = smul.u32 (%p4100_p4), 576, %s3978_s14 }
  0x27   : > { %s362_s23 = sadd.s32 %s3738_s21, %s360_s19  ;;  %s4141_s19 = scalar_lea.vmem [#allocation4], %s3737_s18 }
  0x28   : > { %s364_s24 = sadd.s32 %s3739_s22, %s362_s23 }
  0x29   : > { %s3058_s25 = sshll.u32 %s364_s24, 3 }
  0x2a   : > { %s4136_s16 = scalar_lea.vmem %s5218_s3, %s3058_s25 }
  0x2b   : > { %v379_v0 = vld [vmem:[%s4136_s16] sm:$0xff]  ;;  %v381_v1 = vld [vmem:[%s4136_s16 + $0x8] sm:$0xff]  ;;  %v383_v2 = vld [vmem:[%s4136_s16 + $0x10] sm:$0xff] }
  0x2c   : > { %380 = vst [vmem:[%s4141_s19] sm:$0xff] %v379_v0  ;;  %382 = vst [vmem:[%s4141_s19 + $0x8] sm:$0xff] %v381_v1  ;;  %v385_v3 = vld [vmem:[%s4136_s16 + $0x30] sm:$0xff]  ;;  %v387_v4 = vld [vmem:[%s4136_s16 + $0x38] sm:$0xff] }
  0x2d   : > { %384 = vst [vmem:[%s4141_s19 + $0x10] sm:$0xff] %v383_v2  ;;  %v389_v5 = vld [vmem:[%s4136_s16 + $0x40] sm:$0xff]  ;;  %386 = vst [vmem:[%s4141_s19 + $0x18] sm:$0xff] %v385_v3  ;;  %v393_v7 = vld [vmem:[%s4136_s16 + $0x68] sm:$0xff] }
  0x2e   : > { %388 = vst [vmem:[%s4141_s19 + $0x20] sm:$0xff] %v387_v4  ;;  %390 = vst [vmem:[%s4141_s19 + $0x28] sm:$0xff] %v389_v5  ;;  %v391_v6 = vld [vmem:[%s4136_s16 + $0x60] sm:$0xff]  ;;  %v395_v8 = vld [vmem:[%s4136_s16 + $0x70] sm:$0xff] }
  0x2f   : > { %392 = vst [vmem:[%s4141_s19 + $0x30] sm:$0xff] %v391_v6  ;;  %394 = vst [vmem:[%s4141_s19 + $0x38] sm:$0xff] %v393_v7  ;;  %v397_v9 = vld [vmem:[%s4136_s16 + $0x90] sm:$0xff]  ;;  %v399_v10 = vld [vmem:[%s4136_s16 + $0x98] sm:$0xff] }
  0x30   : > { %396 = vst [vmem:[%s4141_s19 + $0x40] sm:$0xff] %v395_v8  ;;  %v401_v11 = vld [vmem:[%s4136_s16 + $0xa0] sm:$0xff]  ;;  %398 = vst [vmem:[%s4141_s19 + $0x48] sm:$0xff] %v397_v9  ;;  %v405_v13 = vld [vmem:[%s4136_s16 + $0xc8] sm:$0xff] }
  0x31   : > { %400 = vst [vmem:[%s4141_s19 + $0x50] sm:$0xff] %v399_v10  ;;  %402 = vst [vmem:[%s4141_s19 + $0x58] sm:$0xff] %v401_v11  ;;  %v403_v12 = vld [vmem:[%s4136_s16 + $0xc0] sm:$0xff]  ;;  %v407_v14 = vld [vmem:[%s4136_s16 + $0xd0] sm:$0xff] }
  0x32   : > { %404 = vst [vmem:[%s4141_s19 + $0x60] sm:$0xff] %v403_v12  ;;  %406 = vst [vmem:[%s4141_s19 + $0x68] sm:$0xff] %v405_v13  ;;  %v409_v15 = vld [vmem:[%s4136_s16 + $0xf0] sm:$0xff]  ;;  %v411_v16 = vld [vmem:[%s4136_s16 + $0xf8] sm:$0xff] }
  0x33   : > { %408 = vst [vmem:[%s4141_s19 + $0x70] sm:$0xff] %v407_v14  ;;  %v413_v17 = vld [vmem:[%s4136_s16 + $0x100] sm:$0xff]  ;;  %410 = vst [vmem:[%s4141_s19 + $0x78] sm:$0xff] %v409_v15  ;;  %v417_v19 = vld [vmem:[%s4136_s16 + $0x128] sm:$0xff] }
  0x34   : > { %412 = vst [vmem:[%s4141_s19 + $0x80] sm:$0xff] %v411_v16  ;;  %414 = vst [vmem:[%s4141_s19 + $0x88] sm:$0xff] %v413_v17  ;;  %v415_v18 = vld [vmem:[%s4136_s16 + $0x120] sm:$0xff]  ;;  %v419_v20 = vld [vmem:[%s4136_s16 + $0x130] sm:$0xff] }
  0x35   : > { %416 = vst [vmem:[%s4141_s19 + $0x90] sm:$0xff] %v415_v18  ;;  %418 = vst [vmem:[%s4141_s19 + $0x98] sm:$0xff] %v417_v19  ;;  %v421_v21 = vld [vmem:[%s4136_s16 + $0x150] sm:$0xff]  ;;  %v423_v22 = vld [vmem:[%s4136_s16 + $0x158] sm:$0xff] }
  0x36   : > { %420 = vst [vmem:[%s4141_s19 + $0xa0] sm:$0xff] %v419_v20  ;;  %v425_v23 = vld [vmem:[%s4136_s16 + $0x160] sm:$0xff]  ;;  %422 = vst [vmem:[%s4141_s19 + $0xa8] sm:$0xff] %v421_v21  ;;  %v429_v25 = vld [vmem:[%s4136_s16 + $0x188] sm:$0xff] }
  0x37   : > { %424 = vst [vmem:[%s4141_s19 + $0xb0] sm:$0xff] %v423_v22  ;;  %426 = vst [vmem:[%s4141_s19 + $0xb8] sm:$0xff] %v425_v23  ;;  %v427_v24 = vld [vmem:[%s4136_s16 + $0x180] sm:$0xff]  ;;  %v431_v26 = vld [vmem:[%s4136_s16 + $0x190] sm:$0xff] }
  0x38   : > { %428 = vst [vmem:[%s4141_s19 + $0xc0] sm:$0xff] %v427_v24  ;;  %430 = vst [vmem:[%s4141_s19 + $0xc8] sm:$0xff] %v429_v25  ;;  %v433_v27 = vld [vmem:[%s4136_s16 + $0x1b0] sm:$0xff]  ;;  %v435_v28 = vld [vmem:[%s4136_s16 + $0x1b8] sm:$0xff] }
  0x39   : > { %432 = vst [vmem:[%s4141_s19 + $0xd0] sm:$0xff] %v431_v26  ;;  %v437_v29 = vld [vmem:[%s4136_s16 + $0x1c0] sm:$0xff]  ;;  %434 = vst [vmem:[%s4141_s19 + $0xd8] sm:$0xff] %v433_v27  ;;  %v441_v31 = vld [vmem:[%s4136_s16 + $0x1e8] sm:$0xff] }
  0x3a   : > { %436 = vst [vmem:[%s4141_s19 + $0xe0] sm:$0xff] %v435_v28  ;;  %438 = vst [vmem:[%s4141_s19 + $0xe8] sm:$0xff] %v437_v29  ;;  %v439_v30 = vld [vmem:[%s4136_s16 + $0x1e0] sm:$0xff]  ;;  %v443_v32 = vld [vmem:[%s4136_s16 + $0x1f0] sm:$0xff] }
  0x3b   : > { %440 = vst [vmem:[%s4141_s19 + $0xf0] sm:$0xff] %v439_v30  ;;  %442 = vst [vmem:[%s4141_s19 + $0xf8] sm:$0xff] %v441_v31  ;;  %v445_v33 = vld [vmem:[%s4136_s16 + $0x210] sm:$0xff]  ;;  %v447_v34 = vld [vmem:[%s4136_s16 + $0x218] sm:$0xff] }
  0x3c   : > { %444 = vst [vmem:[%s4141_s19 + $0x100] sm:$0xff] %v443_v32  ;;  %v449_v35 = vld [vmem:[%s4136_s16 + $0x220] sm:$0xff]  ;;  %446 = vst [vmem:[%s4141_s19 + $0x108] sm:$0xff] %v445_v33  ;;  %v453_v37 = vld [vmem:[%s4136_s16 + $0x248] sm:$0xff] }
  0x3d   : > { %448 = vst [vmem:[%s4141_s19 + $0x110] sm:$0xff] %v447_v34  ;;  %450 = vst [vmem:[%s4141_s19 + $0x118] sm:$0xff] %v449_v35  ;;  %v451_v36 = vld [vmem:[%s4136_s16 + $0x240] sm:$0xff]  ;;  %v455_v38 = vld [vmem:[%s4136_s16 + $0x250] sm:$0xff] }
  0x3e   : > { %452 = vst [vmem:[%s4141_s19 + $0x120] sm:$0xff] %v451_v36  ;;  %454 = vst [vmem:[%s4141_s19 + $0x128] sm:$0xff] %v453_v37  ;;  %v457_v39 = vld [vmem:[%s4136_s16 + $0x270] sm:$0xff]  ;;  %v459_v40 = vld [vmem:[%s4136_s16 + $0x278] sm:$0xff] }
  0x3f   : > { %456 = vst [vmem:[%s4141_s19 + $0x130] sm:$0xff] %v455_v38  ;;  %v461_v41 = vld [vmem:[%s4136_s16 + $0x280] sm:$0xff]  ;;  %458 = vst [vmem:[%s4141_s19 + $0x138] sm:$0xff] %v457_v39  ;;  %v465_v43 = vld [vmem:[%s4136_s16 + $0x2a8] sm:$0xff] }
  0x40   : > { %460 = vst [vmem:[%s4141_s19 + $0x140] sm:$0xff] %v459_v40  ;;  %462 = vst [vmem:[%s4141_s19 + $0x148] sm:$0xff] %v461_v41  ;;  %v463_v42 = vld [vmem:[%s4136_s16 + $0x2a0] sm:$0xff]  ;;  %v467_v44 = vld [vmem:[%s4136_s16 + $0x2b0] sm:$0xff] }
  0x41   : > { %464 = vst [vmem:[%s4141_s19 + $0x150] sm:$0xff] %v463_v42  ;;  %466 = vst [vmem:[%s4141_s19 + $0x158] sm:$0xff] %v465_v43  ;;  %v469_v45 = vld [vmem:[%s4136_s16 + $0x2d0] sm:$0xff]  ;;  %v471_v46 = vld [vmem:[%s4136_s16 + $0x2d8] sm:$0xff] }
  0x42   : > { %468 = vst [vmem:[%s4141_s19 + $0x160] sm:$0xff] %v467_v44  ;;  %v473_v47 = vld [vmem:[%s4136_s16 + $0x2e0] sm:$0xff]  ;;  %470 = vst [vmem:[%s4141_s19 + $0x168] sm:$0xff] %v469_v45  ;;  %v477_v49 = vld [vmem:[%s4136_s16 + $0x308] sm:$0xff] }
  0x43   : > { %472 = vst [vmem:[%s4141_s19 + $0x170] sm:$0xff] %v471_v46  ;;  %474 = vst [vmem:[%s4141_s19 + $0x178] sm:$0xff] %v473_v47  ;;  %v475_v48 = vld [vmem:[%s4136_s16 + $0x300] sm:$0xff]  ;;  %v479_v50 = vld [vmem:[%s4136_s16 + $0x310] sm:$0xff] }
  0x44   : > { %476 = vst [vmem:[%s4141_s19 + $0x180] sm:$0xff] %v475_v48  ;;  %478 = vst [vmem:[%s4141_s19 + $0x188] sm:$0xff] %v477_v49  ;;  %v481_v51 = vld [vmem:[%s4136_s16 + $0x330] sm:$0xff]  ;;  %v483_v52 = vld [vmem:[%s4136_s16 + $0x338] sm:$0xff] }
  0x45   : > { %480 = vst [vmem:[%s4141_s19 + $0x190] sm:$0xff] %v479_v50  ;;  %v485_v53 = vld [vmem:[%s4136_s16 + $0x340] sm:$0xff]  ;;  %482 = vst [vmem:[%s4141_s19 + $0x198] sm:$0xff] %v481_v51  ;;  %v489_v55 = vld [vmem:[%s4136_s16 + $0x368] sm:$0xff] }
  0x46   : > { %484 = vst [vmem:[%s4141_s19 + $0x1a0] sm:$0xff] %v483_v52  ;;  %486 = vst [vmem:[%s4141_s19 + $0x1a8] sm:$0xff] %v485_v53  ;;  %v487_v54 = vld [vmem:[%s4136_s16 + $0x360] sm:$0xff]  ;;  %v491_v56 = vld [vmem:[%s4136_s16 + $0x370] sm:$0xff] }
  0x47   : > { %488 = vst [vmem:[%s4141_s19 + $0x1b0] sm:$0xff] %v487_v54  ;;  %490 = vst [vmem:[%s4141_s19 + $0x1b8] sm:$0xff] %v489_v55  ;;  %v493_v57 = vld [vmem:[%s4136_s16 + $0x390] sm:$0xff]  ;;  %v495_v58 = vld [vmem:[%s4136_s16 + $0x398] sm:$0xff] }
  0x48   : > { %492 = vst [vmem:[%s4141_s19 + $0x1c0] sm:$0xff] %v491_v56  ;;  %v497_v59 = vld [vmem:[%s4136_s16 + $0x3a0] sm:$0xff]  ;;  %494 = vst [vmem:[%s4141_s19 + $0x1c8] sm:$0xff] %v493_v57  ;;  %v501_v61 = vld [vmem:[%s4136_s16 + $0x3c8] sm:$0xff] }
  0x49   : > { %496 = vst [vmem:[%s4141_s19 + $0x1d0] sm:$0xff] %v495_v58  ;;  %498 = vst [vmem:[%s4141_s19 + $0x1d8] sm:$0xff] %v497_v59  ;;  %v499_v60 = vld [vmem:[%s4136_s16 + $0x3c0] sm:$0xff]  ;;  %v503_v62 = vld [vmem:[%s4136_s16 + $0x3d0] sm:$0xff] }
  0x4a   : > { %500 = vst [vmem:[%s4141_s19 + $0x1e0] sm:$0xff] %v499_v60  ;;  %502 = vst [vmem:[%s4141_s19 + $0x1e8] sm:$0xff] %v501_v61  ;;  %v505_v63 = vld [vmem:[%s4136_s16 + $0x3f0] sm:$0xff]  ;;  %v507_v0 = vld [vmem:[%s4136_s16 + $0x3f8] sm:$0xff] }
  0x4b   : > { %504 = vst [vmem:[%s4141_s19 + $0x1f0] sm:$0xff] %v503_v62  ;;  %v509_v1 = vld [vmem:[%s4136_s16 + $0x400] sm:$0xff]  ;;  %506 = vst [vmem:[%s4141_s19 + $0x1f8] sm:$0xff] %v505_v63  ;;  %v513_v3 = vld [vmem:[%s4136_s16 + $0x428] sm:$0xff] }
  0x4c   : > { %508 = vst [vmem:[%s4141_s19 + $0x200] sm:$0xff] %v507_v0  ;;  %510 = vst [vmem:[%s4141_s19 + $0x208] sm:$0xff] %v509_v1  ;;  %v511_v2 = vld [vmem:[%s4136_s16 + $0x420] sm:$0xff]  ;;  %v515_v4 = vld [vmem:[%s4136_s16 + $0x430] sm:$0xff] }
  0x4d   : > { %512 = vst [vmem:[%s4141_s19 + $0x210] sm:$0xff] %v511_v2  ;;  %514 = vst [vmem:[%s4141_s19 + $0x218] sm:$0xff] %v513_v3  ;;  %v517_v5 = vld [vmem:[%s4136_s16 + $0x450] sm:$0xff]  ;;  %v519_v6 = vld [vmem:[%s4136_s16 + $0x458] sm:$0xff] }
  0x4e   : > { %516 = vst [vmem:[%s4141_s19 + $0x220] sm:$0xff] %v515_v4  ;;  %v521_v7 = vld [vmem:[%s4136_s16 + $0x460] sm:$0xff]  ;;  %518 = vst [vmem:[%s4141_s19 + $0x228] sm:$0xff] %v517_v5  ;;  %v525_v9 = vld [vmem:[%s4136_s16 + $0x488] sm:$0xff] }
  0x4f   : > { %520 = vst [vmem:[%s4141_s19 + $0x230] sm:$0xff] %v519_v6  ;;  %522 = vst [vmem:[%s4141_s19 + $0x238] sm:$0xff] %v521_v7  ;;  %v523_v8 = vld [vmem:[%s4136_s16 + $0x480] sm:$0xff]  ;;  %v527_v10 = vld [vmem:[%s4136_s16 + $0x490] sm:$0xff] }
  0x50   : > { %524 = vst [vmem:[%s4141_s19 + $0x240] sm:$0xff] %v523_v8  ;;  %526 = vst [vmem:[%s4141_s19 + $0x248] sm:$0xff] %v525_v9  ;;  %v529_v11 = vld [vmem:[%s4136_s16 + $0x4b0] sm:$0xff]  ;;  %v531_v12 = vld [vmem:[%s4136_s16 + $0x4b8] sm:$0xff] }
  0x51   : > { %528 = vst [vmem:[%s4141_s19 + $0x250] sm:$0xff] %v527_v10  ;;  %v533_v13 = vld [vmem:[%s4136_s16 + $0x4c0] sm:$0xff]  ;;  %530 = vst [vmem:[%s4141_s19 + $0x258] sm:$0xff] %v529_v11  ;;  %v537_v15 = vld [vmem:[%s4136_s16 + $0x4e8] sm:$0xff] }
  0x52   : > { %532 = vst [vmem:[%s4141_s19 + $0x260] sm:$0xff] %v531_v12  ;;  %534 = vst [vmem:[%s4141_s19 + $0x268] sm:$0xff] %v533_v13  ;;  %v535_v14 = vld [vmem:[%s4136_s16 + $0x4e0] sm:$0xff]  ;;  %v539_v16 = vld [vmem:[%s4136_s16 + $0x4f0] sm:$0xff] }
  0x53   : > { %536 = vst [vmem:[%s4141_s19 + $0x270] sm:$0xff] %v535_v14  ;;  %538 = vst [vmem:[%s4141_s19 + $0x278] sm:$0xff] %v537_v15  ;;  %v541_v17 = vld [vmem:[%s4136_s16 + $0x510] sm:$0xff]  ;;  %v543_v18 = vld [vmem:[%s4136_s16 + $0x518] sm:$0xff] }
  0x54   : > { %540 = vst [vmem:[%s4141_s19 + $0x280] sm:$0xff] %v539_v16  ;;  %v545_v19 = vld [vmem:[%s4136_s16 + $0x520] sm:$0xff]  ;;  %542 = vst [vmem:[%s4141_s19 + $0x288] sm:$0xff] %v541_v17  ;;  %v549_v21 = vld [vmem:[%s4136_s16 + $0x548] sm:$0xff] }
  0x55   : > { %544 = vst [vmem:[%s4141_s19 + $0x290] sm:$0xff] %v543_v18  ;;  %546 = vst [vmem:[%s4141_s19 + $0x298] sm:$0xff] %v545_v19  ;;  %v547_v20 = vld [vmem:[%s4136_s16 + $0x540] sm:$0xff]  ;;  %v551_v22 = vld [vmem:[%s4136_s16 + $0x550] sm:$0xff] }
  0x56   : > { %548 = vst [vmem:[%s4141_s19 + $0x2a0] sm:$0xff] %v547_v20  ;;  %550 = vst [vmem:[%s4141_s19 + $0x2a8] sm:$0xff] %v549_v21  ;;  %v553_v23 = vld [vmem:[%s4136_s16 + $0x570] sm:$0xff]  ;;  %v555_v24 = vld [vmem:[%s4136_s16 + $0x578] sm:$0xff] }
  0x57   : > { %552 = vst [vmem:[%s4141_s19 + $0x2b0] sm:$0xff] %v551_v22  ;;  %v557_v25 = vld [vmem:[%s4136_s16 + $0x580] sm:$0xff]  ;;  %554 = vst [vmem:[%s4141_s19 + $0x2b8] sm:$0xff] %v553_v23  ;;  %v561_v27 = vld [vmem:[%s4136_s16 + $0x5a8] sm:$0xff] }
  0x58   : > { %556 = vst [vmem:[%s4141_s19 + $0x2c0] sm:$0xff] %v555_v24  ;;  %558 = vst [vmem:[%s4141_s19 + $0x2c8] sm:$0xff] %v557_v25  ;;  %v559_v26 = vld [vmem:[%s4136_s16 + $0x5a0] sm:$0xff]  ;;  %v563_v28 = vld [vmem:[%s4136_s16 + $0x5b0] sm:$0xff] }
  0x59   : > { %560 = vst [vmem:[%s4141_s19 + $0x2d0] sm:$0xff] %v559_v26  ;;  %562 = vst [vmem:[%s4141_s19 + $0x2d8] sm:$0xff] %v561_v27  ;;  %v565_v29 = vld [vmem:[%s4136_s16 + $0x5d0] sm:$0xff]  ;;  %v567_v30 = vld [vmem:[%s4136_s16 + $0x5d8] sm:$0xff] }
  0x5a   : > { %564 = vst [vmem:[%s4141_s19 + $0x2e0] sm:$0xff] %v563_v28  ;;  %v569_v31 = vld [vmem:[%s4136_s16 + $0x5e0] sm:$0xff]  ;;  %566 = vst [vmem:[%s4141_s19 + $0x2e8] sm:$0xff] %v565_v29 }
  0x5b   : > { %568 = vst [vmem:[%s4141_s19 + $0x2f0] sm:$0xff] %v567_v30  ;;  %570 = vst [vmem:[%s4141_s19 + $0x2f8] sm:$0xff] %v569_v31 }
  0x5c PF: > { %p3059_p9 = scmp.ge.s32.totalorder %s3982_s15, 1  ;;  %p603_p10 = scmp.lt.s32.totalorder %s3982_s15, 25 }
  0x5e   : > { %p604_p11 = pnand %p3059_p9, %p603_p10 }
  0x5f   : > { %s610_s18 = sand.u32 (!%p604_p11), 1, %s3942_s27   ;;  %p687_p12 = scmp.eq.s32.totalorder (!%p604_p11), %s3958_s9, 0 }
  0x60   : > { %607 = sbr.rel (%p604_p11) target bundleno = 1475 (0x5c3), region = 71  ;;  %p688_p13 = scmp.eq.s32.totalorder (!%p604_p11), %s3954_s30, 0 }
  0x61   : > { %s3740_s16 = smul.u32 (!%p604_p11), 768, %s610_s18  ;;  %p693_p0 = scmp.lt.s32.totalorder (!%p604_p11), %s3962_s10, 1 }
  0x62   : > { %p733_p1 = scmp.eq.s32.totalorder (!%p604_p11), %s3958_s9, 1  ;;  %p4339_p2 = pnand (!%p604_p11), %p688_p13, %p687_p12 }
  0x63   : > { %s5220_s1 = sld [smem:[#allocation16_spill]] (!%p604_p11)  ;;  %s4391_s24 = scalar_lea.vmem (!%p604_p11), [#allocation4], %s3740_s16 }
  0x64   : > { %s5221_s4 = sld [smem:[#allocation18_spill]] (!%p604_p11) }
  0x65   : > { %s5251_s10 = smov (!%p693_p0, %s3962_s10), 1  ;;  %s5222_s8 = sld [smem:[#allocation19_spill]] }
  0x66   : > { %s3060_s27 = scalar_select %p4339_p2, 0, %s3950_s29 }
  0x67   : > { %s3741_s21 = smul.u32 96, %s5251_s10  ;;  %s3086_s17 = sshll.u32 %s5251_s10, 7 }
  0x68   : > { %s692_s22 = smul.u32 48, %s3060_s27  ;;  %s4372_s23 = scalar_lea.vmem %s5189_s6, %s3086_s17 }
  0x69   : > { %s4354_s25 = scalar_lea.vmem %s5220_s1, %s3086_s17  ;;  %s732_s13 = scalar_lea.vmem %s5190_s7, %s5251_s10 }
  0x6a   : > { %s4363_s14 = scalar_lea.vmem %s5221_s4, %s3086_s17  ;;  %p695_p3 = scmp.lt.s32.totalorder %s692_s22, 95 }
  0x6b   : > { %s734_s26 = scalar_select %p733_p1, %s3954_s30, 0 }
  0x6c   : > { %s5253_s22 = smov (!%p695_p3, %s692_s22), 95  ;;  %s5223_s15 = scalar_lea.vmem (!%p4339_p2), %s5185_s2, %s5251_s10 }
  0x6d   : > { %s698_s3 = sadd.s32 %s3741_s21, %s5253_s22  ;;  %s3068_s19 = sshll.u32 %s734_s26, 5 }
  0x6e   : > { %s3061_s18 = sshll.u32 %s698_s3, 3  ;;  %p738_p4 = scmp.lt.s32.totalorder %s3068_s19, 95 }
  0x6f   : > { %s4384_s11 = scalar_lea.vmem %s5183_s0, %s3061_s18  ;;  %752 = sbr.rel (%p4339_p2) target bundleno = 394 (0x18a), region = 79 }
  0x70   : > { %s5255_s19 = smov (!%p738_p4, %s3068_s19), 95  ;;  %s1177_s16 = smul.u32 (!%p4339_p2), 384, %s3950_s29 }
  0x71   : > { %s741_s28 = sadd.s32 %s3741_s21, %s5255_s19 }
  0x72   : > { %s3069_s12 = sshll.u32 %s741_s28, 3  ;;  %s4471_s20 = scalar_lea.vmem (!%p4339_p2), [#allocation2], %s1177_s16 }
  0x73   : > { %s4389_s1 = scalar_lea.vmem %s5222_s8, %s3069_s12 }
  0x74   : > { %v816_v32 = vld [vmem:[%s4354_s25 + $0x78] sm:$0xff]  ;;  %v815_v33 = vld [vmem:[%s4354_s25 + $0x70] sm:$0xff]  ;;  %v814_v34 = vld [vmem:[%s4354_s25 + $0x68] sm:$0xff] }
  0x75   : > { %3297 = vmatprep.subr.mxu0 %v816_v32  ;;  %3641 = vmatprep.subr.mxu1 %v816_v32  ;;  %v813_v35 = vld [vmem:[%s4354_s25 + $0x60] sm:$0xff]  ;;  %v812_v36 = vld [vmem:[%s4354_s25 + $0x58] sm:$0xff]  ;;  %v811_v37 = vld [vmem:[%s4354_s25 + $0x50] sm:$0xff] }
  0x76   : > { %3298 = vmatpush3.msra.mxu0 %v816_v32  ;;  %3657 = vmatpush3.msra.mxu1 %v816_v32  ;;  %v810_v38 = vld [vmem:[%s4354_s25 + $0x48] sm:$0xff]  ;;  %v809_v39 = vld [vmem:[%s4354_s25 + $0x40] sm:$0xff]  ;;  %v808_v40 = vld [vmem:[%s4354_s25 + $0x38] sm:$0xff] }
  0x77   : > { %3299 = vmatprep.subr.mxu0 %v815_v33  ;;  %3642 = vmatprep.subr.mxu1 %v815_v33  ;;  %v807_v41 = vld [vmem:[%s4354_s25 + $0x30] sm:$0xff]  ;;  %v806_v42 = vld [vmem:[%s4354_s25 + $0x28] sm:$0xff]  ;;  %v805_v43 = vld [vmem:[%s4354_s25 + $0x20] sm:$0xff] }
  0x78   : > { %3300 = vmatpush3.msra.mxu0 %v815_v33  ;;  %3658 = vmatpush3.msra.mxu1 %v815_v33  ;;  %v804_v44 = vld [vmem:[%s4354_s25 + $0x18] sm:$0xff]  ;;  %v803_v45 = vld [vmem:[%s4354_s25 + $0x10] sm:$0xff]  ;;  %v802_v46 = vld [vmem:[%s4354_s25 + $0x8] sm:$0xff] }
  0x79   : > { %3301 = vmatprep.subr.mxu0 %v814_v34  ;;  %3643 = vmatprep.subr.mxu1 %v814_v34  ;;  %v801_v47 = vld [vmem:[%s4354_s25] sm:$0xff]  ;;  %v754_v50 = vld [vmem:[%s4384_s11 + $0x8] sm:$0xff]  ;;  %v755_v52 = vld [vmem:[%s4384_s11 + $0x10] sm:$0xff] }
  0x7a   : > { %3302 = vmatpush3.msra.mxu0 %v814_v34  ;;  %3659 = vmatpush3.msra.mxu1 %v814_v34  ;;  %v753_v48 = vld [vmem:[%s4384_s11] sm:$0xff]  ;;  %v778_v51 = vld [vmem:[%s4384_s11 + $0xc8] sm:$0xff]  ;;  %v779_v53 = vld [vmem:[%s4384_s11 + $0xd0] sm:$0xff] }
  0x7b   : > { %3303 = vmatprep.subr.mxu0 %v813_v35  ;;  %3644 = vmatprep.subr.mxu1 %v813_v35  ;;  %v777_v49 = vld [vmem:[%s4384_s11 + $0xc0] sm:$0xff]  ;;  %v756_v54 = vld [vmem:[%s4384_s11 + $0x18] sm:$0xff]  ;;  %v758_v58 = vld [vmem:[%s4384_s11 + $0x28] sm:$0xff] }
  0x7c   : > { %3304 = vmatpush3.msra.mxu0 %v813_v35  ;;  %3660 = vmatpush3.msra.mxu1 %v813_v35  ;;  %v780_v55 = vld [vmem:[%s4384_s11 + $0xd8] sm:$0xff]  ;;  %v757_v56 = vld [vmem:[%s4384_s11 + $0x20] sm:$0xff]  ;;  %v782_v59 = vld [vmem:[%s4384_s11 + $0xe8] sm:$0xff] }
  0x7d   : > { %3305 = vmatprep.subr.mxu0 %v812_v36  ;;  %3645 = vmatprep.subr.mxu1 %v812_v36  ;;  %v781_v57 = vld [vmem:[%s4384_s11 + $0xe0] sm:$0xff]  ;;  %v759_v60 = vld [vmem:[%s4384_s11 + $0x30] sm:$0xff]  ;;  %v760_v62 = vld [vmem:[%s4384_s11 + $0x38] sm:$0xff] }
  0x7e   : > { %3306 = vmatpush3.msra.mxu0 %v812_v36  ;;  %3661 = vmatpush3.msra.mxu1 %v812_v36  ;;  %v783_v61 = vld [vmem:[%s4384_s11 + $0xf0] sm:$0xff]  ;;  %v784_v63 = vld [vmem:[%s4384_s11 + $0xf8] sm:$0xff]  ;;  %v761_v0 = vld [vmem:[%s4384_s11 + $0x40] sm:$0xff] }
  0x7f   : > { %3307 = vmatprep.subr.mxu0 %v811_v37  ;;  %3646 = vmatprep.subr.mxu1 %v811_v37  ;;  %v785_v1 = vld [vmem:[%s4384_s11 + $0x100] sm:$0xff]  ;;  %v762_v2 = vld [vmem:[%s4384_s11 + $0x48] sm:$0xff]  ;;  %v763_v4 = vld [vmem:[%s4384_s11 + $0x50] sm:$0xff] }
  0x80   : > { %3308 = vmatpush3.msra.mxu0 %v811_v37  ;;  %3662 = vmatpush3.msra.mxu1 %v811_v37  ;;  %v786_v3 = vld [vmem:[%s4384_s11 + $0x108] sm:$0xff]  ;;  %v787_v5 = vld [vmem:[%s4384_s11 + $0x110] sm:$0xff]  ;;  %v764_v6 = vld [vmem:[%s4384_s11 + $0x58] sm:$0xff] }
  0x81   : > { %3309 = vmatprep.subr.mxu0 %v810_v38  ;;  %3647 = vmatprep.subr.mxu1 %v810_v38  ;;  %v788_v7 = vld [vmem:[%s4384_s11 + $0x118] sm:$0xff]  ;;  %v765_v8 = vld [vmem:[%s4384_s11 + $0x60] sm:$0xff]  ;;  %v766_v10 = vld [vmem:[%s4384_s11 + $0x68] sm:$0xff] }
  0x82   : > { %3310 = vmatpush3.msra.mxu0 %v810_v38  ;;  %3663 = vmatpush3.msra.mxu1 %v810_v38  ;;  %v789_v9 = vld [vmem:[%s4384_s11 + $0x120] sm:$0xff]  ;;  %v790_v11 = vld [vmem:[%s4384_s11 + $0x128] sm:$0xff]  ;;  %v767_v12 = vld [vmem:[%s4384_s11 + $0x70] sm:$0xff] }
  0x83   : > { %3311 = vmatprep.subr.mxu0 %v809_v39  ;;  %3648 = vmatprep.subr.mxu1 %v809_v39  ;;  %v791_v13 = vld [vmem:[%s4384_s11 + $0x130] sm:$0xff]  ;;  %v768_v14 = vld [vmem:[%s4384_s11 + $0x78] sm:$0xff]  ;;  %v769_v16 = vld [vmem:[%s4384_s11 + $0x80] sm:$0xff] }
  0x84   : > { %3312 = vmatpush3.msra.mxu0 %v809_v39  ;;  %3664 = vmatpush3.msra.mxu1 %v809_v39  ;;  %v792_v15 = vld [vmem:[%s4384_s11 + $0x138] sm:$0xff]  ;;  %v793_v17 = vld [vmem:[%s4384_s11 + $0x140] sm:$0xff]  ;;  %v770_v18 = vld [vmem:[%s4384_s11 + $0x88] sm:$0xff] }
  0x85   : > { %3313 = vmatprep.subr.mxu0 %v808_v40  ;;  %3649 = vmatprep.subr.mxu1 %v808_v40  ;;  %v794_v19 = vld [vmem:[%s4384_s11 + $0x148] sm:$0xff]  ;;  %v771_v20 = vld [vmem:[%s4384_s11 + $0x90] sm:$0xff]  ;;  %v772_v22 = vld [vmem:[%s4384_s11 + $0x98] sm:$0xff] }
  0x86   : > { %3314 = vmatpush3.msra.mxu0 %v808_v40  ;;  %3665 = vmatpush3.msra.mxu1 %v808_v40  ;;  %v795_v21 = vld [vmem:[%s4384_s11 + $0x150] sm:$0xff]  ;;  %v796_v23 = vld [vmem:[%s4384_s11 + $0x158] sm:$0xff]  ;;  %v773_v24 = vld [vmem:[%s4384_s11 + $0xa0] sm:$0xff] }
  0x87   : > { %3315 = vmatprep.subr.mxu0 %v807_v41  ;;  %3650 = vmatprep.subr.mxu1 %v807_v41  ;;  %v797_v25 = vld [vmem:[%s4384_s11 + $0x160] sm:$0xff]  ;;  %v774_v26 = vld [vmem:[%s4384_s11 + $0xa8] sm:$0xff]  ;;  %v775_v28 = vld [vmem:[%s4384_s11 + $0xb0] sm:$0xff] }
  0x88   : > { %3316 = vmatpush3.msra.mxu0 %v807_v41  ;;  %3666 = vmatpush3.msra.mxu1 %v807_v41  ;;  %v798_v27 = vld [vmem:[%s4384_s11 + $0x168] sm:$0xff]  ;;  %v799_v29 = vld [vmem:[%s4384_s11 + $0x170] sm:$0xff]  ;;  %v776_v30 = vld [vmem:[%s4384_s11 + $0xb8] sm:$0xff] }
  0x89   : > { %3317 = vmatprep.subr.mxu0 %v806_v42  ;;  %3651 = vmatprep.subr.mxu1 %v806_v42  ;;  %v800_v31 = vld [vmem:[%s4384_s11 + $0x178] sm:$0xff]  ;;  %v4464_v32 = vld [vmem:[%s5223_s15] ss:$0 sm:$0xff] }
  0x8a   : > { %3318 = vmatpush3.msra.mxu0 %v806_v42  ;;  %3667 = vmatpush3.msra.mxu1 %v806_v42 }
  0x8b   : > { %3319 = vmatprep.subr.mxu0 %v805_v43  ;;  %3652 = vmatprep.subr.mxu1 %v805_v43 }
  0x8c   : > { %3320 = vmatpush3.msra.mxu0 %v805_v43  ;;  %3668 = vmatpush3.msra.mxu1 %v805_v43 }
  0x8d   : > { %3321 = vmatprep.subr.mxu0 %v804_v44  ;;  %3653 = vmatprep.subr.mxu1 %v804_v44 }
  0x8e   : > { %3322 = vmatpush3.msra.mxu0 %v804_v44  ;;  %3669 = vmatpush3.msra.mxu1 %v804_v44 }
  0x8f   : > { %3323 = vmatprep.subr.mxu0 %v803_v45  ;;  %3654 = vmatprep.subr.mxu1 %v803_v45 }
  0x90   : > { %3324 = vmatpush3.msra.mxu0 %v803_v45  ;;  %3670 = vmatpush3.msra.mxu1 %v803_v45 }
  0x91   : > { %3325 = vmatprep.subr.mxu0 %v802_v46  ;;  %3655 = vmatprep.subr.mxu1 %v802_v46 }
  0x92   : > { %3326 = vmatpush3.msra.mxu0 %v802_v46  ;;  %3671 = vmatpush3.msra.mxu1 %v802_v46 }
  0x93   : > { %3327 = vmatprep.subr.mxu0 %v801_v47  ;;  %3656 = vmatprep.subr.mxu1 %v801_v47 }
  0x94   : > { %3328 = vmatpush3.msra.mxu0 %v801_v47  ;;  %3672 = vmatpush3.msra.mxu1 %v801_v47 }
  0x95   : > { %3329 = vmatprep.mubr.f32.mxu0 %v753_v48  ;;  %3365 = vmatprep.mubr.f32.mxu1 %v777_v49 }
  0x96   : > { %3330 = vmatmul.mubr.f32.vlgmr.msra.gmra.mxu0 %v754_v50  ;;  %3366 = vmatmul.mubr.f32.vlgmr.msra.gmra.mxu1 %v778_v51 }
  0x97   : > { %3332 = vmatprep.mubr.f32.mxu0 %v755_v52  ;;  %3368 = vmatprep.mubr.f32.mxu1 %v779_v53 }
  0x9a   : > { %3333 = vmatmul.mubr.f32.gmra.mxu0 %v756_v54  ;;  %3369 = vmatmul.mubr.f32.gmra.mxu1 %v780_v55 }
  0x9b   : > { %3335 = vmatprep.mubr.f32.mxu0 %v757_v56  ;;  %3371 = vmatprep.mubr.f32.mxu1 %v781_v57 }
  0x9e   : > { %3336 = vmatmul.mubr.f32.gmra.mxu0 %v758_v58  ;;  %3372 = vmatmul.mubr.f32.gmra.mxu1 %v782_v59 }
  0x9f   : > { %3338 = vmatprep.mubr.f32.mxu0 %v759_v60  ;;  %3374 = vmatprep.mubr.f32.mxu1 %v783_v61 }
  0xa2   : > { %3339 = vmatmul.mubr.f32.gmra.mxu0 %v760_v62  ;;  %3375 = vmatmul.mubr.f32.gmra.mxu1 %v784_v63 }
  0xa3   : > { %3341 = vmatprep.mubr.f32.mxu0 %v761_v0  ;;  %3377 = vmatprep.mubr.f32.mxu1 %v785_v1 }
  0xa6   : > { %3342 = vmatmul.mubr.f32.gmra.mxu0 %v762_v2  ;;  %3378 = vmatmul.mubr.f32.gmra.mxu1 %v786_v3 }
  0xa7   : > { %3344 = vmatprep.mubr.f32.mxu0 %v763_v4  ;;  %3380 = vmatprep.mubr.f32.mxu1 %v787_v5 }
  0xaa   : > { %3345 = vmatmul.mubr.f32.gmra.mxu0 %v764_v6  ;;  %3381 = vmatmul.mubr.f32.gmra.mxu1 %v788_v7 }
  0xab   : > { %3347 = vmatprep.mubr.f32.mxu0 %v765_v8  ;;  %3383 = vmatprep.mubr.f32.mxu1 %v789_v9 }
  0xae   : > { %3348 = vmatmul.mubr.f32.gmra.mxu0 %v766_v10  ;;  %3384 = vmatmul.mubr.f32.gmra.mxu1 %v790_v11 }
  0xaf   : > { %3350 = vmatprep.mubr.f32.mxu0 %v767_v12  ;;  %3386 = vmatprep.mubr.f32.mxu1 %v791_v13 }
  0xb2   : > { %3351 = vmatmul.mubr.f32.gmra.mxu0 %v768_v14  ;;  %3387 = vmatmul.mubr.f32.gmra.mxu1 %v792_v15 }
  0xb3   : > { %3353 = vmatprep.mubr.f32.mxu0 %v769_v16  ;;  %3389 = vmatprep.mubr.f32.mxu1 %v793_v17 }
  0xb6   : > { %3354 = vmatmul.mubr.f32.gmra.mxu0 %v770_v18  ;;  %3390 = vmatmul.mubr.f32.gmra.mxu1 %v794_v19 }
  0xb7   : > { %3356 = vmatprep.mubr.f32.mxu0 %v771_v20  ;;  %3392 = vmatprep.mubr.f32.mxu1 %v795_v21 }
  0xba   : > { %3357 = vmatmul.mubr.f32.gmra.mxu0 %v772_v22  ;;  %3393 = vmatmul.mubr.f32.gmra.mxu1 %v796_v23 }
  0xbb   : > { %3359 = vmatprep.mubr.f32.mxu0 %v773_v24  ;;  %3395 = vmatprep.mubr.f32.mxu1 %v797_v25 }
  0xbe   : > { %3360 = vmatmul.mubr.f32.gmra.mxu0 %v774_v26  ;;  %3396 = vmatmul.mubr.f32.gmra.mxu1 %v798_v27 }
  0xbf   : > { %3362 = vmatprep.mubr.f32.mxu0 %v775_v28  ;;  %3398 = vmatprep.mubr.f32.mxu1 %v799_v29 }
  0xc2   : > { %3363 = vmatmul.mubr.f32.gmra.mxu0 %v776_v30  ;;  %3399 = vmatmul.mubr.f32.gmra.mxu1 %v800_v31 }
 0x156   : > { %v3331_v33 = vpop.f32.mrf.mxu0  ;;  %v3367_v34 = vpop.f32.mrf.mxu1 }
 0x157   : > { %v896_v35 = vadd.f32 %v3331_v33, %v4464_v32  ;;  %v1016_v36 = vadd.f32 %v3367_v34, %v4464_v32 }
 0x158   : > { %v890_v37 = vpop.f32.mrf.mxu0  ;;  %v1010_v38 = vpop.f32.mrf.mxu1 }
 0x159   : > { %v1130_v39 = vmax.f32 %v896_v35, 0.0  ;;  %v1154_v40 = vmax.f32 %v1016_v36, 0.0  ;;  %v891_v41 = vadd.f32 %v4464_v32, %v890_v37  ;;  %v1011_v42 = vadd.f32 %v4464_v32, %v1010_v38 }
 0x15a   : > { %v3334_v43 = vpop.f32.mrf.mxu0  ;;  %v3370_v44 = vpop.f32.mrf.mxu1 }
 0x15b   : > { %1180 = vst [vmem:[%s4471_s20 + $0x8] sm:$0xff] %v1130_v39  ;;  %1204 = vst [vmem:[%s4471_s20 + $0xc8] sm:$0xff] %v1154_v40  ;;  %v1129_v45 = vmax.f32 %v891_v41, 0.0  ;;  %v1153_v46 = vmax.f32 %v1011_v42, 0.0  ;;  %v906_v47 = vadd.f32 %v3334_v43, %v4464_v32  ;;  %v1026_v48 = vadd.f32 %v3370_v44, %v4464_v32 }
 0x15c   : > { %v900_v49 = vpop.f32.mrf.mxu0  ;;  %v1020_v50 = vpop.f32.mrf.mxu1 }
 0x15d   : > { %1179 = vst [vmem:[%s4471_s20] sm:$0xff] %v1129_v45  ;;  %1203 = vst [vmem:[%s4471_s20 + $0xc0] sm:$0xff] %v1153_v46  ;;  %v1132_v51 = vmax.f32 %v906_v47, 0.0  ;;  %v1156_v52 = vmax.f32 %v1026_v48, 0.0  ;;  %v901_v53 = vadd.f32 %v4464_v32, %v900_v49  ;;  %v1021_v54 = vadd.f32 %v4464_v32, %v1020_v50 }
 0x15e   : > { %v3337_v55 = vpop.f32.mrf.mxu0  ;;  %v3373_v56 = vpop.f32.mrf.mxu1 }
 0x15f   : > { %1182 = vst [vmem:[%s4471_s20 + $0x18] sm:$0xff] %v1132_v51  ;;  %1206 = vst [vmem:[%s4471_s20 + $0xd8] sm:$0xff] %v1156_v52  ;;  %v1131_v57 = vmax.f32 %v901_v53, 0.0  ;;  %v1155_v58 = vmax.f32 %v1021_v54, 0.0  ;;  %v916_v59 = vadd.f32 %v3337_v55, %v4464_v32  ;;  %v1036_v60 = vadd.f32 %v3373_v56, %v4464_v32 }
 0x160   : > { %v910_v61 = vpop.f32.mrf.mxu0  ;;  %v1030_v62 = vpop.f32.mrf.mxu1 }
 0x161   : > { %1181 = vst [vmem:[%s4471_s20 + $0x10] sm:$0xff] %v1131_v57  ;;  %1205 = vst [vmem:[%s4471_s20 + $0xd0] sm:$0xff] %v1155_v58  ;;  %v1134_v63 = vmax.f32 %v916_v59, 0.0  ;;  %v1158_v0 = vmax.f32 %v1036_v60, 0.0  ;;  %v911_v1 = vadd.f32 %v4464_v32, %v910_v61  ;;  %v1031_v2 = vadd.f32 %v4464_v32, %v1030_v62 }
 0x162   : > { %v3340_v3 = vpop.f32.mrf.mxu0  ;;  %v3376_v4 = vpop.f32.mrf.mxu1 }
 0x163   : > { %1184 = vst [vmem:[%s4471_s20 + $0x28] sm:$0xff] %v1134_v63  ;;  %1208 = vst [vmem:[%s4471_s20 + $0xe8] sm:$0xff] %v1158_v0  ;;  %v1133_v5 = vmax.f32 %v911_v1, 0.0  ;;  %v1157_v6 = vmax.f32 %v1031_v2, 0.0  ;;  %v926_v7 = vadd.f32 %v3340_v3, %v4464_v32  ;;  %v1046_v8 = vadd.f32 %v3376_v4, %v4464_v32 }
 0x164   : > { %v920_v9 = vpop.f32.mrf.mxu0  ;;  %v1040_v10 = vpop.f32.mrf.mxu1 }
 0x165   : > { %1183 = vst [vmem:[%s4471_s20 + $0x20] sm:$0xff] %v1133_v5  ;;  %1207 = vst [vmem:[%s4471_s20 + $0xe0] sm:$0xff] %v1157_v6  ;;  %v1136_v11 = vmax.f32 %v926_v7, 0.0  ;;  %v1160_v12 = vmax.f32 %v1046_v8, 0.0  ;;  %v921_v13 = vadd.f32 %v4464_v32, %v920_v9  ;;  %v1041_v14 = vadd.f32 %v4464_v32, %v1040_v10 }
 0x166   : > { %v3343_v15 = vpop.f32.mrf.mxu0  ;;  %v3379_v16 = vpop.f32.mrf.mxu1 }
 0x167   : > { %1186 = vst [vmem:[%s4471_s20 + $0x38] sm:$0xff] %v1136_v11  ;;  %1210 = vst [vmem:[%s4471_s20 + $0xf8] sm:$0xff] %v1160_v12  ;;  %v1135_v17 = vmax.f32 %v921_v13, 0.0  ;;  %v1159_v18 = vmax.f32 %v1041_v14, 0.0  ;;  %v936_v19 = vadd.f32 %v3343_v15, %v4464_v32  ;;  %v1056_v20 = vadd.f32 %v3379_v16, %v4464_v32 }
 0x168   : > { %v930_v21 = vpop.f32.mrf.mxu0  ;;  %v1050_v22 = vpop.f32.mrf.mxu1 }
 0x169   : > { %1185 = vst [vmem:[%s4471_s20 + $0x30] sm:$0xff] %v1135_v17  ;;  %1209 = vst [vmem:[%s4471_s20 + $0xf0] sm:$0xff] %v1159_v18  ;;  %v1138_v23 = vmax.f32 %v936_v19, 0.0  ;;  %v1162_v24 = vmax.f32 %v1056_v20, 0.0  ;;  %v931_v25 = vadd.f32 %v4464_v32, %v930_v21  ;;  %v1051_v26 = vadd.f32 %v4464_v32, %v1050_v22 }
 0x16a   : > { %v3346_v27 = vpop.f32.mrf.mxu0  ;;  %v3382_v28 = vpop.f32.mrf.mxu1 }
 0x16b   : > { %1188 = vst [vmem:[%s4471_s20 + $0x48] sm:$0xff] %v1138_v23  ;;  %1212 = vst [vmem:[%s4471_s20 + $0x108] sm:$0xff] %v1162_v24  ;;  %v1137_v29 = vmax.f32 %v931_v25, 0.0  ;;  %v1161_v30 = vmax.f32 %v1051_v26, 0.0  ;;  %v946_v31 = vadd.f32 %v3346_v27, %v4464_v32  ;;  %v1066_v33 = vadd.f32 %v3382_v28, %v4464_v32 }
 0x16c   : > { %v940_v34 = vpop.f32.mrf.mxu0  ;;  %v1060_v35 = vpop.f32.mrf.mxu1 }
 0x16d   : > { %1187 = vst [vmem:[%s4471_s20 + $0x40] sm:$0xff] %v1137_v29  ;;  %1211 = vst [vmem:[%s4471_s20 + $0x100] sm:$0xff] %v1161_v30  ;;  %v1140_v36 = vmax.f32 %v946_v31, 0.0  ;;  %v1164_v37 = vmax.f32 %v1066_v33, 0.0  ;;  %v941_v38 = vadd.f32 %v4464_v32, %v940_v34  ;;  %v1061_v39 = vadd.f32 %v4464_v32, %v1060_v35 }
 0x16e   : > { %v3349_v40 = vpop.f32.mrf.mxu0  ;;  %v3385_v41 = vpop.f32.mrf.mxu1 }
 0x16f   : > { %1190 = vst [vmem:[%s4471_s20 + $0x58] sm:$0xff] %v1140_v36  ;;  %1214 = vst [vmem:[%s4471_s20 + $0x118] sm:$0xff] %v1164_v37  ;;  %v1139_v42 = vmax.f32 %v941_v38, 0.0  ;;  %v1163_v43 = vmax.f32 %v1061_v39, 0.0  ;;  %v956_v44 = vadd.f32 %v3349_v40, %v4464_v32  ;;  %v1076_v45 = vadd.f32 %v3385_v41, %v4464_v32 }
 0x170   : > { %v950_v46 = vpop.f32.mrf.mxu0  ;;  %v1070_v47 = vpop.f32.mrf.mxu1 }
 0x171   : > { %1189 = vst [vmem:[%s4471_s20 + $0x50] sm:$0xff] %v1139_v42  ;;  %1213 = vst [vmem:[%s4471_s20 + $0x110] sm:$0xff] %v1163_v43  ;;  %v1142_v48 = vmax.f32 %v956_v44, 0.0  ;;  %v1166_v49 = vmax.f32 %v1076_v45, 0.0  ;;  %v951_v50 = vadd.f32 %v4464_v32, %v950_v46  ;;  %v1071_v51 = vadd.f32 %v4464_v32, %v1070_v47 }
 0x172   : > { %v3352_v52 = vpop.f32.mrf.mxu0  ;;  %v3388_v53 = vpop.f32.mrf.mxu1 }
 0x173   : > { %1192 = vst [vmem:[%s4471_s20 + $0x68] sm:$0xff] %v1142_v48  ;;  %1216 = vst [vmem:[%s4471_s20 + $0x128] sm:$0xff] %v1166_v49  ;;  %v1141_v54 = vmax.f32 %v951_v50, 0.0  ;;  %v1165_v55 = vmax.f32 %v1071_v51, 0.0  ;;  %v966_v56 = vadd.f32 %v3352_v52, %v4464_v32  ;;  %v1086_v57 = vadd.f32 %v3388_v53, %v4464_v32 }
 0x174   : > { %v960_v58 = vpop.f32.mrf.mxu0  ;;  %v1080_v59 = vpop.f32.mrf.mxu1 }
 0x175   : > { %1191 = vst [vmem:[%s4471_s20 + $0x60] sm:$0xff] %v1141_v54  ;;  %1215 = vst [vmem:[%s4471_s20 + $0x120] sm:$0xff] %v1165_v55  ;;  %v1144_v60 = vmax.f32 %v966_v56, 0.0  ;;  %v1168_v61 = vmax.f32 %v1086_v57, 0.0  ;;  %v961_v62 = vadd.f32 %v4464_v32, %v960_v58  ;;  %v1081_v63 = vadd.f32 %v4464_v32, %v1080_v59 }
 0x176   : > { %v3355_v0 = vpop.f32.mrf.mxu0  ;;  %v3391_v1 = vpop.f32.mrf.mxu1 }
 0x177   : > { %1194 = vst [vmem:[%s4471_s20 + $0x78] sm:$0xff] %v1144_v60  ;;  %1218 = vst [vmem:[%s4471_s20 + $0x138] sm:$0xff] %v1168_v61  ;;  %v1143_v2 = vmax.f32 %v961_v62, 0.0  ;;  %v1167_v3 = vmax.f32 %v1081_v63, 0.0  ;;  %v976_v4 = vadd.f32 %v3355_v0, %v4464_v32  ;;  %v1096_v5 = vadd.f32 %v3391_v1, %v4464_v32 }
 0x178   : > { %v970_v6 = vpop.f32.mrf.mxu0  ;;  %v1090_v7 = vpop.f32.mrf.mxu1 }
 0x179   : > { %1193 = vst [vmem:[%s4471_s20 + $0x70] sm:$0xff] %v1143_v2  ;;  %1217 = vst [vmem:[%s4471_s20 + $0x130] sm:$0xff] %v1167_v3  ;;  %v1146_v8 = vmax.f32 %v976_v4, 0.0  ;;  %v1170_v9 = vmax.f32 %v1096_v5, 0.0  ;;  %v971_v10 = vadd.f32 %v4464_v32, %v970_v6  ;;  %v1091_v11 = vadd.f32 %v4464_v32, %v1090_v7 }
 0x17a   : > { %v3358_v12 = vpop.f32.mrf.mxu0  ;;  %v3394_v13 = vpop.f32.mrf.mxu1 }
 0x17b   : > { %1196 = vst [vmem:[%s4471_s20 + $0x88] sm:$0xff] %v1146_v8  ;;  %1220 = vst [vmem:[%s4471_s20 + $0x148] sm:$0xff] %v1170_v9  ;;  %v1145_v14 = vmax.f32 %v971_v10, 0.0  ;;  %v1169_v15 = vmax.f32 %v1091_v11, 0.0  ;;  %v986_v16 = vadd.f32 %v3358_v12, %v4464_v32  ;;  %v1106_v17 = vadd.f32 %v3394_v13, %v4464_v32 }
 0x17c   : > { %v980_v18 = vpop.f32.mrf.mxu0  ;;  %v1100_v19 = vpop.f32.mrf.mxu1 }
 0x17d   : > { %1195 = vst [vmem:[%s4471_s20 + $0x80] sm:$0xff] %v1145_v14  ;;  %1219 = vst [vmem:[%s4471_s20 + $0x140] sm:$0xff] %v1169_v15  ;;  %v1148_v20 = vmax.f32 %v986_v16, 0.0  ;;  %v1172_v21 = vmax.f32 %v1106_v17, 0.0  ;;  %v981_v22 = vadd.f32 %v4464_v32, %v980_v18  ;;  %v1101_v23 = vadd.f32 %v4464_v32, %v1100_v19 }
 0x17e   : > { %v3361_v24 = vpop.f32.mrf.mxu0  ;;  %v3397_v25 = vpop.f32.mrf.mxu1 }
 0x17f   : > { %1198 = vst [vmem:[%s4471_s20 + $0x98] sm:$0xff] %v1148_v20  ;;  %1222 = vst [vmem:[%s4471_s20 + $0x158] sm:$0xff] %v1172_v21  ;;  %v1147_v26 = vmax.f32 %v981_v22, 0.0  ;;  %v1171_v27 = vmax.f32 %v1101_v23, 0.0  ;;  %v996_v28 = vadd.f32 %v3361_v24, %v4464_v32  ;;  %v1116_v29 = vadd.f32 %v3397_v25, %v4464_v32 }
 0x180   : > { %v990_v30 = vpop.f32.mrf.mxu0  ;;  %v1110_v31 = vpop.f32.mrf.mxu1 }
 0x181   : > { %1197 = vst [vmem:[%s4471_s20 + $0x90] sm:$0xff] %v1147_v26  ;;  %1221 = vst [vmem:[%s4471_s20 + $0x150] sm:$0xff] %v1171_v27  ;;  %v1150_v33 = vmax.f32 %v996_v28, 0.0  ;;  %v1174_v34 = vmax.f32 %v1116_v29, 0.0  ;;  %v991_v35 = vadd.f32 %v4464_v32, %v990_v30  ;;  %v1111_v36 = vadd.f32 %v4464_v32, %v1110_v31 }
 0x182   : > { %v3364_v37 = vpop.f32.mrf.mxu0  ;;  %v3400_v38 = vpop.f32.mrf.mxu1 }
 0x183   : > { %1200 = vst [vmem:[%s4471_s20 + $0xa8] sm:$0xff] %v1150_v33  ;;  %1224 = vst [vmem:[%s4471_s20 + $0x168] sm:$0xff] %v1174_v34  ;;  %v1149_v39 = vmax.f32 %v991_v35, 0.0  ;;  %v1173_v40 = vmax.f32 %v1111_v36, 0.0  ;;  %v1006_v41 = vadd.f32 %v3364_v37, %v4464_v32  ;;  %v1126_v42 = vadd.f32 %v3400_v38, %v4464_v32 }
 0x184   : > { %v1000_v43 = vpop.f32.mrf.mxu0  ;;  %v1120_v44 = vpop.f32.mrf.mxu1 }
 0x185   : > { %1199 = vst [vmem:[%s4471_s20 + $0xa0] sm:$0xff] %v1149_v39  ;;  %1223 = vst [vmem:[%s4471_s20 + $0x160] sm:$0xff] %v1173_v40  ;;  %v1152_v45 = vmax.f32 %v1006_v41, 0.0  ;;  %v1176_v46 = vmax.f32 %v1126_v42, 0.0  ;;  %v1001_v47 = vadd.f32 %v4464_v32, %v1000_v43  ;;  %v1121_v48 = vadd.f32 %v4464_v32, %v1120_v44 }
 0x187   : > { %1202 = vst [vmem:[%s4471_s20 + $0xb8] sm:$0xff] %v1152_v45  ;;  %1226 = vst [vmem:[%s4471_s20 + $0x178] sm:$0xff] %v1176_v46  ;;  %v1151_v49 = vmax.f32 %v1001_v47, 0.0  ;;  %v1175_v50 = vmax.f32 %v1121_v48, 0.0 }
 0x189   : > { %1201 = vst [vmem:[%s4471_s20 + $0xb0] sm:$0xff] %v1151_v49  ;;  %1225 = vst [vmem:[%s4471_s20 + $0x170] sm:$0xff] %v1175_v50 }
 0x18a PF: > { %p3071_p5 = scmp.ne.s32.totalorder %s3950_s29, 0 }
 0x18c   : > { %1230 = sbr.rel (%p3071_p5) target bundleno = 418 (0x1a2), region = 83 }
 0x191   : > { %v3984_v51 = vmov 0.0  }
 0x192   : > { %1231 = vst [vmem:[#allocation3 + $0xb0] sm:$0xff] %v3984_v51  ;;  %1232 = vst [vmem:[#allocation3] sm:$0xff] %v3984_v51 }
 0x193   : > { %1233 = vst [vmem:[#allocation3 + $0xd8] sm:$0xff] %v3984_v51  ;;  %1234 = vst [vmem:[#allocation3 + $0x18] sm:$0xff] %v3984_v51 }
 0x194   : > { %1235 = vst [vmem:[#allocation3 + $0x50] sm:$0xff] %v3984_v51  ;;  %1236 = vst [vmem:[#allocation3 + $0x68] sm:$0xff] %v3984_v51 }
 0x195   : > { %1237 = vst [vmem:[#allocation3 + $0x30] sm:$0xff] %v3984_v51  ;;  %1238 = vst [vmem:[#allocation3 + $0x48] sm:$0xff] %v3984_v51 }
 0x196   : > { %1239 = vst [vmem:[#allocation3 + $0x80] sm:$0xff] %v3984_v51  ;;  %1240 = vst [vmem:[#allocation3 + $0x88] sm:$0xff] %v3984_v51 }
 0x197   : > { %1241 = vst [vmem:[#allocation3 + $0xe8] sm:$0xff] %v3984_v51  ;;  %1242 = vst [vmem:[#allocation3 + $0xb8] sm:$0xff] %v3984_v51 }
 0x198   : > { %1243 = vst [vmem:[#allocation3 + $0x60] sm:$0xff] %v3984_v51  ;;  %1244 = vst [vmem:[#allocation3 + $0xf0] sm:$0xff] %v3984_v51 }
 0x199   : > { %1245 = vst [vmem:[#allocation3 + $0x8] sm:$0xff] %v3984_v51  ;;  %1246 = vst [vmem:[#allocation3 + $0x78] sm:$0xff] %v3984_v51 }
 0x19a   : > { %1247 = vst [vmem:[#allocation3 + $0x38] sm:$0xff] %v3984_v51  ;;  %1248 = vst [vmem:[#allocation3 + $0x58] sm:$0xff] %v3984_v51 }
 0x19b   : > { %1249 = vst [vmem:[#allocation3 + $0x40] sm:$0xff] %v3984_v51  ;;  %1250 = vst [vmem:[#allocation3 + $0xc8] sm:$0xff] %v3984_v51 }
 0x19c   : > { %1251 = vst [vmem:[#allocation3 + $0xe0] sm:$0xff] %v3984_v51  ;;  %1252 = vst [vmem:[#allocation3 + $0x90] sm:$0xff] %v3984_v51 }
 0x19d   : > { %1253 = vst [vmem:[#allocation3 + $0x70] sm:$0xff] %v3984_v51  ;;  %1254 = vst [vmem:[#allocation3 + $0xc0] sm:$0xff] %v3984_v51 }
 0x19e   : > { %1255 = vst [vmem:[#allocation3 + $0xa8] sm:$0xff] %v3984_v51  ;;  %1256 = vst [vmem:[#allocation3 + $0xd0] sm:$0xff] %v3984_v51 }
 0x19f   : > { %1257 = vst [vmem:[#allocation3 + $0x10] sm:$0xff] %v3984_v51  ;;  %1258 = vst [vmem:[#allocation3 + $0x28] sm:$0xff] %v3984_v51 }
 0x1a0   : > { %1259 = vst [vmem:[#allocation3 + $0xa0] sm:$0xff] %v3984_v51  ;;  %1260 = vst [vmem:[#allocation3 + $0xf8] sm:$0xff] %v3984_v51 }
 0x1a1   : > { %1261 = vst [vmem:[#allocation3 + $0x20] sm:$0xff] %v3984_v51  ;;  %1262 = vst [vmem:[#allocation3 + $0x98] sm:$0xff] %v3984_v51 }
 0x1a2 PF: > { %p1263_p6 = scmp.lt.s32.totalorder %s3958_s9, 0  ;;  %s1264_s21 = ssub.s32 0, %s3958_s9  ;;  %v1311_v32 = vld [vmem:[%s4391_s24 + $0x8] sm:$0xff]  ;;  %v3985_v53 = vmov 0.0   ;;  %v1310_v22 = vld [vmem:[%s4391_s24] sm:$0xff]  ;;  %v1313_v28 = vld [vmem:[%s4391_s24 + $0x18] sm:$0xff] }
 0x1a3   : > { %v1383_v52 = vld [vmem:[%s4391_s24 + $0x248] sm:$0xff]  ;;  %1455 = vmatprep.subr.mxu0 %v3985_v53  ;;  %3673 = vmatprep.subr.mxu1 %v3985_v53  ;;  %s3072_s22 = smin.u32 %s3958_s9, %s1264_s21  ;;  %s1276_s3 = smul.u32 384, %s3950_s29  ;;  %v1382_v23 = vld [vmem:[%s4391_s24 + $0x240] sm:$0xff]  ;;  %v1385_v29 = vld [vmem:[%s4391_s24 + $0x258] sm:$0xff] }
 0x1a4   : > { %s1266_s25 = sand.u32 1, %s3072_s22   ;;  %1519 = vmatprep.mubr.f32.mxu0 %v1311_v32  ;;  %1639 = vmatprep.mubr.f32.mxu1 %v1383_v52  ;;  %v1314_v25 = vld [vmem:[%s4391_s24 + $0x20] sm:$0xff]  ;;  %v1317_v31 = vld [vmem:[%s4391_s24 + $0x38] sm:$0xff]  ;;  %v1316_v35 = vld [vmem:[%s4391_s24 + $0x30] sm:$0xff]  ;;  %p3075_p8 = scmp.ne.s32.totalorder %s3950_s29, 1 }
 0x1a5   : > { %s1267_s19 = ssub.s32 0, %s1266_s25  ;;  %v1386_v26 = vld [vmem:[%s4391_s24 + $0x260] sm:$0xff]  ;;  %v1389_v34 = vld [vmem:[%s4391_s24 + $0x278] sm:$0xff]  ;;  %v1388_v36 = vld [vmem:[%s4391_s24 + $0x270] sm:$0xff]  ;;  %p3076_p9 = scmp.ge.s32.totalorder (!%p3075_p8), %s3958_s9, 1 }
 0x1a6   : > { %s5257_s19 = smov (!%p1263_p6, %s1267_s19), %s1266_s25  ;;  %v1320_v38 = vld [vmem:[%s4391_s24 + $0x50] sm:$0xff]  ;;  %v1319_v41 = vld [vmem:[%s4391_s24 + $0x48] sm:$0xff]  ;;  %v1322_v47 = vld [vmem:[%s4391_s24 + $0x60] sm:$0xff] }
 0x1a7   : > { %p3074_p7 = scmp.lt.s32.totalorder %s5257_s19, 0  ;;  %s1273_s26 = sadd.s32 2, %s5257_s19  ;;  %v1392_v40 = vld [vmem:[%s4391_s24 + $0x290] sm:$0xff]  ;;  %v1391_v42 = vld [vmem:[%s4391_s24 + $0x288] sm:$0xff]  ;;  %v1394_v48 = vld [vmem:[%s4391_s24 + $0x2a0] sm:$0xff] }
 0x1a8   : > { %v1323_v44 = vld [vmem:[%s4391_s24 + $0x68] sm:$0xff]  ;;  %v1326_v50 = vld [vmem:[%s4391_s24 + $0x80] sm:$0xff]  ;;  %v1325_v52 = vld [vmem:[%s4391_s24 + $0x78] sm:$0xff] }
 0x1a9   : > { %s5259_s26 = smov (!%p3074_p7, %s1273_s26), %s5257_s19  ;;  %v1395_v46 = vld [vmem:[%s4391_s24 + $0x2a8] sm:$0xff]  ;;  %v1398_v32 = vld [vmem:[%s4391_s24 + $0x2c0] sm:$0xff] }
 0x1aa   : > { %s1275_s18 = smul.u32 768, %s5259_s26 }
 0x1ac   : > { %s1277_s11 = sadd.s32 %s1276_s3, %s1275_s18 }
 0x1ad   : > { %s4574_s28 = scalar_lea.vmem [#allocation2], %s1277_s11 }
 0x1ae   : > { %v1422_v54 = vld [vmem:[%s4574_s28 + $0x78] sm:$0xff]  ;;  %v1421_v55 = vld [vmem:[%s4574_s28 + $0x70] sm:$0xff]  ;;  %v1420_v56 = vld [vmem:[%s4574_s28 + $0x68] sm:$0xff] }
 0x1af   : > { %1456 = vmatpush1.msra.mxu0 %v1422_v54  ;;  %3705 = vmatpush1.msra.mxu1 %v1422_v54  ;;  %v1419_v57 = vld [vmem:[%s4574_s28 + $0x60] sm:$0xff]  ;;  %v1418_v58 = vld [vmem:[%s4574_s28 + $0x58] sm:$0xff]  ;;  %v1417_v59 = vld [vmem:[%s4574_s28 + $0x50] sm:$0xff] }
 0x1b0   : > { %1457 = vmatprep.subr.mxu0 %v3985_v53  ;;  %3674 = vmatprep.subr.mxu1 %v3985_v53  ;;  %v1416_v60 = vld [vmem:[%s4574_s28 + $0x48] sm:$0xff]  ;;  %v1415_v61 = vld [vmem:[%s4574_s28 + $0x40] sm:$0xff]  ;;  %v1414_v62 = vld [vmem:[%s4574_s28 + $0x38] sm:$0xff] }
 0x1b1   : > { %1458 = vmatpush1.msra.mxu0 %v1421_v55  ;;  %3706 = vmatpush1.msra.mxu1 %v1421_v55  ;;  %v1413_v63 = vld [vmem:[%s4574_s28 + $0x30] sm:$0xff]  ;;  %v1412_v0 = vld [vmem:[%s4574_s28 + $0x28] sm:$0xff]  ;;  %v1411_v1 = vld [vmem:[%s4574_s28 + $0x20] sm:$0xff] }
 0x1b2   : > { %1459 = vmatprep.subr.mxu0 %v3985_v53  ;;  %3675 = vmatprep.subr.mxu1 %v3985_v53  ;;  %v1410_v2 = vld [vmem:[%s4574_s28 + $0x18] sm:$0xff]  ;;  %v1409_v3 = vld [vmem:[%s4574_s28 + $0x10] sm:$0xff]  ;;  %v1408_v4 = vld [vmem:[%s4574_s28 + $0x8] sm:$0xff] }
 0x1b3   : > { %1460 = vmatpush1.msra.mxu0 %v1420_v56  ;;  %3707 = vmatpush1.msra.mxu1 %v1420_v56  ;;  %v1407_v5 = vld [vmem:[%s4574_s28] sm:$0xff]  ;;  %v1438_v6 = vld [vmem:[%s4574_s28 + $0xf8] sm:$0xff]  ;;  %v1437_v7 = vld [vmem:[%s4574_s28 + $0xf0] sm:$0xff] }
 0x1b4   : > { %1461 = vmatprep.subr.mxu0 %v3985_v53  ;;  %3676 = vmatprep.subr.mxu1 %v3985_v53  ;;  %v1436_v8 = vld [vmem:[%s4574_s28 + $0xe8] sm:$0xff]  ;;  %v1435_v9 = vld [vmem:[%s4574_s28 + $0xe0] sm:$0xff]  ;;  %v1434_v10 = vld [vmem:[%s4574_s28 + $0xd8] sm:$0xff] }
 0x1b5   : > { %1462 = vmatpush1.msra.mxu0 %v1419_v57  ;;  %3708 = vmatpush1.msra.mxu1 %v1419_v57  ;;  %v1433_v11 = vld [vmem:[%s4574_s28 + $0xd0] sm:$0xff]  ;;  %v1432_v12 = vld [vmem:[%s4574_s28 + $0xc8] sm:$0xff]  ;;  %v1431_v13 = vld [vmem:[%s4574_s28 + $0xc0] sm:$0xff] }
 0x1b6   : > { %1463 = vmatprep.subr.mxu0 %v3985_v53  ;;  %3677 = vmatprep.subr.mxu1 %v3985_v53  ;;  %v1430_v14 = vld [vmem:[%s4574_s28 + $0xb8] sm:$0xff]  ;;  %v1429_v15 = vld [vmem:[%s4574_s28 + $0xb0] sm:$0xff]  ;;  %v1428_v16 = vld [vmem:[%s4574_s28 + $0xa8] sm:$0xff] }
 0x1b7   : > { %1464 = vmatpush1.msra.mxu0 %v1418_v58  ;;  %3709 = vmatpush1.msra.mxu1 %v1418_v58  ;;  %v1427_v17 = vld [vmem:[%s4574_s28 + $0xa0] sm:$0xff]  ;;  %v1426_v18 = vld [vmem:[%s4574_s28 + $0x98] sm:$0xff]  ;;  %v1425_v19 = vld [vmem:[%s4574_s28 + $0x90] sm:$0xff] }
 0x1b8   : > { %1465 = vmatprep.subr.mxu0 %v3985_v53  ;;  %3678 = vmatprep.subr.mxu1 %v3985_v53  ;;  %v1424_v20 = vld [vmem:[%s4574_s28 + $0x88] sm:$0xff]  ;;  %v1423_v21 = vld [vmem:[%s4574_s28 + $0x80] sm:$0xff]  ;;  %v1454_v24 = vld [vmem:[%s4574_s28 + $0x178] sm:$0xff] }
 0x1b9   : > { %1466 = vmatpush1.msra.mxu0 %v1417_v59  ;;  %3710 = vmatpush1.msra.mxu1 %v1417_v59  ;;  %v1453_v27 = vld [vmem:[%s4574_s28 + $0x170] sm:$0xff]  ;;  %v1452_v30 = vld [vmem:[%s4574_s28 + $0x168] sm:$0xff]  ;;  %v1451_v33 = vld [vmem:[%s4574_s28 + $0x160] sm:$0xff] }
 0x1ba   : > { %1467 = vmatprep.subr.mxu0 %v3985_v53  ;;  %3679 = vmatprep.subr.mxu1 %v3985_v53  ;;  %v1450_v37 = vld [vmem:[%s4574_s28 + $0x158] sm:$0xff]  ;;  %v1449_v39 = vld [vmem:[%s4574_s28 + $0x150] sm:$0xff]  ;;  %v1448_v43 = vld [vmem:[%s4574_s28 + $0x148] sm:$0xff] }
 0x1bb   : > { %1468 = vmatpush1.msra.mxu0 %v1416_v60  ;;  %3711 = vmatpush1.msra.mxu1 %v1416_v60  ;;  %v1447_v45 = vld [vmem:[%s4574_s28 + $0x140] sm:$0xff]  ;;  %v1446_v49 = vld [vmem:[%s4574_s28 + $0x138] sm:$0xff]  ;;  %v1445_v51 = vld [vmem:[%s4574_s28 + $0x130] sm:$0xff] }
 0x1bc   : > { %1469 = vmatprep.subr.mxu0 %v3985_v53  ;;  %3680 = vmatprep.subr.mxu1 %v3985_v53  ;;  %v1444_v54 = vld [vmem:[%s4574_s28 + $0x128] sm:$0xff]  ;;  %v1329_v55 = vld [vmem:[%s4391_s24 + $0x98] sm:$0xff]  ;;  %v1443_v56 = vld [vmem:[%s4574_s28 + $0x120] sm:$0xff] }
 0x1bd   : > { %1470 = vmatpush1.msra.mxu0 %v1415_v61  ;;  %3712 = vmatpush1.msra.mxu1 %v1415_v61  ;;  %v1401_v57 = vld [vmem:[%s4391_s24 + $0x2d8] sm:$0xff]  ;;  %v1328_v58 = vld [vmem:[%s4391_s24 + $0x90] sm:$0xff] }
 0x1be   : > { %1471 = vmatprep.subr.mxu0 %v3985_v53  ;;  %3681 = vmatprep.subr.mxu1 %v3985_v53  ;;  %v1400_v59 = vld [vmem:[%s4391_s24 + $0x2d0] sm:$0xff]  ;;  %v1442_v60 = vld [vmem:[%s4574_s28 + $0x118] sm:$0xff] }
 0x1bf   : > { %1472 = vmatpush1.msra.mxu0 %v1414_v62  ;;  %3713 = vmatpush1.msra.mxu1 %v1414_v62  ;;  %v1332_v61 = vld [vmem:[%s4391_s24 + $0xb0] sm:$0xff] }
 0x1c0   : > { %1473 = vmatprep.subr.mxu0 %v3985_v53  ;;  %3682 = vmatprep.subr.mxu1 %v3985_v53  ;;  %v1441_v62 = vld [vmem:[%s4574_s28 + $0x110] sm:$0xff] }
 0x1c1   : > { %1474 = vmatpush1.msra.mxu0 %v1413_v63  ;;  %3714 = vmatpush1.msra.mxu1 %v1413_v63  ;;  %v1404_v63 = vld [vmem:[%s4391_s24 + $0x2f0] sm:$0xff] }
 0x1c2   : > { %1475 = vmatprep.subr.mxu0 %v3985_v53  ;;  %3683 = vmatprep.subr.mxu1 %v3985_v53 }
 0x1c3   : > { %1476 = vmatpush1.msra.mxu0 %v1412_v0  ;;  %3715 = vmatpush1.msra.mxu1 %v1412_v0  ;;  %v1331_v0 = vld [vmem:[%s4391_s24 + $0xa8] sm:$0xff] }
 0x1c4   : > { %1477 = vmatprep.subr.mxu0 %v3985_v53  ;;  %3684 = vmatprep.subr.mxu1 %v3985_v53 }
 0x1c5   : > { %1478 = vmatpush1.msra.mxu0 %v1411_v1  ;;  %3716 = vmatpush1.msra.mxu1 %v1411_v1  ;;  %v1403_v1 = vld [vmem:[%s4391_s24 + $0x2e8] sm:$0xff] }
 0x1c6   : > { %1479 = vmatprep.subr.mxu0 %v3985_v53  ;;  %3685 = vmatprep.subr.mxu1 %v3985_v53 }
 0x1c7   : > { %1480 = vmatpush1.msra.mxu0 %v1410_v2  ;;  %3717 = vmatpush1.msra.mxu1 %v1410_v2  ;;  %v1440_v2 = vld [vmem:[%s4574_s28 + $0x108] sm:$0xff] }
 0x1c8   : > { %1481 = vmatprep.subr.mxu0 %v3985_v53  ;;  %3686 = vmatprep.subr.mxu1 %v3985_v53 }
 0x1c9   : > { %1482 = vmatpush1.msra.mxu0 %v1409_v3  ;;  %3718 = vmatpush1.msra.mxu1 %v1409_v3  ;;  %v1335_v3 = vld [vmem:[%s4391_s24 + $0xc8] sm:$0xff] }
 0x1ca   : > { %1483 = vmatprep.subr.mxu0 %v3985_v53  ;;  %3687 = vmatprep.subr.mxu1 %v3985_v53 }
 0x1cb   : > { %1484 = vmatpush1.msra.mxu0 %v1408_v4  ;;  %3719 = vmatpush1.msra.mxu1 %v1408_v4  ;;  %v1439_v4 = vld [vmem:[%s4574_s28 + $0x100] sm:$0xff] }
 0x1cc   : > { %1485 = vmatprep.subr.mxu0 %v3985_v53  ;;  %3688 = vmatprep.subr.mxu1 %v3985_v53 }
 0x1cd   : > { %1486 = vmatpush1.msra.mxu0 %v1407_v5  ;;  %3720 = vmatpush1.msra.mxu1 %v1407_v5  ;;  %v1312_v5 = vld [vmem:[%s4391_s24 + $0x10] sm:$0xff] }
 0x1ce   : > { %1487 = vmatprep.subr.mxu0 %v3985_v53  ;;  %3689 = vmatprep.subr.mxu1 %v3985_v53 }
 0x1cf   : > { %1488 = vmatpush2.msra.mxu0 %v1438_v6  ;;  %3721 = vmatpush2.msra.mxu1 %v1438_v6  ;;  %v1334_v6 = vld [vmem:[%s4391_s24 + $0xc0] sm:$0xff] }
 0x1d0   : > { %1489 = vmatprep.subr.mxu0 %v3985_v53  ;;  %3690 = vmatprep.subr.mxu1 %v3985_v53 }
 0x1d1   : > { %1490 = vmatpush2.msra.mxu0 %v1437_v7  ;;  %3722 = vmatpush2.msra.mxu1 %v1437_v7  ;;  %v1315_v7 = vld [vmem:[%s4391_s24 + $0x28] sm:$0xff] }
 0x1d2   : > { %1491 = vmatprep.subr.mxu0 %v3985_v53  ;;  %3691 = vmatprep.subr.mxu1 %v3985_v53 }
 0x1d3   : > { %1492 = vmatpush2.msra.mxu0 %v1436_v8  ;;  %3723 = vmatpush2.msra.mxu1 %v1436_v8  ;;  %v1338_v8 = vld [vmem:[%s4391_s24 + $0xe0] sm:$0xff] }
 0x1d4   : > { %1493 = vmatprep.subr.mxu0 %v3985_v53  ;;  %3692 = vmatprep.subr.mxu1 %v3985_v53 }
 0x1d5   : > { %1494 = vmatpush2.msra.mxu0 %v1435_v9  ;;  %3724 = vmatpush2.msra.mxu1 %v1435_v9  ;;  %v1318_v9 = vld [vmem:[%s4391_s24 + $0x40] sm:$0xff] }
 0x1d6   : > { %1495 = vmatprep.subr.mxu0 %v3985_v53  ;;  %3693 = vmatprep.subr.mxu1 %v3985_v53 }
 0x1d7   : > { %1496 = vmatpush2.msra.mxu0 %v1434_v10  ;;  %3725 = vmatpush2.msra.mxu1 %v1434_v10  ;;  %v1337_v10 = vld [vmem:[%s4391_s24 + $0xd8] sm:$0xff] }
 0x1d8   : > { %1497 = vmatprep.subr.mxu0 %v3985_v53  ;;  %3694 = vmatprep.subr.mxu1 %v3985_v53 }
 0x1d9   : > { %1498 = vmatpush2.msra.mxu0 %v1433_v11  ;;  %3726 = vmatpush2.msra.mxu1 %v1433_v11  ;;  %v1321_v11 = vld [vmem:[%s4391_s24 + $0x58] sm:$0xff] }
 0x1da   : > { %1499 = vmatprep.subr.mxu0 %v3985_v53  ;;  %3695 = vmatprep.subr.mxu1 %v3985_v53 }
 0x1db   : > { %1500 = vmatpush2.msra.mxu0 %v1432_v12  ;;  %3727 = vmatpush2.msra.mxu1 %v1432_v12  ;;  %v1341_v12 = vld [vmem:[%s4391_s24 + $0xf8] sm:$0xff] }
 0x1dc   : > { %1501 = vmatprep.subr.mxu0 %v3985_v53  ;;  %3696 = vmatprep.subr.mxu1 %v3985_v53 }
 0x1dd   : > { %1502 = vmatpush2.msra.mxu0 %v1431_v13  ;;  %3728 = vmatpush2.msra.mxu1 %v1431_v13  ;;  %v1324_v13 = vld [vmem:[%s4391_s24 + $0x70] sm:$0xff] }
 0x1de   : > { %1503 = vmatprep.subr.mxu0 %v3985_v53  ;;  %3697 = vmatprep.subr.mxu1 %v3985_v53 }
 0x1df   : > { %1504 = vmatpush2.msra.mxu0 %v1430_v14  ;;  %3729 = vmatpush2.msra.mxu1 %v1430_v14  ;;  %v1340_v14 = vld [vmem:[%s4391_s24 + $0xf0] sm:$0xff] }
 0x1e0   : > { %1505 = vmatprep.subr.mxu0 %v3985_v53  ;;  %3698 = vmatprep.subr.mxu1 %v3985_v53 }
 0x1e1   : > { %1506 = vmatpush2.msra.mxu0 %v1429_v15  ;;  %3730 = vmatpush2.msra.mxu1 %v1429_v15  ;;  %v1327_v15 = vld [vmem:[%s4391_s24 + $0x88] sm:$0xff] }
 0x1e2   : > { %1507 = vmatprep.subr.mxu0 %v3985_v53  ;;  %3699 = vmatprep.subr.mxu1 %v3985_v53 }
 0x1e3   : > { %1508 = vmatpush2.msra.mxu0 %v1428_v16  ;;  %3731 = vmatpush2.msra.mxu1 %v1428_v16  ;;  %v1344_v16 = vld [vmem:[%s4391_s24 + $0x110] sm:$0xff] }
 0x1e4   : > { %1509 = vmatprep.subr.mxu0 %v3985_v53  ;;  %3700 = vmatprep.subr.mxu1 %v3985_v53 }
 0x1e5   : > { %1510 = vmatpush2.msra.mxu0 %v1427_v17  ;;  %3732 = vmatpush2.msra.mxu1 %v1427_v17  ;;  %v1330_v17 = vld [vmem:[%s4391_s24 + $0xa0] sm:$0xff] }
 0x1e6   : > { %1511 = vmatprep.subr.mxu0 %v3985_v53  ;;  %3701 = vmatprep.subr.mxu1 %v3985_v53 }
 0x1e7   : > { %1512 = vmatpush2.msra.mxu0 %v1426_v18  ;;  %3733 = vmatpush2.msra.mxu1 %v1426_v18  ;;  %v1343_v18 = vld [vmem:[%s4391_s24 + $0x108] sm:$0xff] }
 0x1e8   : > { %1513 = vmatprep.subr.mxu0 %v3985_v53  ;;  %3702 = vmatprep.subr.mxu1 %v3985_v53 }
 0x1e9   : > { %1514 = vmatpush2.msra.mxu0 %v1425_v19  ;;  %3734 = vmatpush2.msra.mxu1 %v1425_v19  ;;  %v1333_v19 = vld [vmem:[%s4391_s24 + $0xb8] sm:$0xff] }
 0x1ea   : > { %1515 = vmatprep.subr.mxu0 %v3985_v53  ;;  %3703 = vmatprep.subr.mxu1 %v3985_v53 }
 0x1eb   : > { %1516 = vmatpush2.msra.mxu0 %v1424_v20  ;;  %3735 = vmatpush2.msra.mxu1 %v1424_v20  ;;  %v1347_v20 = vld [vmem:[%s4391_s24 + $0x128] sm:$0xff] }
 0x1ec   : > { %1517 = vmatprep.subr.mxu0 %v3985_v53  ;;  %3704 = vmatprep.subr.mxu1 %v3985_v53  ;;  %v1397_v53 = vld [vmem:[%s4391_s24 + $0x2b8] sm:$0xff] }
 0x1ed   : > { %1518 = vmatpush2.msra.mxu0 %v1423_v21  ;;  %3736 = vmatpush2.msra.mxu1 %v1423_v21  ;;  %v1336_v21 = vld [vmem:[%s4391_s24 + $0xd0] sm:$0xff] }
 0x1ee   : > { %1520 = vmatmul.mubr.f32.vlgmr.msra.gmra.mxu0 %v1310_v22  ;;  %1640 = vmatmul.mubr.f32.vlgmr.msra.gmra.mxu1 %v1382_v23  ;;  %v1346_v22 = vld [vmem:[%s4391_s24 + $0x120] sm:$0xff]  ;;  %v1339_v23 = vld [vmem:[%s4391_s24 + $0xe8] sm:$0xff] }
 0x1ef   : > { %3401 = vmatprep.subr.mxu1 %v1454_v24  ;;  %1524 = vmatprep.mubr.f32.mxu0 %v1314_v25  ;;  %v1342_v25 = vld [vmem:[%s4391_s24 + $0x100] sm:$0xff] }
 0x1f0   : > { %3402 = vmatpush3.msra.mxu1 %v1454_v24  ;;  %1644 = vmatprep.mubr.f32.mxu1 %v1386_v26  ;;  %v1350_v24 = vld [vmem:[%s4391_s24 + $0x140] sm:$0xff]  ;;  %v1349_v26 = vld [vmem:[%s4391_s24 + $0x138] sm:$0xff] }
 0x1f1   : > { %3403 = vmatprep.subr.mxu1 %v1453_v27 }
 0x1f2   : > { %3404 = vmatpush3.msra.mxu1 %v1453_v27  ;;  %1525 = vmatmul.mubr.f32.gmra.mxu0 %v1313_v28  ;;  %v1345_v27 = vld [vmem:[%s4391_s24 + $0x118] sm:$0xff] }
 0x1f3   : > { %1645 = vmatmul.mubr.f32.gmra.mxu1 %v1385_v29  ;;  %3405 = vmatprep.subr.mxu1 %v1452_v30  ;;  %v1353_v28 = vld [vmem:[%s4391_s24 + $0x158] sm:$0xff]  ;;  %v1348_v29 = vld [vmem:[%s4391_s24 + $0x130] sm:$0xff] }
 0x1f4   : > { %3406 = vmatpush3.msra.mxu1 %v1452_v30  ;;  %1529 = vmatprep.mubr.f32.mxu0 %v1317_v31  ;;  %v1352_v30 = vld [vmem:[%s4391_s24 + $0x150] sm:$0xff]  ;;  %v1351_v31 = vld [vmem:[%s4391_s24 + $0x148] sm:$0xff] }
 0x1f5   : > { %3407 = vmatprep.subr.mxu1 %v1451_v33  ;;  %1649 = vmatprep.mubr.f32.mxu1 %v1389_v34  ;;  %v1354_v34 = vld [vmem:[%s4391_s24 + $0x160] sm:$0xff] }
 0x1f6   : > { %3408 = vmatpush3.msra.mxu1 %v1451_v33  ;;  %1530 = vmatmul.mubr.f32.gmra.mxu0 %v1316_v35  ;;  %v1356_v33 = vld [vmem:[%s4391_s24 + $0x170] sm:$0xff]  ;;  %v1355_v35 = vld [vmem:[%s4391_s24 + $0x168] sm:$0xff] }
 0x1f7   : > { %1650 = vmatmul.mubr.f32.gmra.mxu1 %v1388_v36  ;;  %3409 = vmatprep.subr.mxu1 %v1450_v37  ;;  %v1357_v36 = vld [vmem:[%s4391_s24 + $0x178] sm:$0xff] }
 0x1f8   : > { %3410 = vmatpush3.msra.mxu1 %v1450_v37  ;;  %1534 = vmatprep.mubr.f32.mxu0 %v1320_v38  ;;  %v1359_v37 = vld [vmem:[%s4391_s24 + $0x188] sm:$0xff]  ;;  %v1360_v38 = vld [vmem:[%s4391_s24 + $0x190] sm:$0xff] }
 0x1f9   : > { %3411 = vmatprep.subr.mxu1 %v1449_v39  ;;  %1654 = vmatprep.mubr.f32.mxu1 %v1392_v40  ;;  %v1363_v40 = vld [vmem:[%s4391_s24 + $0x1a8] sm:$0xff] }
 0x1fa   : > { %3412 = vmatpush3.msra.mxu1 %v1449_v39  ;;  %1535 = vmatmul.mubr.f32.gmra.mxu0 %v1319_v41  ;;  %v1358_v39 = vld [vmem:[%s4391_s24 + $0x180] sm:$0xff] }
 0x1fb   : > { %1655 = vmatmul.mubr.f32.gmra.mxu1 %v1391_v42  ;;  %3413 = vmatprep.subr.mxu1 %v1448_v43  ;;  %v1362_v41 = vld [vmem:[%s4391_s24 + $0x1a0] sm:$0xff] }
 0x1fc   : > { %3414 = vmatpush3.msra.mxu1 %v1448_v43  ;;  %1539 = vmatprep.mubr.f32.mxu0 %v1323_v44  ;;  %v1366_v42 = vld [vmem:[%s4391_s24 + $0x1c0] sm:$0xff]  ;;  %v1361_v43 = vld [vmem:[%s4391_s24 + $0x198] sm:$0xff] }
 0x1fd   : > { %3415 = vmatprep.subr.mxu1 %v1447_v45  ;;  %1659 = vmatprep.mubr.f32.mxu1 %v1395_v46  ;;  %v1369_v44 = vld [vmem:[%s4391_s24 + $0x1d8] sm:$0xff]  ;;  %v1372_v46 = vld [vmem:[%s4391_s24 + $0x1f0] sm:$0xff] }
 0x1fe   : > { %3416 = vmatpush3.msra.mxu1 %v1447_v45  ;;  %1540 = vmatmul.mubr.f32.gmra.mxu0 %v1322_v47  ;;  %v1365_v45 = vld [vmem:[%s4391_s24 + $0x1b8] sm:$0xff]  ;;  %v1364_v47 = vld [vmem:[%s4391_s24 + $0x1b0] sm:$0xff] }
 0x1ff   : > { %1660 = vmatmul.mubr.f32.gmra.mxu1 %v1394_v48  ;;  %3417 = vmatprep.subr.mxu1 %v1446_v49  ;;  %v1375_v48 = vld [vmem:[%s4391_s24 + $0x208] sm:$0xff] }
 0x200   : > { %3418 = vmatpush3.msra.mxu1 %v1446_v49  ;;  %1544 = vmatprep.mubr.f32.mxu0 %v1326_v50  ;;  %v1368_v49 = vld [vmem:[%s4391_s24 + $0x1d0] sm:$0xff]  ;;  %v1378_v50 = vld [vmem:[%s4391_s24 + $0x220] sm:$0xff] }
 0x201   : > { %3419 = vmatprep.subr.mxu1 %v1445_v51  ;;  %1664 = vmatprep.mubr.f32.mxu1 %v1398_v32  ;;  %v1381_v32 = vld [vmem:[%s4391_s24 + $0x238] sm:$0xff] }
 0x202   : > { %3420 = vmatpush3.msra.mxu1 %v1445_v51  ;;  %1545 = vmatmul.mubr.f32.gmra.mxu0 %v1325_v52  ;;  %v1367_v51 = vld [vmem:[%s4391_s24 + $0x1c8] sm:$0xff] }
 0x203   : > { %1665 = vmatmul.mubr.f32.gmra.mxu1 %v1397_v53  ;;  %3421 = vmatprep.subr.mxu1 %v1444_v54  ;;  %v1371_v52 = vld [vmem:[%s4391_s24 + $0x1e8] sm:$0xff]  ;;  %v1384_v53 = vld [vmem:[%s4391_s24 + $0x250] sm:$0xff] }
 0x204   : > { %3422 = vmatpush3.msra.mxu1 %v1444_v54  ;;  %1549 = vmatprep.mubr.f32.mxu0 %v1329_v55  ;;  %v1370_v54 = vld [vmem:[%s4391_s24 + $0x1e0] sm:$0xff]  ;;  %v1387_v55 = vld [vmem:[%s4391_s24 + $0x268] sm:$0xff] }
 0x205   : > { %3423 = vmatprep.subr.mxu1 %v1443_v56  ;;  %1669 = vmatprep.mubr.f32.mxu1 %v1401_v57  ;;  %v1390_v57 = vld [vmem:[%s4391_s24 + $0x280] sm:$0xff] }
 0x206   : > { %3424 = vmatpush3.msra.mxu1 %v1443_v56  ;;  %1550 = vmatmul.mubr.f32.gmra.mxu0 %v1328_v58  ;;  %v1374_v56 = vld [vmem:[%s4391_s24 + $0x200] sm:$0xff]  ;;  %v1373_v58 = vld [vmem:[%s4391_s24 + $0x1f8] sm:$0xff] }
 0x207   : > { %1670 = vmatmul.mubr.f32.gmra.mxu1 %v1400_v59  ;;  %3425 = vmatprep.subr.mxu1 %v1442_v60  ;;  %v1393_v59 = vld [vmem:[%s4391_s24 + $0x298] sm:$0xff] }
 0x208   : > { %3426 = vmatpush3.msra.mxu1 %v1442_v60  ;;  %1554 = vmatprep.mubr.f32.mxu0 %v1332_v61  ;;  %v1377_v60 = vld [vmem:[%s4391_s24 + $0x218] sm:$0xff]  ;;  %v1396_v61 = vld [vmem:[%s4391_s24 + $0x2b0] sm:$0xff] }
 0x209   : > { %3427 = vmatprep.subr.mxu1 %v1441_v62  ;;  %1674 = vmatprep.mubr.f32.mxu1 %v1404_v63  ;;  %v1399_v63 = vld [vmem:[%s4391_s24 + $0x2c8] sm:$0xff] }
 0x20a   : > { %3428 = vmatpush3.msra.mxu1 %v1441_v62  ;;  %1555 = vmatmul.mubr.f32.gmra.mxu0 %v1331_v0  ;;  %v1376_v62 = vld [vmem:[%s4391_s24 + $0x210] sm:$0xff] }
 0x20b   : > { %1675 = vmatmul.mubr.f32.gmra.mxu1 %v1403_v1  ;;  %3429 = vmatprep.subr.mxu1 %v1440_v2  ;;  %v1380_v0 = vld [vmem:[%s4391_s24 + $0x230] sm:$0xff]  ;;  %v1402_v1 = vld [vmem:[%s4391_s24 + $0x2e0] sm:$0xff] }
 0x20c   : > { %3430 = vmatpush3.msra.mxu1 %v1440_v2  ;;  %1559 = vmatprep.mubr.f32.mxu0 %v1335_v3  ;;  %v1379_v2 = vld [vmem:[%s4391_s24 + $0x228] sm:$0xff]  ;;  %v1405_v3 = vld [vmem:[%s4391_s24 + $0x2f8] sm:$0xff] }
 0x20d   : > { %3431 = vmatprep.subr.mxu1 %v1439_v4  ;;  %3433 = vmatprep.mubr.f32.mxu1 %v1312_v5 }
 0x20e   : > { %3432 = vmatpush3.msra.mxu1 %v1439_v4  ;;  %1560 = vmatmul.mubr.f32.gmra.mxu0 %v1334_v6 }
 0x20f   : > { %3434 = vmatmul.mubr.f32.vlgmr.msra.gmra.mxu1 %v1315_v7  ;;  %1564 = vmatprep.mubr.f32.mxu0 %v1338_v8 }
 0x210   : > { %3436 = vmatprep.mubr.f32.mxu1 %v1318_v9 }
 0x212   : > { %1565 = vmatmul.mubr.f32.gmra.mxu0 %v1337_v10 }
 0x213   : > { %3437 = vmatmul.mubr.f32.gmra.mxu1 %v1321_v11  ;;  %1569 = vmatprep.mubr.f32.mxu0 %v1341_v12 }
 0x214   : > { %3439 = vmatprep.mubr.f32.mxu1 %v1324_v13 }
 0x216   : > { %1570 = vmatmul.mubr.f32.gmra.mxu0 %v1340_v14 }
 0x217   : > { %3440 = vmatmul.mubr.f32.gmra.mxu1 %v1327_v15  ;;  %1574 = vmatprep.mubr.f32.mxu0 %v1344_v16 }
 0x218   : > { %3442 = vmatprep.mubr.f32.mxu1 %v1330_v17 }
 0x21a   : > { %1575 = vmatmul.mubr.f32.gmra.mxu0 %v1343_v18 }
 0x21b   : > { %3443 = vmatmul.mubr.f32.gmra.mxu1 %v1333_v19  ;;  %1579 = vmatprep.mubr.f32.mxu0 %v1347_v20 }
 0x21c   : > { %3445 = vmatprep.mubr.f32.mxu1 %v1336_v21 }
 0x21e   : > { %1580 = vmatmul.mubr.f32.gmra.mxu0 %v1346_v22 }
 0x21f   : > { %3446 = vmatmul.mubr.f32.gmra.mxu1 %v1339_v23  ;;  %1584 = vmatprep.mubr.f32.mxu0 %v1350_v24 }
 0x220   : > { %3448 = vmatprep.mubr.f32.mxu1 %v1342_v25 }
 0x222   : > { %1585 = vmatmul.mubr.f32.gmra.mxu0 %v1349_v26 }
 0x223   : > { %3449 = vmatmul.mubr.f32.gmra.mxu1 %v1345_v27  ;;  %1589 = vmatprep.mubr.f32.mxu0 %v1353_v28 }
 0x224   : > { %3451 = vmatprep.mubr.f32.mxu1 %v1348_v29 }
 0x226   : > { %1590 = vmatmul.mubr.f32.gmra.mxu0 %v1352_v30 }
 0x227   : > { %3452 = vmatmul.mubr.f32.gmra.mxu1 %v1351_v31  ;;  %1594 = vmatprep.mubr.f32.mxu0 %v1356_v33 }
 0x228   : > { %3454 = vmatprep.mubr.f32.mxu1 %v1354_v34 }
 0x22a   : > { %1595 = vmatmul.mubr.f32.gmra.mxu0 %v1355_v35 }
 0x22b   : > { %3455 = vmatmul.mubr.f32.gmra.mxu1 %v1357_v36  ;;  %1599 = vmatprep.mubr.f32.mxu0 %v1359_v37 }
 0x22c   : > { %3457 = vmatprep.mubr.f32.mxu1 %v1360_v38  ;;  %v1279_v38 = vld [vmem:[#allocation3] sm:$0xff] }
 0x22e   : > { %1600 = vmatmul.mubr.f32.gmra.mxu0 %v1358_v39 }
 0x22f   : > { %3458 = vmatmul.mubr.f32.gmra.mxu1 %v1363_v40  ;;  %1604 = vmatprep.mubr.f32.mxu0 %v1362_v41 }
 0x230   : > { %3460 = vmatprep.mubr.f32.mxu1 %v1366_v42  ;;  %v1278_v42 = vld [vmem:[#allocation3 + $0xb0] sm:$0xff] }
 0x232   : > { %1605 = vmatmul.mubr.f32.gmra.mxu0 %v1361_v43 }
 0x233   : > { %3461 = vmatmul.mubr.f32.gmra.mxu1 %v1369_v44  ;;  %1609 = vmatprep.mubr.f32.mxu0 %v1365_v45 }
 0x234   : > { %3463 = vmatprep.mubr.f32.mxu1 %v1372_v46 }
 0x236   : > { %1610 = vmatmul.mubr.f32.gmra.mxu0 %v1364_v47  ;;  %v1281_v47 = vld [vmem:[#allocation3 + $0x18] sm:$0xff] }
 0x237   : > { %3464 = vmatmul.mubr.f32.gmra.mxu1 %v1375_v48  ;;  %1614 = vmatprep.mubr.f32.mxu0 %v1368_v49 }
 0x238   : > { %3466 = vmatprep.mubr.f32.mxu1 %v1378_v50 }
 0x23a   : > { %1615 = vmatmul.mubr.f32.gmra.mxu0 %v1367_v51 }
 0x23b   : > { %3467 = vmatmul.mubr.f32.gmra.mxu1 %v1381_v32  ;;  %1619 = vmatprep.mubr.f32.mxu0 %v1371_v52  ;;  %v1280_v32 = vld [vmem:[#allocation3 + $0xd8] sm:$0xff] }
 0x23c   : > { %3469 = vmatprep.mubr.f32.mxu1 %v1384_v53 }
 0x23e   : > { %1620 = vmatmul.mubr.f32.gmra.mxu0 %v1370_v54 }
 0x23f   : > { %3470 = vmatmul.mubr.f32.gmra.mxu1 %v1387_v55  ;;  %1624 = vmatprep.mubr.f32.mxu0 %v1374_v56  ;;  %v1283_v56 = vld [vmem:[#allocation3 + $0x68] sm:$0xff] }
 0x240   : > { %3472 = vmatprep.mubr.f32.mxu1 %v1390_v57 }
 0x242   : > { %1625 = vmatmul.mubr.f32.gmra.mxu0 %v1373_v58 }
 0x243   : > { %3473 = vmatmul.mubr.f32.gmra.mxu1 %v1393_v59  ;;  %1629 = vmatprep.mubr.f32.mxu0 %v1377_v60 }
 0x244   : > { %3475 = vmatprep.mubr.f32.mxu1 %v1396_v61  ;;  %v1282_v61 = vld [vmem:[#allocation3 + $0x50] sm:$0xff] }
 0x246   : > { %1630 = vmatmul.mubr.f32.gmra.mxu0 %v1376_v62 }
 0x247   : > { %3476 = vmatmul.mubr.f32.gmra.mxu1 %v1399_v63  ;;  %1634 = vmatprep.mubr.f32.mxu0 %v1380_v0 }
 0x248   : > { %3478 = vmatprep.mubr.f32.mxu1 %v1402_v1 }
 0x24a   : > { %1635 = vmatmul.mubr.f32.gmra.mxu0 %v1379_v2  ;;  %v1285_v2 = vld [vmem:[#allocation3 + $0x48] sm:$0xff] }
 0x24b   : > { %3479 = vmatmul.mubr.f32.gmra.mxu1 %v1405_v3 }
 0x2ae   : > { %v1521_v4 = vpop.f32.mrf.mxu0  ;;  %v4780_v5 = vpop.f32.mrf.mxu1 }
 0x2b0   : > { %v1523_v6 = vpop.f32.mrf.mxu0  ;;  %v1643_v7 = vpop.f32.mrf.mxu1 }
 0x2b2   : > { %v1526_v8 = vpop.f32.mrf.mxu0 }
 0x2b3   : > { %v4782_v9 = vpop.f32.mrf.mxu1 }
 0x2b4   : > { %v1528_v10 = vpop.f32.mrf.mxu0 }
 0x2b5   : > { %v1648_v11 = vpop.f32.mrf.mxu1 }
 0x2b6   : > { %v1531_v12 = vpop.f32.mrf.mxu0 }
 0x2b7   : > { %v4784_v13 = vpop.f32.mrf.mxu1 }
 0x2b8   : > { %v1533_v14 = vpop.f32.mrf.mxu0 }
 0x2b9   : > { %v1653_v15 = vpop.f32.mrf.mxu1 }
 0x2ba   : > { %v1536_v16 = vpop.f32.mrf.mxu0  ;;  %v1287_v15 = vld [vmem:[#allocation3 + $0x88] sm:$0xff] }
 0x2bb   : > { %v4786_v17 = vpop.f32.mrf.mxu1 }
 0x2bc   : > { %v1538_v18 = vpop.f32.mrf.mxu0 }
 0x2bd   : > { %v1658_v19 = vpop.f32.mrf.mxu1 }
 0x2be   : > { %v1541_v20 = vpop.f32.mrf.mxu0 }
 0x2bf   : > { %v4788_v21 = vpop.f32.mrf.mxu1 }
 0x2c0   : > { %v1543_v22 = vpop.f32.mrf.mxu0 }
 0x2c1   : > { %v1663_v23 = vpop.f32.mrf.mxu1 }
 0x2c2   : > { %v1546_v24 = vpop.f32.mrf.mxu0 }
 0x2c3   : > { %v4790_v25 = vpop.f32.mrf.mxu1 }
 0x2c4   : > { %v1548_v26 = vpop.f32.mrf.mxu0 }
 0x2c5   : > { %v1668_v27 = vpop.f32.mrf.mxu1 }
 0x2c6   : > { %v1551_v28 = vpop.f32.mrf.mxu0 }
 0x2c7   : > { %v4792_v29 = vpop.f32.mrf.mxu1 }
 0x2c8   : > { %v1553_v30 = vpop.f32.mrf.mxu0 }
 0x2c9   : > { %v1673_v31 = vpop.f32.mrf.mxu1  ;;  %v1289_v30 = vld [vmem:[#allocation3 + $0xb8] sm:$0xff] }
 0x2ca   : > { %v1556_v33 = vpop.f32.mrf.mxu0 }
 0x2cb   : > { %v4794_v34 = vpop.f32.mrf.mxu1 }
 0x2cc   : > { %v1558_v35 = vpop.f32.mrf.mxu0 }
 0x2cd   : > { %v1678_v36 = vpop.f32.mrf.mxu1 }
 0x2ce   : > { %v1561_v37 = vpop.f32.mrf.mxu0 }
 0x2cf   : > { %v3435_v39 = vpop.f32.mrf.mxu1 }
 0x2d0   : > { %v1752_v40 = vadd.f32 %v3435_v39, %v1526_v8  ;;  %v1563_v41 = vpop.f32.mrf.mxu0  ;;  %v1284_v8 = vld [vmem:[#allocation3 + $0x30] sm:$0xff] }
 0x2d1   : > { %v1746_v43 = vpop.f32.mrf.mxu1 }
 0x2d2   : > { %v1906_v44 = vadd.f32 %v1752_v40, %v1279_v38  ;;  %v1747_v45 = vadd.f32 %v1746_v43, %v1521_v4  ;;  %v1566_v46 = vpop.f32.mrf.mxu0 }
 0x2d3   : > { %v3438_v48 = vpop.f32.mrf.mxu1 }
 0x2d4   : > { %1938 = vst [vmem:[#allocation3] sm:$0xff] %v1906_v44  ;;  %v1905_v49 = vadd.f32 %v1747_v45, %v1278_v42  ;;  %v1762_v50 = vadd.f32 %v3438_v48, %v1536_v16  ;;  %v1568_v51 = vpop.f32.mrf.mxu0  ;;  %v1291_v42 = vld [vmem:[#allocation3 + $0xf0] sm:$0xff] }
 0x2d5   : > { %v1756_v52 = vpop.f32.mrf.mxu1  ;;  %v1293_v51 = vld [vmem:[#allocation3 + $0x78] sm:$0xff] }
 0x2d6   : > { %1937 = vst [vmem:[#allocation3 + $0xb0] sm:$0xff] %v1905_v49  ;;  %v1908_v53 = vadd.f32 %v1762_v50, %v1281_v47  ;;  %v1757_v54 = vadd.f32 %v1756_v52, %v1531_v12  ;;  %v1571_v55 = vpop.f32.mrf.mxu0 }
 0x2d7   : > { %v3441_v57 = vpop.f32.mrf.mxu1 }
 0x2d8   : > { %1940 = vst [vmem:[#allocation3 + $0x18] sm:$0xff] %v1908_v53  ;;  %v1907_v58 = vadd.f32 %v1757_v54, %v1280_v32  ;;  %v1772_v59 = vadd.f32 %v3441_v57, %v1546_v24  ;;  %v1573_v60 = vpop.f32.mrf.mxu0 }
 0x2d9   : > { %v1766_v62 = vpop.f32.mrf.mxu1 }
 0x2da   : > { %1939 = vst [vmem:[#allocation3 + $0xd8] sm:$0xff] %v1907_v58  ;;  %v1910_v63 = vadd.f32 %v1772_v59, %v1283_v56  ;;  %v1767_v0 = vadd.f32 %v1766_v62, %v1541_v20  ;;  %v1576_v1 = vpop.f32.mrf.mxu0  ;;  %v1286_v20 = vld [vmem:[#allocation3 + $0x80] sm:$0xff] }
 0x2db   : > { %v3444_v3 = vpop.f32.mrf.mxu1 }
 0x2dc   : > { %1942 = vst [vmem:[#allocation3 + $0x68] sm:$0xff] %v1910_v63  ;;  %v1909_v4 = vadd.f32 %v1767_v0, %v1282_v61  ;;  %v1782_v6 = vadd.f32 %v3444_v3, %v1556_v33  ;;  %v1578_v7 = vpop.f32.mrf.mxu0  ;;  %v1294_v63 = vld [vmem:[#allocation3 + $0x38] sm:$0xff] }
 0x2dd   : > { %v1776_v10 = vpop.f32.mrf.mxu1 }
 0x2de   : > { %1941 = vst [vmem:[#allocation3 + $0x50] sm:$0xff] %v1909_v4  ;;  %v1912_v11 = vadd.f32 %v1782_v6, %v1285_v2  ;;  %v1777_v12 = vadd.f32 %v1776_v10, %v1551_v28  ;;  %v1581_v14 = vpop.f32.mrf.mxu0  ;;  %v1288_v28 = vld [vmem:[#allocation3 + $0xe8] sm:$0xff]  ;;  %v1295_v2 = vld [vmem:[#allocation3 + $0x58] sm:$0xff] }
 0x2df   : > { %v3447_v16 = vpop.f32.mrf.mxu1 }
 0x2e0   : > { %1944 = vst [vmem:[#allocation3 + $0x48] sm:$0xff] %v1912_v11  ;;  %v1911_v18 = vadd.f32 %v1777_v12, %v1284_v8  ;;  %v1792_v19 = vadd.f32 %v3447_v16, %v1566_v46  ;;  %v1583_v22 = vpop.f32.mrf.mxu0  ;;  %v1296_v12 = vld [vmem:[#allocation3 + $0x40] sm:$0xff] }
 0x2e1   : > { %v1786_v23 = vpop.f32.mrf.mxu1 }
 0x2e2   : > { %1943 = vst [vmem:[#allocation3 + $0x30] sm:$0xff] %v1911_v18  ;;  %v1914_v24 = vadd.f32 %v1792_v19, %v1287_v15  ;;  %v1787_v26 = vadd.f32 %v1786_v23, %v1561_v37  ;;  %v1586_v27 = vpop.f32.mrf.mxu0  ;;  %v1290_v37 = vld [vmem:[#allocation3 + $0x60] sm:$0xff] }
 0x2e3   : > { %v3450_v31 = vpop.f32.mrf.mxu1 }
 0x2e4   : > { %1946 = vst [vmem:[#allocation3 + $0x88] sm:$0xff] %v1914_v24  ;;  %v1913_v33 = vadd.f32 %v1787_v26, %v1286_v20  ;;  %v1802_v35 = vadd.f32 %v3450_v31, %v1576_v1  ;;  %v1588_v36 = vpop.f32.mrf.mxu0  ;;  %v1297_v20 = vld [vmem:[#allocation3 + $0xc8] sm:$0xff] }
 0x2e5   : > { %v1796_v38 = vpop.f32.mrf.mxu1 }
 0x2e6   : > { %1945 = vst [vmem:[#allocation3 + $0x80] sm:$0xff] %v1913_v33  ;;  %v1916_v39 = vadd.f32 %v1802_v35, %v1289_v30  ;;  %v1797_v40 = vadd.f32 %v1796_v38, %v1571_v55  ;;  %v1591_v41 = vpop.f32.mrf.mxu0  ;;  %v1292_v55 = vld [vmem:[#allocation3 + $0x8] sm:$0xff]  ;;  %v1298_v33 = vld [vmem:[#allocation3 + $0xe0] sm:$0xff] }
 0x2e7   : > { %v3453_v43 = vpop.f32.mrf.mxu1 }
 0x2e8   : > { %1948 = vst [vmem:[#allocation3 + $0xb8] sm:$0xff] %v1916_v39  ;;  %v1915_v44 = vadd.f32 %v1797_v40, %v1288_v28  ;;  %v1812_v45 = vadd.f32 %v3453_v43, %v1586_v27  ;;  %v1593_v46 = vpop.f32.mrf.mxu0  ;;  %v1303_v28 = vld [vmem:[#allocation3 + $0xd0] sm:$0xff] }
 0x2e9   : > { %v1806_v47 = vpop.f32.mrf.mxu1  ;;  %v1299_v46 = vld [vmem:[#allocation3 + $0x90] sm:$0xff] }
 0x2ea   : > { %1947 = vst [vmem:[#allocation3 + $0xe8] sm:$0xff] %v1915_v44  ;;  %v1918_v48 = vadd.f32 %v1812_v45, %v1291_v42  ;;  %v1807_v49 = vadd.f32 %v1806_v47, %v1581_v14  ;;  %v1596_v50 = vpop.f32.mrf.mxu0  ;;  %v1302_v42 = vld [vmem:[#allocation3 + $0xa8] sm:$0xff] }
 0x2eb   : > { %v3456_v32 = vpop.f32.mrf.mxu1 }
 0x2ec   : > { %1950 = vst [vmem:[#allocation3 + $0xf0] sm:$0xff] %v1918_v48  ;;  %v1917_v52 = vadd.f32 %v1807_v49, %v1290_v37  ;;  %v1822_v53 = vadd.f32 %v3456_v32, %v1596_v50  ;;  %v1598_v54 = vpop.f32.mrf.mxu0  ;;  %v1305_v48 = vld [vmem:[#allocation3 + $0x28] sm:$0xff] }
 0x2ed   : > { %v1816_v56 = vpop.f32.mrf.mxu1 }
 0x2ee   : > { %1949 = vst [vmem:[#allocation3 + $0x60] sm:$0xff] %v1917_v52  ;;  %v1920_v57 = vadd.f32 %v1822_v53, %v1293_v51  ;;  %v1817_v58 = vadd.f32 %v1816_v56, %v1591_v41  ;;  %v1601_v59 = vpop.f32.mrf.mxu0  ;;  %v1300_v56 = vld [vmem:[#allocation3 + $0x70] sm:$0xff] }
 0x2ef   : > { %v3459_v60 = vpop.f32.mrf.mxu1 }
 0x2f0   : > { %1952 = vst [vmem:[#allocation3 + $0x78] sm:$0xff] %v1920_v57  ;;  %v1919_v61 = vadd.f32 %v1817_v58, %v1292_v55  ;;  %v1603_v62 = vpop.f32.mrf.mxu0  ;;  %v1307_v58 = vld [vmem:[#allocation3 + $0xf8] sm:$0xff] }
 0x2f1   : > { %v1826_v0 = vpop.f32.mrf.mxu1 }
 0x2f2   : > { %1951 = vst [vmem:[#allocation3 + $0x8] sm:$0xff] %v1919_v61  ;;  %v1827_v1 = vadd.f32 %v1826_v0, %v1601_v59  ;;  %v1606_v3 = vpop.f32.mrf.mxu0 }
 0x2f3   : > { %v1832_v4 = vadd.f32 %v3459_v60, %v1606_v3  ;;  %v3462_v6 = vpop.f32.mrf.mxu1  ;;  %v1301_v3 = vld [vmem:[#allocation3 + $0xc0] sm:$0xff] }
 0x2f4   : > { %v1921_v7 = vadd.f32 %v1827_v1, %v1294_v63  ;;  %v1608_v8 = vpop.f32.mrf.mxu0  ;;  %v1306_v63 = vld [vmem:[#allocation3 + $0xa0] sm:$0xff] }
 0x2f5   : > { %v1922_v10 = vadd.f32 %v1832_v4, %v1295_v2  ;;  %v1836_v11 = vpop.f32.mrf.mxu1 }
 0x2f6   : > { %1953 = vst [vmem:[#allocation3 + $0x38] sm:$0xff] %v1921_v7  ;;  %v1611_v14 = vpop.f32.mrf.mxu0 }
 0x2f7   : > { %1954 = vst [vmem:[#allocation3 + $0x58] sm:$0xff] %v1922_v10  ;;  %v1837_v15 = vadd.f32 %v1836_v11, %v1611_v14  ;;  %v3465_v16 = vpop.f32.mrf.mxu1 }
 0x2f8   : > { %v1613_v18 = vpop.f32.mrf.mxu0 }
 0x2f9   : > { %v1923_v19 = vadd.f32 %v1837_v15, %v1296_v12  ;;  %v1846_v22 = vpop.f32.mrf.mxu1  ;;  %v1308_v12 = vld [vmem:[#allocation3 + $0x20] sm:$0xff] }
 0x2fa   : > { %v1616_v23 = vpop.f32.mrf.mxu0 }
 0x2fb   : > { %1955 = vst [vmem:[#allocation3 + $0x40] sm:$0xff] %v1923_v19  ;;  %v1842_v24 = vadd.f32 %v3462_v6, %v1616_v23  ;;  %v3468_v26 = vpop.f32.mrf.mxu1  ;;  %v1309_v6 = vld [vmem:[#allocation3 + $0x98] sm:$0xff] }
 0x2fc   : > { %v1618_v27 = vpop.f32.mrf.mxu0 }
 0x2fd   : > { %v1924_v30 = vadd.f32 %v1842_v24, %v1297_v20  ;;  %v1856_v31 = vpop.f32.mrf.mxu1 }
 0x2fe   : > { %v1621_v35 = vpop.f32.mrf.mxu0 }
 0x2ff   : > { %1956 = vst [vmem:[#allocation3 + $0xc8] sm:$0xff] %v1924_v30  ;;  %v1847_v36 = vadd.f32 %v1846_v22, %v1621_v35  ;;  %v3471_v38 = vpop.f32.mrf.mxu1 }
 0x300   : > { %v1872_v39 = vadd.f32 %v3471_v38, %v4782_v9  ;;  %v1623_v40 = vpop.f32.mrf.mxu0  ;;  %v1304_v9 = vld [vmem:[#allocation3 + $0x10] sm:$0xff] }
 0x301   : > { %v1925_v41 = vadd.f32 %v1847_v36, %v1298_v33  ;;  %v1866_v43 = vpop.f32.mrf.mxu1 }
 0x302   : > { %v1930_v44 = vadd.f32 %v1872_v39, %v1303_v28  ;;  %v1867_v45 = vadd.f32 %v1866_v43, %v4780_v5  ;;  %v1626_v37 = vpop.f32.mrf.mxu0 }
 0x303   : > { %1957 = vst [vmem:[#allocation3 + $0xe0] sm:$0xff] %v1925_v41  ;;  %v1852_v47 = vadd.f32 %v3465_v16, %v1626_v37  ;;  %v3474_v49 = vpop.f32.mrf.mxu1 }
 0x304   : > { %1962 = vst [vmem:[#allocation3 + $0xd0] sm:$0xff] %v1930_v44  ;;  %v1929_v50 = vadd.f32 %v1867_v45, %v1302_v42  ;;  %v1882_v51 = vadd.f32 %v3474_v49, %v4786_v17  ;;  %v1628_v32 = vpop.f32.mrf.mxu0 }
 0x305   : > { %v1926_v52 = vadd.f32 %v1852_v47, %v1299_v46  ;;  %v1876_v53 = vpop.f32.mrf.mxu1 }
 0x306   : > { %1961 = vst [vmem:[#allocation3 + $0xa8] sm:$0xff] %v1929_v50  ;;  %v1932_v54 = vadd.f32 %v1882_v51, %v1305_v48  ;;  %v1877_v55 = vadd.f32 %v1876_v53, %v4784_v13  ;;  %v1631_v5 = vpop.f32.mrf.mxu0 }
 0x307   : > { %1958 = vst [vmem:[#allocation3 + $0x90] sm:$0xff] %v1926_v52  ;;  %v1857_v57 = vadd.f32 %v1856_v31, %v1631_v5  ;;  %v3477_v59 = vpop.f32.mrf.mxu1 }
 0x308   : > { %1964 = vst [vmem:[#allocation3 + $0x28] sm:$0xff] %v1932_v54  ;;  %v1931_v60 = vadd.f32 %v1877_v55, %v1304_v9  ;;  %v1892_v61 = vadd.f32 %v3477_v59, %v4790_v25  ;;  %v1633_v62 = vpop.f32.mrf.mxu0 }
 0x309   : > { %v1927_v17 = vadd.f32 %v1857_v57, %v1300_v56  ;;  %v1886_v0 = vpop.f32.mrf.mxu1 }
 0x30a   : > { %1963 = vst [vmem:[#allocation3 + $0x10] sm:$0xff] %v1931_v60  ;;  %v1934_v1 = vadd.f32 %v1892_v61, %v1307_v58  ;;  %v1887_v2 = vadd.f32 %v1886_v0, %v4788_v21  ;;  %v1636_v13 = vpop.f32.mrf.mxu0 }
 0x30b   : > { %1959 = vst [vmem:[#allocation3 + $0x70] sm:$0xff] %v1927_v17  ;;  %v1862_v4 = vadd.f32 %v3468_v26, %v1636_v13  ;;  %v3480_v7 = vpop.f32.mrf.mxu1 }
 0x30c   : > { %1966 = vst [vmem:[#allocation3 + $0xf8] sm:$0xff] %v1934_v1  ;;  %v1933_v8 = vadd.f32 %v1887_v2, %v1306_v63  ;;  %v1902_v10 = vadd.f32 %v3480_v7, %v4794_v34  ;;  %v1638_v11 = vpop.f32.mrf.mxu0 }
 0x30d   : > { %v1928_v25 = vadd.f32 %v1862_v4, %v1301_v3  ;;  %v1896_v14 = vpop.f32.mrf.mxu1 }
 0x30e   : > { %1965 = vst [vmem:[#allocation3 + $0xa0] sm:$0xff] %v1933_v8  ;;  %v1936_v15 = vadd.f32 %v1902_v10, %v1309_v6  ;;  %v1897_v16 = vadd.f32 %v1896_v14, %v4792_v29  ;;  %1972 = sbr.rel (%p3075_p8) target bundleno = 1475 (0x5c3), region = 87 }
 0x30f   : > { %1960 = vst [vmem:[#allocation3 + $0xc0] sm:$0xff] %v1928_v25 }
 0x310   : > { %1968 = vst [vmem:[#allocation3 + $0x98] sm:$0xff] %v1936_v15  ;;  %v1935_v21 = vadd.f32 %v1897_v16, %v1308_v12 }
 0x312   : > { %1967 = vst [vmem:[#allocation3 + $0x20] sm:$0xff] %v1935_v21 }
 0x313   : > { %1976 = sbr.rel (%p3076_p9) target bundleno = 817 (0x331), region = 91  ;;  %s1977_s12 = sadd.s32 (!%p3076_p9), 1, %s3958_s9 }
 0x314   : > { %p1978_p10 = scmp.lt.s32.totalorder (!%p3076_p9), %s1977_s12, 0  ;;  %s1979_s17 = ssub.s32 (!%p3076_p9), 0, %s1977_s12 }
 0x315   : > { %s3077_s27 = smin.u32 (!%p3076_p9), %s1979_s17, %s1977_s12  ;;  %s3080_s15 = sshll.u32 (!%p3076_p9), %s3954_s30, 8 }
 0x316   : > { %s1981_s24 = sand.u32 (!%p3076_p9), 1, %s3077_s27  }
 0x317   : > { %s1982_s4 = ssub.s32 (!%p3076_p9), 0, %s1981_s24 }
 0x318   : > { %s5261_s4 = smov (!%p1978_p10, %s1982_s4), %s1981_s24  ;;  %v1993_v29 = vld [vmem:[#allocation3 + $0xb0] sm:$0xff]  ;;  %v1994_v34 = vld [vmem:[#allocation3] sm:$0xff]  ;;  %v1995_v18 = vld [vmem:[#allocation3 + $0xd8] sm:$0xff] }
 0x319   : > { %p3079_p11 = scmp.lt.s32.totalorder %s5261_s4, 0  ;;  %s1988_s8 = sadd.s32 2, %s5261_s4  ;;  %v1996_v19 = vld [vmem:[#allocation3 + $0x18] sm:$0xff]  ;;  %v1997_v22 = vld [vmem:[#allocation3 + $0x50] sm:$0xff]  ;;  %v1998_v20 = vld [vmem:[#allocation3 + $0x68] sm:$0xff] }
 0x31a   : > { %v1999_v23 = vld [vmem:[#allocation3 + $0x30] sm:$0xff]  ;;  %v2000_v24 = vld [vmem:[#allocation3 + $0x48] sm:$0xff]  ;;  %v2001_v26 = vld [vmem:[#allocation3 + $0x80] sm:$0xff] }
 0x31b   : > { %s5263_s8 = smov (!%p3079_p11, %s1988_s8), %s5261_s4  ;;  %v2002_v27 = vld [vmem:[#allocation3 + $0x88] sm:$0xff]  ;;  %v2004_v31 = vld [vmem:[#allocation3 + $0xb8] sm:$0xff]  ;;  %v2005_v33 = vld [vmem:[#allocation3 + $0x60] sm:$0xff] }
 0x31c   : > { %v2003_v30 = vld [vmem:[#allocation3 + $0xe8] sm:$0xff]  ;;  %v2006_v35 = vld [vmem:[#allocation3 + $0xf0] sm:$0xff]  ;;  %v2008_v28 = vld [vmem:[#allocation3 + $0x78] sm:$0xff]  ;;  %s1990_s29 = smul.u32 768, %s5263_s8 }
 0x31d   : > { %v2007_v36 = vld [vmem:[#allocation3 + $0x8] sm:$0xff]  ;;  %v2009_v38 = vld [vmem:[#allocation3 + $0x38] sm:$0xff]  ;;  %v2011_v40 = vld [vmem:[#allocation3 + $0x40] sm:$0xff] }
 0x31e   : > { %v2010_v39 = vld [vmem:[#allocation3 + $0x58] sm:$0xff]  ;;  %v2012_v41 = vld [vmem:[#allocation3 + $0xc8] sm:$0xff]  ;;  %v2013_v42 = vld [vmem:[#allocation3 + $0xe0] sm:$0xff]  ;;  %s1992_s16 = sadd.s32 %s3080_s15, %s1990_s29 }
 0x31f   : > { %v2014_v43 = vld [vmem:[#allocation3 + $0x90] sm:$0xff]  ;;  %v2016_v45 = vld [vmem:[#allocation3 + $0xc0] sm:$0xff]  ;;  %v2017_v46 = vld [vmem:[#allocation3 + $0xa8] sm:$0xff]  ;;  %s4813_s20 = scalar_lea.vmem [#allocation2], %s1992_s16 }
 0x320   : > { %v2015_v44 = vld [vmem:[#allocation3 + $0x70] sm:$0xff]  ;;  %v2020_v48 = vld [vmem:[#allocation3 + $0x28] sm:$0xff]  ;;  %v2021_v49 = vld [vmem:[#allocation3 + $0xa0] sm:$0xff]  ;;  %2026 = vst [vmem:[%s4813_s20] sm:$0xff] %v1993_v29 }
 0x321   : > { %v2018_v37 = vld [vmem:[#allocation3 + $0xd0] sm:$0xff]  ;;  %v2022_v50 = vld [vmem:[#allocation3 + $0xf8] sm:$0xff]  ;;  %v2023_v51 = vld [vmem:[#allocation3 + $0x20] sm:$0xff]  ;;  %2027 = vst [vmem:[%s4813_s20 + $0x8] sm:$0xff] %v1994_v34 }
 0x322   : > { %v2019_v47 = vld [vmem:[#allocation3 + $0x10] sm:$0xff]  ;;  %v2024_v32 = vld [vmem:[#allocation3 + $0x98] sm:$0xff]  ;;  %2028 = vst [vmem:[%s4813_s20 + $0x10] sm:$0xff] %v1995_v18  ;;  %2029 = vst [vmem:[%s4813_s20 + $0x18] sm:$0xff] %v1996_v19 }
 0x323   : > { %2030 = vst [vmem:[%s4813_s20 + $0x20] sm:$0xff] %v1997_v22  ;;  %2031 = vst [vmem:[%s4813_s20 + $0x28] sm:$0xff] %v1998_v20 }
 0x324   : > { %2032 = vst [vmem:[%s4813_s20 + $0x30] sm:$0xff] %v1999_v23  ;;  %2033 = vst [vmem:[%s4813_s20 + $0x38] sm:$0xff] %v2000_v24 }
 0x325   : > { %2034 = vst [vmem:[%s4813_s20 + $0x40] sm:$0xff] %v2001_v26  ;;  %2035 = vst [vmem:[%s4813_s20 + $0x48] sm:$0xff] %v2002_v27 }
 0x326   : > { %2036 = vst [vmem:[%s4813_s20 + $0x50] sm:$0xff] %v2003_v30  ;;  %2037 = vst [vmem:[%s4813_s20 + $0x58] sm:$0xff] %v2004_v31 }
 0x327   : > { %2038 = vst [vmem:[%s4813_s20 + $0x60] sm:$0xff] %v2005_v33  ;;  %2039 = vst [vmem:[%s4813_s20 + $0x68] sm:$0xff] %v2006_v35 }
 0x328   : > { %2040 = vst [vmem:[%s4813_s20 + $0x70] sm:$0xff] %v2007_v36  ;;  %2041 = vst [vmem:[%s4813_s20 + $0x78] sm:$0xff] %v2008_v28 }
 0x329   : > { %2042 = vst [vmem:[%s4813_s20 + $0x80] sm:$0xff] %v2009_v38  ;;  %2043 = vst [vmem:[%s4813_s20 + $0x88] sm:$0xff] %v2010_v39 }
 0x32a   : > { %2044 = vst [vmem:[%s4813_s20 + $0x90] sm:$0xff] %v2011_v40  ;;  %2045 = vst [vmem:[%s4813_s20 + $0x98] sm:$0xff] %v2012_v41 }
 0x32b   : > { %2046 = vst [vmem:[%s4813_s20 + $0xa0] sm:$0xff] %v2013_v42  ;;  %2047 = vst [vmem:[%s4813_s20 + $0xa8] sm:$0xff] %v2014_v43 }
 0x32c   : > { %2048 = vst [vmem:[%s4813_s20 + $0xb0] sm:$0xff] %v2015_v44  ;;  %2049 = vst [vmem:[%s4813_s20 + $0xb8] sm:$0xff] %v2016_v45 }
 0x32d   : > { %2050 = vst [vmem:[%s4813_s20 + $0xc0] sm:$0xff] %v2017_v46  ;;  %2051 = vst [vmem:[%s4813_s20 + $0xc8] sm:$0xff] %v2018_v37 }
 0x32e   : > { %2052 = vst [vmem:[%s4813_s20 + $0xd0] sm:$0xff] %v2019_v47  ;;  %2053 = vst [vmem:[%s4813_s20 + $0xd8] sm:$0xff] %v2020_v48 }
 0x32f   : > { %2054 = vst [vmem:[%s4813_s20 + $0xe0] sm:$0xff] %v2021_v49  ;;  %2055 = vst [vmem:[%s4813_s20 + $0xe8] sm:$0xff] %v2022_v50 }
 0x330   : > { %2056 = vst [vmem:[%s4813_s20 + $0xf0] sm:$0xff] %v2023_v51  ;;  %2057 = vst [vmem:[%s4813_s20 + $0xf8] sm:$0xff] %v2024_v32 }
 0x331 PF: > { %p3081_p12 = scmp.ne.s32.totalorder %s3958_s9, 1 }
 0x333   : > { %2061 = sbr.rel (%p3081_p12) target bundleno = 1475 (0x5c3), region = 95 }
 0x338   : > { %v2109_v52 = vld [vmem:[%s4363_s14 + $0x78] sm:$0xff]  ;;  %v2108_v9 = vld [vmem:[%s4363_s14 + $0x70] sm:$0xff]  ;;  %v2107_v53 = vld [vmem:[%s4363_s14 + $0x68] sm:$0xff] }
 0x339   : > { %3481 = vmatprep.subr.mxu0 %v2109_v52  ;;  %v2106_v54 = vld [vmem:[%s4363_s14 + $0x60] sm:$0xff]  ;;  %v2062_v55 = vld [vmem:[#allocation3 + $0xb0] sm:$0xff]  ;;  %v2105_v56 = vld [vmem:[%s4363_s14 + $0x58] sm:$0xff] }
 0x33a   : > { %3482 = vmatpush3.msra.mxu0 %v2109_v52  ;;  %3513 = vmatprep.mubr.f32.mxu0 %v2062_v55  ;;  %v2104_v5 = vld [vmem:[%s4363_s14 + $0x50] sm:$0xff]  ;;  %v2103_v57 = vld [vmem:[%s4363_s14 + $0x48] sm:$0xff]  ;;  %v2102_v58 = vld [vmem:[%s4363_s14 + $0x40] sm:$0xff] }
 0x33b   : > { %3483 = vmatprep.subr.mxu0 %v2108_v9  ;;  %v2101_v59 = vld [vmem:[%s4363_s14 + $0x38] sm:$0xff]  ;;  %v2100_v60 = vld [vmem:[%s4363_s14 + $0x30] sm:$0xff]  ;;  %v2099_v17 = vld [vmem:[%s4363_s14 + $0x28] sm:$0xff] }
 0x33c   : > { %3484 = vmatpush3.msra.mxu0 %v2108_v9  ;;  %v2389_v61 = vld [vmem:[%s4372_s23 + $0x78] sm:$0xff]  ;;  %v2388_v62 = vld [vmem:[%s4372_s23 + $0x70] sm:$0xff]  ;;  %v2387_v63 = vld [vmem:[%s4372_s23 + $0x68] sm:$0xff] }
 0x33d   : > { %3485 = vmatprep.subr.mxu0 %v2107_v53  ;;  %3561 = vmatprep.subr.mxu1 %v2389_v61  ;;  %v2098_v0 = vld [vmem:[%s4363_s14 + $0x20] sm:$0xff]  ;;  %v2097_v2 = vld [vmem:[%s4363_s14 + $0x18] sm:$0xff]  ;;  %v2096_v13 = vld [vmem:[%s4363_s14 + $0x10] sm:$0xff] }
 0x33e   : > { %3486 = vmatpush3.msra.mxu0 %v2107_v53  ;;  %3562 = vmatpush3.msra.mxu1 %v2389_v61  ;;  %v2386_v1 = vld [vmem:[%s4372_s23 + $0x60] sm:$0xff]  ;;  %v2385_v3 = vld [vmem:[%s4372_s23 + $0x58] sm:$0xff]  ;;  %v2384_v4 = vld [vmem:[%s4372_s23 + $0x50] sm:$0xff] }
 0x33f   : > { %3487 = vmatprep.subr.mxu0 %v2106_v54  ;;  %3563 = vmatprep.subr.mxu1 %v2388_v62  ;;  %v2095_v6 = vld [vmem:[%s4363_s14 + $0x8] sm:$0xff]  ;;  %v2094_v8 = vld [vmem:[%s4363_s14] sm:$0xff]  ;;  %v2381_v25 = vld [vmem:[%s4372_s23 + $0x38] sm:$0xff]  ;;  %s5224_s14 = scalar_lea.vmem %s5188_s5, %s5251_s10 }
 0x340   : > { %3488 = vmatpush3.msra.mxu0 %v2106_v54  ;;  %3564 = vmatpush3.msra.mxu1 %v2388_v62  ;;  %v2383_v7 = vld [vmem:[%s4372_s23 + $0x48] sm:$0xff]  ;;  %v2382_v10 = vld [vmem:[%s4372_s23 + $0x40] sm:$0xff]  ;;  %v2064_v12 = vld [vmem:[#allocation3 + $0xd8] sm:$0xff] }
 0x341   : > { %3489 = vmatprep.subr.mxu0 %v2105_v56  ;;  %3565 = vmatprep.subr.mxu1 %v2387_v63  ;;  %v2063_v11 = vld [vmem:[#allocation3] sm:$0xff]  ;;  %v2380_v14 = vld [vmem:[%s4372_s23 + $0x30] sm:$0xff]  ;;  %v2065_v15 = vld [vmem:[#allocation3 + $0x18] sm:$0xff] }
 0x342   : > { %3490 = vmatpush3.msra.mxu0 %v2105_v56  ;;  %3566 = vmatpush3.msra.mxu1 %v2387_v63  ;;  %v2379_v16 = vld [vmem:[%s4372_s23 + $0x28] sm:$0xff]  ;;  %v2066_v21 = vld [vmem:[#allocation3 + $0x50] sm:$0xff]  ;;  %v2378_v29 = vld [vmem:[%s4372_s23 + $0x20] sm:$0xff] }
 0x343   : > { %3491 = vmatprep.subr.mxu0 %v2104_v5  ;;  %3567 = vmatprep.subr.mxu1 %v2386_v1  ;;  %v2067_v34 = vld [vmem:[#allocation3 + $0x68] sm:$0xff]  ;;  %v2068_v18 = vld [vmem:[#allocation3 + $0x30] sm:$0xff]  ;;  %v2070_v22 = vld [vmem:[#allocation3 + $0x80] sm:$0xff] }
 0x344   : > { %3492 = vmatpush3.msra.mxu0 %v2104_v5  ;;  %3568 = vmatpush3.msra.mxu1 %v2386_v1  ;;  %v2069_v19 = vld [vmem:[#allocation3 + $0x48] sm:$0xff]  ;;  %v2073_v24 = vld [vmem:[#allocation3 + $0xb8] sm:$0xff]  ;;  %v2074_v26 = vld [vmem:[#allocation3 + $0x60] sm:$0xff] }
 0x345   : > { %3493 = vmatprep.subr.mxu0 %v2103_v57  ;;  %3569 = vmatprep.subr.mxu1 %v2385_v3  ;;  %v2071_v20 = vld [vmem:[#allocation3 + $0x88] sm:$0xff]  ;;  %v2075_v27 = vld [vmem:[#allocation3 + $0xf0] sm:$0xff]  ;;  %v2077_v31 = vld [vmem:[#allocation3 + $0x78] sm:$0xff] }
 0x346   : > { %3494 = vmatpush3.msra.mxu0 %v2103_v57  ;;  %3570 = vmatpush3.msra.mxu1 %v2385_v3  ;;  %v2072_v23 = vld [vmem:[#allocation3 + $0xe8] sm:$0xff]  ;;  %v2078_v33 = vld [vmem:[#allocation3 + $0x38] sm:$0xff]  ;;  %v2080_v36 = vld [vmem:[#allocation3 + $0x40] sm:$0xff] }
 0x347   : > { %3495 = vmatprep.subr.mxu0 %v2102_v58  ;;  %3571 = vmatprep.subr.mxu1 %v2384_v4  ;;  %v2076_v30 = vld [vmem:[#allocation3 + $0x8] sm:$0xff]  ;;  %v2079_v35 = vld [vmem:[#allocation3 + $0x58] sm:$0xff]  ;;  %v2082_v38 = vld [vmem:[#allocation3 + $0xe0] sm:$0xff] }
 0x348   : > { %3496 = vmatpush3.msra.mxu0 %v2102_v58  ;;  %3572 = vmatpush3.msra.mxu1 %v2384_v4  ;;  %v2081_v28 = vld [vmem:[#allocation3 + $0xc8] sm:$0xff]  ;;  %v2083_v39 = vld [vmem:[#allocation3 + $0x90] sm:$0xff]  ;;  %v2085_v41 = vld [vmem:[#allocation3 + $0xc0] sm:$0xff] }
 0x349   : > { %3497 = vmatprep.subr.mxu0 %v2101_v59  ;;  %3573 = vmatprep.subr.mxu1 %v2383_v7  ;;  %v2084_v40 = vld [vmem:[#allocation3 + $0x70] sm:$0xff]  ;;  %v2086_v42 = vld [vmem:[#allocation3 + $0xa8] sm:$0xff]  ;;  %v2090_v46 = vld [vmem:[#allocation3 + $0xa0] sm:$0xff] }
 0x34a   : > { %3498 = vmatpush3.msra.mxu0 %v2101_v59  ;;  %3574 = vmatpush3.msra.mxu1 %v2383_v7  ;;  %v2087_v43 = vld [vmem:[#allocation3 + $0xd0] sm:$0xff]  ;;  %v2089_v45 = vld [vmem:[#allocation3 + $0x28] sm:$0xff]  ;;  %v2091_v37 = vld [vmem:[#allocation3 + $0xf8] sm:$0xff] }
 0x34b   : > { %3499 = vmatprep.subr.mxu0 %v2100_v60  ;;  %3575 = vmatprep.subr.mxu1 %v2382_v10  ;;  %v2088_v44 = vld [vmem:[#allocation3 + $0x10] sm:$0xff]  ;;  %v2092_v47 = vld [vmem:[#allocation3 + $0x20] sm:$0xff]  ;;  %v2093_v48 = vld [vmem:[#allocation3 + $0x98] sm:$0xff] }
 0x34c   : > { %3500 = vmatpush3.msra.mxu0 %v2100_v60  ;;  %3576 = vmatpush3.msra.mxu1 %v2382_v10  ;;  %v2377_v49 = vld [vmem:[%s4372_s23 + $0x18] sm:$0xff]  ;;  %v2376_v50 = vld [vmem:[%s4372_s23 + $0x10] sm:$0xff]  ;;  %v2375_v51 = vld [vmem:[%s4372_s23 + $0x8] sm:$0xff] }
 0x34d   : > { %3501 = vmatprep.subr.mxu0 %v2099_v17  ;;  %3577 = vmatprep.subr.mxu1 %v2381_v25  ;;  %v2374_v32 = vld [vmem:[%s4372_s23] sm:$0xff] }
 0x34e   : > { %3502 = vmatpush3.msra.mxu0 %v2099_v17  ;;  %3578 = vmatpush3.msra.mxu1 %v2381_v25  ;;  %v4885_v52 = vld [vmem:[%s5224_s14] ss:$0 sm:$0xff] }
 0x34f   : > { %3503 = vmatprep.subr.mxu0 %v2098_v0  ;;  %3579 = vmatprep.subr.mxu1 %v2380_v14 }
 0x350   : > { %3504 = vmatpush3.msra.mxu0 %v2098_v0  ;;  %3580 = vmatpush3.msra.mxu1 %v2380_v14 }
 0x351   : > { %3505 = vmatprep.subr.mxu0 %v2097_v2  ;;  %3581 = vmatprep.subr.mxu1 %v2379_v16 }
 0x352   : > { %3506 = vmatpush3.msra.mxu0 %v2097_v2  ;;  %3582 = vmatpush3.msra.mxu1 %v2379_v16 }
 0x353   : > { %3507 = vmatprep.subr.mxu0 %v2096_v13  ;;  %3583 = vmatprep.subr.mxu1 %v2378_v29 }
 0x354   : > { %3508 = vmatpush3.msra.mxu0 %v2096_v13  ;;  %3584 = vmatpush3.msra.mxu1 %v2378_v29 }
 0x355   : > { %3509 = vmatprep.subr.mxu0 %v2095_v6  ;;  %3585 = vmatprep.subr.mxu1 %v2377_v49 }
 0x356   : > { %3510 = vmatpush3.msra.mxu0 %v2095_v6  ;;  %3586 = vmatpush3.msra.mxu1 %v2377_v49 }
 0x357   : > { %3511 = vmatprep.subr.mxu0 %v2094_v8  ;;  %3587 = vmatprep.subr.mxu1 %v2376_v50 }
 0x358   : > { %3512 = vmatpush3.msra.mxu0 %v2094_v8  ;;  %3588 = vmatpush3.msra.mxu1 %v2376_v50 }
 0x359   : > { %3514 = vmatmul.mubr.f32.vlgmr.msra.gmra.mxu0 %v2063_v11  ;;  %3589 = vmatprep.subr.mxu1 %v2375_v51 }
 0x35a   : > { %3516 = vmatprep.mubr.f32.mxu0 %v2064_v12  ;;  %3590 = vmatpush3.msra.mxu1 %v2375_v51 }
 0x35b   : > { %3591 = vmatprep.subr.mxu1 %v2374_v32 }
 0x35c   : > { %3592 = vmatpush3.msra.mxu1 %v2374_v32 }
 0x35d   : > { %3517 = vmatmul.mubr.f32.gmra.mxu0 %v2065_v15 }
 0x35e   : > { %3519 = vmatprep.mubr.f32.mxu0 %v2066_v21 }
 0x361   : > { %3520 = vmatmul.mubr.f32.gmra.mxu0 %v2067_v34 }
 0x362   : > { %3522 = vmatprep.mubr.f32.mxu0 %v2068_v18 }
 0x365   : > { %3523 = vmatmul.mubr.f32.gmra.mxu0 %v2069_v19 }
 0x366   : > { %3525 = vmatprep.mubr.f32.mxu0 %v2070_v22 }
 0x369   : > { %3526 = vmatmul.mubr.f32.gmra.mxu0 %v2071_v20 }
 0x36a   : > { %3528 = vmatprep.mubr.f32.mxu0 %v2072_v23 }
 0x36d   : > { %3529 = vmatmul.mubr.f32.gmra.mxu0 %v2073_v24 }
 0x36e   : > { %3531 = vmatprep.mubr.f32.mxu0 %v2074_v26 }
 0x371   : > { %3532 = vmatmul.mubr.f32.gmra.mxu0 %v2075_v27 }
 0x372   : > { %3534 = vmatprep.mubr.f32.mxu0 %v2076_v30 }
 0x375   : > { %3535 = vmatmul.mubr.f32.gmra.mxu0 %v2077_v31 }
 0x376   : > { %3537 = vmatprep.mubr.f32.mxu0 %v2078_v33 }
 0x379   : > { %3538 = vmatmul.mubr.f32.gmra.mxu0 %v2079_v35 }
 0x37a   : > { %3540 = vmatprep.mubr.f32.mxu0 %v2080_v36 }
 0x37d   : > { %3541 = vmatmul.mubr.f32.gmra.mxu0 %v2081_v28 }
 0x37e   : > { %3543 = vmatprep.mubr.f32.mxu0 %v2082_v38 }
 0x381   : > { %3544 = vmatmul.mubr.f32.gmra.mxu0 %v2083_v39 }
 0x382   : > { %3546 = vmatprep.mubr.f32.mxu0 %v2084_v40 }
 0x385   : > { %3547 = vmatmul.mubr.f32.gmra.mxu0 %v2085_v41 }
 0x386   : > { %3549 = vmatprep.mubr.f32.mxu0 %v2086_v42 }
 0x389   : > { %3550 = vmatmul.mubr.f32.gmra.mxu0 %v2087_v43 }
 0x38a   : > { %3552 = vmatprep.mubr.f32.mxu0 %v2088_v44 }
 0x38d   : > { %3553 = vmatmul.mubr.f32.gmra.mxu0 %v2089_v45 }
 0x38e   : > { %3555 = vmatprep.mubr.f32.mxu0 %v2090_v46 }
 0x391   : > { %3556 = vmatmul.mubr.f32.gmra.mxu0 %v2091_v37 }
 0x392   : > { %3558 = vmatprep.mubr.f32.mxu0 %v2092_v47 }
 0x395   : > { %3559 = vmatmul.mubr.f32.gmra.mxu0 %v2093_v48 }
 0x419   : > { %v3515_v9 = vpop.f32.mrf.mxu0 }
 0x41a   : > { %v2189_v53 = vadd.f32 %v3515_v9, %v4885_v52 }
 0x41b   : > { %v2183_v54 = vpop.f32.mrf.mxu0 }
 0x41c   : > { %v2184_v55 = vadd.f32 %v4885_v52, %v2183_v54  ;;  %v2343_v57 = vmax.f32 %v2189_v53, 0.0 }
 0x41d   : > { %v3518_v56 = vpop.f32.mrf.mxu0 }
 0x41e   : > { %v2342_v5 = vmax.f32 %v2184_v55, 0.0  ;;  %v2199_v58 = vadd.f32 %v3518_v56, %v4885_v52 }
 0x41f   : > { %v2193_v59 = vpop.f32.mrf.mxu0 }
 0x420   : > { %v2194_v60 = vadd.f32 %v4885_v52, %v2193_v59  ;;  %3593 = vmatprep.mubr.f32.mxu1 %v2342_v5  ;;  %v2345_v63 = vmax.f32 %v2199_v58, 0.0 }
 0x421   : > { %v3521_v61 = vpop.f32.mrf.mxu0  ;;  %3594 = vmatmul.mubr.f32.vlgmr.msra.gmra.mxu1 %v2343_v57 }
 0x422   : > { %v2344_v62 = vmax.f32 %v2194_v60, 0.0  ;;  %v2209_v17 = vadd.f32 %v3521_v61, %v4885_v52 }
 0x423   : > { %v2203_v0 = vpop.f32.mrf.mxu0 }
 0x424   : > { %v2204_v1 = vadd.f32 %v4885_v52, %v2203_v0  ;;  %3596 = vmatprep.mubr.f32.mxu1 %v2344_v62  ;;  %v2347_v2 = vmax.f32 %v2209_v17, 0.0 }
 0x425   : > { %v3524_v3 = vpop.f32.mrf.mxu0  ;;  %3597 = vmatmul.mubr.f32.gmra.mxu1 %v2345_v63 }
 0x426   : > { %v2346_v13 = vmax.f32 %v2204_v1, 0.0  ;;  %v2219_v4 = vadd.f32 %v3524_v3, %v4885_v52 }
 0x427   : > { %v2213_v6 = vpop.f32.mrf.mxu0 }
 0x428   : > { %v2214_v7 = vadd.f32 %v4885_v52, %v2213_v6  ;;  %3599 = vmatprep.mubr.f32.mxu1 %v2346_v13  ;;  %v2349_v8 = vmax.f32 %v2219_v4, 0.0 }
 0x429   : > { %v3527_v10 = vpop.f32.mrf.mxu0  ;;  %3600 = vmatmul.mubr.f32.gmra.mxu1 %v2347_v2 }
 0x42a   : > { %v2348_v11 = vmax.f32 %v2214_v7, 0.0  ;;  %v2229_v25 = vadd.f32 %v3527_v10, %v4885_v52 }
 0x42b   : > { %v2223_v12 = vpop.f32.mrf.mxu0 }
 0x42c   : > { %v2224_v14 = vadd.f32 %v4885_v52, %v2223_v12  ;;  %3602 = vmatprep.mubr.f32.mxu1 %v2348_v11  ;;  %v2351_v15 = vmax.f32 %v2229_v25, 0.0 }
 0x42d   : > { %v3530_v16 = vpop.f32.mrf.mxu0  ;;  %3603 = vmatmul.mubr.f32.gmra.mxu1 %v2349_v8 }
 0x42e   : > { %v2350_v21 = vmax.f32 %v2224_v14, 0.0  ;;  %v2239_v29 = vadd.f32 %v3530_v16, %v4885_v52 }
 0x42f   : > { %v2233_v34 = vpop.f32.mrf.mxu0 }
 0x430   : > { %v2234_v18 = vadd.f32 %v4885_v52, %v2233_v34  ;;  %3605 = vmatprep.mubr.f32.mxu1 %v2350_v21  ;;  %v2353_v19 = vmax.f32 %v2239_v29, 0.0 }
 0x431   : > { %v3533_v22 = vpop.f32.mrf.mxu0  ;;  %3606 = vmatmul.mubr.f32.gmra.mxu1 %v2351_v15 }
 0x432   : > { %v2352_v20 = vmax.f32 %v2234_v18, 0.0  ;;  %v2249_v23 = vadd.f32 %v3533_v22, %v4885_v52  ;;  %v4924_v18 = vld [vmem:[%s732_s13] ss:$0 sm:$0xff] }
 0x433   : > { %v2243_v24 = vpop.f32.mrf.mxu0 }
 0x434   : > { %v2244_v26 = vadd.f32 %v4885_v52, %v2243_v24  ;;  %3608 = vmatprep.mubr.f32.mxu1 %v2352_v20  ;;  %v2355_v27 = vmax.f32 %v2249_v23, 0.0 }
 0x435   : > { %v3536_v30 = vpop.f32.mrf.mxu0  ;;  %3609 = vmatmul.mubr.f32.gmra.mxu1 %v2353_v19 }
 0x436   : > { %v2354_v31 = vmax.f32 %v2244_v26, 0.0  ;;  %v2259_v33 = vadd.f32 %v3536_v30, %v4885_v52 }
 0x437   : > { %v2253_v35 = vpop.f32.mrf.mxu0 }
 0x438   : > { %v2254_v36 = vadd.f32 %v4885_v52, %v2253_v35  ;;  %3611 = vmatprep.mubr.f32.mxu1 %v2354_v31  ;;  %v2357_v28 = vmax.f32 %v2259_v33, 0.0 }
 0x439   : > { %v3539_v38 = vpop.f32.mrf.mxu0  ;;  %3612 = vmatmul.mubr.f32.gmra.mxu1 %v2355_v27 }
 0x43a   : > { %v2356_v39 = vmax.f32 %v2254_v36, 0.0  ;;  %v2269_v40 = vadd.f32 %v3539_v38, %v4885_v52 }
 0x43b   : > { %v2263_v41 = vpop.f32.mrf.mxu0 }
 0x43c   : > { %v2264_v42 = vadd.f32 %v4885_v52, %v2263_v41  ;;  %3614 = vmatprep.mubr.f32.mxu1 %v2356_v39  ;;  %v2359_v43 = vmax.f32 %v2269_v40, 0.0 }
 0x43d   : > { %v3542_v44 = vpop.f32.mrf.mxu0  ;;  %3615 = vmatmul.mubr.f32.gmra.mxu1 %v2357_v28 }
 0x43e   : > { %v2358_v45 = vmax.f32 %v2264_v42, 0.0  ;;  %v2279_v46 = vadd.f32 %v3542_v44, %v4885_v52 }
 0x43f   : > { %v2273_v37 = vpop.f32.mrf.mxu0 }
 0x440   : > { %v2274_v47 = vadd.f32 %v4885_v52, %v2273_v37  ;;  %3617 = vmatprep.mubr.f32.mxu1 %v2358_v45  ;;  %v2361_v48 = vmax.f32 %v2279_v46, 0.0 }
 0x441   : > { %v3545_v49 = vpop.f32.mrf.mxu0  ;;  %3618 = vmatmul.mubr.f32.gmra.mxu1 %v2359_v43 }
 0x442   : > { %v2360_v50 = vmax.f32 %v2274_v47, 0.0  ;;  %v2289_v51 = vadd.f32 %v3545_v49, %v4885_v52 }
 0x443   : > { %v2283_v32 = vpop.f32.mrf.mxu0 }
 0x444   : > { %v2284_v9 = vadd.f32 %v4885_v52, %v2283_v32  ;;  %3620 = vmatprep.mubr.f32.mxu1 %v2360_v50  ;;  %v2363_v53 = vmax.f32 %v2289_v51, 0.0 }
 0x445   : > { %v3548_v54 = vpop.f32.mrf.mxu0  ;;  %3621 = vmatmul.mubr.f32.gmra.mxu1 %v2361_v48 }
 0x446   : > { %v2362_v55 = vmax.f32 %v2284_v9, 0.0  ;;  %v2299_v56 = vadd.f32 %v3548_v54, %v4885_v52 }
 0x447   : > { %v2293_v5 = vpop.f32.mrf.mxu0 }
 0x448   : > { %v2294_v57 = vadd.f32 %v4885_v52, %v2293_v5  ;;  %3623 = vmatprep.mubr.f32.mxu1 %v2362_v55  ;;  %v2365_v58 = vmax.f32 %v2299_v56, 0.0 }
 0x449   : > { %v3551_v59 = vpop.f32.mrf.mxu0  ;;  %3624 = vmatmul.mubr.f32.gmra.mxu1 %v2363_v53 }
 0x44a   : > { %v2364_v60 = vmax.f32 %v2294_v57, 0.0  ;;  %v2309_v61 = vadd.f32 %v3551_v59, %v4885_v52 }
 0x44b   : > { %v2303_v62 = vpop.f32.mrf.mxu0 }
 0x44c   : > { %v2304_v17 = vadd.f32 %v4885_v52, %v2303_v62  ;;  %3626 = vmatprep.mubr.f32.mxu1 %v2364_v60  ;;  %v2367_v63 = vmax.f32 %v2309_v61, 0.0 }
 0x44d   : > { %v3554_v0 = vpop.f32.mrf.mxu0  ;;  %3627 = vmatmul.mubr.f32.gmra.mxu1 %v2365_v58 }
 0x44e   : > { %v2366_v1 = vmax.f32 %v2304_v17, 0.0  ;;  %v2319_v2 = vadd.f32 %v3554_v0, %v4885_v52 }
 0x44f   : > { %v2313_v3 = vpop.f32.mrf.mxu0 }
 0x450   : > { %v2314_v13 = vadd.f32 %v4885_v52, %v2313_v3  ;;  %3629 = vmatprep.mubr.f32.mxu1 %v2366_v1  ;;  %v2369_v4 = vmax.f32 %v2319_v2, 0.0 }
 0x451   : > { %v3557_v6 = vpop.f32.mrf.mxu0  ;;  %3630 = vmatmul.mubr.f32.gmra.mxu1 %v2367_v63 }
 0x452   : > { %v2368_v7 = vmax.f32 %v2314_v13, 0.0  ;;  %v2329_v8 = vadd.f32 %v3557_v6, %v4885_v52 }
 0x453   : > { %v2323_v10 = vpop.f32.mrf.mxu0 }
 0x454   : > { %v2324_v11 = vadd.f32 %v4885_v52, %v2323_v10  ;;  %3632 = vmatprep.mubr.f32.mxu1 %v2368_v7  ;;  %v2371_v25 = vmax.f32 %v2329_v8, 0.0 }
 0x455   : > { %v3560_v12 = vpop.f32.mrf.mxu0  ;;  %3633 = vmatmul.mubr.f32.gmra.mxu1 %v2369_v4 }
 0x456   : > { %v2370_v14 = vmax.f32 %v2324_v11, 0.0  ;;  %v2339_v15 = vadd.f32 %v3560_v12, %v4885_v52 }
 0x457   : > { %v2333_v16 = vpop.f32.mrf.mxu0 }
 0x458   : > { %v2334_v21 = vadd.f32 %v4885_v52, %v2333_v16  ;;  %3635 = vmatprep.mubr.f32.mxu1 %v2370_v14  ;;  %v2373_v29 = vmax.f32 %v2339_v15, 0.0 }
 0x459   : > { %3636 = vmatmul.mubr.f32.gmra.mxu1 %v2371_v25 }
 0x45a   : > { %v2372_v34 = vmax.f32 %v2334_v21, 0.0 }
 0x45c   : > { %3638 = vmatprep.mubr.f32.mxu1 %v2372_v34 }
 0x45d   : > { %3639 = vmatmul.mubr.f32.gmra.mxu1 %v2373_v29 }
 0x4e1   : > { %v3595_v19 = vpop.f32.mrf.mxu1 }
 0x4e2   : > { %v4927_v22 = vadd.f32 %v3595_v19, %v4924_v18 }
 0x4e3   : > { %v2463_v20 = vpop.f32.mrf.mxu1 }
 0x4e4   : > { %v4930_v23 = vadd.f32 %v4924_v18, %v2463_v20  ;;  %v2623_v52 = vmul.f32 %v4927_v22, %v4927_v22 }
 0x4e5   : > { %v3598_v24 = vpop.f32.mrf.mxu1 }
 0x4e6   : > { %v4935_v26 = vadd.f32 %v3598_v24, %v4924_v18  ;;  %2656 = vadd.xlane.f32.xlu0 %v2623_v52  ;;  %v2622_v33 = vmul.f32 %v4930_v23, %v4930_v23 }
 0x4e7   : > { %v2473_v27 = vpop.f32.mrf.mxu1 }
 0x4e8   : > { %v4938_v30 = vadd.f32 %v4924_v18, %v2473_v27  ;;  %v2625_v31 = vmul.f32 %v4935_v26, %v4935_v26 }
 0x4e9   : > { %v3601_v35 = vpop.f32.mrf.mxu1 }
 0x4ea   : > { %2660 = vadd.xlane.f32.xlu1 %v2625_v31  ;;  %2654 = vadd.xlane.f32.xlu0 %v2622_v33  ;;  %v4945_v28 = vadd.f32 %v3601_v35, %v4924_v18  ;;  %v2624_v39 = vmul.f32 %v4938_v30, %v4938_v30 }
 0x4eb   : > { %v2483_v36 = vpop.f32.mrf.mxu1 }
 0x4ec   : > { %v4948_v38 = vadd.f32 %v4924_v18, %v2483_v36  ;;  %v2627_v45 = vmul.f32 %v4945_v28, %v4945_v28 }
 0x4ed   : > { %v3604_v40 = vpop.f32.mrf.mxu1 }
 0x4ee   : > { %2658 = vadd.xlane.f32.xlu1 %v2624_v39  ;;  %v2626_v41 = vmul.f32 %v4948_v38, %v4948_v38  ;;  %v4955_v43 = vadd.f32 %v3604_v40, %v4924_v18 }
 0x4ef   : > { %v2493_v42 = vpop.f32.mrf.mxu1 }
 0x4f0   : > { %v4958_v44 = vadd.f32 %v4924_v18, %v2493_v42  ;;  %2662 = vadd.xlane.f32.xlu0 %v2626_v41  ;;  %v2629_v50 = vmul.f32 %v4955_v43, %v4955_v43 }
 0x4f1   : > { %v3607_v46 = vpop.f32.mrf.mxu1 }
 0x4f2   : > { %2664 = vadd.xlane.f32.xlu1 %v2627_v45  ;;  %v2628_v37 = vmul.f32 %v4958_v44, %v4958_v44  ;;  %v4965_v48 = vadd.f32 %v3607_v46, %v4924_v18 }
 0x4f3   : > { %v2503_v47 = vpop.f32.mrf.mxu1 }
 0x4f4   : > { %v4968_v49 = vadd.f32 %v4924_v18, %v2503_v47  ;;  %2666 = vadd.xlane.f32.xlu0 %v2628_v37  ;;  %v2631_v55 = vmul.f32 %v4965_v48, %v4965_v48 }
 0x4f5   : > { %v3610_v51 = vpop.f32.mrf.mxu1 }
 0x4f6   : > { %2668 = vadd.xlane.f32.xlu1 %v2629_v50  ;;  %v2630_v32 = vmul.f32 %v4968_v49, %v4968_v49  ;;  %v4975_v53 = vadd.f32 %v3610_v51, %v4924_v18 }
 0x4f7   : > { %v2513_v9 = vpop.f32.mrf.mxu1 }
 0x4f8   : > { %v4978_v54 = vadd.f32 %v4924_v18, %v2513_v9  ;;  %2670 = vadd.xlane.f32.xlu0 %v2630_v32  ;;  %v2633_v60 = vmul.f32 %v4975_v53, %v4975_v53 }
 0x4f9   : > { %v3613_v56 = vpop.f32.mrf.mxu1 }
 0x4fa   : > { %2672 = vadd.xlane.f32.xlu1 %v2631_v55  ;;  %v2632_v5 = vmul.f32 %v4978_v54, %v4978_v54  ;;  %v4985_v58 = vadd.f32 %v3613_v56, %v4924_v18 }
 0x4fb   : > { %v2523_v57 = vpop.f32.mrf.mxu1 }
 0x4fc   : > { %v4988_v59 = vadd.f32 %v4924_v18, %v2523_v57  ;;  %2674 = vadd.xlane.f32.xlu0 %v2632_v5  ;;  %v2635_v1 = vmul.f32 %v4985_v58, %v4985_v58 }
 0x4fd   : > { %v3616_v61 = vpop.f32.mrf.mxu1 }
 0x4fe   : > { %2676 = vadd.xlane.f32.xlu1 %v2633_v60  ;;  %v2634_v62 = vmul.f32 %v4988_v59, %v4988_v59  ;;  %v4995_v63 = vadd.f32 %v3616_v61, %v4924_v18 }
 0x4ff   : > { %v2533_v17 = vpop.f32.mrf.mxu1 }
 0x500   : > { %v4998_v0 = vadd.f32 %v4924_v18, %v2533_v17  ;;  %2678 = vadd.xlane.f32.xlu0 %v2634_v62  ;;  %v2637_v7 = vmul.f32 %v4995_v63, %v4995_v63 }
 0x501   : > { %v3619_v2 = vpop.f32.mrf.mxu1 }
 0x502   : > { %2680 = vadd.xlane.f32.xlu1 %v2635_v1  ;;  %v2636_v3 = vmul.f32 %v4998_v0, %v4998_v0  ;;  %v5005_v4 = vadd.f32 %v3619_v2, %v4924_v18 }
 0x503   : > { %v2543_v13 = vpop.f32.mrf.mxu1 }
 0x504   : > { %v5008_v6 = vadd.f32 %v4924_v18, %v2543_v13  ;;  %2682 = vadd.xlane.f32.xlu0 %v2636_v3  ;;  %v2639_v14 = vmul.f32 %v5005_v4, %v5005_v4 }
 0x505   : > { %v3622_v8 = vpop.f32.mrf.mxu1 }
 0x506   : > { %2684 = vadd.xlane.f32.xlu1 %v2637_v7  ;;  %v2638_v10 = vmul.f32 %v5008_v6, %v5008_v6  ;;  %v5015_v25 = vadd.f32 %v3622_v8, %v4924_v18 }
 0x507   : > { %v2553_v11 = vpop.f32.mrf.mxu1 }
 0x508   : > { %v5018_v12 = vadd.f32 %v4924_v18, %v2553_v11  ;;  %2686 = vadd.xlane.f32.xlu0 %v2638_v10  ;;  %v2641_v19 = vmul.f32 %v5015_v25, %v5015_v25 }
 0x509   : > { %v3625_v15 = vpop.f32.mrf.mxu1 }
 0x50a   : > { %2688 = vadd.xlane.f32.xlu1 %v2639_v14  ;;  %v2640_v16 = vmul.f32 %v5018_v12, %v5018_v12  ;;  %v5025_v29 = vadd.f32 %v3625_v15, %v4924_v18 }
 0x50b   : > { %v2563_v21 = vpop.f32.mrf.mxu1 }
 0x50c   : > { %v5028_v34 = vadd.f32 %v4924_v18, %v2563_v21  ;;  %2690 = vadd.xlane.f32.xlu0 %v2640_v16  ;;  %v2643_v33 = vmul.f32 %v5025_v29, %v5025_v29 }
 0x50d   : > { %v3628_v20 = vpop.f32.mrf.mxu1 }
 0x50e   : > { %2692 = vadd.xlane.f32.xlu1 %v2641_v19  ;;  %v2642_v52 = vmul.f32 %v5028_v34, %v5028_v34  ;;  %v5035_v27 = vadd.f32 %v3628_v20, %v4924_v18 }
 0x50f   : > { %v2573_v24 = vpop.f32.mrf.mxu1 }
 0x510   : > { %v5038_v31 = vadd.f32 %v4924_v18, %v2573_v24  ;;  %2694 = vadd.xlane.f32.xlu0 %v2642_v52  ;;  %v2645_v42 = vmul.f32 %v5035_v27, %v5035_v27 }
 0x511   : > { %v3631_v35 = vpop.f32.mrf.mxu1 }
 0x512   : > { %2696 = vadd.xlane.f32.xlu1 %v2643_v33  ;;  %v2644_v36 = vmul.f32 %v5038_v31, %v5038_v31  ;;  %v5045_v40 = vadd.f32 %v3631_v35, %v4924_v18 }
 0x513   : > { %v2583_v39 = vpop.f32.mrf.mxu1 }
 0x514   : > { %v5048_v41 = vadd.f32 %v4924_v18, %v2583_v39  ;;  %2698 = vadd.xlane.f32.xlu0 %v2644_v36  ;;  %v2647_v51 = vmul.f32 %v5045_v40, %v5045_v40 }
 0x515   : > { %v3634_v45 = vpop.f32.mrf.mxu1 }
 0x516   : > { %2700 = vadd.xlane.f32.xlu1 %v2645_v42  ;;  %v2646_v46 = vmul.f32 %v5048_v41, %v5048_v41  ;;  %v5055_v47 = vadd.f32 %v3634_v45, %v4924_v18 }
 0x517   : > { %v2593_v37 = vpop.f32.mrf.mxu1 }
 0x518   : > { %v5058_v50 = vadd.f32 %v4924_v18, %v2593_v37  ;;  %2702 = vadd.xlane.f32.xlu0 %v2646_v46  ;;  %v2649_v57 = vmul.f32 %v5055_v47, %v5055_v47 }
 0x519   : > { %v3637_v32 = vpop.f32.mrf.mxu1 }
 0x51a   : > { %2704 = vadd.xlane.f32.xlu1 %v2647_v51  ;;  %v2648_v9 = vmul.f32 %v5058_v50, %v5058_v50  ;;  %v5065_v56 = vadd.f32 %v3637_v32, %v4924_v18 }
 0x51b   : > { %v2603_v55 = vpop.f32.mrf.mxu1 }
 0x51c   : > { %v5068_v5 = vadd.f32 %v4924_v18, %v2603_v55  ;;  %2706 = vadd.xlane.f32.xlu0 %v2648_v9  ;;  %v2651_v2 = vmul.f32 %v5065_v56, %v5065_v56 }
 0x51d   : > { %v3640_v60 = vpop.f32.mrf.mxu1 }
 0x51e   : > { %2708 = vadd.xlane.f32.xlu1 %v2649_v57  ;;  %v2650_v61 = vmul.f32 %v5068_v5, %v5068_v5  ;;  %v5075_v17 = vadd.f32 %v3640_v60, %v4924_v18 }
 0x51f   : > { %v2613_v62 = vpop.f32.mrf.mxu1 }
 0x520   : > { %v5078_v1 = vadd.f32 %v4924_v18, %v2613_v62  ;;  %2710 = vadd.xlane.f32.xlu0 %v2650_v61  ;;  %v2653_v13 = vmul.f32 %v5075_v17, %v5075_v17 }
 0x522   : > { %2712 = vadd.xlane.f32.xlu1 %v2651_v2  ;;  %v2652_v3 = vmul.f32 %v5078_v1, %v5078_v1 }
 0x524   : > { %2714 = vadd.xlane.f32.xlu0 %v2652_v3 }
 0x526   : > { %2716 = vadd.xlane.f32.xlu1 %v2653_v13 }
 0x56f   : > { %v2657_v7 = vpop.xlane.xlu0 %2656 }
 0x570   : > { %v2719_v8 = vmax.f32 %v2657_v7, 1e-24 }
 0x572   : > { %3832 = vrsqrt.f32 %v2719_v8 }
 0x573   : > { %v2661_v10 = vpop.xlane.xlu1 %2660  ;;  %v2655_v11 = vpop.xlane.xlu0 %2654 }
 0x574   : > { %v2721_v18 = vmax.f32 %v2661_v10, 1e-24  ;;  %v2718_v14 = vmax.f32 %v2655_v11, 1e-24 }
 0x576   : > { %3834 = vrsqrt.f32 %v2721_v18 }
 0x577   : > { %3836 = vrsqrt.f32 %v2718_v14  ;;  %v2659_v15 = vpop.xlane.xlu1 %2658 }
 0x578   : > { %v2720_v16 = vmax.f32 %v2659_v15, 1e-24 }
 0x579   : > { %v2663_v21 = vpop.xlane.xlu0 %2662 }
 0x57a   : > { %3838 = vrsqrt.f32 %v2720_v16  ;;  %v2722_v19 = vmax.f32 %v2663_v21, 1e-24 }
 0x57b   : > { %v2665_v20 = vpop.xlane.xlu1 %2664 }
 0x57c   : > { %3840 = vrsqrt.f32 %v2722_v19  ;;  %v2723_v52 = vmax.f32 %v2665_v20, 1e-24 }
 0x57d   : > { %v2667_v24 = vpop.xlane.xlu0 %2666 }
 0x57e   : > { %3842 = vrsqrt.f32 %v2723_v52  ;;  %v2724_v33 = vmax.f32 %v2667_v24, 1e-24 }
 0x57f   : > { %v3833_v35 = vpop.eup %3832  ;;  %v2669_v36 = vpop.xlane.xlu1 %2668 }
 0x580   : > { %v2783_v39 = vmul.f32 %v3833_v35, %v4927_v22  ;;  %3844 = vrsqrt.f32 %v2724_v33  ;;  %v2725_v42 = vmax.f32 %v2669_v36, 1e-24 }
 0x581   : > { %v2671_v45 = vpop.xlane.xlu0 %2670 }
 0x582   : > { %2815 = vst [vmem:[%s4389_s1 + $0x8] sm:$0xff] %v2783_v39  ;;  %3846 = vrsqrt.f32 %v2725_v42  ;;  %v2726_v46 = vmax.f32 %v2671_v45, 1e-24 }
 0x583   : > { %v3835_v37 = vpop.eup %3834  ;;  %v2673_v51 = vpop.xlane.xlu1 %2672 }
 0x584   : > { %v3837_v32 = vpop.eup %3836  ;;  %v2785_v9 = vmul.f32 %v3835_v37, %v4935_v26  ;;  %3848 = vrsqrt.f32 %v2726_v46  ;;  %v2727_v55 = vmax.f32 %v2673_v51, 1e-24 }
 0x585   : > { %v2782_v57 = vmul.f32 %v3837_v32, %v4930_v23  ;;  %v2675_v60 = vpop.xlane.xlu0 %2674 }
 0x586   : > { %2817 = vst [vmem:[%s4389_s1 + $0x18] sm:$0xff] %v2785_v9  ;;  %3850 = vrsqrt.f32 %v2727_v55  ;;  %v2728_v22 = vmax.f32 %v2675_v60, 1e-24 }
 0x587   : > { %v3839_v61 = vpop.eup %3838  ;;  %2814 = vst [vmem:[%s4389_s1] sm:$0xff] %v2782_v57  ;;  %v2677_v62 = vpop.xlane.xlu1 %2676 }
 0x588   : > { %v2784_v2 = vmul.f32 %v3839_v61, %v4938_v30  ;;  %3852 = vrsqrt.f32 %v2728_v22  ;;  %v2729_v3 = vmax.f32 %v2677_v62, 1e-24 }
 0x589   : > { %v3841_v13 = vpop.eup %3840  ;;  %v2679_v26 = vpop.xlane.xlu0 %2678 }
 0x58a   : > { %2816 = vst [vmem:[%s4389_s1 + $0x10] sm:$0xff] %v2784_v2  ;;  %v2786_v7 = vmul.f32 %v3841_v13, %v4948_v38  ;;  %3854 = vrsqrt.f32 %v2729_v3  ;;  %v2730_v23 = vmax.f32 %v2679_v26, 1e-24 }
 0x58b   : > { %v3843_v8 = vpop.eup %3842  ;;  %v2681_v10 = vpop.xlane.xlu1 %2680 }
 0x58c   : > { %2818 = vst [vmem:[%s4389_s1 + $0x20] sm:$0xff] %v2786_v7  ;;  %v2787_v11 = vmul.f32 %v3843_v8, %v4945_v28  ;;  %3856 = vrsqrt.f32 %v2730_v23  ;;  %v2731_v18 = vmax.f32 %v2681_v10, 1e-24 }
 0x58d   : > { %v3845_v30 = vpop.eup %3844  ;;  %v2683_v14 = vpop.xlane.xlu0 %2682 }
 0x58e   : > { %2819 = vst [vmem:[%s4389_s1 + $0x28] sm:$0xff] %v2787_v11  ;;  %v2788_v15 = vmul.f32 %v3845_v30, %v4958_v44  ;;  %3858 = vrsqrt.f32 %v2731_v18  ;;  %v2732_v16 = vmax.f32 %v2683_v14, 1e-24 }
 0x58f   : > { %v3847_v38 = vpop.eup %3846  ;;  %v2685_v21 = vpop.xlane.xlu1 %2684 }
 0x590   : > { %2820 = vst [vmem:[%s4389_s1 + $0x30] sm:$0xff] %v2788_v15  ;;  %v2789_v19 = vmul.f32 %v3847_v38, %v4955_v43  ;;  %3860 = vrsqrt.f32 %v2732_v16  ;;  %v2733_v20 = vmax.f32 %v2685_v21, 1e-24 }
 0x591   : > { %v3849_v28 = vpop.eup %3848  ;;  %v2687_v52 = vpop.xlane.xlu0 %2686 }
 0x592   : > { %2821 = vst [vmem:[%s4389_s1 + $0x38] sm:$0xff] %v2789_v19  ;;  %v2790_v24 = vmul.f32 %v3849_v28, %v4968_v49  ;;  %3862 = vrsqrt.f32 %v2733_v20  ;;  %v2734_v33 = vmax.f32 %v2687_v52, 1e-24 }
 0x593   : > { %v3851_v44 = vpop.eup %3850  ;;  %v2689_v35 = vpop.xlane.xlu1 %2688 }
 0x594   : > { %2822 = vst [vmem:[%s4389_s1 + $0x40] sm:$0xff] %v2790_v24  ;;  %v2791_v36 = vmul.f32 %v3851_v44, %v4965_v48  ;;  %3864 = vrsqrt.f32 %v2734_v33  ;;  %v2735_v39 = vmax.f32 %v2689_v35, 1e-24 }
 0x595   : > { %v3853_v43 = vpop.eup %3852  ;;  %v2691_v42 = vpop.xlane.xlu0 %2690 }
 0x596   : > { %2823 = vst [vmem:[%s4389_s1 + $0x48] sm:$0xff] %v2791_v36  ;;  %v2792_v45 = vmul.f32 %v3853_v43, %v4978_v54  ;;  %3866 = vrsqrt.f32 %v2735_v39  ;;  %v2736_v46 = vmax.f32 %v2691_v42, 1e-24 }
 0x597   : > { %v3855_v49 = vpop.eup %3854  ;;  %v2693_v37 = vpop.xlane.xlu1 %2692 }
 0x598   : > { %2824 = vst [vmem:[%s4389_s1 + $0x50] sm:$0xff] %v2792_v45  ;;  %v2793_v51 = vmul.f32 %v3855_v49, %v4975_v53  ;;  %3868 = vrsqrt.f32 %v2736_v46  ;;  %v2737_v32 = vmax.f32 %v2693_v37, 1e-24 }
 0x599   : > { %v3857_v48 = vpop.eup %3856  ;;  %v2695_v9 = vpop.xlane.xlu0 %2694 }
 0x59a   : > { %2825 = vst [vmem:[%s4389_s1 + $0x58] sm:$0xff] %v2793_v51  ;;  %v2794_v55 = vmul.f32 %v3857_v48, %v4988_v59  ;;  %3870 = vrsqrt.f32 %v2737_v32  ;;  %v2738_v57 = vmax.f32 %v2695_v9, 1e-24 }
 0x59b   : > { %v3859_v54 = vpop.eup %3858  ;;  %v2697_v60 = vpop.xlane.xlu1 %2696 }
 0x59c   : > { %2826 = vst [vmem:[%s4389_s1 + $0x60] sm:$0xff] %v2794_v55  ;;  %v2795_v22 = vmul.f32 %v3859_v54, %v4985_v58  ;;  %3872 = vrsqrt.f32 %v2738_v57  ;;  %v2739_v61 = vmax.f32 %v2697_v60, 1e-24 }
 0x59d   : > { %v3861_v53 = vpop.eup %3860  ;;  %v2699_v62 = vpop.xlane.xlu0 %2698 }
 0x59e   : > { %2827 = vst [vmem:[%s4389_s1 + $0x68] sm:$0xff] %v2795_v22  ;;  %v2796_v2 = vmul.f32 %v3861_v53, %v4998_v0  ;;  %3874 = vrsqrt.f32 %v2739_v61  ;;  %v2740_v3 = vmax.f32 %v2699_v62, 1e-24 }
 0x59f   : > { %v3863_v59 = vpop.eup %3862  ;;  %v2701_v13 = vpop.xlane.xlu1 %2700 }
 0x5a0   : > { %2828 = vst [vmem:[%s4389_s1 + $0x70] sm:$0xff] %v2796_v2  ;;  %v2797_v26 = vmul.f32 %v3863_v59, %v4995_v63  ;;  %3876 = vrsqrt.f32 %v2740_v3  ;;  %v2741_v7 = vmax.f32 %v2701_v13, 1e-24 }
 0x5a1   : > { %v3865_v58 = vpop.eup %3864  ;;  %v2703_v23 = vpop.xlane.xlu0 %2702 }
 0x5a2   : > { %2829 = vst [vmem:[%s4389_s1 + $0x78] sm:$0xff] %v2797_v26  ;;  %v2798_v8 = vmul.f32 %v3865_v58, %v5008_v6  ;;  %3878 = vrsqrt.f32 %v2741_v7  ;;  %v2742_v10 = vmax.f32 %v2703_v23, 1e-24 }
 0x5a3   : > { %v3867_v0 = vpop.eup %3866  ;;  %v2705_v11 = vpop.xlane.xlu1 %2704 }
 0x5a4   : > { %2830 = vst [vmem:[%s4389_s1 + $0x80] sm:$0xff] %v2798_v8  ;;  %v2799_v18 = vmul.f32 %v3867_v0, %v5005_v4  ;;  %3880 = vrsqrt.f32 %v2742_v10  ;;  %v2743_v30 = vmax.f32 %v2705_v11, 1e-24 }
 0x5a5   : > { %v3869_v63 = vpop.eup %3868  ;;  %v2707_v14 = vpop.xlane.xlu0 %2706 }
 0x5a6   : > { %2831 = vst [vmem:[%s4389_s1 + $0x88] sm:$0xff] %v2799_v18  ;;  %v2800_v15 = vmul.f32 %v3869_v63, %v5018_v12  ;;  %3882 = vrsqrt.f32 %v2743_v30  ;;  %v2744_v16 = vmax.f32 %v2707_v14, 1e-24 }
 0x5a7   : > { %v3871_v6 = vpop.eup %3870  ;;  %v2709_v38 = vpop.xlane.xlu1 %2708 }
 0x5a8   : > { %2832 = vst [vmem:[%s4389_s1 + $0x90] sm:$0xff] %v2800_v15  ;;  %v2801_v21 = vmul.f32 %v3871_v6, %v5015_v25  ;;  %3884 = vrsqrt.f32 %v2744_v16  ;;  %v2745_v19 = vmax.f32 %v2709_v38, 1e-24 }
 0x5a9   : > { %v3873_v4 = vpop.eup %3872  ;;  %v2711_v20 = vpop.xlane.xlu0 %2710 }
 0x5aa   : > { %2833 = vst [vmem:[%s4389_s1 + $0x98] sm:$0xff] %v2801_v21  ;;  %v2802_v28 = vmul.f32 %v3873_v4, %v5028_v34  ;;  %3886 = vrsqrt.f32 %v2745_v19  ;;  %v2746_v52 = vmax.f32 %v2711_v20, 1e-24 }
 0x5ab   : > { %v3875_v12 = vpop.eup %3874  ;;  %v2713_v24 = vpop.xlane.xlu1 %2712 }
 0x5ac   : > { %2834 = vst [vmem:[%s4389_s1 + $0xa0] sm:$0xff] %v2802_v28  ;;  %v2803_v33 = vmul.f32 %v3875_v12, %v5025_v29  ;;  %3888 = vrsqrt.f32 %v2746_v52  ;;  %v2747_v44 = vmax.f32 %v2713_v24, 1e-24 }
 0x5ad   : > { %v3877_v25 = vpop.eup %3876  ;;  %v2715_v35 = vpop.xlane.xlu0 %2714 }
 0x5ae   : > { %2835 = vst [vmem:[%s4389_s1 + $0xa8] sm:$0xff] %v2803_v33  ;;  %v2804_v36 = vmul.f32 %v3877_v25, %v5038_v31  ;;  %3890 = vrsqrt.f32 %v2747_v44  ;;  %v2748_v34 = vmax.f32 %v2715_v35, 1e-24 }
 0x5af   : > { %v3879_v39 = vpop.eup %3878  ;;  %v2717_v43 = vpop.xlane.xlu1 %2716 }
 0x5b0   : > { %2836 = vst [vmem:[%s4389_s1 + $0xb0] sm:$0xff] %v2804_v36  ;;  %v2805_v42 = vmul.f32 %v3879_v39, %v5035_v27  ;;  %3892 = vrsqrt.f32 %v2748_v34  ;;  %v2749_v29 = vmax.f32 %v2717_v43, 1e-24 }
 0x5b1   : > { %v3881_v45 = vpop.eup %3880 }
 0x5b2   : > { %2837 = vst [vmem:[%s4389_s1 + $0xb8] sm:$0xff] %v2805_v42  ;;  %v2806_v46 = vmul.f32 %v3881_v45, %v5048_v41  ;;  %3894 = vrsqrt.f32 %v2749_v29 }
 0x5b3   : > { %v3883_v49 = vpop.eup %3882 }
 0x5b4   : > { %2838 = vst [vmem:[%s4389_s1 + $0xc0] sm:$0xff] %v2806_v46  ;;  %v2807_v31 = vmul.f32 %v3883_v49, %v5045_v40 }
 0x5b5   : > { %v3885_v37 = vpop.eup %3884 }
 0x5b6   : > { %2839 = vst [vmem:[%s4389_s1 + $0xc8] sm:$0xff] %v2807_v31  ;;  %v2808_v51 = vmul.f32 %v3885_v37, %v5058_v50 }
 0x5b7   : > { %v3887_v27 = vpop.eup %3886 }
 0x5b8   : > { %2840 = vst [vmem:[%s4389_s1 + $0xd0] sm:$0xff] %v2808_v51  ;;  %v2809_v32 = vmul.f32 %v3887_v27, %v5055_v47 }
 0x5b9   : > { %v3889_v48 = vpop.eup %3888 }
 0x5ba   : > { %2841 = vst [vmem:[%s4389_s1 + $0xd8] sm:$0xff] %v2809_v32  ;;  %v2810_v41 = vmul.f32 %v3889_v48, %v5068_v5 }
 0x5bb   : > { %v3891_v9 = vpop.eup %3890 }
 0x5bc   : > { %2842 = vst [vmem:[%s4389_s1 + $0xe0] sm:$0xff] %v2810_v41  ;;  %v2811_v55 = vmul.f32 %v3891_v9, %v5065_v56 }
 0x5bd   : > { %v3893_v57 = vpop.eup %3892 }
 0x5be   : > { %2843 = vst [vmem:[%s4389_s1 + $0xe8] sm:$0xff] %v2811_v55  ;;  %v2812_v40 = vmul.f32 %v3893_v57, %v5078_v1 }
 0x5bf   : > { %v3895_v54 = vpop.eup %3894 }
 0x5c0   : > { %2844 = vst [vmem:[%s4389_s1 + $0xf0] sm:$0xff] %v2812_v40  ;;  %v2813_v50 = vmul.f32 %v3895_v54, %v5075_v17 }
 0x5c2   : > { %2845 = vst [vmem:[%s4389_s1 + $0xf8] sm:$0xff] %v2813_v50 }
 0x5c3 PF: > { %s5225_s10 = sld [smem:[#allocation10_spill]] }
 0x5c4   : > { %s5226_s27 = sld [smem:[#allocation5_spill]] }
 0x5c5   : > { %s5227_s28 = sld [smem:[#allocation15_spill]] }
 0x5c6   : > { %s5228_s29 = sld [smem:[#allocation6_spill]] }
 0x5c7   : > { %s5229_s30 = sld [smem:[#allocation7_spill]] }
 0x5c8   : > { %s5230_s9 = sld [smem:[#allocation8_spill]] }
 0x5c9   : > { %s18_s15 = sadd.s32 1, %s5225_s10   ;;  %s5231_s10 = sld [smem:[#allocation9_spill]] }
 0x5ca   : > { %p15_p13 = scmp.ge.s32.totalorder %s18_s15, 26   ;;  %s5232_s11 = sld [smem:[#allocation13_spill]] }
 0x5cb   : > { %s5233_s12 = sld [smem:[#allocation11_spill]] }
 0x5cc   : > { %s5234_s13 = sld [smem:[#allocation12_spill]]  ;;  %17 = sbr.rel (!%p15_p13) target bundleno = 11 (0xb), region = 154 }
 0x5cd   : > { %s5235_s14 = sld [smem:[#allocation14_spill]] }

// kernel: dc_contrastive_forward.3
= control target key start
LH: loop header
LB: loop body
LE: loop exit
PB: predicated region body
PF: predicated region fallthrough
CT: control target
= control target key end

     0   :  { %s6225_s0 = inlined_call_operand.vmem [shape: f32[2,768,128], index: 0, kind: input, shape index: {}, may-alias: {0,1}]   ;;  %s6226_s1 = inlined_call_operand.vmem [shape: f32[2,768,128], index: 1, kind: input, shape index: {}, may-alias: {0,1}]   ;;  %s6227_s2 = inlined_call_operand.vmem [shape: bf16[768,768], index: 2, kind: input, shape index: {}]   ;;  %s6228_s3 = inlined_call_operand.vmem [shape: bf16[768,768], index: 3, kind: input, shape index: {}]   ;;  %s6229_s4 = inlined_call_operand.vmem [shape: f32[768,1], index: 4, kind: output, shape index: {0}]   ;;  %s6230_s5 = inlined_call_operand.vmem [shape: f32[768,1], index: 5, kind: output, shape index: {1}]   ;;  %s6231_s6 = inlined_call_operand.vmem [shape: f32[3,1,768], index: 6, kind: output, shape index: {2}]   ;;  %s6232_s7 = inlined_call_operand.vmem [shape: f32[3,1,768], index: 7, kind: output, shape index: {3}]  }
   0x1   :  { %6315 = sst [smem:[#allocation53_spill]] %s6225_s0 }
   0x2   :  { %6316 = sst [smem:[#allocation54_spill]] %s6227_s2 }
   0x3   :  { %6317 = sst [smem:[#allocation55_spill]] %s6228_s3 }
   0x4   :  { %s3933_s24 = smov 0   ;;  %s3935_s25 = smov 0  }
   0x5   :  { %s3937_s26 = smov 0   ;;  %s3939_s27 = smov 0  }
   0x6   :  { %s3941_s28 = smov 0   ;;  %s3943_s29 = smov 0  }
   0x7   :  { %s3945_s30 = smov 0  }
   0x8 LB: > { %s27_s8 = sadd.s32 1, %s3881_s28  ;;  %s30_s9 = sadd.s32 1, %s3885_s29  ;;  %s3889_s30 = sphi %s3945_s30, %s18_s30   ;;  %s3885_s29 = sphi %s3943_s29, %s6575_s29   ;;  %s3881_s28 = sphi %s3941_s28, %s6574_s28   ;;  %s3877_s27 = sphi %s3939_s27, %s6573_s27   ;;  %s3873_s26 = sphi %s3937_s26, %s6572_s26   ;;  %s3869_s25 = sphi %s3935_s25, %s6571_s25   ;;  %s3865_s24 = sphi %s3933_s24, %s6570_s24  }
   0x9   : > { %p28_p0 = scmp.ge.s32.totalorder %s27_s8, 2  ;;  %p98_p1 = scmp.ne.s32.totalorder %s3869_s25, %s3865_s24 }
   0xa   : > { %p99_p2 = scmp.eq.s32.totalorder %s3889_s30, 0  ;;  %s91_s14 = sadd.s32 1, %s3869_s25 }
   0xb   : > { %s6577_s8 = smov (%p28_p0, %s27_s8), 0  ;;  %s6579_s9 = smov (!%p28_p0, %s30_s9), %s3885_s29 }
   0xc   : > { %p3976_p3 = por %p99_p2, %p98_p1  ;;  %p32_p4 = scmp.ge.s32.totalorder %s6579_s9, 3 }
   0xd   : > { %s87_s11 = ssub.s32 %s3881_s28, %s6577_s8  ;;  %p3161_p6 = scmp.ge.s32.totalorder %s3889_s30, 6 }
   0xe   : > { %s6581_s9 = smov (%p32_p4, %s6579_s9), 0 }
   0xf   : > { %6319 = sst [smem:[#allocation4_spill]] %s6581_s9  ;;  %s86_s12 = ssub.s32 %s3885_s29, %s6581_s9 }
  0x10   : > { %s88_s13 = sor.u32 %s87_s11, %s86_s12  ;;  %260 = sbr.rel (%p3161_p6) target bundleno = 113 (0x71), region = 16 }
  0x11   : > { %p89_p5 = scmp.eq.s32.totalorder %s88_s13, 0 }
  0x13   : > { %s3988_s15 = scalar_select %p89_p5, %s3869_s25, %s91_s14  }
  0x15   : > { %282 = sbr.rel (!%p3976_p3) target bundleno = 67 (0x43), region = 28  ;;  %s284_s16 = sand.u32 (%p3976_p3), 1, %s3869_s25  }
  0x16   : > { %s288_s17 = smul.u32 (%p3976_p3), 3, %s3881_s28  ;;  %s6320_s2 = sld [smem:[#allocation54_spill]] (%p3976_p3) }
  0x17   : > { %s3579_s18 = smul.u32 (%p3976_p3), 384, %s284_s16 }
  0x18   : > { %s3580_s19 = smul.u32 (%p3976_p3), 192, %s3885_s29 }
  0x19   : > { %s4004_s12 = scalar_lea.vmem (%p3976_p3), [#allocation2], %s3579_s18 }
  0x1a   : > { %s290_s20 = sadd.s32 %s3580_s19, %s288_s17 }
  0x1b   : > { %s3164_s21 = sshll.u32 %s290_s20, 2 }
  0x1c   : > { %s3999_s11 = scalar_lea.vmem %s6320_s2, %s3164_s21 }
  0x1d   : > { %v307_v0 = vld [vmem:[%s3999_s11] sm:$0xff]  ;;  %v309_v1 = vld [vmem:[%s3999_s11 + $0x18] sm:$0xff]  ;;  %v311_v2 = vld [vmem:[%s3999_s11 + $0x30] sm:$0xff] }
  0x1e   : > { %308 = vst [vmem:[%s4004_s12] sm:$0xff] %v307_v0  ;;  %310 = vst [vmem:[%s4004_s12 + $0xc] sm:$0xff] %v309_v1  ;;  %v313_v3 = vld [vmem:[%s3999_s11 + $0x48] sm:$0xff]  ;;  %v315_v4 = vld [vmem:[%s3999_s11 + $0x60] sm:$0xff] }
  0x1f   : > { %312 = vst [vmem:[%s4004_s12 + $0x18] sm:$0xff] %v311_v2  ;;  %v317_v5 = vld [vmem:[%s3999_s11 + $0x78] sm:$0xff]  ;;  %314 = vst [vmem:[%s4004_s12 + $0x24] sm:$0xff] %v313_v3  ;;  %v319_v6 = vld [vmem:[%s3999_s11 + $0x90] sm:$0xff] }
  0x20   : > { %316 = vst [vmem:[%s4004_s12 + $0x30] sm:$0xff] %v315_v4  ;;  %318 = vst [vmem:[%s4004_s12 + $0x3c] sm:$0xff] %v317_v5  ;;  %v321_v7 = vld [vmem:[%s3999_s11 + $0xa8] sm:$0xff]  ;;  %v323_v8 = vld [vmem:[%s3999_s11 + $0xc0] sm:$0xff] }
  0x21   : > { %320 = vst [vmem:[%s4004_s12 + $0x48] sm:$0xff] %v319_v6  ;;  %322 = vst [vmem:[%s4004_s12 + $0x54] sm:$0xff] %v321_v7  ;;  %v325_v9 = vld [vmem:[%s3999_s11 + $0xd8] sm:$0xff]  ;;  %v327_v10 = vld [vmem:[%s3999_s11 + $0xf0] sm:$0xff] }
  0x22   : > { %324 = vst [vmem:[%s4004_s12 + $0x60] sm:$0xff] %v323_v8  ;;  %v329_v11 = vld [vmem:[%s3999_s11 + $0x108] sm:$0xff]  ;;  %326 = vst [vmem:[%s4004_s12 + $0x6c] sm:$0xff] %v325_v9  ;;  %v331_v12 = vld [vmem:[%s3999_s11 + $0x120] sm:$0xff] }
  0x23   : > { %328 = vst [vmem:[%s4004_s12 + $0x78] sm:$0xff] %v327_v10  ;;  %330 = vst [vmem:[%s4004_s12 + $0x84] sm:$0xff] %v329_v11  ;;  %v333_v13 = vld [vmem:[%s3999_s11 + $0x138] sm:$0xff]  ;;  %v335_v14 = vld [vmem:[%s3999_s11 + $0x150] sm:$0xff] }
  0x24   : > { %332 = vst [vmem:[%s4004_s12 + $0x90] sm:$0xff] %v331_v12  ;;  %334 = vst [vmem:[%s4004_s12 + $0x9c] sm:$0xff] %v333_v13  ;;  %v337_v15 = vld [vmem:[%s3999_s11 + $0x168] sm:$0xff]  ;;  %v339_v16 = vld [vmem:[%s3999_s11 + $0x180] sm:$0xff] }
  0x25   : > { %336 = vst [vmem:[%s4004_s12 + $0xa8] sm:$0xff] %v335_v14  ;;  %v341_v17 = vld [vmem:[%s3999_s11 + $0x198] sm:$0xff]  ;;  %338 = vst [vmem:[%s4004_s12 + $0xb4] sm:$0xff] %v337_v15  ;;  %v343_v18 = vld [vmem:[%s3999_s11 + $0x1b0] sm:$0xff] }
  0x26   : > { %340 = vst [vmem:[%s4004_s12 + $0xc0] sm:$0xff] %v339_v16  ;;  %342 = vst [vmem:[%s4004_s12 + $0xcc] sm:$0xff] %v341_v17  ;;  %v345_v19 = vld [vmem:[%s3999_s11 + $0x1c8] sm:$0xff]  ;;  %v347_v20 = vld [vmem:[%s3999_s11 + $0x1e0] sm:$0xff] }
  0x27   : > { %344 = vst [vmem:[%s4004_s12 + $0xd8] sm:$0xff] %v343_v18  ;;  %346 = vst [vmem:[%s4004_s12 + $0xe4] sm:$0xff] %v345_v19  ;;  %v349_v21 = vld [vmem:[%s3999_s11 + $0x1f8] sm:$0xff]  ;;  %v351_v22 = vld [vmem:[%s3999_s11 + $0x210] sm:$0xff] }
  0x28   : > { %348 = vst [vmem:[%s4004_s12 + $0xf0] sm:$0xff] %v347_v20  ;;  %v353_v23 = vld [vmem:[%s3999_s11 + $0x228] sm:$0xff]  ;;  %350 = vst [vmem:[%s4004_s12 + $0xfc] sm:$0xff] %v349_v21  ;;  %v355_v24 = vld [vmem:[%s3999_s11 + $0x240] sm:$0xff] }
  0x29   : > { %352 = vst [vmem:[%s4004_s12 + $0x108] sm:$0xff] %v351_v22  ;;  %354 = vst [vmem:[%s4004_s12 + $0x114] sm:$0xff] %v353_v23  ;;  %v357_v25 = vld [vmem:[%s3999_s11 + $0x258] sm:$0xff]  ;;  %v359_v26 = vld [vmem:[%s3999_s11 + $0x270] sm:$0xff] }
  0x2a   : > { %356 = vst [vmem:[%s4004_s12 + $0x120] sm:$0xff] %v355_v24  ;;  %358 = vst [vmem:[%s4004_s12 + $0x12c] sm:$0xff] %v357_v25  ;;  %v361_v27 = vld [vmem:[%s3999_s11 + $0x288] sm:$0xff]  ;;  %v363_v28 = vld [vmem:[%s3999_s11 + $0x2a0] sm:$0xff] }
  0x2b   : > { %360 = vst [vmem:[%s4004_s12 + $0x138] sm:$0xff] %v359_v26  ;;  %v365_v29 = vld [vmem:[%s3999_s11 + $0x2b8] sm:$0xff]  ;;  %362 = vst [vmem:[%s4004_s12 + $0x144] sm:$0xff] %v361_v27  ;;  %v367_v30 = vld [vmem:[%s3999_s11 + $0x2d0] sm:$0xff] }
  0x2c   : > { %364 = vst [vmem:[%s4004_s12 + $0x150] sm:$0xff] %v363_v28  ;;  %366 = vst [vmem:[%s4004_s12 + $0x15c] sm:$0xff] %v365_v29  ;;  %v369_v31 = vld [vmem:[%s3999_s11 + $0x2e8] sm:$0xff]  ;;  %v3167_v33 = vld [vmem:[%s3999_s11 + $0x20] sm:$0xf] }
  0x2d   : > { %v3165_v32 = vld [vmem:[%s3999_s11 + $0x8] sm:$0xf]  ;;  %368 = vst [vmem:[%s4004_s12 + $0x168] sm:$0xff] %v367_v30  ;;  %370 = vst [vmem:[%s4004_s12 + $0x174] sm:$0xff] %v369_v31  ;;  %v3169_v34 = vld [vmem:[%s3999_s11 + $0x38] sm:$0xf] }
  0x2e   : > { %3166 = vst [vmem:[%s4004_s12 + $0x8] sm:$0xf] %v3165_v32  ;;  %v3171_v35 = vld [vmem:[%s3999_s11 + $0x50] sm:$0xf]  ;;  %3168 = vst [vmem:[%s4004_s12 + $0x14] sm:$0xf] %v3167_v33 }
  0x2f   : > { %3170 = vst [vmem:[%s4004_s12 + $0x20] sm:$0xf] %v3169_v34  ;;  %3172 = vst [vmem:[%s4004_s12 + $0x2c] sm:$0xf] %v3171_v35  ;;  %v3173_v36 = vld [vmem:[%s3999_s11 + $0x68] sm:$0xf] }
  0x30   : > { %v3175_v37 = vld [vmem:[%s3999_s11 + $0x80] sm:$0xf]  ;;  %v3177_v38 = vld [vmem:[%s3999_s11 + $0x98] sm:$0xf]  ;;  %3174 = vst [vmem:[%s4004_s12 + $0x38] sm:$0xf] %v3173_v36 }
  0x31   : > { %3176 = vst [vmem:[%s4004_s12 + $0x44] sm:$0xf] %v3175_v37  ;;  %3178 = vst [vmem:[%s4004_s12 + $0x50] sm:$0xf] %v3177_v38  ;;  %v3179_v39 = vld [vmem:[%s3999_s11 + $0xb0] sm:$0xf] }
  0x32   : > { %v3181_v40 = vld [vmem:[%s3999_s11 + $0xc8] sm:$0xf]  ;;  %v3183_v41 = vld [vmem:[%s3999_s11 + $0xe0] sm:$0xf]  ;;  %3180 = vst [vmem:[%s4004_s12 + $0x5c] sm:$0xf] %v3179_v39 }
  0x33   : > { %3182 = vst [vmem:[%s4004_s12 + $0x68] sm:$0xf] %v3181_v40  ;;  %3184 = vst [vmem:[%s4004_s12 + $0x74] sm:$0xf] %v3183_v41  ;;  %v3185_v42 = vld [vmem:[%s3999_s11 + $0xf8] sm:$0xf] }
  0x34   : > { %v3187_v43 = vld [vmem:[%s3999_s11 + $0x110] sm:$0xf]  ;;  %v3189_v44 = vld [vmem:[%s3999_s11 + $0x128] sm:$0xf]  ;;  %3186 = vst [vmem:[%s4004_s12 + $0x80] sm:$0xf] %v3185_v42 }
  0x35   : > { %3188 = vst [vmem:[%s4004_s12 + $0x8c] sm:$0xf] %v3187_v43  ;;  %3190 = vst [vmem:[%s4004_s12 + $0x98] sm:$0xf] %v3189_v44  ;;  %v3191_v45 = vld [vmem:[%s3999_s11 + $0x140] sm:$0xf] }
  0x36   : > { %v3193_v46 = vld [vmem:[%s3999_s11 + $0x158] sm:$0xf]  ;;  %v3195_v47 = vld [vmem:[%s3999_s11 + $0x170] sm:$0xf]  ;;  %3192 = vst [vmem:[%s4004_s12 + $0xa4] sm:$0xf] %v3191_v45 }
  0x37   : > { %3194 = vst [vmem:[%s4004_s12 + $0xb0] sm:$0xf] %v3193_v46  ;;  %3196 = vst [vmem:[%s4004_s12 + $0xbc] sm:$0xf] %v3195_v47  ;;  %v3197_v48 = vld [vmem:[%s3999_s11 + $0x188] sm:$0xf] }
  0x38   : > { %v3199_v49 = vld [vmem:[%s3999_s11 + $0x1a0] sm:$0xf]  ;;  %v3201_v50 = vld [vmem:[%s3999_s11 + $0x1b8] sm:$0xf]  ;;  %3198 = vst [vmem:[%s4004_s12 + $0xc8] sm:$0xf] %v3197_v48 }
  0x39   : > { %3200 = vst [vmem:[%s4004_s12 + $0xd4] sm:$0xf] %v3199_v49  ;;  %3202 = vst [vmem:[%s4004_s12 + $0xe0] sm:$0xf] %v3201_v50  ;;  %v3203_v51 = vld [vmem:[%s3999_s11 + $0x1d0] sm:$0xf] }
  0x3a   : > { %v3205_v52 = vld [vmem:[%s3999_s11 + $0x1e8] sm:$0xf]  ;;  %v3207_v53 = vld [vmem:[%s3999_s11 + $0x200] sm:$0xf]  ;;  %3204 = vst [vmem:[%s4004_s12 + $0xec] sm:$0xf] %v3203_v51 }
  0x3b   : > { %3206 = vst [vmem:[%s4004_s12 + $0xf8] sm:$0xf] %v3205_v52  ;;  %3208 = vst [vmem:[%s4004_s12 + $0x104] sm:$0xf] %v3207_v53  ;;  %v3209_v54 = vld [vmem:[%s3999_s11 + $0x218] sm:$0xf] }
  0x3c   : > { %v3211_v55 = vld [vmem:[%s3999_s11 + $0x230] sm:$0xf]  ;;  %v3213_v56 = vld [vmem:[%s3999_s11 + $0x248] sm:$0xf]  ;;  %3210 = vst [vmem:[%s4004_s12 + $0x110] sm:$0xf] %v3209_v54 }
  0x3d   : > { %3212 = vst [vmem:[%s4004_s12 + $0x11c] sm:$0xf] %v3211_v55  ;;  %3214 = vst [vmem:[%s4004_s12 + $0x128] sm:$0xf] %v3213_v56  ;;  %v3215_v57 = vld [vmem:[%s3999_s11 + $0x260] sm:$0xf] }
  0x3e   : > { %v3217_v58 = vld [vmem:[%s3999_s11 + $0x278] sm:$0xf]  ;;  %v3219_v59 = vld [vmem:[%s3999_s11 + $0x290] sm:$0xf]  ;;  %3216 = vst [vmem:[%s4004_s12 + $0x134] sm:$0xf] %v3215_v57 }
  0x3f   : > { %3218 = vst [vmem:[%s4004_s12 + $0x140] sm:$0xf] %v3217_v58  ;;  %3220 = vst [vmem:[%s4004_s12 + $0x14c] sm:$0xf] %v3219_v59  ;;  %v3221_v60 = vld [vmem:[%s3999_s11 + $0x2a8] sm:$0xf] }
  0x40   : > { %v3223_v61 = vld [vmem:[%s3999_s11 + $0x2c0] sm:$0xf]  ;;  %v3225_v62 = vld [vmem:[%s3999_s11 + $0x2d8] sm:$0xf]  ;;  %3222 = vst [vmem:[%s4004_s12 + $0x158] sm:$0xf] %v3221_v60 }
  0x41   : > { %3224 = vst [vmem:[%s4004_s12 + $0x164] sm:$0xf] %v3223_v61  ;;  %3226 = vst [vmem:[%s4004_s12 + $0x170] sm:$0xf] %v3225_v62  ;;  %v3227_v63 = vld [vmem:[%s3999_s11 + $0x2f0] sm:$0xf] }
  0x42   : > { %3228 = vst [vmem:[%s4004_s12 + $0x17c] sm:$0xf] %v3227_v63 }
  0x43 PF: > { %448 = sbr.rel (!%p3976_p3) target bundleno = 113 (0x71), region = 54  ;;  %s450_s13 = sand.u32 (%p3976_p3), 1, %s3869_s25  }
  0x44   : > { %s454_s14 = smul.u32 (%p3976_p3), 3, %s3881_s28  ;;  %s6321_s3 = sld [smem:[#allocation55_spill]] (%p3976_p3) }
  0x45   : > { %s3581_s16 = smul.u32 (%p3976_p3), 384, %s450_s13 }
  0x46   : > { %s3582_s17 = smul.u32 (%p3976_p3), 192, %s3885_s29 }
  0x47   : > { %s4144_s10 = scalar_lea.vmem (%p3976_p3), [#allocation3], %s3581_s16 }
  0x48   : > { %s456_s18 = sadd.s32 %s3582_s17, %s454_s14 }
  0x49   : > { %s3231_s19 = sshll.u32 %s456_s18, 2 }
  0x4a   : > { %s4139_s22 = scalar_lea.vmem %s6321_s3, %s3231_s19 }
  0x4b   : > { %v473_v0 = vld [vmem:[%s4139_s22] sm:$0xff]  ;;  %v475_v1 = vld [vmem:[%s4139_s22 + $0x18] sm:$0xff]  ;;  %v477_v2 = vld [vmem:[%s4139_s22 + $0x30] sm:$0xff] }
  0x4c   : > { %474 = vst [vmem:[%s4144_s10] sm:$0xff] %v473_v0  ;;  %476 = vst [vmem:[%s4144_s10 + $0xc] sm:$0xff] %v475_v1  ;;  %v479_v3 = vld [vmem:[%s4139_s22 + $0x48] sm:$0xff]  ;;  %v481_v4 = vld [vmem:[%s4139_s22 + $0x60] sm:$0xff] }
  0x4d   : > { %478 = vst [vmem:[%s4144_s10 + $0x18] sm:$0xff] %v477_v2  ;;  %v483_v5 = vld [vmem:[%s4139_s22 + $0x78] sm:$0xff]  ;;  %480 = vst [vmem:[%s4144_s10 + $0x24] sm:$0xff] %v479_v3  ;;  %v485_v6 = vld [vmem:[%s4139_s22 + $0x90] sm:$0xff] }
  0x4e   : > { %482 = vst [vmem:[%s4144_s10 + $0x30] sm:$0xff] %v481_v4  ;;  %484 = vst [vmem:[%s4144_s10 + $0x3c] sm:$0xff] %v483_v5  ;;  %v487_v7 = vld [vmem:[%s4139_s22 + $0xa8] sm:$0xff]  ;;  %v489_v8 = vld [vmem:[%s4139_s22 + $0xc0] sm:$0xff] }
  0x4f   : > { %486 = vst [vmem:[%s4144_s10 + $0x48] sm:$0xff] %v485_v6  ;;  %488 = vst [vmem:[%s4144_s10 + $0x54] sm:$0xff] %v487_v7  ;;  %v491_v9 = vld [vmem:[%s4139_s22 + $0xd8] sm:$0xff]  ;;  %v493_v10 = vld [vmem:[%s4139_s22 + $0xf0] sm:$0xff] }
  0x50   : > { %490 = vst [vmem:[%s4144_s10 + $0x60] sm:$0xff] %v489_v8  ;;  %v495_v11 = vld [vmem:[%s4139_s22 + $0x108] sm:$0xff]  ;;  %492 = vst [vmem:[%s4144_s10 + $0x6c] sm:$0xff] %v491_v9  ;;  %v497_v12 = vld [vmem:[%s4139_s22 + $0x120] sm:$0xff] }
  0x51   : > { %494 = vst [vmem:[%s4144_s10 + $0x78] sm:$0xff] %v493_v10  ;;  %496 = vst [vmem:[%s4144_s10 + $0x84] sm:$0xff] %v495_v11  ;;  %v499_v13 = vld [vmem:[%s4139_s22 + $0x138] sm:$0xff]  ;;  %v501_v14 = vld [vmem:[%s4139_s22 + $0x150] sm:$0xff] }
  0x52   : > { %498 = vst [vmem:[%s4144_s10 + $0x90] sm:$0xff] %v497_v12  ;;  %500 = vst [vmem:[%s4144_s10 + $0x9c] sm:$0xff] %v499_v13  ;;  %v503_v15 = vld [vmem:[%s4139_s22 + $0x168] sm:$0xff]  ;;  %v505_v16 = vld [vmem:[%s4139_s22 + $0x180] sm:$0xff] }
  0x53   : > { %502 = vst [vmem:[%s4144_s10 + $0xa8] sm:$0xff] %v501_v14  ;;  %v507_v17 = vld [vmem:[%s4139_s22 + $0x198] sm:$0xff]  ;;  %504 = vst [vmem:[%s4144_s10 + $0xb4] sm:$0xff] %v503_v15  ;;  %v509_v18 = vld [vmem:[%s4139_s22 + $0x1b0] sm:$0xff] }
  0x54   : > { %506 = vst [vmem:[%s4144_s10 + $0xc0] sm:$0xff] %v505_v16  ;;  %508 = vst [vmem:[%s4144_s10 + $0xcc] sm:$0xff] %v507_v17  ;;  %v511_v19 = vld [vmem:[%s4139_s22 + $0x1c8] sm:$0xff]  ;;  %v513_v20 = vld [vmem:[%s4139_s22 + $0x1e0] sm:$0xff] }
  0x55   : > { %510 = vst [vmem:[%s4144_s10 + $0xd8] sm:$0xff] %v509_v18  ;;  %512 = vst [vmem:[%s4144_s10 + $0xe4] sm:$0xff] %v511_v19  ;;  %v515_v21 = vld [vmem:[%s4139_s22 + $0x1f8] sm:$0xff]  ;;  %v517_v22 = vld [vmem:[%s4139_s22 + $0x210] sm:$0xff] }
  0x56   : > { %514 = vst [vmem:[%s4144_s10 + $0xf0] sm:$0xff] %v513_v20  ;;  %v519_v23 = vld [vmem:[%s4139_s22 + $0x228] sm:$0xff]  ;;  %516 = vst [vmem:[%s4144_s10 + $0xfc] sm:$0xff] %v515_v21  ;;  %v521_v24 = vld [vmem:[%s4139_s22 + $0x240] sm:$0xff] }
  0x57   : > { %518 = vst [vmem:[%s4144_s10 + $0x108] sm:$0xff] %v517_v22  ;;  %520 = vst [vmem:[%s4144_s10 + $0x114] sm:$0xff] %v519_v23  ;;  %v523_v25 = vld [vmem:[%s4139_s22 + $0x258] sm:$0xff]  ;;  %v525_v26 = vld [vmem:[%s4139_s22 + $0x270] sm:$0xff] }
  0x58   : > { %522 = vst [vmem:[%s4144_s10 + $0x120] sm:$0xff] %v521_v24  ;;  %524 = vst [vmem:[%s4144_s10 + $0x12c] sm:$0xff] %v523_v25  ;;  %v527_v27 = vld [vmem:[%s4139_s22 + $0x288] sm:$0xff]  ;;  %v529_v28 = vld [vmem:[%s4139_s22 + $0x2a0] sm:$0xff] }
  0x59   : > { %526 = vst [vmem:[%s4144_s10 + $0x138] sm:$0xff] %v525_v26  ;;  %v531_v29 = vld [vmem:[%s4139_s22 + $0x2b8] sm:$0xff]  ;;  %528 = vst [vmem:[%s4144_s10 + $0x144] sm:$0xff] %v527_v27  ;;  %v533_v30 = vld [vmem:[%s4139_s22 + $0x2d0] sm:$0xff] }
  0x5a   : > { %530 = vst [vmem:[%s4144_s10 + $0x150] sm:$0xff] %v529_v28  ;;  %532 = vst [vmem:[%s4144_s10 + $0x15c] sm:$0xff] %v531_v29  ;;  %v535_v31 = vld [vmem:[%s4139_s22 + $0x2e8] sm:$0xff]  ;;  %v3234_v33 = vld [vmem:[%s4139_s22 + $0x20] sm:$0xf] }
  0x5b   : > { %v3232_v32 = vld [vmem:[%s4139_s22 + $0x8] sm:$0xf]  ;;  %534 = vst [vmem:[%s4144_s10 + $0x168] sm:$0xff] %v533_v30  ;;  %536 = vst [vmem:[%s4144_s10 + $0x174] sm:$0xff] %v535_v31  ;;  %v3236_v34 = vld [vmem:[%s4139_s22 + $0x38] sm:$0xf] }
  0x5c   : > { %3233 = vst [vmem:[%s4144_s10 + $0x8] sm:$0xf] %v3232_v32  ;;  %v3238_v35 = vld [vmem:[%s4139_s22 + $0x50] sm:$0xf]  ;;  %3235 = vst [vmem:[%s4144_s10 + $0x14] sm:$0xf] %v3234_v33 }
  0x5d   : > { %3237 = vst [vmem:[%s4144_s10 + $0x20] sm:$0xf] %v3236_v34  ;;  %3239 = vst [vmem:[%s4144_s10 + $0x2c] sm:$0xf] %v3238_v35  ;;  %v3240_v36 = vld [vmem:[%s4139_s22 + $0x68] sm:$0xf] }
  0x5e   : > { %v3242_v37 = vld [vmem:[%s4139_s22 + $0x80] sm:$0xf]  ;;  %v3244_v38 = vld [vmem:[%s4139_s22 + $0x98] sm:$0xf]  ;;  %3241 = vst [vmem:[%s4144_s10 + $0x38] sm:$0xf] %v3240_v36 }
  0x5f   : > { %3243 = vst [vmem:[%s4144_s10 + $0x44] sm:$0xf] %v3242_v37  ;;  %3245 = vst [vmem:[%s4144_s10 + $0x50] sm:$0xf] %v3244_v38  ;;  %v3246_v39 = vld [vmem:[%s4139_s22 + $0xb0] sm:$0xf] }
  0x60   : > { %v3248_v40 = vld [vmem:[%s4139_s22 + $0xc8] sm:$0xf]  ;;  %v3250_v41 = vld [vmem:[%s4139_s22 + $0xe0] sm:$0xf]  ;;  %3247 = vst [vmem:[%s4144_s10 + $0x5c] sm:$0xf] %v3246_v39 }
  0x61   : > { %3249 = vst [vmem:[%s4144_s10 + $0x68] sm:$0xf] %v3248_v40  ;;  %3251 = vst [vmem:[%s4144_s10 + $0x74] sm:$0xf] %v3250_v41  ;;  %v3252_v42 = vld [vmem:[%s4139_s22 + $0xf8] sm:$0xf] }
  0x62   : > { %v3254_v43 = vld [vmem:[%s4139_s22 + $0x110] sm:$0xf]  ;;  %v3256_v44 = vld [vmem:[%s4139_s22 + $0x128] sm:$0xf]  ;;  %3253 = vst [vmem:[%s4144_s10 + $0x80] sm:$0xf] %v3252_v42 }
  0x63   : > { %3255 = vst [vmem:[%s4144_s10 + $0x8c] sm:$0xf] %v3254_v43  ;;  %3257 = vst [vmem:[%s4144_s10 + $0x98] sm:$0xf] %v3256_v44  ;;  %v3258_v45 = vld [vmem:[%s4139_s22 + $0x140] sm:$0xf] }
  0x64   : > { %v3260_v46 = vld [vmem:[%s4139_s22 + $0x158] sm:$0xf]  ;;  %v3262_v47 = vld [vmem:[%s4139_s22 + $0x170] sm:$0xf]  ;;  %3259 = vst [vmem:[%s4144_s10 + $0xa4] sm:$0xf] %v3258_v45 }
  0x65   : > { %3261 = vst [vmem:[%s4144_s10 + $0xb0] sm:$0xf] %v3260_v46  ;;  %3263 = vst [vmem:[%s4144_s10 + $0xbc] sm:$0xf] %v3262_v47  ;;  %v3264_v48 = vld [vmem:[%s4139_s22 + $0x188] sm:$0xf] }
  0x66   : > { %v3266_v49 = vld [vmem:[%s4139_s22 + $0x1a0] sm:$0xf]  ;;  %v3268_v50 = vld [vmem:[%s4139_s22 + $0x1b8] sm:$0xf]  ;;  %3265 = vst [vmem:[%s4144_s10 + $0xc8] sm:$0xf] %v3264_v48 }
  0x67   : > { %3267 = vst [vmem:[%s4144_s10 + $0xd4] sm:$0xf] %v3266_v49  ;;  %3269 = vst [vmem:[%s4144_s10 + $0xe0] sm:$0xf] %v3268_v50  ;;  %v3270_v51 = vld [vmem:[%s4139_s22 + $0x1d0] sm:$0xf] }
  0x68   : > { %v3272_v52 = vld [vmem:[%s4139_s22 + $0x1e8] sm:$0xf]  ;;  %v3274_v53 = vld [vmem:[%s4139_s22 + $0x200] sm:$0xf]  ;;  %3271 = vst [vmem:[%s4144_s10 + $0xec] sm:$0xf] %v3270_v51 }
  0x69   : > { %3273 = vst [vmem:[%s4144_s10 + $0xf8] sm:$0xf] %v3272_v52  ;;  %3275 = vst [vmem:[%s4144_s10 + $0x104] sm:$0xf] %v3274_v53  ;;  %v3276_v54 = vld [vmem:[%s4139_s22 + $0x218] sm:$0xf] }
  0x6a   : > { %v3278_v55 = vld [vmem:[%s4139_s22 + $0x230] sm:$0xf]  ;;  %v3280_v56 = vld [vmem:[%s4139_s22 + $0x248] sm:$0xf]  ;;  %3277 = vst [vmem:[%s4144_s10 + $0x110] sm:$0xf] %v3276_v54 }
  0x6b   : > { %3279 = vst [vmem:[%s4144_s10 + $0x11c] sm:$0xf] %v3278_v55  ;;  %3281 = vst [vmem:[%s4144_s10 + $0x128] sm:$0xf] %v3280_v56  ;;  %v3282_v57 = vld [vmem:[%s4139_s22 + $0x260] sm:$0xf] }
  0x6c   : > { %v3284_v58 = vld [vmem:[%s4139_s22 + $0x278] sm:$0xf]  ;;  %v3286_v59 = vld [vmem:[%s4139_s22 + $0x290] sm:$0xf]  ;;  %3283 = vst [vmem:[%s4144_s10 + $0x134] sm:$0xf] %v3282_v57 }
  0x6d   : > { %3285 = vst [vmem:[%s4144_s10 + $0x140] sm:$0xf] %v3284_v58  ;;  %3287 = vst [vmem:[%s4144_s10 + $0x14c] sm:$0xf] %v3286_v59  ;;  %v3288_v60 = vld [vmem:[%s4139_s22 + $0x2a8] sm:$0xf] }
  0x6e   : > { %v3290_v61 = vld [vmem:[%s4139_s22 + $0x2c0] sm:$0xf]  ;;  %v3292_v62 = vld [vmem:[%s4139_s22 + $0x2d8] sm:$0xf]  ;;  %3289 = vst [vmem:[%s4144_s10 + $0x158] sm:$0xf] %v3288_v60 }
  0x6f   : > { %3291 = vst [vmem:[%s4144_s10 + $0x164] sm:$0xf] %v3290_v61  ;;  %3293 = vst [vmem:[%s4144_s10 + $0x170] sm:$0xf] %v3292_v62  ;;  %v3294_v63 = vld [vmem:[%s4139_s22 + $0x2f0] sm:$0xf] }
  0x70   : > { %3295 = vst [vmem:[%s4144_s10 + $0x17c] sm:$0xf] %v3294_v63 }
  0x71 PF: > { %p3296_p7 = scmp.ge.s32.totalorder %s3889_s30, 1  ;;  %p613_p8 = scmp.lt.s32.totalorder %s3889_s30, 7 }
  0x73   : > { %p614_p9 = pnand %p3296_p7, %p613_p8 }
  0x75   : > { %617 = sbr.rel (%p614_p9) target bundleno = 836 (0x344), region = 80 }
  0x7a   : > { %s620_s23 = sand.u32 1, %s3865_s24   ;;  %s3297_s11 = sshll.u32 %s3877_s27, 5 }
  0x7b   : > { %s3583_s12 = smul.u32 384, %s620_s23  ;;  %p695_p10 = scmp.lt.s32.totalorder %s3297_s11, 95 }
  0x7c   : > { %s700_s13 = smul.u32 48, %s3873_s26  ;;  %p724_p12 = scmp.lt.s32.totalorder %s3877_s27, 2 }
  0x7d   : > { %s6583_s11 = smov (!%p695_p10, %s3297_s11), 95  ;;  %s723_s14 = smul.u32 3, %s3873_s26 }
  0x7e   : > { %p701_p11 = scmp.lt.s32.totalorder %s700_s13, 95  ;;  %s3298_s16 = sshll.u32 %s6583_s11, 3 }
  0x7f   : > { %s6322_s0 = sld [smem:[#allocation53_spill]]  ;;  %s4286_s22 = scalar_lea.vmem %s6229_s4, %s3298_s16 }
  0x80   : > { %s6585_s13 = smov (!%p701_p11, %s700_s13), 95  ;;  %s4291_s23 = scalar_lea.vmem %s6230_s5, %s3298_s16 }
  0x81   : > { %p726_p13 = scmp.lt.s32.totalorder %s723_s14, 5  ;;  %s3299_s2 = sshll.u32 %s6585_s13, 3 }
  0x82   : > { %s4296_s9 = scalar_lea.vmem %s6226_s1, %s3299_s2  ;;  %s6587_s27 = smov (!%p724_p12, %s3877_s27), 2 }
  0x83   : > { %s6589_s14 = smov (!%p726_p13, %s723_s14), 5  ;;  %s3584_s17 = smul.u32 6, %s6587_s27 }
  0x84   : > { %s4311_s3 = scalar_lea.vmem [#allocation3], %s3583_s12  ;;  %p3304_p0 = scmp.ne.s32.totalorder %s3873_s26, 0 }
  0x85   : > { %s4281_s19 = scalar_lea.vmem %s6322_s0, %s3298_s16  ;;  %s4299_s18 = sadd.s32 %s3584_s17, %s6589_s14 }
  0x86   : > { %s730_s24 = scalar_lea.vmem %s6231_s6, %s4299_s18  ;;  %s739_s13 = scalar_lea.vmem %s6232_s7, %s4299_s18 }
  0x87   : > { %s4309_s0 = scalar_lea.vmem [#allocation2], %s3583_s12  ;;  %744 = sbr.rel (%p3304_p0) target bundleno = 173 (0xad), region = 92 }
  0x8c   : > { %vm745_vm0 = vcmask 7168   ;;  %v3891_v0 = vmov 0.0  }
  0x8d   : > { %746 = vst.msk [vmem:[%s4286_s22] sm:$0xff] %vm745_vm0, %v3891_v0  ;;  %747 = vst.msk [vmem:[%s4286_s22 + $0x8] sm:$0xff] %vm745_vm0, %v3891_v0 }
  0x8e   : > { %748 = vst.msk [vmem:[%s4286_s22 + $0x10] sm:$0xff] %vm745_vm0, %v3891_v0  ;;  %749 = vst.msk [vmem:[%s4286_s22 + $0x18] sm:$0xff] %vm745_vm0, %v3891_v0 }
  0x8f   : > { %750 = vst.msk [vmem:[%s4286_s22 + $0x20] sm:$0xff] %vm745_vm0, %v3891_v0  ;;  %751 = vst.msk [vmem:[%s4286_s22 + $0x28] sm:$0xff] %vm745_vm0, %v3891_v0 }
  0x90   : > { %752 = vst.msk [vmem:[%s4286_s22 + $0x30] sm:$0xff] %vm745_vm0, %v3891_v0  ;;  %753 = vst.msk [vmem:[%s4286_s22 + $0x38] sm:$0xff] %vm745_vm0, %v3891_v0 }
  0x91   : > { %754 = vst.msk [vmem:[%s4286_s22 + $0x40] sm:$0xff] %vm745_vm0, %v3891_v0  ;;  %755 = vst.msk [vmem:[%s4286_s22 + $0x48] sm:$0xff] %vm745_vm0, %v3891_v0 }
  0x92   : > { %756 = vst.msk [vmem:[%s4286_s22 + $0x50] sm:$0xff] %vm745_vm0, %v3891_v0  ;;  %757 = vst.msk [vmem:[%s4286_s22 + $0x58] sm:$0xff] %vm745_vm0, %v3891_v0 }
  0x93   : > { %758 = vst.msk [vmem:[%s4286_s22 + $0x60] sm:$0xff] %vm745_vm0, %v3891_v0  ;;  %759 = vst.msk [vmem:[%s4286_s22 + $0x68] sm:$0xff] %vm745_vm0, %v3891_v0 }
  0x94   : > { %760 = vst.msk [vmem:[%s4286_s22 + $0x70] sm:$0xff] %vm745_vm0, %v3891_v0  ;;  %761 = vst.msk [vmem:[%s4286_s22 + $0x78] sm:$0xff] %vm745_vm0, %v3891_v0 }
  0x95   : > { %762 = vst.msk [vmem:[%s4286_s22 + $0x80] sm:$0xff] %vm745_vm0, %v3891_v0  ;;  %763 = vst.msk [vmem:[%s4286_s22 + $0x88] sm:$0xff] %vm745_vm0, %v3891_v0 }
  0x96   : > { %764 = vst.msk [vmem:[%s4286_s22 + $0x90] sm:$0xff] %vm745_vm0, %v3891_v0  ;;  %765 = vst.msk [vmem:[%s4286_s22 + $0x98] sm:$0xff] %vm745_vm0, %v3891_v0 }
  0x97   : > { %766 = vst.msk [vmem:[%s4286_s22 + $0xa0] sm:$0xff] %vm745_vm0, %v3891_v0  ;;  %767 = vst.msk [vmem:[%s4286_s22 + $0xa8] sm:$0xff] %vm745_vm0, %v3891_v0 }
  0x98   : > { %768 = vst.msk [vmem:[%s4286_s22 + $0xb0] sm:$0xff] %vm745_vm0, %v3891_v0  ;;  %769 = vst.msk [vmem:[%s4286_s22 + $0xb8] sm:$0xff] %vm745_vm0, %v3891_v0 }
  0x99   : > { %770 = vst.msk [vmem:[%s4286_s22 + $0xc0] sm:$0xff] %vm745_vm0, %v3891_v0  ;;  %771 = vst.msk [vmem:[%s4286_s22 + $0xc8] sm:$0xff] %vm745_vm0, %v3891_v0 }
  0x9a   : > { %772 = vst.msk [vmem:[%s4286_s22 + $0xd0] sm:$0xff] %vm745_vm0, %v3891_v0  ;;  %773 = vst.msk [vmem:[%s4286_s22 + $0xd8] sm:$0xff] %vm745_vm0, %v3891_v0 }
  0x9b   : > { %774 = vst.msk [vmem:[%s4286_s22 + $0xe0] sm:$0xff] %vm745_vm0, %v3891_v0  ;;  %775 = vst.msk [vmem:[%s4286_s22 + $0xe8] sm:$0xff] %vm745_vm0, %v3891_v0 }
  0x9c   : > { %776 = vst.msk [vmem:[%s4286_s22 + $0xf0] sm:$0xff] %vm745_vm0, %v3891_v0  ;;  %777 = vst.msk [vmem:[%s4286_s22 + $0xf8] sm:$0xff] %vm745_vm0, %v3891_v0 }
  0x9d   : > { %778 = vst.msk [vmem:[%s4291_s23] sm:$0xff] %vm745_vm0, %v3891_v0  ;;  %779 = vst.msk [vmem:[%s4291_s23 + $0x8] sm:$0xff] %vm745_vm0, %v3891_v0 }
  0x9e   : > { %780 = vst.msk [vmem:[%s4291_s23 + $0x10] sm:$0xff] %vm745_vm0, %v3891_v0  ;;  %781 = vst.msk [vmem:[%s4291_s23 + $0x18] sm:$0xff] %vm745_vm0, %v3891_v0 }
  0x9f   : > { %782 = vst.msk [vmem:[%s4291_s23 + $0x20] sm:$0xff] %vm745_vm0, %v3891_v0  ;;  %783 = vst.msk [vmem:[%s4291_s23 + $0x28] sm:$0xff] %vm745_vm0, %v3891_v0 }
  0xa0   : > { %784 = vst.msk [vmem:[%s4291_s23 + $0x30] sm:$0xff] %vm745_vm0, %v3891_v0  ;;  %785 = vst.msk [vmem:[%s4291_s23 + $0x38] sm:$0xff] %vm745_vm0, %v3891_v0 }
  0xa1   : > { %786 = vst.msk [vmem:[%s4291_s23 + $0x40] sm:$0xff] %vm745_vm0, %v3891_v0  ;;  %787 = vst.msk [vmem:[%s4291_s23 + $0x48] sm:$0xff] %vm745_vm0, %v3891_v0 }
  0xa2   : > { %788 = vst.msk [vmem:[%s4291_s23 + $0x50] sm:$0xff] %vm745_vm0, %v3891_v0  ;;  %789 = vst.msk [vmem:[%s4291_s23 + $0x58] sm:$0xff] %vm745_vm0, %v3891_v0 }
  0xa3   : > { %790 = vst.msk [vmem:[%s4291_s23 + $0x60] sm:$0xff] %vm745_vm0, %v3891_v0  ;;  %791 = vst.msk [vmem:[%s4291_s23 + $0x68] sm:$0xff] %vm745_vm0, %v3891_v0 }
  0xa4   : > { %792 = vst.msk [vmem:[%s4291_s23 + $0x70] sm:$0xff] %vm745_vm0, %v3891_v0  ;;  %793 = vst.msk [vmem:[%s4291_s23 + $0x78] sm:$0xff] %vm745_vm0, %v3891_v0 }
  0xa5   : > { %794 = vst.msk [vmem:[%s4291_s23 + $0x80] sm:$0xff] %vm745_vm0, %v3891_v0  ;;  %795 = vst.msk [vmem:[%s4291_s23 + $0x88] sm:$0xff] %vm745_vm0, %v3891_v0 }
  0xa6   : > { %796 = vst.msk [vmem:[%s4291_s23 + $0x90] sm:$0xff] %vm745_vm0, %v3891_v0  ;;  %797 = vst.msk [vmem:[%s4291_s23 + $0x98] sm:$0xff] %vm745_vm0, %v3891_v0 }
  0xa7   : > { %798 = vst.msk [vmem:[%s4291_s23 + $0xa0] sm:$0xff] %vm745_vm0, %v3891_v0  ;;  %799 = vst.msk [vmem:[%s4291_s23 + $0xa8] sm:$0xff] %vm745_vm0, %v3891_v0 }
  0xa8   : > { %800 = vst.msk [vmem:[%s4291_s23 + $0xb0] sm:$0xff] %vm745_vm0, %v3891_v0  ;;  %801 = vst.msk [vmem:[%s4291_s23 + $0xb8] sm:$0xff] %vm745_vm0, %v3891_v0 }
  0xa9   : > { %802 = vst.msk [vmem:[%s4291_s23 + $0xc0] sm:$0xff] %vm745_vm0, %v3891_v0  ;;  %803 = vst.msk [vmem:[%s4291_s23 + $0xc8] sm:$0xff] %vm745_vm0, %v3891_v0 }
  0xaa   : > { %804 = vst.msk [vmem:[%s4291_s23 + $0xd0] sm:$0xff] %vm745_vm0, %v3891_v0  ;;  %805 = vst.msk [vmem:[%s4291_s23 + $0xd8] sm:$0xff] %vm745_vm0, %v3891_v0 }
  0xab   : > { %806 = vst.msk [vmem:[%s4291_s23 + $0xe0] sm:$0xff] %vm745_vm0, %v3891_v0  ;;  %807 = vst.msk [vmem:[%s4291_s23 + $0xe8] sm:$0xff] %vm745_vm0, %v3891_v0 }
  0xac   : > { %808 = vst.msk [vmem:[%s4291_s23 + $0xf0] sm:$0xff] %vm745_vm0, %v3891_v0  ;;  %809 = vst.msk [vmem:[%s4291_s23 + $0xf8] sm:$0xff] %vm745_vm0, %v3891_v0 }
  0xad PF: > { %v3336_v1 = vld [vmem:[%s4296_s9 + $0x3f8] sm:$0xff]  ;;  %v3335_v4 = vld [vmem:[%s4296_s9 + $0x3f0] sm:$0xff]  ;;  %v3334_v7 = vld [vmem:[%s4296_s9 + $0x3e8] sm:$0xff]  ;;  %vm2268_vm2 = vcmask 7168  }
  0xae   : > { %v3320_v2 = vld [vmem:[%s4296_s9 + $0x378] sm:$0xff]  ;;  %3355 = vmatprep.subr.mxu0 %v3336_v1  ;;  %v3351_v5 = vld [vmem:[%s4296_s9 + $0x470] sm:$0xff]  ;;  %v3350_v8 = vld [vmem:[%s4296_s9 + $0x468] sm:$0xff] }
  0xaf   : > { %v3352_v3 = vld [vmem:[%s4296_s9 + $0x478] sm:$0xff]  ;;  %3356 = vmatpush3.xpose.msra.mxu0 %v3320_v2  ;;  %v3319_v6 = vld [vmem:[%s4296_s9 + $0x370] sm:$0xff]  ;;  %v3318_v9 = vld [vmem:[%s4296_s9 + $0x368] sm:$0xff] }
  0xb0   : > { %3499 = vmatprep.subr.mxu1 %v3352_v3  ;;  %3357 = vmatprep.subr.mxu0 %v3335_v4  ;;  %v3333_v10 = vld [vmem:[%s4296_s9 + $0x3e0] sm:$0xff]  ;;  %v3332_v13 = vld [vmem:[%s4296_s9 + $0x3d8] sm:$0xff]  ;;  %v3331_v16 = vld [vmem:[%s4296_s9 + $0x3d0] sm:$0xff] }
  0xb1   : > { %3500 = vmatpush3.xpose.msra.mxu1 %v3352_v3  ;;  %v3349_v11 = vld [vmem:[%s4296_s9 + $0x460] sm:$0xff]  ;;  %v3348_v14 = vld [vmem:[%s4296_s9 + $0x458] sm:$0xff]  ;;  %v3347_v17 = vld [vmem:[%s4296_s9 + $0x450] sm:$0xff] }
  0xb2   : > { %3501 = vmatprep.subr.mxu1 %v3351_v5  ;;  %v3317_v12 = vld [vmem:[%s4296_s9 + $0x360] sm:$0xff]  ;;  %v3316_v15 = vld [vmem:[%s4296_s9 + $0x358] sm:$0xff]  ;;  %v3315_v19 = vld [vmem:[%s4296_s9 + $0x350] sm:$0xff] }
  0xb3   : > { %3358 = vmatpush3.xpose.msra.mxu0 %v3319_v6  ;;  %v4524_v18 = vld [vmem:[%s4281_s19] sm:$0xff]  ;;  %v3330_v20 = vld [vmem:[%s4296_s9 + $0x3c8] sm:$0xff]  ;;  %v3328_v26 = vld [vmem:[%s4296_s9 + $0x3b8] sm:$0xff] }
  0xb4   : > { %3359 = vmatprep.subr.mxu0 %v3334_v7  ;;  %3387 = vmatprep.mubr.f32.mxu0 %v4524_v18  ;;  %v3346_v21 = vld [vmem:[%s4296_s9 + $0x448] sm:$0xff]  ;;  %v3329_v23 = vld [vmem:[%s4296_s9 + $0x3c0] sm:$0xff]  ;;  %v3344_v27 = vld [vmem:[%s4296_s9 + $0x438] sm:$0xff] }
  0xb5   : > { %3502 = vmatpush3.xpose.msra.mxu1 %v3351_v5  ;;  %3531 = vmatprep.mubr.f32.mxu1 %v4524_v18  ;;  %v3314_v22 = vld [vmem:[%s4296_s9 + $0x348] sm:$0xff]  ;;  %v3345_v24 = vld [vmem:[%s4296_s9 + $0x440] sm:$0xff]  ;;  %v3312_v28 = vld [vmem:[%s4296_s9 + $0x338] sm:$0xff] }
  0xb6   : > { %3503 = vmatprep.subr.mxu1 %v3350_v8  ;;  %v3313_v25 = vld [vmem:[%s4296_s9 + $0x340] sm:$0xff]  ;;  %v3327_v29 = vld [vmem:[%s4296_s9 + $0x3b0] sm:$0xff]  ;;  %v3326_v32 = vld [vmem:[%s4296_s9 + $0x3a8] sm:$0xff] }
  0xb7   : > { %3360 = vmatpush3.xpose.msra.mxu0 %v3318_v9  ;;  %v3343_v30 = vld [vmem:[%s4296_s9 + $0x430] sm:$0xff]  ;;  %v3342_v33 = vld [vmem:[%s4296_s9 + $0x428] sm:$0xff]  ;;  %v3325_v35 = vld [vmem:[%s4296_s9 + $0x3a0] sm:$0xff] }
  0xb8   : > { %3361 = vmatprep.subr.mxu0 %v3333_v10  ;;  %v3311_v31 = vld [vmem:[%s4296_s9 + $0x330] sm:$0xff]  ;;  %v3310_v34 = vld [vmem:[%s4296_s9 + $0x328] sm:$0xff]  ;;  %v3341_v36 = vld [vmem:[%s4296_s9 + $0x420] sm:$0xff] }
  0xb9   : > { %3504 = vmatpush3.xpose.msra.mxu1 %v3350_v8  ;;  %v3309_v37 = vld [vmem:[%s4296_s9 + $0x320] sm:$0xff]  ;;  %v3324_v38 = vld [vmem:[%s4296_s9 + $0x398] sm:$0xff]  ;;  %v3323_v41 = vld [vmem:[%s4296_s9 + $0x390] sm:$0xff] }
  0xba   : > { %3505 = vmatprep.subr.mxu1 %v3349_v11  ;;  %v3340_v39 = vld [vmem:[%s4296_s9 + $0x418] sm:$0xff]  ;;  %v3339_v42 = vld [vmem:[%s4296_s9 + $0x410] sm:$0xff]  ;;  %v3322_v44 = vld [vmem:[%s4296_s9 + $0x388] sm:$0xff] }
  0xbb   : > { %3362 = vmatpush3.xpose.msra.mxu0 %v3317_v12  ;;  %v3308_v40 = vld [vmem:[%s4296_s9 + $0x318] sm:$0xff]  ;;  %v3307_v43 = vld [vmem:[%s4296_s9 + $0x310] sm:$0xff]  ;;  %v3338_v45 = vld [vmem:[%s4296_s9 + $0x408] sm:$0xff] }
  0xbc   : > { %3363 = vmatprep.subr.mxu0 %v3332_v13  ;;  %v3306_v46 = vld [vmem:[%s4296_s9 + $0x308] sm:$0xff]  ;;  %v3321_v47 = vld [vmem:[%s4296_s9 + $0x380] sm:$0xff]  ;;  %v812_v51 = vld [vmem:[%s4281_s19 + $0x10] sm:$0xff] }
  0xbd   : > { %3506 = vmatpush3.xpose.msra.mxu1 %v3349_v11  ;;  %v3337_v48 = vld [vmem:[%s4296_s9 + $0x400] sm:$0xff]  ;;  %v811_v50 = vld [vmem:[%s4281_s19 + $0x8] sm:$0xff]  ;;  %v813_v52 = vld [vmem:[%s4281_s19 + $0x18] sm:$0xff] }
  0xbe   : > { %3507 = vmatprep.subr.mxu1 %v3348_v14  ;;  %v3305_v49 = vld [vmem:[%s4296_s9 + $0x300] sm:$0xff]  ;;  %v815_v54 = vld [vmem:[%s4281_s19 + $0x28] sm:$0xff]  ;;  %v816_v55 = vld [vmem:[%s4281_s19 + $0x30] sm:$0xff] }
  0xbf   : > { %3364 = vmatpush3.xpose.msra.mxu0 %v3316_v15  ;;  %v814_v53 = vld [vmem:[%s4281_s19 + $0x20] sm:$0xff]  ;;  %v817_v56 = vld [vmem:[%s4281_s19 + $0x38] sm:$0xff]  ;;  %v819_v58 = vld [vmem:[%s4281_s19 + $0x48] sm:$0xff] }
  0xc0   : > { %3365 = vmatprep.subr.mxu0 %v3331_v16  ;;  %v818_v57 = vld [vmem:[%s4281_s19 + $0x40] sm:$0xff]  ;;  %v820_v59 = vld [vmem:[%s4281_s19 + $0x50] sm:$0xff]  ;;  %v821_v60 = vld [vmem:[%s4281_s19 + $0x58] sm:$0xff] }
  0xc1   : > { %3508 = vmatpush3.xpose.msra.mxu1 %v3348_v14  ;;  %v822_v61 = vld [vmem:[%s4281_s19 + $0x60] sm:$0xff]  ;;  %v823_v62 = vld [vmem:[%s4281_s19 + $0x68] sm:$0xff]  ;;  %v824_v63 = vld [vmem:[%s4281_s19 + $0x70] sm:$0xff] }
  0xc2   : > { %3509 = vmatprep.subr.mxu1 %v3347_v17  ;;  %v825_v0 = vld [vmem:[%s4281_s19 + $0x78] sm:$0xff]  ;;  %v826_v1 = vld [vmem:[%s4281_s19 + $0x80] sm:$0xff]  ;;  %v827_v2 = vld [vmem:[%s4281_s19 + $0x88] sm:$0xff] }
  0xc3   : > { %3366 = vmatpush3.xpose.msra.mxu0 %v3315_v19  ;;  %v828_v3 = vld [vmem:[%s4281_s19 + $0x90] sm:$0xff]  ;;  %v829_v4 = vld [vmem:[%s4281_s19 + $0x98] sm:$0xff]  ;;  %v830_v5 = vld [vmem:[%s4281_s19 + $0xa0] sm:$0xff] }
  0xc4   : > { %3367 = vmatprep.subr.mxu0 %v3330_v20  ;;  %v831_v6 = vld [vmem:[%s4281_s19 + $0xa8] sm:$0xff]  ;;  %v832_v7 = vld [vmem:[%s4281_s19 + $0xb0] sm:$0xff]  ;;  %v833_v8 = vld [vmem:[%s4281_s19 + $0xb8] sm:$0xff] }
  0xc5   : > { %3510 = vmatpush3.xpose.msra.mxu1 %v3347_v17  ;;  %v834_v9 = vld [vmem:[%s4281_s19 + $0xc0] sm:$0xff]  ;;  %v835_v10 = vld [vmem:[%s4281_s19 + $0xc8] sm:$0xff]  ;;  %v836_v11 = vld [vmem:[%s4281_s19 + $0xd0] sm:$0xff] }
  0xc6   : > { %3511 = vmatprep.subr.mxu1 %v3346_v21  ;;  %v837_v12 = vld [vmem:[%s4281_s19 + $0xd8] sm:$0xff]  ;;  %v838_v13 = vld [vmem:[%s4281_s19 + $0xe0] sm:$0xff]  ;;  %v839_v14 = vld [vmem:[%s4281_s19 + $0xe8] sm:$0xff] }
  0xc7   : > { %3368 = vmatpush3.xpose.msra.mxu0 %v3314_v22  ;;  %v840_v15 = vld [vmem:[%s4281_s19 + $0xf0] sm:$0xff]  ;;  %v841_v16 = vld [vmem:[%s4281_s19 + $0xf8] sm:$0xff]  ;;  %v4592_v17 = vld [vmem:[%s4309_s0] sm:$0xff] }
  0xc8   : > { %3369 = vmatprep.subr.mxu0 %v3329_v23  ;;  %v4598_v19 = vld [vmem:[%s4309_s0 + $0x8] ss:$60 sps:$4 sm:$0xff]   ;;  %v4601_v20 = vld [vmem:[%s4309_s0 + $0x18] sm:$0xff] }
  0xc9   : > { %3512 = vmatpush3.xpose.msra.mxu1 %v3346_v21  ;;  %v4604_v21 = vld [vmem:[%s4309_s0 + $0x20] ss:$12 sps:$4 sm:$0xff]   ;;  %v4607_v22 = vld [vmem:[%s4309_s0 + $0x24] sm:$0xff]  ;;  %v4610_v23 = vld [vmem:[%s4309_s0 + $0x14] ss:$36 sps:$4 sm:$0xff]  }
  0xca   : > { %3513 = vmatprep.subr.mxu1 %v3345_v24 }
  0xcb   : > { %3370 = vmatpush3.xpose.msra.mxu0 %v3313_v25  ;;  %v4841_v25 = vld [vmem:[%s4311_s3 + $0x84] sm:$0xff] }
  0xcc   : > { %3371 = vmatprep.subr.mxu0 %v3328_v26  ;;  %v4833_v26 = vld [vmem:[%s4311_s3 + $0x78] sm:$0xff]  ;;  %6347 = vst [vmem:[#allocation29_spill] sm:$0xff] %v4841_v25  ;;  %v6357_v25 = vunpack.c.h.bf16 %v4592_v17 }
  0xcd   : > { %3514 = vmatpush3.xpose.msra.mxu1 %v3345_v24  ;;  %6346 = vst [vmem:[#allocation28_spill] sm:$0xff] %v4833_v26  ;;  %v4874_v26 = vld [vmem:[%s4311_s3 + $0x9c] sm:$0xff]  ;;  %v6355_v24 = vunpack.c.l.bf16 %v4592_v17  ;;  %v6360_v17 = vunpack.c.h.bf16 %v4604_v21 }
  0xce   : > { %3515 = vmatprep.subr.mxu1 %v3344_v27  ;;  %6354 = vst [vmem:[#allocation36_spill] sm:$0xff] %v4874_v26 }
  0xcf   : > { %3372 = vmatpush3.xpose.msra.mxu0 %v3312_v28  ;;  %v4617_v28 = vld [vmem:[%s4309_s0 + $0x30] sm:$0xff] }
  0xd0   : > { %3373 = vmatprep.subr.mxu0 %v3327_v29 }
  0xd1   : > { %3516 = vmatpush3.xpose.msra.mxu1 %v3344_v27 }
  0xd2   : > { %3517 = vmatprep.subr.mxu1 %v3343_v30 }
  0xd3   : > { %3374 = vmatpush3.xpose.msra.mxu0 %v3311_v31  ;;  %v4808_v31 = vld [vmem:[%s4311_s3 + $0x80] ss:$12 sps:$4 sm:$0xff]  }
  0xd4   : > { %3375 = vmatprep.subr.mxu0 %v3326_v32  ;;  %6341 = vst [vmem:[#allocation23_spill] sm:$0xff] %v4808_v31  ;;  %v4823_v32 = vld [vmem:[%s4309_s0 + $0x170] ss:$12 sps:$4 sm:$0xff]  }
  0xd5   : > { %3518 = vmatpush3.xpose.msra.mxu1 %v3343_v30  ;;  %v4814_v30 = vld [vmem:[%s4311_s3 + $0x6c] sm:$0xff]  ;;  %6344 = vst [vmem:[#allocation26_spill] sm:$0xff] %v4823_v32 }
  0xd6   : > { %3519 = vmatprep.subr.mxu1 %v3342_v33  ;;  %6342 = vst [vmem:[#allocation24_spill] sm:$0xff] %v4814_v30  ;;  %v4861_v30 = vld [vmem:[%s4311_s3 + $0x90] sm:$0xff] }
  0xd7   : > { %3376 = vmatpush3.xpose.msra.mxu0 %v3310_v34  ;;  %v4627_v34 = vld [vmem:[%s4309_s0 + $0x3c] sm:$0xff]  ;;  %6352 = vst [vmem:[#allocation34_spill] sm:$0xff] %v4861_v30 }
  0xd8   : > { %3377 = vmatprep.subr.mxu0 %v3325_v35  ;;  %v4630_v35 = vld [vmem:[%s4311_s3] sm:$0xff] }
  0xd9   : > { %3520 = vmatpush3.xpose.msra.mxu1 %v3342_v33  ;;  %v4624_v33 = vld [vmem:[%s4309_s0 + $0x50] ss:$12 sps:$4 sm:$0xff]  }
  0xda   : > { %3521 = vmatprep.subr.mxu1 %v3341_v36 }
  0xdb   : > { %3378 = vmatpush3.xpose.msra.mxu0 %v3309_v37 }
  0xdc   : > { %3379 = vmatprep.subr.mxu0 %v3324_v38 }
  0xdd   : > { %3522 = vmatpush3.xpose.msra.mxu1 %v3341_v36 }
  0xde   : > { %3523 = vmatprep.subr.mxu1 %v3340_v39 }
  0xdf   : > { %3380 = vmatpush3.xpose.msra.mxu0 %v3308_v40  ;;  %v4637_v40 = vld [vmem:[%s4311_s3 + $0x8] ss:$12 sps:$4 sm:$0xff]  }
  0xe0   : > { %3381 = vmatprep.subr.mxu0 %v3323_v41  ;;  %v4818_v41 = vld [vmem:[%s4309_s0 + $0xc0] sm:$0xff] }
  0xe1   : > { %3524 = vmatpush3.xpose.msra.mxu1 %v3340_v39  ;;  %6343 = vst [vmem:[#allocation25_spill] sm:$0xff] %v4818_v41  ;;  %v4849_v39 = vld [vmem:[%s4309_s0 + $0xcc] sm:$0xff] }
  0xe2   : > { %3525 = vmatprep.subr.mxu1 %v3339_v42  ;;  %6349 = vst [vmem:[#allocation31_spill] sm:$0xff] %v4849_v39 }
  0xe3   : > { %3382 = vmatpush3.xpose.msra.mxu0 %v3307_v43  ;;  %v4805_v43 = vld [vmem:[%s4309_s0 + $0x158] ss:$12 sps:$4 sm:$0xff]  }
  0xe4   : > { %3383 = vmatprep.subr.mxu0 %v3322_v44  ;;  %6340 = vst [vmem:[#allocation22_spill] sm:$0xff] %v4805_v43 }
  0xe5   : > { %3526 = vmatpush3.xpose.msra.mxu1 %v3339_v42  ;;  %v4827_v42 = vld [vmem:[%s4311_s3 + $0x98] ss:$12 sps:$4 sm:$0xff]  }
  0xe6   : > { %3527 = vmatprep.subr.mxu1 %v3338_v45  ;;  %6345 = vst [vmem:[#allocation27_spill] sm:$0xff] %v4827_v42 }
  0xe7   : > { %3384 = vmatpush3.xpose.msra.mxu0 %v3306_v46  ;;  %v4647_v46 = vld [vmem:[%s4309_s0 + $0x48] sm:$0xff] }
  0xe8   : > { %3385 = vmatprep.subr.mxu0 %v3321_v47  ;;  %v4788_v47 = vld [vmem:[%s4309_s0 + $0x140] ss:$12 sps:$4 sm:$0xff]  }
  0xe9   : > { %3528 = vmatpush3.xpose.msra.mxu1 %v3338_v45  ;;  %v4644_v45 = vld [vmem:[%s4309_s0 + $0x68] ss:$12 sps:$4 sm:$0xff]   ;;  %6337 = vst [vmem:[#allocation19_spill] sm:$0xff] %v4788_v47 }
  0xea   : > { %3529 = vmatprep.subr.mxu1 %v3337_v48 }
  0xeb   : > { %3386 = vmatpush3.xpose.msra.mxu0 %v3305_v49  ;;  %v6234_v49 = vlaneseq }
  0xed   : > { %3530 = vmatpush3.xpose.msra.mxu1 %v3337_v48  ;;  %v4779_v48 = vld [vmem:[%s4309_s0 + $0x128] ss:$12 sps:$4 sm:$0xff]  }
  0xee   : > { %3388 = vmatmul.mubr.f32.vlgmr.msra.gmra.mxu0 %v4524_v18  ;;  %v4595_v18 = vld [vmem:[%s4309_s0 + $0xc] sm:$0xff]  ;;  %6335 = vst [vmem:[#allocation17_spill] sm:$0xff] %v4779_v48 }
  0xef   : > { %3389 = vmatprep.mubr.f32.mxu0 %v811_v50 }
  0xf0   : > { %3532 = vmatmul.mubr.f32.vlgmr.msra.gmra.mxu1 %v811_v50 }
  0xf1   : > { %3534 = vmatprep.mubr.f32.mxu1 %v812_v51 }
  0xf2   : > { %3390 = vmatmul.mubr.f32.gmra.mxu0 %v811_v50  ;;  %v4653_v50 = vld [vmem:[%s4309_s0 + $0x80] ss:$12 sps:$4 sm:$0xff]  }
  0xf3   : > { %3391 = vmatprep.mubr.f32.mxu0 %v812_v51 }
  0xf4   : > { %3535 = vmatmul.mubr.f32.gmra.mxu1 %v813_v52 }
  0xf5   : > { %3537 = vmatprep.mubr.f32.mxu1 %v814_v53 }
  0xf6   : > { %3392 = vmatmul.mubr.f32.gmra.mxu0 %v812_v51  ;;  %v4737_v51 = vld [vmem:[%s4311_s3 + $0x50] ss:$12 sps:$4 sm:$0xff]  }
  0xf7   : > { %3393 = vmatprep.mubr.f32.mxu0 %v813_v52  ;;  %6327 = vst [vmem:[#allocation9_spill] sm:$0xff] %v4737_v51 }
  0xf8   : > { %3538 = vmatmul.mubr.f32.gmra.mxu1 %v815_v54 }
  0xf9   : > { %3540 = vmatprep.mubr.f32.mxu1 %v816_v55 }
  0xfa   : > { %3394 = vmatmul.mubr.f32.gmra.mxu0 %v813_v52  ;;  %v4657_v52 = vld [vmem:[%s4309_s0 + $0x54] sm:$0xff] }
  0xfb   : > { %3395 = vmatprep.mubr.f32.mxu0 %v814_v53 }
  0xfc   : > { %3541 = vmatmul.mubr.f32.gmra.mxu1 %v817_v56 }
  0xfd   : > { %3543 = vmatprep.mubr.f32.mxu1 %v818_v57 }
  0xfe   : > { %3396 = vmatmul.mubr.f32.gmra.mxu0 %v814_v53  ;;  %v4660_v53 = vld [vmem:[%s4311_s3 + $0xc] sm:$0xff] }
  0xff   : > { %3397 = vmatprep.mubr.f32.mxu0 %v815_v54 }
 0x100   : > { %3544 = vmatmul.mubr.f32.gmra.mxu1 %v819_v58 }
 0x101   : > { %3546 = vmatprep.mubr.f32.mxu1 %v820_v59 }
 0x102   : > { %3398 = vmatmul.mubr.f32.gmra.mxu0 %v815_v54  ;;  %v4773_v54 = vld [vmem:[%s4311_s3 + $0x68] ss:$12 sps:$4 sm:$0xff]  }
 0x103   : > { %3399 = vmatprep.mubr.f32.mxu0 %v816_v55  ;;  %6334 = vst [vmem:[#allocation16_spill] sm:$0xff] %v4773_v54 }
 0x104   : > { %3547 = vmatmul.mubr.f32.gmra.mxu1 %v821_v60 }
 0x105   : > { %3549 = vmatprep.mubr.f32.mxu1 %v822_v61 }
 0x106   : > { %3400 = vmatmul.mubr.f32.gmra.mxu0 %v816_v55  ;;  %v4763_v55 = vld [vmem:[%s4309_s0 + $0x9c] sm:$0xff] }
 0x107   : > { %3401 = vmatprep.mubr.f32.mxu0 %v817_v56  ;;  %6332 = vst [vmem:[#allocation14_spill] sm:$0xff] %v4763_v55 }
 0x108   : > { %3550 = vmatmul.mubr.f32.gmra.mxu1 %v823_v62 }
 0x109   : > { %3552 = vmatprep.mubr.f32.mxu1 %v824_v63 }
 0x10a   : > { %3402 = vmatmul.mubr.f32.gmra.mxu0 %v817_v56  ;;  %v4747_v56 = vld [vmem:[%s4309_s0 + $0x90] sm:$0xff] }
 0x10b   : > { %3403 = vmatprep.mubr.f32.mxu0 %v818_v57  ;;  %6329 = vst [vmem:[#allocation11_spill] sm:$0xff] %v4747_v56 }
 0x10c   : > { %3553 = vmatmul.mubr.f32.gmra.mxu1 %v825_v0 }
 0x10d   : > { %3555 = vmatprep.mubr.f32.mxu1 %v826_v1 }
 0x10e   : > { %3404 = vmatmul.mubr.f32.gmra.mxu0 %v818_v57  ;;  %v4724_v57 = vld [vmem:[%s4309_s0 + $0xe0] ss:$12 sps:$4 sm:$0xff]  }
 0x10f   : > { %3405 = vmatprep.mubr.f32.mxu0 %v819_v58 }
 0x110   : > { %3556 = vmatmul.mubr.f32.gmra.mxu1 %v827_v2 }
 0x111   : > { %3558 = vmatprep.mubr.f32.mxu1 %v828_v3 }
 0x112   : > { %3406 = vmatmul.mubr.f32.gmra.mxu0 %v819_v58  ;;  %v4667_v58 = vld [vmem:[%s4309_s0 + $0x98] ss:$12 sps:$4 sm:$0xff]  }
 0x113   : > { %3407 = vmatprep.mubr.f32.mxu0 %v820_v59 }
 0x114   : > { %3559 = vmatmul.mubr.f32.gmra.mxu1 %v829_v4 }
 0x115   : > { %3561 = vmatprep.mubr.f32.mxu1 %v830_v5 }
 0x116   : > { %3408 = vmatmul.mubr.f32.gmra.mxu0 %v820_v59  ;;  %v3892_v59 = vmov 1966171168  }
 0x117   : > { %3409 = vmatprep.mubr.f32.mxu0 %v821_v60  ;;  %v2737_v44 = vunpack.c.l.s4 %v3892_v59  ;;  %v4853_v59 = vld [vmem:[%s4309_s0 + $0xd8] sm:$0xff] }
 0x118   : > { %3562 = vmatmul.mubr.f32.gmra.mxu1 %v831_v6  ;;  %6350 = vst [vmem:[#allocation32_spill] sm:$0xff] %v4853_v59 }
 0x119   : > { %3564 = vmatprep.mubr.f32.mxu1 %v832_v7  ;;  %v2738_v29 = vunpack.c.0.s8 %v2737_v44  ;;  %v4868_v44 = vld [vmem:[%s4309_s0 + $0xe4] sm:$0xff] }
 0x11a   : > { %3410 = vmatmul.mubr.f32.gmra.mxu0 %v821_v60  ;;  %v4759_v60 = vld [vmem:[%s4309_s0 + $0x110] ss:$12 sps:$4 sm:$0xff]   ;;  %6353 = vst [vmem:[#allocation35_spill] sm:$0xff] %v4868_v44 }
 0x11b   : > { %3411 = vmatprep.mubr.f32.mxu0 %v822_v61  ;;  %6331 = vst [vmem:[#allocation13_spill] sm:$0xff] %v4759_v60 }
 0x11c   : > { %3565 = vmatmul.mubr.f32.gmra.mxu1 %v833_v8 }
 0x11d   : > { %3567 = vmatprep.mubr.f32.mxu1 %v834_v9 }
 0x11e   : > { %3412 = vmatmul.mubr.f32.gmra.mxu0 %v822_v61  ;;  %v4844_v61 = vld [vmem:[%s4311_s3 + $0xb0] ss:$12 sps:$4 sm:$0xff]  }
 0x11f   : > { %3413 = vmatprep.mubr.f32.mxu0 %v823_v62  ;;  %6348 = vst [vmem:[#allocation30_spill] sm:$0xff] %v4844_v61 }
 0x120   : > { %3568 = vmatmul.mubr.f32.gmra.mxu1 %v835_v10 }
 0x121   : > { %3570 = vmatprep.mubr.f32.mxu1 %v836_v11 }
 0x122   : > { %3414 = vmatmul.mubr.f32.gmra.mxu0 %v823_v62  ;;  %v4744_v62 = vld [vmem:[%s4309_s0 + $0xf8] ss:$12 sps:$4 sm:$0xff]  }
 0x123   : > { %3415 = vmatprep.mubr.f32.mxu0 %v824_v63  ;;  %6328 = vst [vmem:[#allocation10_spill] sm:$0xff] %v4744_v62 }
 0x124   : > { %3571 = vmatmul.mubr.f32.gmra.mxu1 %v837_v12 }
 0x125   : > { %3573 = vmatprep.mubr.f32.mxu1 %v838_v13 }
 0x126   : > { %3416 = vmatmul.mubr.f32.gmra.mxu0 %v824_v63  ;;  %v4674_v63 = vld [vmem:[%s4309_s0 + $0x60] sm:$0xff] }
 0x127   : > { %3417 = vmatprep.mubr.f32.mxu0 %v825_v0 }
 0x128   : > { %3574 = vmatmul.mubr.f32.gmra.mxu1 %v839_v14 }
 0x129   : > { %3576 = vmatprep.mubr.f32.mxu1 %v840_v15 }
 0x12a   : > { %3418 = vmatmul.mubr.f32.gmra.mxu0 %v825_v0  ;;  %v4677_v0 = vld [vmem:[%s4309_s0 + $0xb0] ss:$12 sps:$4 sm:$0xff]  }
 0x12b   : > { %3419 = vmatprep.mubr.f32.mxu0 %v826_v1 }
 0x12c   : > { %3577 = vmatmul.mubr.f32.gmra.mxu1 %v841_v16 }
 0x12e   : > { %3420 = vmatmul.mubr.f32.gmra.mxu0 %v826_v1  ;;  %v4770_v1 = vld [vmem:[%s4311_s3 + $0x54] sm:$0xff] }
 0x12f   : > { %3421 = vmatprep.mubr.f32.mxu0 %v827_v2  ;;  %6333 = vst [vmem:[#allocation15_spill] sm:$0xff] %v4770_v1 }
 0x132   : > { %3422 = vmatmul.mubr.f32.gmra.mxu0 %v827_v2  ;;  %v4798_v2 = vld [vmem:[%s4309_s0 + $0xb4] sm:$0xff] }
 0x133   : > { %3423 = vmatprep.mubr.f32.mxu0 %v828_v3  ;;  %6339 = vst [vmem:[#allocation21_spill] sm:$0xff] %v4798_v2 }
 0x136   : > { %3424 = vmatmul.mubr.f32.gmra.mxu0 %v828_v3  ;;  %v4707_v3 = vld [vmem:[%s4311_s3 + $0x30] sm:$0xff] }
 0x137   : > { %3425 = vmatprep.mubr.f32.mxu0 %v829_v4  ;;  %6323 = vst [vmem:[#allocation5_spill] sm:$0xff] %v4707_v3 }
 0x13a   : > { %3426 = vmatmul.mubr.f32.gmra.mxu0 %v829_v4  ;;  %v4704_v4 = vld [vmem:[%s4309_s0 + $0xc8] ss:$12 sps:$4 sm:$0xff]  }
 0x13b   : > { %3427 = vmatprep.mubr.f32.mxu0 %v830_v5 }
 0x13e   : > { %3428 = vmatmul.mubr.f32.gmra.mxu0 %v830_v5  ;;  %v4684_v5 = vld [vmem:[%s4311_s3 + $0x18] sm:$0xff] }
 0x13f   : > { %3429 = vmatprep.mubr.f32.mxu0 %v831_v6 }
 0x142   : > { %3430 = vmatmul.mubr.f32.gmra.mxu0 %v831_v6  ;;  %v4687_v6 = vld [vmem:[%s4311_s3 + $0x20] ss:$12 sps:$4 sm:$0xff]  }
 0x143   : > { %3431 = vmatprep.mubr.f32.mxu0 %v832_v7 }
 0x146   : > { %3432 = vmatmul.mubr.f32.gmra.mxu0 %v832_v7  ;;  %v4690_v7 = vld [vmem:[%s4311_s3 + $0x24] sm:$0xff] }
 0x147   : > { %3433 = vmatprep.mubr.f32.mxu0 %v833_v8 }
 0x14a   : > { %3434 = vmatmul.mubr.f32.gmra.mxu0 %v833_v8  ;;  %v4717_v8 = vld [vmem:[%s4309_s0 + $0x78] sm:$0xff] }
 0x14b   : > { %3435 = vmatprep.mubr.f32.mxu0 %v834_v9 }
 0x14e   : > { %3436 = vmatmul.mubr.f32.gmra.mxu0 %v834_v9  ;;  %v4710_v9 = vld [vmem:[%s4311_s3 + $0x38] ss:$12 sps:$4 sm:$0xff]  }
 0x14f   : > { %3437 = vmatprep.mubr.f32.mxu0 %v835_v10  ;;  %6324 = vst [vmem:[#allocation6_spill] sm:$0xff] %v4710_v9 }
 0x152   : > { %3438 = vmatmul.mubr.f32.gmra.mxu0 %v835_v10  ;;  %v4791_v10 = vld [vmem:[%s4311_s3 + $0x60] sm:$0xff] }
 0x153   : > { %3439 = vmatprep.mubr.f32.mxu0 %v836_v11  ;;  %6338 = vst [vmem:[#allocation20_spill] sm:$0xff] %v4791_v10  ;;  %v6356_v10 = vunpack.c.l.bf16 %v4610_v23 }
 0x156   : > { %3440 = vmatmul.mubr.f32.gmra.mxu0 %v836_v11  ;;  %v4783_v11 = vld [vmem:[%s4309_s0 + $0xa8] sm:$0xff] }
 0x157   : > { %3441 = vmatprep.mubr.f32.mxu0 %v837_v12  ;;  %6336 = vst [vmem:[#allocation18_spill] sm:$0xff] %v4783_v11 }
 0x15a   : > { %3442 = vmatmul.mubr.f32.gmra.mxu0 %v837_v12  ;;  %v4697_v12 = vld [vmem:[%s4309_s0 + $0x6c] sm:$0xff] }
 0x15b   : > { %3443 = vmatprep.mubr.f32.mxu0 %v838_v13 }
 0x15e   : > { %3444 = vmatmul.mubr.f32.gmra.mxu0 %v838_v13  ;;  %v4727_v13 = vld [vmem:[%s4311_s3 + $0x3c] sm:$0xff] }
 0x15f   : > { %3445 = vmatprep.mubr.f32.mxu0 %v839_v14  ;;  %6325 = vst [vmem:[#allocation7_spill] sm:$0xff] %v4727_v13 }
 0x162   : > { %3446 = vmatmul.mubr.f32.gmra.mxu0 %v839_v14  ;;  %v2740_v14 = vshrl.u32 %v6234_v49, 7 }
 0x163   : > { %3447 = vmatprep.mubr.f32.mxu0 %v840_v15 }
 0x164   : > { %v4856_v49 = vsub.s32 %v2738_v29, %v2740_v14 }
 0x166   : > { %3448 = vmatmul.mubr.f32.gmra.mxu0 %v840_v15  ;;  %v4734_v15 = vld [vmem:[%s4309_s0 + $0x84] sm:$0xff]  ;;  %6351 = vst [vmem:[#allocation33_spill] sm:$0xff] %v4856_v49 }
 0x167   : > { %3449 = vmatprep.mubr.f32.mxu0 %v841_v16  ;;  %6326 = vst [vmem:[#allocation8_spill] sm:$0xff] %v4734_v15 }
 0x16a   : > { %3450 = vmatmul.mubr.f32.gmra.mxu0 %v841_v16  ;;  %v4750_v16 = vld [vmem:[%s4311_s3 + $0x48] sm:$0xff] }
 0x16b   : > { %6330 = vst [vmem:[#allocation12_spill] sm:$0xff] %v4750_v16 }
 0x1ae   : > { %v956_v36 = vpop.f32.mrf.mxu0 }
 0x1af   : > { %v1372_v14 = vmul.f32 5.0, %v956_v36 }
 0x1b0   : > { %v3533_v32 = vpop.f32.mrf.mxu1  ;;  %v958_v37 = vpop.f32.mrf.mxu0 }
 0x1b1   : > { %v1377_v27 = vmul.f32 5.0, %v3533_v32  ;;  %v1468_v43 = vmul.f32 1.442695, %v1372_v14  ;;  %v1373_v29 = vmul.f32 5.0, %v958_v37  ;;  %v2333_v49 = vmul.f32 %v6355_v24, %v1372_v14 }
 0x1b2   : > { %v1213_v42 = vpop.f32.mrf.mxu1  ;;  %v962_v39 = vpop.f32.mrf.mxu0 }
 0x1b3   : > { %v1478_v36 = vmul.f32 1.442695, %v1377_v27  ;;  %v1374_v2 = vmul.f32 5.0, %v1213_v42  ;;  %v4885_v41 = vmul.f32 %v6356_v10, %v1377_v27  ;;  %3643 = vpow2.f32 %v1468_v43 }
 0x1b4   : > { %v3536_v54 = vpop.f32.mrf.mxu1  ;;  %v1470_v31 = vmul.f32 1.442695, %v1373_v29  ;;  %v2334_v37 = vmul.f32 %v6357_v25, %v1373_v29  ;;  %v1375_v59 = vmul.f32 5.0, %v962_v39  ;;  %v964_v44 = vpop.f32.mrf.mxu0  ;;  %v6358_v42 = vunpack.c.l.bf16 %v4598_v19 }
 0x1b5   : > { %3645 = vpow2.f32 %v1478_v36  ;;  %v1472_v32 = vmul.f32 1.442695, %v1374_v2  ;;  %v1383_v30 = vmul.f32 5.0, %v3536_v54  ;;  %v6359_v27 = vunpack.c.l.bf16 %v4595_v18 }
 0x1b6   : > { %v1223_v24 = vpop.f32.mrf.mxu1  ;;  %v2335_v14 = vmul.f32 %v6358_v42, %v1374_v2  ;;  %3647 = vpow2.f32 %v1470_v31  ;;  %v1474_v47 = vmul.f32 1.442695, %v1375_v59  ;;  %v1376_v38 = vmul.f32 5.0, %v964_v44  ;;  %v968_v43 = vpop.f32.mrf.mxu0 }
 0x1b7   : > { %v2336_v10 = vmul.f32 %v6359_v27, %v1375_v59  ;;  %3649 = vpow2.f32 %v1472_v32  ;;  %v1490_v11 = vmul.f32 1.442695, %v1383_v30  ;;  %v4896_v25 = vmul.f32 %v6360_v17, %v1383_v30 }
 0x1b8   : > { %v1380_v39 = vmul.f32 5.0, %v1223_v24  ;;  %v3539_v29 = vpop.f32.mrf.mxu1  ;;  %3651 = vpow2.f32 %v1474_v47  ;;  %v1476_v36 = vmul.f32 1.442695, %v1376_v38  ;;  %v6361_v2 = vunpack.c.h.bf16 %v4595_v18  ;;  %v970_v1 = vpop.f32.mrf.mxu0 }
 0x1b9   : > { %v2764_v54 = vadd.f32 %v2336_v10, %v2333_v49  ;;  %v1378_v42 = vmul.f32 5.0, %v968_v43  ;;  %3653 = vpow2.f32 %v1490_v11  ;;  %v6362_v44 = vunpack.c.l.bf16 %v4604_v21 }
 0x1ba   : > { %v2337_v31 = vmul.f32 %v6361_v2, %v1376_v38  ;;  %v1484_v59 = vmul.f32 1.442695, %v1380_v39  ;;  %v1233_v27 = vpop.f32.mrf.mxu1  ;;  %3655 = vpow2.f32 %v1476_v36  ;;  %v1379_v17 = vmul.f32 5.0, %v970_v1  ;;  %v974_v18 = vpop.f32.mrf.mxu0 }
 0x1bb   : > { %v4902_v32 = vmul.f32 %v6362_v44, %v1380_v39  ;;  %v2429_v24 = vadd.f32 %v2334_v37, %v2333_v49  ;;  %v1480_v48 = vmul.f32 1.442695, %v1378_v42  ;;  %v6363_v47 = vunpack.c.l.bf16 %v4601_v20 }
 0x1bc   : > { %v2801_v30 = vadd.f32 %v2337_v31, %v2334_v37  ;;  %3657 = vpow2.f32 %v1484_v59  ;;  %v1389_v38 = vmul.f32 5.0, %v3539_v29  ;;  %v3542_v11 = vpop.f32.mrf.mxu1  ;;  %v1482_v43 = vmul.f32 1.442695, %v1379_v17 }
 0x1bd   : > { %v4906_v55 = vmul.f32 %v6363_v47, %v1378_v42  ;;  %v6364_v2 = vunpack.c.h.bf16 %v4601_v20  ;;  %v2430_v39 = vadd.f32 %v2429_v24, %v2335_v14  ;;  %v1381_v44 = vmul.f32 5.0, %v974_v18  ;;  %v976_v42 = vpop.f32.mrf.mxu0 }
 0x1be   : > { %3659 = vpow2.f32 %v1480_v48  ;;  %v1502_v49 = vmul.f32 1.442695, %v1389_v38  ;;  %v6365_v37 = vunpack.c.h.bf16 %v4598_v19  ;;  %v1243_v59 = vpop.f32.mrf.mxu1  ;;  %v6366_v20 = vunpack.c.l.bf16 %v4607_v22 }
 0x1bf   : > { %v4910_v21 = vmul.f32 %v6364_v2, %v1379_v17  ;;  %v2765_v1 = vadd.f32 %v2764_v54, %v4906_v55  ;;  %3661 = vpow2.f32 %v1482_v43  ;;  %2431 = vadd.xlane.f32.xlu0 %v2430_v39  ;;  %v1486_v47 = vmul.f32 1.442695, %v1381_v44  ;;  %v980_v18 = vpop.f32.mrf.mxu0 }
 0x1c0   : > { %v4915_v36 = vmul.f32 %v6365_v37, %v1389_v38  ;;  %v4920_v17 = vmul.f32 %v6366_v20, %v1381_v44  ;;  %3663 = vpow2.f32 %v1502_v49  ;;  %v1382_v48 = vmul.f32 5.0, %v976_v42  ;;  %v3545_v2 = vpop.f32.mrf.mxu1  ;;  %v4924_v37 = vpop.eup %3643 }
 0x1c1   : > { %v2802_v29 = vadd.f32 %v2801_v30, %v4910_v21  ;;  %v1386_v24 = vmul.f32 5.0, %v1233_v27  ;;  %v2433_v54 = vadd.f32 %v2337_v31, %v2336_v10  ;;  %3665 = vpow2.f32 %v1486_v47  ;;  %v982_v10 = vpop.f32.mrf.mxu0 }
 0x1c2   : > { %v2766_v19 = vadd.f32 %v2765_v1, %v4920_v17  ;;  %v2838_v38 = vadd.f32 %v4885_v41, %v2335_v14  ;;  %v1384_v43 = vmul.f32 5.0, %v980_v18  ;;  %v1488_v30 = vmul.f32 1.442695, %v1382_v48  ;;  %v1253_v31 = vpop.f32.mrf.mxu1  ;;  %v4934_v42 = vpop.eup %3645 }
 0x1c3   : > { %v6367_v39 = vunpack.c.h.bf16 %v4607_v22  ;;  %v1496_v44 = vmul.f32 1.442695, %v1386_v24  ;;  %v6368_v49 = vunpack.c.h.bf16 %v4610_v23  ;;  %v2434_v1 = vadd.f32 %v2433_v54, %v4885_v41  ;;  %v4942_v22 = vpop.eup %3647 }
 0x1c4   : > { %v2839_v14 = vadd.f32 %v2838_v38, %v4902_v32  ;;  %v1492_v47 = vmul.f32 1.442695, %v1384_v43  ;;  %v6369_v20 = vunpack.c.l.bf16 %v4617_v28  ;;  %3667 = vpow2.f32 %v1488_v30  ;;  %v4947_v16 = vpop.eup %3649 }
 0x1c5   : > { %v4928_v51 = vmul.f32 %v6367_v39, %v1382_v48  ;;  %v4932_v27 = vmul.f32 %v6368_v49, %v1386_v24  ;;  %v1395_v48 = vmul.f32 5.0, %v3542_v11  ;;  %v1385_v24 = vmul.f32 5.0, %v982_v10  ;;  %v986_v39 = vpop.f32.mrf.mxu0  ;;  %v4945_v49 = vpop.f32.mrf.mxu1  ;;  %2435 = vadd.xlane.f32.xlu1 %v2434_v1 }
 0x1c6   : > { %v4940_v18 = vmul.f32 %v6369_v20, %v1384_v43  ;;  %3669 = vpow2.f32 %v1496_v44  ;;  %v2840_v41 = vadd.f32 %v2839_v14, %v4896_v25  ;;  %v1392_v38 = vmul.f32 5.0, %v1243_v59  ;;  %v4951_v43 = vpop.eup %3651 }
 0x1c7   : > { %v2803_v23 = vadd.f32 %v2802_v29, %v4928_v51  ;;  %3671 = vpow2.f32 %v1492_v47  ;;  %v1514_v30 = vmul.f32 1.442695, %v1395_v48  ;;  %v6370_v29 = vunpack.c.h.bf16 %v4624_v33  ;;  %v988_v20 = vpop.f32.mrf.mxu0  ;;  %v1263_v60 = vpop.f32.mrf.mxu1 }
 0x1c8   : > { %v2767_v54 = vadd.f32 %v2766_v19, %v4940_v18  ;;  %v1494_v10 = vmul.f32 1.442695, %v1385_v24  ;;  %v4957_v61 = vpop.eup %3653  ;;  %v6372_v44 = vunpack.c.h.bf16 %v4617_v28  ;;  %v1508_v1 = vmul.f32 1.442695, %v1392_v38 }
 0x1c9   : > { %v4955_v11 = vmul.f32 %v6370_v29, %v1395_v48  ;;  %v6373_v59 = vunpack.c.l.bf16 %v4624_v33  ;;  %v2841_v47 = vadd.f32 %v2840_v41, %v4932_v27  ;;  %v4968_v56 = vpop.eup %3655  ;;  %3673 = vpow2.f32 %v1514_v30  ;;  %v992_v62 = vpop.f32.mrf.mxu0 }
 0x1ca   : > { %v4961_v14 = vmul.f32 %v6372_v44, %v1385_v24  ;;  %v2437_v48 = vadd.f32 %v4910_v21, %v4906_v55  ;;  %v1387_v29 = vmul.f32 5.0, %v986_v39  ;;  %v1401_v13 = vmul.f32 5.0, %v3545_v2  ;;  %v4972_v15 = vpop.eup %3657  ;;  %v3551_v21 = vpop.f32.mrf.mxu1 }
 0x1cb   : > { %6371 = vst [vmem:[#allocation37_spill] sm:$0xff] %v4955_v11  ;;  %v4965_v19 = vmul.f32 %v6373_v59, %v1392_v38  ;;  %3675 = vpow2.f32 %v1494_v10  ;;  %v2842_v33 = vadd.f32 %v2841_v47, %v4915_v36  ;;  %v1388_v24 = vmul.f32 5.0, %v988_v20  ;;  %v994_v55 = vpop.f32.mrf.mxu0  ;;  %v4981_v2 = vpop.eup %3659 }
 0x1cc   : > { %v2804_v28 = vadd.f32 %v2803_v23, %v4961_v14  ;;  %3677 = vpow2.f32 %v1508_v1  ;;  %v2438_v41 = vadd.f32 %v2437_v48, %v4902_v32  ;;  %v1498_v38 = vmul.f32 1.442695, %v1387_v29  ;;  %v4988_v1 = vpop.eup %3661 }
 0x1cd   : > { %v6374_v30 = vunpack.c.l.bf16 %v4627_v34  ;;  %v2843_v39 = vadd.f32 %v2842_v33, %v4965_v19  ;;  %v1526_v10 = vmul.f32 1.442695, %v1401_v13  ;;  %v6375_v23 = vunpack.c.h.bf16 %v4644_v45  ;;  %v4995_v9 = vpop.eup %3663 }
 0x1ce   : > { %v1500_v20 = vmul.f32 1.442695, %v1388_v24  ;;  %2439 = vadd.xlane.f32.xlu0 %v2438_v41  ;;  %3679 = vpow2.f32 %v1498_v38  ;;  %v6377_v47 = vunpack.c.h.bf16 %v4627_v34  ;;  %6378 = vst [vmem:[#allocation39_spill] sm:$0xff] %v4995_v9  ;;  %v5000_v3 = vpop.eup %3665  ;;  %v6379_v34 = vunpack.c.l.bf16 %v4644_v45  ;;  %v1273_v38 = vpop.f32.mrf.mxu1 }
 0x1cf   : > { %v4979_v44 = vmul.f32 %v6374_v30, %v1387_v29  ;;  %v4986_v59 = vmul.f32 %v6375_v23, %v1401_v13  ;;  %v1398_v29 = vmul.f32 5.0, %v1253_v31  ;;  %v998_v30 = vpop.f32.mrf.mxu0  ;;  %3681 = vpow2.f32 %v1526_v10 }
 0x1d0   : > { %v4993_v48 = vmul.f32 %v6377_v47, %v1388_v24  ;;  %v2844_v33 = vadd.f32 %v2843_v39, %v4955_v11  ;;  %v2441_v13 = vadd.f32 %v4928_v51, %v4920_v17  ;;  %v1390_v23 = vmul.f32 5.0, %v992_v62 }
 0x1d1   : > { %6376 = vst [vmem:[#allocation38_spill] sm:$0xff] %v4986_v59  ;;  %v2768_v32 = vadd.f32 %v2767_v54, %v4979_v44  ;;  %3683 = vpow2.f32 %v1500_v20  ;;  %v1520_v41 = vmul.f32 1.442695, %v1398_v29  ;;  %v5005_v24 = vmul.f32 %v6379_v34, %v1398_v29  ;;  %v1000_v31 = vpop.f32.mrf.mxu0  ;;  %v5014_v45 = vpop.eup %3667 }
 0x1d2   : > { %v2805_v54 = vadd.f32 %v2804_v28, %v4993_v48  ;;  %v2442_v10 = vadd.f32 %v2441_v13, %v4896_v25  ;;  %v1504_v47 = vmul.f32 1.442695, %v1390_v23  ;;  %v6381_v39 = vunpack.c.l.bf16 %v4647_v46 }
 0x1d3   : > { %6380 = vst [vmem:[#allocation40_spill] sm:$0xff] %v5005_v24  ;;  %v1407_v51 = vmul.f32 5.0, %v4945_v49  ;;  %3685 = vpow2.f32 %v1520_v41  ;;  %v2845_v62 = vadd.f32 %v2844_v33, %v5005_v24  ;;  %v1391_v17 = vmul.f32 5.0, %v994_v55  ;;  %v1004_v20 = vpop.f32.mrf.mxu0  ;;  %v5018_v34 = vpop.eup %3669 }
 0x1d4   : > { %v5010_v9 = vmul.f32 %v6381_v39, %v1390_v23  ;;  %v1404_v28 = vmul.f32 5.0, %v1263_v60  ;;  %2443 = vadd.xlane.f32.xlu1 %v2442_v10  ;;  %3687 = vpow2.f32 %v1504_v47  ;;  %6382 = vst [vmem:[#allocation41_spill] sm:$0xff] %v5018_v34  ;;  %v6383_v23 = vunpack.c.h.bf16 %v4653_v50  ;;  %v3554_v47 = vpop.f32.mrf.mxu1  ;;  %v5032_v39 = vpop.eup %3671 }
 0x1d5   : > { %v1538_v25 = vmul.f32 1.442695, %v1407_v51  ;;  %v1506_v41 = vmul.f32 1.442695, %v1391_v17  ;;  %v6384_v55 = vunpack.c.h.bf16 %v4647_v46  ;;  %v6385_v33 = vunpack.c.l.bf16 %v4653_v50 }
 0x1d6   : > { %v2769_v29 = vadd.f32 %v2768_v32, %v5010_v9  ;;  %v5022_v49 = vmul.f32 %v6383_v23, %v1407_v51  ;;  %v1006_v32 = vpop.f32.mrf.mxu0  ;;  %v1532_v13 = vmul.f32 1.442695, %v1404_v28  ;;  %v2846_v26 = vadd.f32 %v2845_v62, %v4986_v59 }
 0x1d7   : > { %v5026_v60 = vmul.f32 %v6384_v55, %v1391_v17  ;;  %v5030_v10 = vmul.f32 %v6385_v33, %v1404_v28  ;;  %v6387_v24 = vunpack.c.l.bf16 %v4630_v35  ;;  %v6388_v46 = vunpack.c.h.bf16 %v4630_v35  ;;  %v5053_v33 = vpop.eup %3673 }
 0x1d8   : > { %3689 = vpow2.f32 %v1538_v25  ;;  %v6389_v23 = vunpack.c.l.bf16 %v4637_v40  ;;  %v1393_v28 = vmul.f32 5.0, %v998_v30  ;;  %v5051_v62 = vpop.f32.mrf.mxu0  ;;  %6390 = vst [vmem:[#allocation43_spill] sm:$0xff] %v5053_v33  ;;  %v6391_v25 = vunpack.c.l.bf16 %v4657_v52 }
 0x1d9   : > { %6386 = vst [vmem:[#allocation42_spill] sm:$0xff] %v5030_v10  ;;  %v5038_v51 = vmul.f32 %v4924_v37, %v6387_v24  ;;  %v5043_v17 = vmul.f32 %v4942_v22, %v6388_v46  ;;  %v2806_v50 = vadd.f32 %v2805_v54, %v5026_v60  ;;  %3691 = vpow2.f32 %v1506_v41  ;;  %v5058_v24 = vpop.eup %3675 }
 0x1da   : > { %v5049_v55 = vmul.f32 %v4947_v16, %v6389_v23  ;;  %v2847_v37 = vadd.f32 %v2846_v26, %v5030_v10  ;;  %v1413_v22 = vmul.f32 5.0, %v3551_v21  ;;  %v1510_v54 = vmul.f32 1.442695, %v1393_v28  ;;  %v1283_v23 = vpop.f32.mrf.mxu1  ;;  %v5064_v59 = vpop.f32.mrf.mxu0 }
 0x1db   : > { %v2108_v35 = vadd.f32 %v5043_v17, %v5038_v51  ;;  %v5062_v46 = vmul.f32 %v6391_v25, %v1393_v28  ;;  %v1394_v16 = vmul.f32 5.0, %v1000_v31  ;;  %v1410_v30 = vmul.f32 5.0, %v1273_v38  ;;  %v5066_v33 = vpop.eup %3677 }
 0x1dc   : > { %6392 = vst [vmem:[#allocation44_spill] sm:$0xff] %v5066_v33  ;;  %3693 = vpow2.f32 %v1532_v13  ;;  %v1550_v41 = vmul.f32 1.442695, %v1413_v22  ;;  %v2848_v21 = vadd.f32 %v2847_v37, %v5022_v49  ;;  %v6393_v11 = vunpack.c.h.bf16 %v4667_v58  ;;  %v5079_v25 = vpop.f32.mrf.mxu0  ;;  %v5081_v33 = vpop.eup %3679 }
 0x1dd   : > { %v2109_v26 = vadd.f32 %v2108_v35, %v5049_v55  ;;  %v2770_v10 = vadd.f32 %v2769_v29, %v5062_v46  ;;  %v1512_v28 = vmul.f32 1.442695, %v1394_v16  ;;  %v6395_v31 = vunpack.c.h.bf16 %v4657_v52  ;;  %v5089_v29 = vpop.eup %3681 }
 0x1de   : > { %v5073_v34 = vmul.f32 %v6393_v11, %v1413_v22  ;;  %3695 = vpow2.f32 %v1510_v54  ;;  %v1544_v13 = vmul.f32 1.442695, %v1410_v30  ;;  %v6396_v37 = vunpack.c.l.bf16 %v4667_v58  ;;  %6397 = vst [vmem:[#allocation46_spill] sm:$0xff] %v5089_v29  ;;  %v5096_v54 = vpop.eup %3683 }
 0x1df   : > { %v5077_v38 = vmul.f32 %v6395_v31, %v1394_v16  ;;  %2110 = vadd.xlane.f32.xlu0 %v2109_v26  ;;  %v2445_v11 = vadd.f32 %v4961_v14, %v4940_v18  ;;  %3697 = vpow2.f32 %v1550_v41  ;;  %v2449_v22 = vadd.f32 %v4993_v48, %v4979_v44  ;;  %v3557_v31 = vpop.f32.mrf.mxu1  ;;  %v5094_v26 = vpop.f32.mrf.mxu0 }
 0x1e0   : > { %6394 = vst [vmem:[#allocation45_spill] sm:$0xff] %v5073_v34  ;;  %v5085_v35 = vmul.f32 %v6396_v37, %v1410_v30  ;;  %v1396_v16 = vmul.f32 5.0, %v1004_v20  ;;  %3699 = vpow2.f32 %v1512_v28  ;;  %v1419_v18 = vmul.f32 5.0, %v3554_v47  ;;  %v5107_v20 = vpop.eup %3685 }
 0x1e1   : > { %v2807_v52 = vadd.f32 %v2806_v50, %v5077_v38  ;;  %v2446_v30 = vadd.f32 %v2445_v11, %v4932_v27  ;;  %v2450_v14 = vadd.f32 %v2449_v22, %v4915_v36  ;;  %v6398_v50 = vunpack.c.l.bf16 %v4674_v63  ;;  %v5105_v48 = vpop.f32.mrf.mxu0  ;;  %v5110_v27 = vpop.eup %3687 }
 0x1e2   : > { %v2849_v58 = vadd.f32 %v2848_v21, %v5085_v35  ;;  %v1516_v41 = vmul.f32 1.442695, %v1396_v16  ;;  %v1397_v44 = vmul.f32 5.0, %v1006_v32  ;;  %3701 = vpow2.f32 %v1544_v13  ;;  %v1293_v22 = vpop.f32.mrf.mxu1 }
 0x1e3   : > { %v5103_v37 = vmul.f32 %v6398_v50, %v1396_v16  ;;  %2447 = vadd.xlane.f32.xlu0 %v2446_v30  ;;  %v1562_v28 = vmul.f32 1.442695, %v1419_v18  ;;  %v1416_v29 = vmul.f32 5.0, %v1283_v23  ;;  %2451 = vadd.xlane.f32.xlu1 %v2450_v14  ;;  %v6399_v11 = vunpack.c.h.bf16 %v4674_v63  ;;  %v5117_v16 = vpop.f32.mrf.mxu0 }
 0x1e4   : > { %v2850_v21 = vadd.f32 %v2849_v58, %v5073_v34  ;;  %3703 = vpow2.f32 %v1516_v41  ;;  %v1518_v47 = vmul.f32 1.442695, %v1397_v44  ;;  %v6400_v13 = vunpack.c.h.bf16 %v4677_v0 }
 0x1e5   : > { %v2771_v36 = vadd.f32 %v2770_v10, %v5103_v37  ;;  %v5115_v32 = vmul.f32 %v6399_v11, %v1397_v44  ;;  %3705 = vpow2.f32 %v1562_v28  ;;  %v6401_v58 = vunpack.c.l.bf16 %v4677_v0  ;;  %v5137_v11 = vpop.f32.mrf.mxu0  ;;  %v5139_v0 = vpop.eup %3689 }
 0x1e6   : > { %v5121_v23 = vmul.f32 %v6400_v13, %v1419_v18  ;;  %v6403_v14 = vunpack.c.l.bf16 %v4660_v53  ;;  %v1556_v41 = vmul.f32 1.442695, %v1416_v29  ;;  %v6404_v50 = vunpack.c.h.bf16 %v4660_v53  ;;  %6406 = vst [vmem:[#allocation48_spill] sm:$0xff] %v5139_v0  ;;  %v5146_v53 = vpop.eup %3691 }
 0x1e7   : > { %v5125_v30 = vmul.f32 %v6401_v58, %v1416_v29  ;;  %v2808_v63 = vadd.f32 %v2807_v52, %v5115_v32  ;;  %v6405_v28 = vunpack.c.h.bf16 %v4637_v40  ;;  %3707 = vpow2.f32 %v1518_v47  ;;  %v3560_v47 = vpop.f32.mrf.mxu1 }
 0x1e8   : > { %v2015_v10 = vmul.f32 %v4951_v43, %v6403_v14  ;;  %v2016_v44 = vmul.f32 %v4968_v56, %v6404_v50  ;;  %v6407_v52 = vunpack.c.l.bf16 %v4684_v5  ;;  %v6408_v58 = vunpack.c.h.bf16 %v4684_v5  ;;  %v5153_v50 = vpop.f32.mrf.mxu0 }
 0x1e9   : > { %6402 = vst [vmem:[#allocation47_spill] sm:$0xff] %v5125_v30  ;;  %v2017_v18 = vmul.f32 %v4934_v42, %v6405_v28  ;;  %v2851_v13 = vadd.f32 %v2850_v21, %v5125_v30  ;;  %v1400_v5 = vmul.f32 5.0, %v5064_v59  ;;  %v6410_v0 = vunpack.c.l.bf16 %v4697_v12 }
 0x1ea   : > { %v2621_v43 = vadd.f32 %v2015_v10, %v5038_v51  ;;  %v2018_v29 = vmul.f32 %v4981_v2, %v6407_v52  ;;  %v2112_v56 = vadd.f32 %v2016_v44, %v2015_v10  ;;  %v2658_v40 = vadd.f32 %v2016_v44, %v5043_v17  ;;  %v5159_v10 = vpop.eup %3693  ;;  %v5162_v30 = vpop.f32.mrf.mxu0 }
 0x1eb   : > { %v2695_v42 = vadd.f32 %v2017_v18, %v5049_v55  ;;  %v2019_v14 = vmul.f32 %v4988_v1, %v6408_v58  ;;  %v6409_v51 = vunpack.c.l.bf16 %v4687_v6  ;;  %v1399_v2 = vmul.f32 5.0, %v5051_v62 }
 0x1ec   : > { %v2622_v28 = vadd.f32 %v2621_v43, %v2018_v29  ;;  %v1425_v52 = vmul.f32 5.0, %v3557_v31  ;;  %v2113_v17 = vadd.f32 %v2112_v56, %v2017_v18  ;;  %v5168_v43 = vpop.eup %3695  ;;  %3709 = vpow2.f32 %v1556_v41  ;;  %v1303_v56 = vpop.f32.mrf.mxu1 }
 0x1ed   : > { %v2020_v21 = vmul.f32 %v4972_v15, %v6409_v51  ;;  %v2116_v44 = vadd.f32 %v2019_v14, %v2018_v29  ;;  %v2659_v55 = vadd.f32 %v2658_v40, %v2019_v14  ;;  %v1522_v58 = vmul.f32 1.442695, %v1399_v2  ;;  %v5178_v40 = vpop.f32.mrf.mxu0 }
 0x1ee   : > { %v5166_v34 = vmul.f32 %v6410_v0, %v1399_v2  ;;  %v1574_v15 = vmul.f32 1.442695, %v1425_v52  ;;  %2114 = vadd.xlane.f32.xlu0 %v2113_v17  ;;  %v6411_v31 = vunpack.c.h.bf16 %v4704_v4  ;;  %v6413_v59 = vunpack.c.h.bf16 %v4697_v12 }
 0x1ef   : > { %v2696_v1 = vadd.f32 %v2695_v42, %v2020_v21  ;;  %v2117_v62 = vadd.f32 %v2116_v44, %v2020_v21  ;;  %v5180_v42 = vpop.eup %3697  ;;  %v1524_v14 = vmul.f32 1.442695, %v1400_v5  ;;  %v1422_v51 = vmul.f32 5.0, %v1293_v22 }
 0x1f0   : > { %v5172_v18 = vmul.f32 %v6411_v31, %v1425_v52  ;;  %v5176_v29 = vmul.f32 %v6413_v59, %v1400_v5  ;;  %v2772_v0 = vadd.f32 %v2771_v36, %v5166_v34  ;;  %v2852_v41 = vadd.f32 %v2851_v13, %v5121_v23  ;;  %v5184_v21 = vpop.eup %3699  ;;  %v5193_v31 = vpop.f32.mrf.mxu0 }
 0x1f1   : > { %2118 = vadd.xlane.f32.xlu1 %v2117_v62  ;;  %3711 = vpow2.f32 %v1522_v58  ;;  %v6414_v12 = vunpack.c.l.bf16 %v4690_v7  ;;  %v6415_v17 = vunpack.c.h.bf16 %v4690_v7  ;;  %v1568_v36 = vmul.f32 1.442695, %v1422_v51  ;;  %v5202_v58 = vpop.eup %3701 }
 0x1f2   : > { %6412 = vst [vmem:[#allocation49_spill] sm:$0xff] %v5172_v18  ;;  %v2809_v2 = vadd.f32 %v2808_v63, %v5176_v29  ;;  %3713 = vpow2.f32 %v1574_v15  ;;  %v6416_v22 = vunpack.c.l.bf16 %v4704_v4  ;;  %v6417_v5 = vunpack.c.h.bf16 %v4687_v6  ;;  %v5210_v6 = vpop.f32.mrf.mxu0 }
 0x1f3   : > { %v2021_v52 = vmul.f32 %v5000_v3, %v6414_v12  ;;  %v2022_v44 = vmul.f32 %v5014_v45, %v6415_v17  ;;  %v2453_v7 = vadd.f32 %v5026_v60, %v5010_v9  ;;  %v3563_v45 = vpop.f32.mrf.mxu1  ;;  %v5206_v12 = vpop.eup %3703  ;;  %3715 = vpow2.f32 %v1524_v14 }
 0x1f4   : > { %v5197_v13 = vmul.f32 %v6416_v22, %v1422_v51  ;;  %v2023_v63 = vmul.f32 %v4957_v61, %v6417_v5  ;;  %v1402_v51 = vmul.f32 5.0, %v5079_v25  ;;  %v5212_v61 = vpop.eup %3705  ;;  %v6419_v60 = vunpack.c.l.bf16 %v4717_v8 }
 0x1f5   : > { %v2120_v62 = vadd.f32 %v2022_v44, %v2021_v52  ;;  %v2623_v3 = vadd.f32 %v2622_v28, %v2021_v52  ;;  %v2660_v59 = vadd.f32 %v2659_v55, %v2022_v44  ;;  %6418 = vst [vmem:[#allocation50_spill] sm:$0xff] %v5212_v61  ;;  %v2454_v28 = vadd.f32 %v2453_v7, %v4965_v19 }
 0x1f6   : > { %v2853_v4 = vadd.f32 %v2852_v41, %v5197_v13  ;;  %v2697_v15 = vadd.f32 %v2696_v1, %v2023_v63  ;;  %v1431_v55 = vmul.f32 5.0, %v3560_v47  ;;  %v1403_v52 = vmul.f32 5.0, %v5094_v26  ;;  %v5221_v41 = vpop.eup %3707  ;;  %v1313_v26 = vpop.f32.mrf.mxu1 }
 0x1f7   : > { %v2121_v17 = vadd.f32 %v2120_v62, %v2023_v63  ;;  %v1528_v9 = vmul.f32 1.442695, %v1402_v51  ;;  %v5218_v44 = vmul.f32 %v6419_v60, %v1402_v51  ;;  %v1428_v14 = vmul.f32 5.0, %v1303_v56  ;;  %2455 = vadd.xlane.f32.xlu0 %v2454_v28  ;;  %v6430_v60 = vld [vmem:[#allocation41_spill] sm:$0xff] }
 0x1f8   : > { %v2854_v1 = vadd.f32 %v2853_v4, %v5172_v18  ;;  %3717 = vpow2.f32 %v1568_v36  ;;  %v1586_v25 = vmul.f32 1.442695, %v1431_v55  ;;  %v1530_v22 = vmul.f32 1.442695, %v1403_v52  ;;  %v5236_v36 = vpop.f32.mrf.mxu0  ;;  %v3566_v61 = vpop.f32.mrf.mxu1 }
 0x1f9   : > { %2122 = vadd.xlane.f32.xlu1 %v2121_v17  ;;  %v6420_v19 = vunpack.c.h.bf16 %v4717_v8  ;;  %3719 = vpow2.f32 %v1528_v9  ;;  %v2773_v5 = vadd.f32 %v2772_v0, %v5218_v44  ;;  %v6421_v63 = vunpack.c.h.bf16 %v4724_v57  ;;  %v6425_v8 = vld [vmem:[#allocation5_spill] sm:$0xff]  ;;  %v6428_v9 = vld [vmem:[#allocation6_spill] sm:$0xff] }
 0x1fa   : > { %v6423_v62 = vunpack.c.l.bf16 %v4724_v57  ;;  %v1580_v51 = vmul.f32 1.442695, %v1428_v14  ;;  %v6426_v17 = vunpack.c.l.bf16 %v6425_v8  ;;  %3721 = vpow2.f32 %v1586_v25 }
 0x1fb   : > { %v5225_v47 = vmul.f32 %v6420_v19, %v1403_v52  ;;  %v5230_v56 = vmul.f32 %v6421_v63, %v1431_v55  ;;  %v6427_v52 = vunpack.c.h.bf16 %v6425_v8  ;;  %v6429_v57 = vunpack.c.l.bf16 %v6428_v9 }
 0x1fc   : > { %v5234_v7 = vmul.f32 %v6423_v62, %v1428_v14  ;;  %v2024_v28 = vmul.f32 %v5032_v39, %v6426_v17  ;;  %v2457_v63 = vadd.f32 %v5077_v38, %v5062_v46  ;;  %3723 = vpow2.f32 %v1530_v22  ;;  %v5251_v39 = vpop.eup %3709  ;;  %v6432_v17 = vld [vmem:[#allocation37_spill] sm:$0xff] }
 0x1fd   : > { %6422 = vst [vmem:[#allocation51_spill] sm:$0xff] %v5230_v56  ;;  %v2810_v4 = vadd.f32 %v2809_v2, %v5225_v47  ;;  %v2025_v0 = vmul.f32 %v5058_v24, %v6427_v52  ;;  %v2026_v19 = vmul.f32 %v6430_v60, %v6429_v57  ;;  %6431 = vst [vmem:[#allocation5_spill] sm:$0xff] %v5251_v39  ;;  %v1405_v25 = vmul.f32 5.0, %v5105_v48  ;;  %v5255_v52 = vpop.f32.mrf.mxu0 }
 0x1fe   : > { %6424 = vst [vmem:[#allocation52_spill] sm:$0xff] %v5234_v7  ;;  %v2855_v55 = vadd.f32 %v2854_v1, %v5234_v7  ;;  %v2624_v14 = vadd.f32 %v2623_v3, %v2024_v28  ;;  %v2458_v24 = vadd.f32 %v2457_v63, %v6432_v17  ;;  %v1437_v1 = vmul.f32 5.0, %v3563_v45  ;;  %v5259_v38 = vpop.eup %3711  ;;  %v6436_v45 = vld [vmem:[#allocation10_spill] sm:$0xff] }
 0x1ff   : > { %v2124_v2 = vadd.f32 %v2025_v0, %v2024_v28  ;;  %v2661_v62 = vadd.f32 %v2660_v59, %v2025_v0  ;;  %v2698_v8 = vadd.f32 %v2697_v15, %v2026_v19  ;;  %v1406_v57 = vmul.f32 5.0, %v5117_v16  ;;  %v6433_v59 = vld [vmem:[#allocation8_spill] sm:$0xff]  ;;  %v5265_v48 = vpop.eup %3713 }
 0x200   : > { %v1434_v60 = vmul.f32 5.0, %v1313_v26  ;;  %v2856_v46 = vadd.f32 %v2855_v55, %v5230_v56  ;;  %3725 = vpow2.f32 %v1580_v51  ;;  %2459 = vadd.xlane.f32.xlu1 %v2458_v24  ;;  %v1534_v3 = vmul.f32 1.442695, %v1405_v25  ;;  %6435 = vst [vmem:[#allocation6_spill] sm:$0xff] %v5265_v48  ;;  %v5286_v48 = vpop.f32.mrf.mxu0 }
 0x201   : > { %v2125_v7 = vadd.f32 %v2124_v2, %v2026_v19  ;;  %v6434_v15 = vunpack.c.l.bf16 %v6433_v59  ;;  %v1598_v28 = vmul.f32 1.442695, %v1437_v1  ;;  %v6437_v0 = vunpack.c.h.bf16 %v6436_v45  ;;  %v1323_v2 = vpop.f32.mrf.mxu1 }
 0x202   : > { %v1536_v16 = vmul.f32 1.442695, %v1406_v57  ;;  %v6439_v26 = vunpack.c.h.bf16 %v6433_v59  ;;  %v6440_v51 = vunpack.c.l.bf16 %v6436_v45  ;;  %v1592_v24 = vmul.f32 1.442695, %v1434_v60 }
 0x203   : > { %v5263_v22 = vmul.f32 %v6434_v15, %v1405_v25  ;;  %2126 = vadd.xlane.f32.xlu0 %v2125_v7  ;;  %v5269_v19 = vmul.f32 %v6437_v0, %v1437_v1  ;;  %v6442_v25 = vld [vmem:[#allocation7_spill] sm:$0xff]  ;;  %3727 = vpow2.f32 %v1534_v3  ;;  %v3569_v3 = vpop.f32.mrf.mxu1 }
 0x204   : > { %v5273_v55 = vmul.f32 %v6439_v26, %v1406_v57  ;;  %v5277_v63 = vmul.f32 %v6440_v51, %v1434_v60  ;;  %v6443_v15 = vunpack.c.l.bf16 %v6442_v25  ;;  %v6444_v1 = vunpack.c.h.bf16 %v6442_v25  ;;  %v5288_v57 = vpop.eup %3715  ;;  %v6446_v60 = vld [vmem:[#allocation39_spill] sm:$0xff] }
 0x205   : > { %6438 = vst [vmem:[#allocation41_spill] sm:$0xff] %v5269_v19  ;;  %v2774_v17 = vadd.f32 %v2773_v5, %v5263_v22  ;;  %v6445_v5 = vunpack.c.h.bf16 %v6428_v9  ;;  %3729 = vpow2.f32 %v1598_v28  ;;  %v5298_v56 = vpop.eup %3717  ;;  %v1409_v9 = vmul.f32 5.0, %v5153_v50 }
 0x206   : > { %6441 = vst [vmem:[#allocation37_spill] sm:$0xff] %v5277_v63  ;;  %v2027_v7 = vmul.f32 %v5081_v33, %v6443_v15  ;;  %v2028_v0 = vmul.f32 %v5096_v54, %v6444_v1  ;;  %v2811_v59 = vadd.f32 %v2810_v4, %v5273_v55  ;;  %v2857_v45 = vadd.f32 %v2856_v46, %v5277_v63  ;;  %v5303_v28 = vpop.eup %3719 }
 0x207   : > { %v2029_v26 = vmul.f32 %v6446_v60, %v6445_v5  ;;  %3731 = vpow2.f32 %v1536_v16  ;;  %v2461_v54 = vadd.f32 %v5115_v32, %v5103_v37  ;;  %v1408_v1 = vmul.f32 5.0, %v5137_v11  ;;  %6447 = vst [vmem:[#allocation8_spill] sm:$0xff] %v5298_v56  ;;  %v5301_v5 = vpop.f32.mrf.mxu0  ;;  %v6449_v16 = vld [vmem:[#allocation11_spill] sm:$0xff]  ;;  %v5316_v60 = vpop.eup %3721 }
 0x208   : > { %v2128_v51 = vadd.f32 %v2028_v0, %v2027_v7  ;;  %v2625_v33 = vadd.f32 %v2624_v14, %v2027_v7  ;;  %v2662_v15 = vadd.f32 %v2661_v62, %v2028_v0  ;;  %v1443_v46 = vmul.f32 5.0, %v3566_v61  ;;  %v6448_v14 = vld [vmem:[#allocation40_spill] sm:$0xff]  ;;  %6453 = vst [vmem:[#allocation10_spill] sm:$0xff] %v5316_v60 }
 0x209   : > { %v2699_v25 = vadd.f32 %v2698_v8, %v2029_v26  ;;  %v1440_v63 = vmul.f32 5.0, %v1323_v2  ;;  %v2462_v62 = vadd.f32 %v2461_v54, %v6448_v14  ;;  %v1540_v8 = vmul.f32 1.442695, %v1408_v1  ;;  %v6452_v2 = vld [vmem:[#allocation30_spill] sm:$0xff]  ;;  %v5326_v14 = vpop.eup %3723  ;;  %v6463_v60 = vld [vmem:[#allocation44_spill] sm:$0xff] }
 0x20a   : > { %v2129_v4 = vadd.f32 %v2128_v51, %v2029_v26  ;;  %v6450_v7 = vunpack.c.l.bf16 %v6449_v16  ;;  %v2858_v32 = vadd.f32 %v2857_v45, %v5269_v19  ;;  %3733 = vpow2.f32 %v1592_v24  ;;  %v6454_v26 = vld [vmem:[#allocation13_spill] sm:$0xff] }
 0x20b   : > { %v1610_v11 = vmul.f32 1.442695, %v1443_v46  ;;  %v6451_v61 = vunpack.c.h.bf16 %v6449_v16  ;;  %2463 = vadd.xlane.f32.xlu0 %v2462_v62  ;;  %3735 = vpow2.f32 %v1540_v8  ;;  %v6455_v51 = vunpack.c.h.bf16 %v6454_v26 }
 0x20c   : > { %v5308_v37 = vmul.f32 %v6450_v7, %v1408_v1  ;;  %2130 = vadd.xlane.f32.xlu1 %v2129_v4  ;;  %v1542_v1 = vmul.f32 1.442695, %v1409_v9  ;;  %v6456_v45 = vunpack.c.l.bf16 %v6454_v26  ;;  %v1333_v4 = vpop.f32.mrf.mxu1  ;;  %v1604_v7 = vmul.f32 1.442695, %v1440_v63  ;;  %v6461_v26 = vld [vmem:[#allocation9_spill] sm:$0xff] }
 0x20d   : > { %v5313_v50 = vmul.f32 %v6451_v61, %v1409_v9  ;;  %v5320_v54 = vmul.f32 %v6455_v51, %v1443_v46  ;;  %v6458_v61 = vld [vmem:[#allocation12_spill] sm:$0xff]  ;;  %v5335_v51 = vpop.f32.mrf.mxu0  ;;  %3737 = vpow2.f32 %v1610_v11  ;;  %v1411_v11 = vmul.f32 5.0, %v5162_v30  ;;  %v6467_v30 = vld [vmem:[#allocation17_spill] sm:$0xff] }
 0x20e   : > { %v5324_v24 = vmul.f32 %v6456_v45, %v1440_v63  ;;  %v2775_v16 = vadd.f32 %v2774_v17, %v5308_v37  ;;  %v6459_v0 = vunpack.c.l.bf16 %v6458_v61  ;;  %v6460_v8 = vunpack.c.h.bf16 %v6458_v61  ;;  %v5344_v61 = vpop.eup %3725 }
 0x20f   : > { %v6462_v45 = vunpack.c.l.bf16 %v6461_v26  ;;  %v2465_v63 = vadd.f32 %v5176_v29, %v5166_v34  ;;  %v2812_v17 = vadd.f32 %v2811_v59, %v5313_v50  ;;  %v5350_v29 = vpop.f32.mrf.mxu0  ;;  %3739 = vpow2.f32 %v1542_v1 }
 0x210   : > { %6457 = vst [vmem:[#allocation7_spill] sm:$0xff] %v5324_v24  ;;  %v2030_v62 = vmul.f32 %v5110_v27, %v6459_v0  ;;  %v2031_v46 = vmul.f32 %v5146_v53, %v6460_v8  ;;  %v2859_v9 = vadd.f32 %v2858_v32, %v5324_v24  ;;  %v6464_v8 = vld [vmem:[#allocation38_spill] sm:$0xff]  ;;  %v1449_v32 = vmul.f32 5.0, %v3569_v3  ;;  %v3572_v24 = vpop.f32.mrf.mxu1 }
 0x211   : > { %v2032_v19 = vmul.f32 %v6463_v60, %v6462_v45  ;;  %v2466_v18 = vadd.f32 %v2465_v63, %v6464_v8  ;;  %v1412_v60 = vmul.f32 5.0, %v5178_v40  ;;  %v1446_v45 = vmul.f32 5.0, %v1333_v4  ;;  %v6474_v8 = vld [vmem:[#allocation15_spill] sm:$0xff] }
 0x212   : > { %v2132_v56 = vadd.f32 %v2031_v46, %v2030_v62  ;;  %v2626_v27 = vadd.f32 %v2625_v33, %v2030_v62  ;;  %v2663_v0 = vadd.f32 %v2662_v15, %v2031_v46  ;;  %v2860_v34 = vadd.f32 %v2859_v9, %v5320_v54  ;;  %v6465_v33 = vld [vmem:[#allocation14_spill] sm:$0xff]  ;;  %v5356_v46 = vpop.eup %3727 }
 0x213   : > { %v2700_v53 = vadd.f32 %v2699_v25, %v2032_v19  ;;  %2467 = vadd.xlane.f32.xlu1 %v2466_v18  ;;  %v1546_v59 = vmul.f32 1.442695, %v1411_v11  ;;  %v6466_v15 = vunpack.c.l.bf16 %v6465_v33  ;;  %v1622_v62 = vmul.f32 1.442695, %v1449_v32  ;;  %v5366_v18 = vpop.eup %3729 }
 0x214   : > { %v2133_v39 = vadd.f32 %v2132_v56, %v2032_v19  ;;  %3741 = vpow2.f32 %v1604_v7  ;;  %v6468_v56 = vunpack.c.h.bf16 %v6467_v30  ;;  %v1548_v19 = vmul.f32 1.442695, %v1412_v60  ;;  %6472 = vst [vmem:[#allocation11_spill] sm:$0xff] %v5366_v18 }
 0x215   : > { %v5354_v25 = vmul.f32 %v6466_v15, %v1411_v11  ;;  %v6470_v3 = vunpack.c.l.bf16 %v6467_v30  ;;  %v6473_v1 = vunpack.c.h.bf16 %v6465_v33  ;;  %v1616_v63 = vmul.f32 1.442695, %v1446_v45  ;;  %v1343_v15 = vpop.f32.mrf.mxu1  ;;  %v6478_v33 = vld [vmem:[#allocation43_spill] sm:$0xff] }
 0x216   : > { %2134 = vadd.xlane.f32.xlu0 %v2133_v39  ;;  %v5360_v40 = vmul.f32 %v6468_v56, %v1449_v32  ;;  %v6475_v11 = vunpack.c.l.bf16 %v6474_v8  ;;  %v6476_v7 = vunpack.c.h.bf16 %v6474_v8  ;;  %v5378_v56 = vpop.eup %3731  ;;  %3743 = vpow2.f32 %v1546_v59 }
 0x217   : > { %v5364_v4 = vmul.f32 %v6470_v3, %v1446_v45  ;;  %v5370_v9 = vmul.f32 %v6473_v1, %v1412_v60  ;;  %v2776_v30 = vadd.f32 %v2775_v16, %v5354_v25  ;;  %v6477_v60 = vunpack.c.h.bf16 %v6461_v26  ;;  %v5385_v1 = vpop.f32.mrf.mxu0  ;;  %v5390_v16 = vpop.eup %3733 }
 0x218   : > { %6469 = vst [vmem:[#allocation39_spill] sm:$0xff] %v5360_v40  ;;  %v2033_v39 = vmul.f32 %v5168_v43, %v6475_v11  ;;  %v2034_v32 = vmul.f32 %v5184_v21, %v6476_v7  ;;  %3745 = vpow2.f32 %v1622_v62  ;;  %v2469_v7 = vadd.f32 %v5225_v47, %v5218_v44  ;;  %v5393_v18 = vpop.eup %3735  ;;  %v6479_v62 = vld [vmem:[#allocation42_spill] sm:$0xff] }
 0x219   : > { %6471 = vst [vmem:[#allocation40_spill] sm:$0xff] %v5364_v4  ;;  %v2861_v3 = vadd.f32 %v2860_v34, %v5364_v4  ;;  %v2035_v45 = vmul.f32 %v6478_v33, %v6477_v60  ;;  %3747 = vpow2.f32 %v1548_v19  ;;  %v1414_v59 = vmul.f32 5.0, %v5193_v31  ;;  %v3575_v33 = vpop.f32.mrf.mxu1  ;;  %v6480_v19 = vld [vmem:[#allocation18_spill] sm:$0xff]  ;;  %v5401_v31 = vpop.f32.mrf.mxu0 }
 0x21a   : > { %v2136_v43 = vadd.f32 %v2034_v32, %v2033_v39  ;;  %v2627_v11 = vadd.f32 %v2626_v27, %v2033_v39  ;;  %v2664_v8 = vadd.f32 %v2663_v0, %v2034_v32  ;;  %v1455_v4 = vmul.f32 5.0, %v3572_v24 }
 0x21b   : > { %v2701_v21 = vadd.f32 %v2700_v53, %v2035_v45  ;;  %v1415_v26 = vmul.f32 5.0, %v5210_v6  ;;  %v1452_v60 = vmul.f32 5.0, %v1343_v15  ;;  %v2470_v27 = vadd.f32 %v2469_v7, %v6479_v62  ;;  %v5408_v15 = vpop.eup %3737 }
 0x21c   : > { %v2137_v34 = vadd.f32 %v2136_v43, %v2035_v45  ;;  %v1552_v0 = vmul.f32 1.442695, %v1414_v59  ;;  %v6481_v53 = vunpack.c.l.bf16 %v6480_v19  ;;  %v2862_v44 = vadd.f32 %v2861_v3, %v5360_v40  ;;  %6483 = vst [vmem:[#allocation30_spill] sm:$0xff] %v5408_v15  ;;  %v6484_v45 = vld [vmem:[#allocation19_spill] sm:$0xff]  ;;  %v5434_v15 = vpop.eup %3739 }
 0x21d   : > { %v2813_v47 = vadd.f32 %v2812_v17, %v5370_v9  ;;  %3749 = vpow2.f32 %v1616_v63  ;;  %v1634_v6 = vmul.f32 1.442695, %v1455_v4  ;;  %v6482_v24 = vunpack.c.h.bf16 %v6480_v19  ;;  %2471 = vadd.xlane.f32.xlu0 %v2470_v27 }
 0x21e   : > { %v5398_v39 = vmul.f32 %v6481_v53, %v1414_v59  ;;  %2138 = vadd.xlane.f32.xlu1 %v2137_v34  ;;  %3751 = vpow2.f32 %v1552_v0  ;;  %v6485_v43 = vunpack.c.h.bf16 %v6484_v45  ;;  %v1554_v3 = vmul.f32 1.442695, %v1415_v26  ;;  %v6489_v34 = vld [vmem:[#allocation20_spill] sm:$0xff]  ;;  %v1353_v0 = vpop.f32.mrf.mxu1 }
 0x21f   : > { %v5406_v32 = vmul.f32 %v6482_v24, %v1415_v26  ;;  %v6487_v59 = vunpack.c.l.bf16 %v6484_v45  ;;  %v1628_v63 = vmul.f32 1.442695, %v1452_v60  ;;  %v6490_v19 = vunpack.c.l.bf16 %v6489_v34  ;;  %v6492_v26 = vld [vmem:[#allocation16_spill] sm:$0xff] }
 0x220   : > { %v5412_v7 = vmul.f32 %v6485_v43, %v1455_v4  ;;  %v2777_v17 = vadd.f32 %v2776_v30, %v5398_v39  ;;  %v6491_v24 = vunpack.c.h.bf16 %v6489_v34  ;;  %3753 = vpow2.f32 %v1634_v6 }
 0x221   : > { %v5416_v62 = vmul.f32 %v6487_v59, %v1452_v60  ;;  %v2036_v53 = vmul.f32 %v5206_v12, %v6490_v19  ;;  %v6493_v43 = vunpack.c.l.bf16 %v6492_v26  ;;  %v2473_v30 = vadd.f32 %v5273_v55, %v5263_v22  ;;  %v5431_v60 = vpop.f32.mrf.mxu0 }
 0x222   : > { %6486 = vst [vmem:[#allocation13_spill] sm:$0xff] %v5412_v7  ;;  %v2037_v27 = vmul.f32 %v5221_v41, %v6491_v24  ;;  %v2814_v59 = vadd.f32 %v2813_v47, %v5406_v32  ;;  %v1461_v24 = vmul.f32 5.0, %v3575_v33  ;;  %v1418_v22 = vmul.f32 5.0, %v5255_v52  ;;  %v3578_v47 = vpop.f32.mrf.mxu1  ;;  %v6496_v33 = vld [vmem:[#allocation22_spill] sm:$0xff] }
 0x223   : > { %6488 = vst [vmem:[#allocation12_spill] sm:$0xff] %v5416_v62  ;;  %v2863_v4 = vadd.f32 %v2862_v44, %v5416_v62  ;;  %v2038_v45 = vmul.f32 %v5107_v20, %v6493_v43  ;;  %v2628_v19 = vadd.f32 %v2627_v11, %v2036_v53  ;;  %v2474_v6 = vadd.f32 %v2473_v30, %v5022_v49  ;;  %v5438_v62 = vpop.eup %3741 }
 0x224   : > { %v2140_v12 = vadd.f32 %v2037_v27, %v2036_v53  ;;  %v2665_v34 = vadd.f32 %v2664_v8, %v2037_v27  ;;  %v1417_v44 = vmul.f32 5.0, %v5236_v36  ;;  %v1458_v55 = vmul.f32 5.0, %v1353_v0  ;;  %v6494_v8 = vld [vmem:[#allocation21_spill] sm:$0xff]  ;;  %v5446_v27 = vpop.f32.mrf.mxu0  ;;  %v5448_v36 = vpop.eup %3743 }
 0x225   : > { %v2702_v41 = vadd.f32 %v2701_v21, %v2038_v45  ;;  %v2864_v43 = vadd.f32 %v2863_v4, %v5412_v7  ;;  %3755 = vpow2.f32 %v1554_v3  ;;  %2475 = vadd.xlane.f32.xlu1 %v2474_v6  ;;  %v6495_v53 = vunpack.c.l.bf16 %v6494_v8  ;;  %v5458_v30 = vpop.eup %3745 }
 0x226   : > { %v2141_v20 = vadd.f32 %v2140_v12, %v2038_v45  ;;  %v1558_v11 = vmul.f32 1.442695, %v1417_v44  ;;  %v1646_v49 = vmul.f32 1.442695, %v1461_v24  ;;  %3757 = vpow2.f32 %v1628_v63  ;;  %6499 = vst [vmem:[#allocation9_spill] sm:$0xff] %v5458_v30 }
 0x227   : > { %v5444_v21 = vmul.f32 %v6495_v53, %v1417_v44  ;;  %v6497_v52 = vunpack.c.h.bf16 %v6496_v33  ;;  %v1560_v4 = vmul.f32 1.442695, %v1418_v22  ;;  %v6498_v3 = vunpack.c.l.bf16 %v6496_v33  ;;  %v6501_v53 = vld [vmem:[#allocation24_spill] sm:$0xff] }
 0x228   : > { %2142 = vadd.xlane.f32.xlu0 %v2141_v20  ;;  %v6500_v12 = vunpack.c.h.bf16 %v6494_v8  ;;  %v1640_v44 = vmul.f32 1.442695, %v1458_v55  ;;  %v6502_v7 = vunpack.c.l.bf16 %v6501_v53  ;;  %v6503_v20 = vunpack.c.h.bf16 %v6501_v53 }
 0x229   : > { %v5452_v0 = vmul.f32 %v6497_v52, %v1461_v24  ;;  %v5456_v45 = vmul.f32 %v6498_v3, %v1458_v55  ;;  %v5470_v52 = vpop.eup %3747  ;;  %3759 = vpow2.f32 %v1558_v11  ;;  %v2778_v33 = vadd.f32 %v2777_v17, %v5444_v21  ;;  %v1363_v55 = vpop.f32.mrf.mxu1 }
 0x22a   : > { %v5462_v6 = vmul.f32 %v6500_v12, %v1418_v22  ;;  %v2039_v63 = vmul.f32 %v5259_v38, %v6502_v7  ;;  %v2040_v24 = vmul.f32 %v5288_v57, %v6503_v20  ;;  %v6504_v8 = vunpack.c.h.bf16 %v6492_v26  ;;  %v6505_v22 = vld [vmem:[#allocation46_spill] sm:$0xff]  ;;  %v5477_v7 = vpop.f32.mrf.mxu0  ;;  %v5482_v53 = vpop.eup %3749 }
 0x22b   : > { %v2865_v3 = vadd.f32 %v2864_v43, %v5456_v45  ;;  %3761 = vpow2.f32 %v1646_v49  ;;  %v2477_v11 = vadd.f32 %v5313_v50, %v5308_v37  ;;  %v1420_v17 = vmul.f32 5.0, %v5286_v48  ;;  %v5485_v49 = vpop.eup %3751 }
 0x22c   : > { %v2041_v12 = vmul.f32 %v6505_v22, %v6504_v8  ;;  %v2144_v30 = vadd.f32 %v2040_v24, %v2039_v63  ;;  %v2629_v40 = vadd.f32 %v2628_v19, %v2039_v63  ;;  %v2666_v38 = vadd.f32 %v2665_v34, %v2040_v24  ;;  %v6506_v63 = vld [vmem:[#allocation25_spill] sm:$0xff] }
 0x22d   : > { %3763 = vpow2.f32 %v1560_v4  ;;  %v1467_v26 = vmul.f32 5.0, %v3578_v47  ;;  %v1421_v20 = vmul.f32 5.0, %v5301_v5  ;;  %v1464_v8 = vmul.f32 5.0, %v1363_v55  ;;  %v5496_v5 = vpop.eup %3753 }
 0x22e   : > { %v2703_v57 = vadd.f32 %v2702_v41, %v2041_v12  ;;  %v2145_v43 = vadd.f32 %v2144_v30, %v2041_v12  ;;  %v2478_v19 = vadd.f32 %v2477_v11, %v5085_v35  ;;  %v1564_v34 = vmul.f32 1.442695, %v1420_v17  ;;  %v5494_v30 = vpop.f32.mrf.mxu0  ;;  %v6508_v35 = vld [vmem:[#allocation26_spill] sm:$0xff] }
 0x22f   : > { %v6507_v4 = vunpack.c.l.bf16 %v6506_v63  ;;  %v2866_v37 = vadd.f32 %v2865_v3, %v5452_v0  ;;  %v2815_v48 = vadd.f32 %v2814_v59, %v5462_v6  ;;  %3765 = vpow2.f32 %v1640_v44 }
 0x230   : > { %2146 = vadd.xlane.f32.xlu1 %v2145_v43  ;;  %v1658_v50 = vmul.f32 1.442695, %v1467_v26  ;;  %v1566_v47 = vmul.f32 1.442695, %v1421_v20  ;;  %2479 = vadd.xlane.f32.xlu0 %v2478_v19  ;;  %3767 = vpow2.f32 %v1564_v34  ;;  %v6509_v24 = vunpack.c.h.bf16 %v6508_v35 }
 0x231   : > { %v5490_v41 = vmul.f32 %v6507_v4, %v1420_v17  ;;  %v6511_v12 = vunpack.c.h.bf16 %v6506_v63  ;;  %v6512_v59 = vunpack.c.l.bf16 %v6508_v35  ;;  %v1652_v11 = vmul.f32 1.442695, %v1464_v8  ;;  %v6513_v17 = vld [vmem:[#allocation28_spill] sm:$0xff] }
 0x232   : > { %v5500_v22 = vmul.f32 %v6509_v24, %v1467_v26  ;;  %v6514_v43 = vunpack.c.l.bf16 %v6513_v17  ;;  %v6515_v34 = vunpack.c.h.bf16 %v6513_v17  ;;  %3769 = vpow2.f32 %v1658_v50  ;;  %v6518_v17 = vld [vmem:[#allocation45_spill] sm:$0xff] }
 0x233   : > { %v5504_v55 = vmul.f32 %v6511_v12, %v1421_v20  ;;  %v5508_v44 = vmul.f32 %v6512_v59, %v1464_v8  ;;  %v2779_v3 = vadd.f32 %v2778_v33, %v5490_v41  ;;  %v6516_v20 = vld [vmem:[#allocation23_spill] sm:$0xff]  ;;  %v2481_v24 = vadd.f32 %v5370_v9, %v5354_v25  ;;  %v5523_v59 = vpop.f32.mrf.mxu0  ;;  %v6519_v9 = vld [vmem:[#allocation29_spill] sm:$0xff] }
 0x234   : > { %6510 = vst [vmem:[#allocation44_spill] sm:$0xff] %v5500_v22  ;;  %v2042_v19 = vmul.f32 %v5303_v28, %v6514_v43  ;;  %v2043_v26 = vmul.f32 %v5326_v14, %v6515_v34  ;;  %v6517_v4 = vunpack.c.l.bf16 %v6516_v20  ;;  %3771 = vpow2.f32 %v1566_v47  ;;  %v5525_v28 = vpop.eup %3755 }
 0x235   : > { %v2867_v63 = vadd.f32 %v2866_v37, %v5508_v44  ;;  %v2482_v37 = vadd.f32 %v2481_v24, %v6518_v17  ;;  %v1423_v43 = vmul.f32 5.0, %v5335_v51  ;;  %v5530_v34 = vpop.eup %3757  ;;  %v1424_v25 = vmul.f32 5.0, %v5350_v29 }
 0x236   : > { %v2044_v35 = vmul.f32 %v5159_v10, %v6517_v4  ;;  %v2148_v33 = vadd.f32 %v2043_v26, %v2042_v19  ;;  %v2630_v8 = vadd.f32 %v2629_v40, %v2042_v19  ;;  %v2667_v12 = vadd.f32 %v2666_v38, %v2043_v26  ;;  %v5546_v29 = vpop.eup %3759 }
 0x237   : > { %v2868_v14 = vadd.f32 %v2867_v63, %v5500_v22  ;;  %v6520_v47 = vunpack.c.l.bf16 %v6519_v9  ;;  %v6521_v38 = vunpack.c.h.bf16 %v6519_v9  ;;  %2483 = vadd.xlane.f32.xlu1 %v2482_v37  ;;  %v6522_v63 = vld [vmem:[#allocation31_spill] sm:$0xff]  ;;  %v6524_v51 = vunpack.c.h.bf16 %v6516_v20 }
 0x238   : > { %v2704_v50 = vadd.f32 %v2703_v57, %v2044_v35  ;;  %v2149_v10 = vadd.f32 %v2148_v33, %v2044_v35  ;;  %v1570_v57 = vmul.f32 1.442695, %v1423_v43  ;;  %v6523_v4 = vunpack.c.l.bf16 %v6522_v63  ;;  %v6525_v35 = vld [vmem:[#allocation48_spill] sm:$0xff]  ;;  %v5551_v37 = vpop.eup %3761 }
 0x239   : > { %v2045_v40 = vmul.f32 %v5356_v46, %v6520_v47  ;;  %v2046_v19 = vmul.f32 %v5378_v56, %v6521_v38  ;;  %v2869_v26 = vrot.slane %v2868_v14, 4  ;;  %v2047_v33 = vmul.f32 %v6525_v35, %v6524_v51  ;;  %v5549_v56 = vpop.f32.mrf.mxu0 }
 0x23a   : > { %v5541_v24 = vmul.f32 %v6523_v4, %v1423_v43  ;;  %v2816_v17 = vadd.f32 %v2815_v48, %v5504_v55  ;;  %3773 = vpow2.f32 %v1652_v11  ;;  %2150 = vadd.xlane.f32.xlu0 %v2149_v10  ;;  %v1572_v38 = vmul.f32 1.442695, %v1424_v25  ;;  %v5557_v51 = vpop.eup %3763 }
 0x23b   : > { %v2152_v46 = vadd.f32 %v2046_v19, %v2045_v40  ;;  %v2631_v9 = vadd.f32 %v2630_v8, %v2045_v40  ;;  %v2870_v47 = vadd.f32 %v2869_v26, %v2868_v14  ;;  %v6526_v43 = vunpack.c.h.bf16 %v6522_v63  ;;  %v6527_v26 = vld [vmem:[#allocation34_spill] sm:$0xff] }
 0x23c   : > { %v2668_v20 = vadd.f32 %v2667_v12, %v2046_v19  ;;  %3775 = vpow2.f32 %v1570_v57  ;;  %v2780_v48 = vadd.f32 %v2779_v3, %v5541_v24  ;;  %v2705_v10 = vadd.f32 %v2704_v50, %v2047_v33  ;;  %v6530_v3 = vld [vmem:[#allocation27_spill] sm:$0xff] }
 0x23d   : > { %v5555_v4 = vmul.f32 %v6526_v43, %v1424_v25  ;;  %v2153_v11 = vadd.f32 %v2152_v46, %v2047_v33  ;;  %v2871_v35 = vrot.slane %v2870_v47, 2  ;;  %v2485_v8 = vadd.f32 %v5406_v32, %v5398_v39  ;;  %v5575_v32 = vpop.f32.mrf.mxu0  ;;  %v6532_v33 = vld [vmem:[#allocation47_spill] sm:$0xff] }
 0x23e   : > { %v1426_v40 = vmul.f32 5.0, %v5385_v1  ;;  %v1427_v14 = vmul.f32 5.0, %v5401_v31  ;;  %v6528_v25 = vunpack.c.l.bf16 %v6527_v26  ;;  %v6529_v19 = vunpack.c.h.bf16 %v6527_v26  ;;  %v5577_v1 = vpop.eup %3765 }
 0x23f   : > { %2154 = vadd.xlane.f32.xlu1 %v2153_v11  ;;  %v6531_v63 = vunpack.c.l.bf16 %v6530_v3  ;;  %v2489_v39 = vadd.f32 %v5462_v6, %v5444_v21  ;;  %v2872_v31 = vadd.f32 %v2871_v35, %v2870_v47  ;;  %v2486_v46 = vadd.f32 %v2485_v8, %v6532_v33 }
 0x240   : > { %v2048_v12 = vmul.f32 %v5393_v18, %v6528_v25  ;;  %v2049_v57 = vmul.f32 %v5434_v15, %v6529_v19  ;;  %v1576_v43 = vmul.f32 1.442695, %v1426_v40  ;;  %v6533_v18 = vld [vmem:[#allocation32_spill] sm:$0xff]  ;;  %v5584_v15 = vpop.eup %3767  ;;  %3777 = vpow2.f32 %v1572_v38  ;;  %v5594_v38 = vpop.f32.mrf.mxu0 }
 0x241   : > { %v2050_v50 = vmul.f32 %v5202_v58, %v6531_v63  ;;  %v6534_v11 = vunpack.c.l.bf16 %v6533_v18  ;;  %v1578_v25 = vmul.f32 1.442695, %v1427_v14  ;;  %v2873_v63 = vrot.slane %v2872_v31, 1  ;;  %2487 = vadd.xlane.f32.xlu0 %v2486_v46  ;;  %v5591_v8 = vpop.eup %3769 }
 0x242   : > { %v2156_v58 = vadd.f32 %v2049_v57, %v2048_v12  ;;  %v2632_v19 = vadd.f32 %v2631_v9, %v2048_v12  ;;  %v2817_v21 = vadd.f32 %v2816_v17, %v5555_v4  ;;  %v6535_v6 = vunpack.c.h.bf16 %v6533_v18  ;;  %v5596_v22 = vpop.eup %3771 }
 0x243   : > { %v5582_v26 = vmul.f32 %v6534_v11, %v1426_v40  ;;  %v2669_v35 = vadd.f32 %v2668_v20, %v2049_v57  ;;  %3779 = vpow2.f32 %v1576_v43  ;;  %v2706_v11 = vadd.f32 %v2705_v10, %v2050_v50  ;;  %v6536_v20 = vld [vmem:[#allocation36_spill] sm:$0xff] }
 0x244   : > { %v5589_v47 = vmul.f32 %v6535_v6, %v1427_v14  ;;  %v2157_v33 = vadd.f32 %v2156_v58, %v2050_v50  ;;  %3781 = vpow2.f32 %v1578_v25  ;;  %v2490_v17 = vadd.f32 %v2489_v39, %v5121_v23  ;;  %v6540_v39 = vld [vmem:[#allocation35_spill] sm:$0xff] }
 0x245   : > { %v2781_v40 = vadd.f32 %v2780_v48, %v5582_v26  ;;  %v1429_v9 = vmul.f32 5.0, %v5431_v60  ;;  %v1430_v14 = vmul.f32 5.0, %v5446_v27  ;;  %v6537_v12 = vunpack.c.l.bf16 %v6536_v20  ;;  %v1700_v6 = vld [vmem:[%s4309_s0 + $0xf0] sm:$0xff] }
 0x246   : > { %v6538_v48 = vunpack.c.h.bf16 %v6536_v20  ;;  %v6539_v50 = vunpack.c.h.bf16 %v6530_v3  ;;  %v2493_v23 = vadd.f32 %v5504_v55, %v5490_v41  ;;  %v2818_v60 = vadd.f32 %v2817_v21, %v5589_v47  ;;  %2158 = vadd.xlane.f32.xlu0 %v2157_v33  ;;  %2491 = vadd.xlane.f32.xlu1 %v2490_v17  ;;  %v5621_v20 = vpop.f32.mrf.mxu0 }
 0x247   : > { %v2051_v57 = vmul.f32 %v5448_v36, %v6537_v12  ;;  %v1582_v27 = vmul.f32 1.442695, %v1429_v9  ;;  %v6541_v43 = vunpack.c.l.bf16 %v6540_v39  ;;  %v1584_v36 = vmul.f32 1.442695, %v1430_v14  ;;  %v5623_v41 = vpop.eup %3773 }
 0x248   : > { %v2052_v10 = vmul.f32 %v5470_v52, %v6538_v48  ;;  %v2053_v46 = vmul.f32 %v5180_v42, %v6539_v50  ;;  %v5617_v25 = vadd.f32 %v2873_v63, %v2872_v31  ;;  %v1848_v42 = vld [vmem:[%s4311_s3 + $0xa8] sm:$0xff]  ;;  %v6542_v55 = vunpack.c.h.bf16 %v6540_v39  ;;  %v5640_v50 = vpop.f32.mrf.mxu0  ;;  %v1702_v39 = vld [vmem:[%s4309_s0 + $0xfc] sm:$0xff] }
 0x249   : > { %v5615_v18 = vmul.f32 %v6541_v43, %v1429_v9  ;;  %v2633_v58 = vadd.f32 %v2632_v19, %v2051_v57  ;;  %3783 = vpow2.f32 %v1582_v27  ;;  %v2494_v17 = vadd.f32 %v2493_v23, %v5197_v13 }
 0x24a   : > { %v2160_v52 = vadd.f32 %v2052_v10, %v2051_v57  ;;  %v2670_v3 = vadd.f32 %v2669_v35, %v2052_v10  ;;  %v5627_v21 = vmul.f32 %v6542_v55, %v1430_v14  ;;  %v2707_v33 = vadd.f32 %v2706_v11, %v2053_v46  ;;  %v5632_v35 = vpop.eup %3775 }
 0x24b   : > { %v2782_v31 = vadd.f32 %v2781_v40, %v5615_v18  ;;  %3785 = vpow2.f32 %v1584_v36  ;;  %v1432_v19 = vmul.f32 5.0, %v5477_v7  ;;  %2495 = vadd.xlane.f32.xlu0 %v2494_v17  ;;  %v1784_v9 = vunpack.c.l.bf16 %v1700_v6  ;;  %v6544_v40 = vld [vmem:[#allocation5_spill] sm:$0xff] }
 0x24c   : > { %v2161_v63 = vadd.f32 %v2160_v52, %v2053_v46  ;;  %v1433_v12 = vmul.f32 5.0, %v5494_v30  ;;  %v1785_v57 = vunpack.c.h.bf16 %v1700_v6  ;;  %v1926_v48 = vunpack.c.l.bf16 %v1848_v42  ;;  %v6545_v52 = vld [vmem:[#allocation49_spill] sm:$0xff] }
 0x24d   : > { %v1588_v11 = vmul.f32 1.442695, %v1432_v19  ;;  %v1927_v14 = vunpack.c.h.bf16 %v1848_v42  ;;  %v6543_v13 = vunpack.c.l.bf16 %v6452_v2  ;;  %v2497_v7 = vadd.f32 %v5555_v4, %v5541_v24  ;;  %v1850_v42 = vld [vmem:[%s4311_s3 + $0xb4] sm:$0xff]  ;;  %v5652_v55 = vpop.eup %3777  ;;  %v6546_v24 = vld [vmem:[#allocation33_spill] sm:$0xff] }
 0x24e   : > { %2162 = vadd.xlane.f32.xlu1 %v2161_v63  ;;  %v2819_v46 = vadd.f32 %v2818_v60, %v5627_v21  ;;  %v5643_v23 = vmul.f32 %v1784_v9, %v1432_v19  ;;  %v1590_v30 = vmul.f32 1.442695, %v1433_v12  ;;  %v5645_v27 = vmul.f32 %v1785_v57, %v1433_v12 }
 0x24f   : > { %v2056_v10 = vmul.f32 %v6544_v40, %v6543_v13  ;;  %3787 = vpow2.f32 %v1588_v11  ;;  %v2054_v43 = vmul.f32 %v5485_v49, %v1926_v48  ;;  %v2055_v36 = vmul.f32 %v5525_v28, %v1927_v14  ;;  %v5659_v28 = vpop.f32.mrf.mxu0 }
 0x250   : > { %v2498_v6 = vadd.f32 %v2497_v7, %v6545_v52  ;;  %v2783_v60 = vadd.f32 %v2782_v31, %v5643_v23  ;;  %3789 = vpow2.f32 %v1590_v30  ;;  %v2820_v63 = vadd.f32 %v2819_v46, %v5645_v27  ;;  %v5661_v12 = vpop.eup %3779  ;;  %v6548_v7 = vld [vmem:[#allocation50_spill] sm:$0xff] }
 0x251   : > { %v2708_v17 = vadd.f32 %v2707_v33, %v2056_v10  ;;  %v2164_v19 = vadd.f32 %v2055_v36, %v2054_v43  ;;  %v1435_v49 = vmul.f32 5.0, %v5523_v59  ;;  %v1787_v9 = vunpack.c.l.bf16 %v1702_v39  ;;  %v5664_v31 = vpop.eup %3781 }
 0x252   : > { %2499 = vadd.xlane.f32.xlu1 %v2498_v6  ;;  %v1436_v57 = vmul.f32 5.0, %v5549_v56  ;;  %v1788_v48 = vunpack.c.h.bf16 %v1702_v39  ;;  %v1929_v11 = vunpack.c.l.bf16 %v1850_v42  ;;  %v1930_v14 = vunpack.c.h.bf16 %v1850_v42  ;;  %v1704_v6 = vld [vmem:[%s4309_s0 + $0x108] sm:$0xff] }
 0x253   : > { %v2165_v33 = vadd.f32 %v2164_v19, %v2056_v10  ;;  %v1594_v13 = vmul.f32 1.442695, %v1435_v49  ;;  %v5666_v40 = vmul.f32 %v1787_v9, %v1435_v49  ;;  %v6547_v59 = vunpack.c.h.bf16 %v6452_v2  ;;  %v1852_v19 = vld [vmem:[%s4311_s3 + $0xc0] sm:$0xff]  ;;  %v5679_v2 = vpop.f32.mrf.mxu0 }
 0x254   : > { %v1596_v30 = vmul.f32 1.442695, %v1436_v57  ;;  %v5671_v52 = vmul.f32 %v1788_v48, %v1436_v57  ;;  %v2057_v56 = vmul.f32 %v5546_v29, %v1929_v11  ;;  %v2058_v39 = vmul.f32 %v5557_v51, %v1930_v14  ;;  %v5683_v48 = vld [vmem:[%s4311_s3 + $0xc8] ss:$12 sps:$4 sm:$0xff]  }
 0x255   : > { %v2059_v46 = vmul.f32 %v6548_v7, %v6547_v59  ;;  %v2634_v42 = vadd.f32 %v2633_v58, %v2054_v43  ;;  %v2671_v4 = vadd.f32 %v2670_v3, %v2055_v36  ;;  %2166 = vadd.xlane.f32.xlu0 %v2165_v33  ;;  %3791 = vpow2.f32 %v1594_v13  ;;  %v6549_v58 = vld [vmem:[#allocation52_spill] sm:$0xff]  ;;  %v5696_v59 = vpop.f32.mrf.mxu0 }
 0x256   : > { %v2501_v10 = vadd.f32 %v5589_v47, %v5582_v26  ;;  %v2784_v49 = vadd.f32 %v2783_v60, %v5666_v40  ;;  %3793 = vpow2.f32 %v1596_v30  ;;  %v2168_v9 = vadd.f32 %v2058_v39, %v2057_v56  ;;  %v5685_v29 = vpop.eup %3783 }
 0x257   : > { %v2709_v57 = vadd.f32 %v2708_v17, %v2059_v46  ;;  %v2821_v51 = vadd.f32 %v2820_v63, %v5671_v52  ;;  %v1438_v43 = vmul.f32 5.0, %v5575_v32  ;;  %v1790_v36 = vunpack.c.l.bf16 %v1704_v6 }
 0x258   : > { %v2502_v3 = vadd.f32 %v2501_v10, %v6549_v58  ;;  %v5690_v26 = vpop.eup %3785  ;;  %v2169_v47 = vadd.f32 %v2168_v9, %v2059_v46  ;;  %v1439_v11 = vmul.f32 5.0, %v5594_v38  ;;  %v1791_v60 = vunpack.c.h.bf16 %v1704_v6  ;;  %v1706_v9 = vld [vmem:[%s4309_s0 + $0x114] sm:$0xff] }
 0x259   : > { %v1932_v14 = vunpack.c.l.bf16 %v1852_v19  ;;  %v1600_v17 = vmul.f32 1.442695, %v1438_v43  ;;  %v5693_v33 = vmul.f32 %v1790_v36, %v1438_v43  ;;  %v1933_v13 = vunpack.c.h.bf16 %v1852_v19  ;;  %v1854_v19 = vld [vmem:[%s4311_s3 + $0xcc] sm:$0xff]  ;;  %v6550_v43 = vld [vmem:[#allocation8_spill] sm:$0xff] }
 0x25a   : > { %2503 = vadd.xlane.f32.xlu0 %v2502_v3  ;;  %v1934_v63 = vunpack.c.l.bf16 %v5683_v48  ;;  %2170 = vadd.xlane.f32.xlu1 %v2169_v47  ;;  %v1602_v32 = vmul.f32 1.442695, %v1439_v11  ;;  %v5698_v7 = vmul.f32 %v1791_v60, %v1439_v11  ;;  %v2505_v38 = vadd.f32 %v5627_v21, %v5615_v18  ;;  %v6551_v47 = vld [vmem:[#allocation51_spill] sm:$0xff] }
 0x25b   : > { %v2060_v46 = vmul.f32 %v5584_v15, %v1932_v14  ;;  %v2635_v30 = vadd.f32 %v2634_v42, %v2057_v56  ;;  %v2672_v6 = vadd.f32 %v2671_v4, %v2058_v39  ;;  %3795 = vpow2.f32 %v1600_v17 }
 0x25c   : > { %v2061_v10 = vmul.f32 %v5596_v22, %v1933_v13  ;;  %v5706_v58 = vpop.eup %3787  ;;  %v2785_v3 = vadd.f32 %v2784_v49, %v5693_v33  ;;  %3797 = vpow2.f32 %v1602_v32  ;;  %v2062_v36 = vmul.f32 %v6550_v43, %v1934_v63  ;;  %v5715_v22 = vpop.f32.mrf.mxu0 }
 0x25d   : > { %v2506_v11 = vadd.f32 %v2505_v38, %v6551_v47  ;;  %v5711_v15 = vpop.eup %3789  ;;  %v2822_v18 = vadd.f32 %v2821_v51, %v5698_v7  ;;  %v2636_v4 = vadd.f32 %v2635_v30, %v2060_v46  ;;  %v1441_v56 = vmul.f32 5.0, %v5621_v20 }
 0x25e   : > { %v2172_v21 = vadd.f32 %v2061_v10, %v2060_v46  ;;  %v1793_v39 = vunpack.c.l.bf16 %v1706_v9  ;;  %v1442_v42 = vmul.f32 5.0, %v5640_v50  ;;  %v1794_v49 = vunpack.c.h.bf16 %v1706_v9  ;;  %v1708_v9 = vld [vmem:[%s4309_s0 + $0x120] sm:$0xff] }
 0x25f   : > { %2507 = vadd.xlane.f32.xlu1 %v2506_v11  ;;  %v1935_v60 = vunpack.c.l.bf16 %v1854_v19  ;;  %v1606_v17 = vmul.f32 1.442695, %v1441_v56  ;;  %v1936_v13 = vunpack.c.h.bf16 %v1854_v19  ;;  %v1937_v63 = vunpack.c.h.bf16 %v5683_v48  ;;  %v5728_v19 = vpop.f32.mrf.mxu0  ;;  %v6552_v11 = vld [vmem:[#allocation6_spill] sm:$0xff] }
 0x260   : > { %v2173_v14 = vadd.f32 %v2172_v21, %v2062_v36  ;;  %v5719_v32 = vmul.f32 %v1793_v39, %v1441_v56  ;;  %v1608_v51 = vmul.f32 1.442695, %v1442_v42  ;;  %v5721_v20 = vmul.f32 %v1794_v49, %v1442_v42 }
 0x261   : > { %v2063_v46 = vmul.f32 %v5632_v35, %v1935_v60  ;;  %v2673_v38 = vadd.f32 %v2672_v6, %v2061_v10  ;;  %3799 = vpow2.f32 %v1606_v17  ;;  %v2064_v50 = vmul.f32 %v5652_v55, %v1936_v13  ;;  %v1856_v35 = vld [vmem:[%s4311_s3 + $0xd8] sm:$0xff]  ;;  %v5736_v6 = vld [vmem:[%s4311_s3 + $0xe0] ss:$12 sps:$4 sm:$0xff]   ;;  %v1114_v13 = vpop.f32.mrf.mxu0 }
 0x262   : > { %2174 = vadd.xlane.f32.xlu0 %v2173_v14  ;;  %v2509_v30 = vadd.f32 %v5645_v27, %v5643_v23  ;;  %v5730_v48 = vpop.eup %3791  ;;  %v2710_v43 = vadd.f32 %v2709_v57, %v2062_v36  ;;  %v2786_v47 = vadd.f32 %v2785_v3, %v5719_v32  ;;  %3801 = vpow2.f32 %v1608_v51  ;;  %v6553_v27 = vld [vmem:[#allocation37_spill] sm:$0xff] }
 0x263   : > { %v2065_v21 = vmul.f32 %v6552_v11, %v1937_v63  ;;  %v5738_v10 = vpop.eup %3793  ;;  %v2823_v55 = vadd.f32 %v2822_v18, %v5721_v20  ;;  %v2176_v56 = vadd.f32 %v2064_v50, %v2063_v46  ;;  %v2637_v23 = vadd.f32 %v2636_v4, %v2063_v46 }
 0x264   : > { %v2510_v39 = vadd.f32 %v2509_v30, %v6553_v27  ;;  %v1444_v42 = vmul.f32 5.0, %v5659_v28  ;;  %v1796_v49 = vunpack.c.l.bf16 %v1708_v9  ;;  %v1445_v57 = vmul.f32 5.0, %v5679_v2 }
 0x265   : > { %v1797_v3 = vunpack.c.h.bf16 %v1708_v9  ;;  %v2177_v36 = vadd.f32 %v2176_v56, %v2065_v21  ;;  %v1938_v60 = vunpack.c.l.bf16 %v1856_v35  ;;  %v1939_v14 = vunpack.c.h.bf16 %v1856_v35  ;;  %v1710_v9 = vld [vmem:[%s4309_s0 + $0x12c] sm:$0xff] }
 0x266   : > { %2511 = vadd.xlane.f32.xlu0 %v2510_v39  ;;  %v1940_v17 = vunpack.c.l.bf16 %v5736_v6  ;;  %v1612_v18 = vmul.f32 1.442695, %v1444_v42  ;;  %v5745_v63 = vmul.f32 %v1796_v49, %v1444_v42  ;;  %v1614_v4 = vmul.f32 1.442695, %v1445_v57  ;;  %v1858_v39 = vld [vmem:[%s4311_s3 + $0xe4] sm:$0xff] }
 0x267   : > { %v5747_v51 = vmul.f32 %v1797_v3, %v1445_v57  ;;  %v2674_v28 = vadd.f32 %v2673_v38, %v2064_v50  ;;  %2178 = vadd.xlane.f32.xlu1 %v2177_v36  ;;  %v2066_v2 = vmul.f32 %v5661_v12, %v1938_v60  ;;  %v2067_v46 = vmul.f32 %v5664_v31, %v1939_v14  ;;  %v1118_v50 = vpop.f32.mrf.mxu0 }
 0x268   : > { %v2513_v30 = vadd.f32 %v5671_v52, %v5666_v40  ;;  %v5754_v11 = vpop.eup %3795  ;;  %v2711_v35 = vadd.f32 %v2710_v43, %v2065_v21  ;;  %3803 = vpow2.f32 %v1612_v18  ;;  %v2068_v56 = vmul.f32 %v5344_v61, %v1940_v17  ;;  %v6554_v52 = vld [vmem:[#allocation41_spill] sm:$0xff] }
 0x269   : > { %v1447_v27 = vmul.f32 5.0, %v5696_v59  ;;  %v5759_v42 = vpop.eup %3797  ;;  %v2787_v38 = vadd.f32 %v2786_v47, %v5745_v63  ;;  %3805 = vpow2.f32 %v1614_v4  ;;  %v2824_v12 = vadd.f32 %v2823_v55, %v5747_v51  ;;  %v1120_v18 = vpop.f32.mrf.mxu0 }
 0x26a   : > { %v2180_v31 = vadd.f32 %v2067_v46, %v2066_v2  ;;  %v2638_v40 = vadd.f32 %v2637_v23, %v2066_v2  ;;  %v2514_v49 = vadd.f32 %v2513_v30, %v6554_v52  ;;  %v1799_v43 = vunpack.c.l.bf16 %v1710_v9  ;;  %v1860_v30 = vld [vmem:[%s4311_s3 + $0xf0] sm:$0xff] }
 0x26b   : > { %v1618_v57 = vmul.f32 1.442695, %v1447_v27  ;;  %v1448_v61 = vmul.f32 5.0, %v5715_v22  ;;  %v1800_v3 = vunpack.c.h.bf16 %v1710_v9  ;;  %v1941_v59 = vunpack.c.l.bf16 %v1858_v39 }
 0x26c   : > { %v2181_v21 = vadd.f32 %v2180_v31, %v2068_v56  ;;  %v2675_v36 = vadd.f32 %v2674_v28, %v2067_v46  ;;  %2515 = vadd.xlane.f32.xlu1 %v2514_v49  ;;  %v5765_v47 = vmul.f32 %v1799_v43, %v1447_v27  ;;  %v1942_v60 = vunpack.c.h.bf16 %v1858_v39  ;;  %v6556_v31 = vld [vmem:[#allocation7_spill] sm:$0xff] }
 0x26d   : > { %v1943_v55 = vunpack.c.h.bf16 %v5736_v6  ;;  %v1620_v23 = vmul.f32 1.442695, %v1448_v61  ;;  %v5768_v14 = vmul.f32 %v1800_v3, %v1448_v61  ;;  %v2069_v17 = vmul.f32 %v5685_v29, %v1941_v59  ;;  %v1712_v6 = vld [vmem:[%s4309_s0 + $0x138] sm:$0xff]  ;;  %v6555_v29 = vld [vmem:[#allocation10_spill] sm:$0xff] }
 0x26e   : > { %2182 = vadd.xlane.f32.xlu0 %v2181_v21  ;;  %v2517_v22 = vadd.f32 %v5698_v7, %v5693_v33  ;;  %v5773_v4 = vpop.eup %3799  ;;  %v2712_v28 = vadd.f32 %v2711_v35, %v2068_v56  ;;  %3807 = vpow2.f32 %v1618_v57  ;;  %v2070_v2 = vmul.f32 %v5690_v26, %v1942_v60  ;;  %v1861_v7 = vld [vmem:[%s4311_s3 + $0xf8] ss:$12 sps:$4 sm:$0xff]   ;;  %v1124_v21 = vpop.f32.mrf.mxu0 }
 0x26f   : > { %v1450_v46 = vmul.f32 5.0, %v5728_v19  ;;  %v5779_v9 = vpop.eup %3801  ;;  %v2788_v27 = vadd.f32 %v2787_v38, %v5765_v47  ;;  %3809 = vpow2.f32 %v1620_v23  ;;  %v2071_v39 = vmul.f32 %v6555_v29, %v1943_v55 }
 0x270   : > { %v2518_v33 = vadd.f32 %v2517_v22, %v6556_v31  ;;  %v2825_v52 = vadd.f32 %v2824_v12, %v5768_v14  ;;  %v2184_v35 = vadd.f32 %v2070_v2, %v2069_v17  ;;  %v2639_v56 = vadd.f32 %v2638_v40, %v2069_v17  ;;  %v1714_v22 = vld [vmem:[%s4309_s0 + $0x144] sm:$0xff]  ;;  %v1126_v29 = vpop.f32.mrf.mxu0 }
 0x271   : > { %v1624_v49 = vmul.f32 1.442695, %v1450_v46  ;;  %v1802_v26 = vunpack.c.l.bf16 %v1712_v6  ;;  %v1451_v19 = vmul.f32 5.0, %v1114_v13  ;;  %v1803_v57 = vunpack.c.h.bf16 %v1712_v6 }
 0x272   : > { %2519 = vadd.xlane.f32.xlu0 %v2518_v33  ;;  %v1944_v43 = vunpack.c.l.bf16 %v1860_v30  ;;  %v2185_v61 = vadd.f32 %v2184_v35, %v2071_v39  ;;  %v2676_v38 = vadd.f32 %v2675_v36, %v2070_v2  ;;  %v1945_v3 = vunpack.c.h.bf16 %v1860_v30  ;;  %v1862_v30 = vld [vmem:[%s4311_s3 + $0xfc] sm:$0xff] }
 0x273   : > { %v1946_v59 = vunpack.c.l.bf16 %v1861_v7  ;;  %v5786_v60 = vmul.f32 %v1802_v26, %v1450_v46  ;;  %v1626_v55 = vmul.f32 1.442695, %v1451_v19  ;;  %v5788_v23 = vmul.f32 %v1803_v57, %v1451_v19 }
 0x274   : > { %v2072_v12 = vmul.f32 %v5706_v58, %v1944_v43  ;;  %2186 = vadd.xlane.f32.xlu1 %v2185_v61  ;;  %3811 = vpow2.f32 %v1624_v49  ;;  %v2073_v13 = vmul.f32 %v5711_v15, %v1945_v3  ;;  %v2521_v40 = vadd.f32 %v5721_v20, %v5719_v32  ;;  %v1716_v3 = vld [vmem:[%s4309_s0 + $0x150] sm:$0xff] }
 0x275   : > { %v1453_v17 = vmul.f32 5.0, %v1118_v50  ;;  %v5795_v36 = vpop.eup %3803  ;;  %v2713_v2 = vadd.f32 %v2712_v28, %v2071_v39  ;;  %v2789_v46 = vadd.f32 %v2788_v27, %v5786_v60  ;;  %3813 = vpow2.f32 %v1626_v55 }
 0x276   : > { %v2074_v6 = vmul.f32 %v5390_v16, %v1946_v59  ;;  %v5800_v58 = vpop.eup %3805  ;;  %v2826_v31 = vadd.f32 %v2825_v52, %v5788_v23  ;;  %v2188_v15 = vadd.f32 %v2073_v13, %v2072_v12  ;;  %v2640_v33 = vadd.f32 %v2639_v56, %v2072_v12  ;;  %v1130_v56 = vpop.f32.mrf.mxu0  ;;  %v6557_v59 = vld [vmem:[#allocation11_spill] sm:$0xff] }
 0x277   : > { %v2522_v32 = vadd.f32 %v2521_v40, %v5320_v54  ;;  %v1630_v20 = vmul.f32 1.442695, %v1453_v17  ;;  %v1805_v50 = vunpack.c.l.bf16 %v1714_v22  ;;  %v1454_v35 = vmul.f32 5.0, %v1120_v18 }
 0x278   : > { %v1806_v49 = vunpack.c.h.bf16 %v1714_v22  ;;  %v2189_v28 = vadd.f32 %v2188_v15, %v2074_v6  ;;  %v1947_v27 = vunpack.c.l.bf16 %v1862_v30  ;;  %v1948_v39 = vunpack.c.h.bf16 %v1862_v30  ;;  %v5822_v22 = vld [vmem:[%s4311_s3 + $0x110] ss:$12 sps:$4 sm:$0xff]   ;;  %v1132_v15 = vpop.f32.mrf.mxu0 }
 0x279   : > { %2523 = vadd.xlane.f32.xlu1 %v2522_v32  ;;  %v1949_v16 = vunpack.c.h.bf16 %v1861_v7  ;;  %v2677_v26 = vadd.f32 %v2676_v38, %v2073_v13  ;;  %v5804_v19 = vmul.f32 %v1805_v50, %v1453_v17  ;;  %v1632_v57 = vmul.f32 1.442695, %v1454_v35  ;;  %v1864_v13 = vld [vmem:[%s4311_s3 + $0x108] sm:$0xff]  ;;  %v5825_v50 = vpop.xlane.xlu0 %2431 }
 0x27a   : > { %v5806_v52 = vmul.f32 %v1806_v49, %v1454_v35  ;;  %v2714_v43 = vadd.f32 %v2713_v2, %v2074_v6  ;;  %2190 = vadd.xlane.f32.xlu0 %v2189_v28  ;;  %v2075_v54 = vmul.f32 %v5730_v48, %v1947_v27  ;;  %v2076_v18 = vmul.f32 %v5738_v10, %v1948_v39 }
 0x27b   : > { %v2525_v61 = vadd.f32 %v5747_v51, %v5745_v63  ;;  %v5813_v7 = vpop.eup %3807  ;;  %3815 = vpow2.f32 %v1630_v20  ;;  %v2790_v38 = vadd.f32 %v2789_v46, %v5804_v19  ;;  %v2077_v55 = vmul.f32 %v6557_v59, %v1949_v16  ;;  %v6558_v63 = vld [vmem:[#allocation40_spill] sm:$0xff] }
 0x27c   : > { %v1456_v12 = vmul.f32 5.0, %v1124_v21  ;;  %v5818_v40 = vpop.eup %3809  ;;  %3817 = vpow2.f32 %v1632_v57  ;;  %v2827_v48 = vadd.f32 %v2826_v31, %v5806_v52  ;;  %v2192_v17 = vadd.f32 %v2076_v18, %v2075_v54  ;;  %v1718_v16 = vld [vmem:[%s4309_s0 + $0x15c] sm:$0xff] }
 0x27d   : > { %v2641_v10 = vadd.f32 %v2640_v33, %v2075_v54  ;;  %v2526_v51 = vadd.f32 %v2525_v61, %v6558_v63  ;;  %v1808_v6 = vunpack.c.l.bf16 %v1716_v3  ;;  %v1457_v30 = vmul.f32 5.0, %v1126_v29  ;;  %v1866_v61 = vld [vmem:[%s4311_s3 + $0x114] sm:$0xff]  ;;  %v5848_v63 = vpop.xlane.xlu1 %2435 }
 0x27e   : > { %v1636_v2 = vmul.f32 1.442695, %v1456_v12  ;;  %v2193_v46 = vadd.f32 %v2192_v17, %v2077_v55  ;;  %v1809_v32 = vunpack.c.h.bf16 %v1716_v3  ;;  %v1950_v21 = vunpack.c.l.bf16 %v1864_v13  ;;  %v1136_v3 = vpop.f32.mrf.mxu0 }
 0x27f   : > { %v1951_v20 = vunpack.c.h.bf16 %v1864_v13  ;;  %v2678_v35 = vadd.f32 %v2677_v26, %v2076_v18  ;;  %2527 = vadd.xlane.f32.xlu0 %v2526_v51  ;;  %v5827_v31 = vmul.f32 %v1808_v6, %v1456_v12  ;;  %v1638_v33 = vmul.f32 1.442695, %v1457_v30  ;;  %v5845_v13 = vpop.xlane.xlu0 %2439 }
 0x280   : > { %v1952_v49 = vunpack.c.l.bf16 %v5822_v22  ;;  %2194 = vadd.xlane.f32.xlu1 %v2193_v46  ;;  %v5830_v28 = vmul.f32 %v1809_v32, %v1457_v30  ;;  %v2078_v29 = vmul.f32 %v5754_v11, %v1950_v21  ;;  %v2529_v39 = vadd.f32 %v5768_v14, %v5765_v47  ;;  %v6559_v14 = vld [vmem:[#allocation39_spill] sm:$0xff] }
 0x281   : > { %v2079_v27 = vmul.f32 %v5759_v42, %v1951_v20  ;;  %v5837_v57 = vpop.eup %3811  ;;  %v2715_v26 = vadd.f32 %v2714_v43, %v2077_v55  ;;  %3819 = vpow2.f32 %v1636_v2  ;;  %v2791_v54 = vadd.f32 %v2790_v38, %v5827_v31 }
 0x282   : > { %v1459_v18 = vmul.f32 5.0, %v1130_v56  ;;  %v5841_v59 = vpop.eup %3813  ;;  %3821 = vpow2.f32 %v1638_v33  ;;  %v2828_v11 = vadd.f32 %v2827_v48, %v5830_v28  ;;  %v2080_v42 = vmul.f32 %v5438_v62, %v1952_v49 }
 0x283   : > { %v2196_v12 = vadd.f32 %v2079_v27, %v2078_v29  ;;  %v2642_v47 = vadd.f32 %v2641_v10, %v2078_v29  ;;  %v2530_v17 = vadd.f32 %v2529_v39, %v6559_v14  ;;  %v1811_v55 = vunpack.c.l.bf16 %v1718_v16  ;;  %v1138_v10 = vpop.f32.mrf.mxu0  ;;  %v5858_v20 = vpop.xlane.xlu0 %2110  ;;  %v1720_v29 = vld [vmem:[%s4309_s0 + $0x168] sm:$0xff] }
 0x284   : > { %v1642_v43 = vmul.f32 1.442695, %v1459_v18  ;;  %v1460_v38 = vmul.f32 5.0, %v1132_v15  ;;  %v1812_v51 = vunpack.c.h.bf16 %v1718_v16  ;;  %v1953_v2 = vunpack.c.l.bf16 %v1866_v61 }
 0x285   : > { %v2197_v56 = vadd.f32 %v2196_v12, %v2080_v42  ;;  %v2679_v6 = vadd.f32 %v2678_v35, %v2079_v27  ;;  %2531 = vadd.xlane.f32.xlu1 %v2530_v17  ;;  %v5850_v48 = vmul.f32 %v1811_v55, %v1459_v18  ;;  %v1954_v62 = vunpack.c.h.bf16 %v1866_v61  ;;  %v5863_v27 = vpop.xlane.xlu1 %2443  ;;  %v6561_v61 = vld [vmem:[#allocation12_spill] sm:$0xff]  ;;  %v1142_v14 = vpop.f32.mrf.mxu0 }
 0x286   : > { %v1955_v30 = vunpack.c.h.bf16 %v5822_v22  ;;  %v1644_v46 = vmul.f32 1.442695, %v1460_v38  ;;  %v5853_v32 = vmul.f32 %v1812_v51, %v1460_v38  ;;  %v2081_v21 = vmul.f32 %v5773_v4, %v1953_v2  ;;  %v1868_v22 = vld [vmem:[%s4311_s3 + $0x120] sm:$0xff]  ;;  %v6560_v4 = vld [vmem:[#allocation30_spill] sm:$0xff] }
 0x287   : > { %2198 = vadd.xlane.f32.xlu0 %v2197_v56  ;;  %v2533_v15 = vadd.f32 %v5788_v23, %v5786_v60  ;;  %v2716_v35 = vadd.f32 %v2715_v26, %v2080_v42  ;;  %3823 = vpow2.f32 %v1642_v43  ;;  %v2082_v33 = vmul.f32 %v5779_v9, %v1954_v62  ;;  %v5871_v23 = vld [vmem:[%s4311_s3 + $0x128] ss:$12 sps:$4 sm:$0xff]  }
 0x288   : > { %v1462_v49 = vmul.f32 5.0, %v1136_v3  ;;  %v5865_v39 = vpop.eup %3815  ;;  %v2792_v16 = vadd.f32 %v2791_v54, %v5850_v48  ;;  %3825 = vpow2.f32 %v1644_v46  ;;  %v2083_v18 = vmul.f32 %v6560_v4, %v1955_v30 }
 0x289   : > { %v2534_v60 = vadd.f32 %v2533_v15, %v6561_v61  ;;  %v5873_v26 = vpop.eup %3817  ;;  %v2829_v9 = vadd.f32 %v2828_v11, %v5853_v32  ;;  %v2200_v3 = vadd.f32 %v2082_v33, %v2081_v21  ;;  %v2643_v42 = vadd.f32 %v2642_v47, %v2081_v21  ;;  %v5877_v62 = vpop.xlane.xlu1 %2451  ;;  %v1870_v61 = vld [vmem:[%s4311_s3 + $0x12c] sm:$0xff] }
 0x28a   : > { %v1648_v12 = vmul.f32 1.442695, %v1462_v49  ;;  %v1814_v17 = vunpack.c.l.bf16 %v1720_v29  ;;  %v1463_v43 = vmul.f32 5.0, %v1138_v10  ;;  %v1815_v55 = vunpack.c.h.bf16 %v1720_v29  ;;  %v5884_v21 = vpop.xlane.xlu0 %2447  ;;  %v1144_v29 = vpop.f32.mrf.mxu0 }
 0x28b   : > { %2535 = vadd.xlane.f32.xlu0 %v2534_v60  ;;  %v1956_v54 = vunpack.c.l.bf16 %v1868_v22  ;;  %v2201_v56 = vadd.f32 %v2200_v3, %v2083_v18  ;;  %v2680_v38 = vadd.f32 %v2679_v6, %v2082_v33  ;;  %v1957_v51 = vunpack.c.h.bf16 %v1868_v22  ;;  %v1722_v33 = vld [vmem:[%s4309_s0 + $0x174] sm:$0xff] }
 0x28c   : > { %v1958_v2 = vunpack.c.l.bf16 %v5871_v23  ;;  %v5879_v30 = vmul.f32 %v1814_v17, %v1462_v49  ;;  %v1650_v11 = vmul.f32 1.442695, %v1463_v43  ;;  %v5881_v47 = vmul.f32 %v1815_v55, %v1463_v43 }
 0x28d   : > { %v2084_v46 = vmul.f32 %v5795_v36, %v1956_v54  ;;  %2202 = vadd.xlane.f32.xlu1 %v2201_v56  ;;  %3827 = vpow2.f32 %v1648_v12  ;;  %v2085_v10 = vmul.f32 %v5800_v58, %v1957_v51  ;;  %v2537_v6 = vadd.f32 %v5806_v52, %v5804_v19  ;;  %v6562_v19 = vld [vmem:[#allocation13_spill] sm:$0xff]  ;;  %v5900_v56 = vpop.xlane.xlu1 %2118 }
 0x28e   : > { %v1465_v15 = vmul.f32 5.0, %v1142_v14  ;;  %v5890_v49 = vpop.eup %3819  ;;  %v2717_v22 = vadd.f32 %v2716_v35, %v2083_v18  ;;  %v2793_v4 = vadd.f32 %v2792_v16, %v5879_v30  ;;  %3829 = vpow2.f32 %v1650_v11  ;;  %v5906_v11 = vpop.xlane.xlu0 %2114 }
 0x28f   : > { %v2086_v36 = vmul.f32 %v5482_v53, %v1958_v2  ;;  %v5895_v60 = vpop.eup %3821  ;;  %v2830_v58 = vadd.f32 %v2829_v9, %v5881_v47  ;;  %v2204_v3 = vadd.f32 %v2085_v10, %v2084_v46  ;;  %v2644_v12 = vadd.f32 %v2643_v42, %v2084_v46  ;;  %v1872_v53 = vld [vmem:[%s4311_s3 + $0x138] sm:$0xff] }
 0x290   : > { %v2538_v52 = vadd.f32 %v2537_v6, %v6562_v19  ;;  %v1654_v14 = vmul.f32 1.442695, %v1465_v15  ;;  %v1817_v17 = vunpack.c.l.bf16 %v1722_v33  ;;  %v1466_v43 = vmul.f32 5.0, %v1144_v29 }
 0x291   : > { %v1818_v55 = vunpack.c.h.bf16 %v1722_v33  ;;  %v2205_v35 = vadd.f32 %v2204_v3, %v2086_v36  ;;  %v2681_v18 = vadd.f32 %v2680_v38, %v2085_v10  ;;  %v1959_v16 = vunpack.c.l.bf16 %v1870_v61 }
 0x292   : > { %2539 = vadd.xlane.f32.xlu1 %v2538_v52  ;;  %v1960_v54 = vunpack.c.h.bf16 %v1870_v61  ;;  %v2718_v51 = vadd.f32 %v2717_v22, %v2086_v36  ;;  %v5902_v2 = vmul.f32 %v1817_v17, %v1465_v15  ;;  %v1656_v9 = vmul.f32 1.442695, %v1466_v43  ;;  %v1873_v22 = vld [vmem:[%s4311_s3 + $0x140] ss:$12 sps:$4 sm:$0xff]   ;;  %v1874_v17 = vld [vmem:[%s4311_s3 + $0x144] sm:$0xff] }
 0x293   : > { %v5904_v42 = vmul.f32 %v1818_v55, %v1466_v43  ;;  %2206 = vadd.xlane.f32.xlu0 %v2205_v35  ;;  %v1961_v46 = vunpack.c.h.bf16 %v5871_v23  ;;  %v2087_v38 = vmul.f32 %v5813_v7, %v1959_v16  ;;  %v2541_v6 = vadd.f32 %v5830_v28, %v5827_v31  ;;  %v6563_v23 = vld [vmem:[#allocation9_spill] sm:$0xff]  ;;  %v5924_v55 = vpop.xlane.xlu1 %2122 }
 0x294   : > { %v2088_v10 = vmul.f32 %v5818_v40, %v1960_v54  ;;  %v5913_v33 = vpop.eup %3823  ;;  %3831 = vpow2.f32 %v1654_v14  ;;  %v2794_v15 = vadd.f32 %v2793_v4, %v5902_v2  ;;  %v1962_v36 = vunpack.c.l.bf16 %v1872_v53 }
 0x295   : > { %v2831_v29 = vadd.f32 %v2830_v58, %v5904_v42  ;;  %v5918_v61 = vpop.eup %3825  ;;  %3833 = vpow2.f32 %v1656_v9  ;;  %v2089_v7 = vmul.f32 %v6563_v23, %v1961_v46  ;;  %v2645_v40 = vadd.f32 %v2644_v12, %v2087_v38  ;;  %v5929_v9 = vpop.xlane.xlu0 %2455 }
 0x296   : > { %v2208_v3 = vadd.f32 %v2088_v10, %v2087_v38  ;;  %v2795_v19 = vrot.slane %v2794_v15, 4  ;;  %v2542_v31 = vadd.f32 %v2541_v6, %v5456_v45  ;;  %v1963_v28 = vunpack.c.h.bf16 %v1872_v53 }
 0x297   : > { %v2832_v52 = vrot.slane %v2831_v29, 4  ;;  %v2719_v43 = vadd.f32 %v2718_v51, %v2089_v7  ;;  %v1964_v4 = vunpack.c.l.bf16 %v1873_v22  ;;  %v2090_v58 = vmul.f32 %v5837_v57, %v1962_v36  ;;  %v1876_v36 = vld [vmem:[%s4311_s3 + $0x150] sm:$0xff] }
 0x298   : > { %v2209_v14 = vadd.f32 %v2208_v3, %v2089_v7  ;;  %v2796_v35 = vadd.f32 %v2795_v19, %v2794_v15  ;;  %2543 = vadd.xlane.f32.xlu0 %v2542_v31  ;;  %v2091_v54 = vmul.f32 %v5841_v59, %v1963_v28  ;;  %v2545_v12 = vadd.f32 %v5853_v32, %v5850_v48  ;;  %v1877_v19 = vld [vmem:[%s4311_s3 + $0x158] ss:$12 sps:$4 sm:$0xff]  }
 0x299   : > { %v2833_v16 = vadd.f32 %v2832_v52, %v2831_v29  ;;  %v2682_v45 = vadd.f32 %v2681_v18, %v2088_v10  ;;  %v2092_v53 = vmul.f32 %v5530_v34, %v1964_v4  ;;  %v1965_v51 = vunpack.c.l.bf16 %v1874_v17  ;;  %v5943_v4 = vpop.xlane.xlu0 %2126 }
 0x29a   : > { %2210 = vadd.xlane.f32.xlu1 %v2209_v14  ;;  %v1966_v46 = vunpack.c.h.bf16 %v1874_v17  ;;  %v5932_v57 = vpop.eup %3827  ;;  %v2797_v38 = vrot.slane %v2796_v35, 2  ;;  %v2212_v15 = vadd.f32 %v2091_v54, %v2090_v58  ;;  %v2646_v29 = vadd.f32 %v2645_v40, %v2090_v58  ;;  %v1878_v17 = vld [vmem:[%s4311_s3 + $0x15c] sm:$0xff]  ;;  %v5941_v14 = vpop.xlane.xlu1 %2459 }
 0x29b   : > { %v2834_v6 = vrot.slane %v2833_v16, 2  ;;  %v3830_v59 = vpop.eup %3829  ;;  %v2720_v23 = vadd.f32 %v2719_v43, %v2092_v53  ;;  %v2546_v48 = vadd.f32 %v2545_v12, %v5452_v0  ;;  %v1967_v32 = vunpack.c.h.bf16 %v1873_v22 }
 0x29c   : > { %v2093_v18 = vmul.f32 %v5865_v39, %v1965_v51  ;;  %v2798_v10 = vadd.f32 %v2797_v38, %v2796_v35  ;;  %v2213_v7 = vadd.f32 %v2212_v15, %v2092_v53  ;;  %v2094_v3 = vmul.f32 %v5873_v26, %v1966_v46  ;;  %v1880_v46 = vld [vmem:[%s4311_s3 + $0x168] sm:$0xff] }
 0x29d   : > { %v2835_v34 = vadd.f32 %v2834_v6, %v2833_v16  ;;  %v2683_v52 = vadd.f32 %v2682_v45, %v2091_v54  ;;  %v2095_v31 = vmul.f32 %v5496_v5, %v1967_v32  ;;  %v1968_v40 = vunpack.c.l.bf16 %v1876_v36 }
 0x29e   : > { %2547 = vadd.xlane.f32.xlu1 %v2546_v48  ;;  %v1969_v28 = vunpack.c.h.bf16 %v1876_v36  ;;  %v2799_v0 = vrot.slane %v2798_v10, 1  ;;  %2214 = vadd.xlane.f32.xlu0 %v2213_v7  ;;  %v2216_v39 = vadd.f32 %v2094_v3, %v2093_v18  ;;  %v2647_v43 = vadd.f32 %v2646_v29, %v2093_v18  ;;  %v1881_v18 = vld [vmem:[%s4311_s3 + $0x170] ss:$12 sps:$4 sm:$0xff]  }
 0x29f   : > { %v2836_v22 = vrot.slane %v2835_v34, 1  ;;  %v6564_v58 = vlaneseq  ;;  %v2721_v35 = vadd.f32 %v2720_v23, %v2095_v31  ;;  %v1970_v5 = vunpack.c.l.bf16 %v1877_v19 }
 0x2a0   : > { %v2096_v16 = vmul.f32 %v5890_v49, %v1968_v40  ;;  %v2097_v54 = vmul.f32 %v5895_v60, %v1969_v28  ;;  %v2800_v12 = vadd.f32 %v2799_v0, %v2798_v10  ;;  %v2217_v53 = vadd.f32 %v2216_v39, %v2095_v31  ;;  %v5956_v40 = vpop.xlane.xlu1 %2130  ;;  %v2301_v0 = vld [vmem:[%s4291_s23] sm:$0xff] }
 0x2a1   : > { %vm5946_vm1 = vcmp.lt.s32.totalorder %v6564_v58, 384  ;;  %v2837_v45 = vadd.f32 %v2836_v22, %v2835_v34  ;;  %v1971_v51 = vunpack.c.l.bf16 %v1878_v17  ;;  %v3832_v38 = vpop.eup %3831  ;;  %v2684_v6 = vadd.f32 %v2683_v52, %v2094_v3 }
 0x2a2   : > { %v2098_v15 = vmul.f32 %v5577_v1, %v1970_v5  ;;  %v2220_v29 = vadd.f32 %v2097_v54, %v2096_v16  ;;  %v2648_v36 = vadd.f32 %v2647_v43, %v2096_v16  ;;  %v3834_v48 = vpop.eup %3833  ;;  %2218 = vadd.xlane.f32.xlu1 %v2217_v53  ;;  %v1972_v32 = vunpack.c.h.bf16 %v1878_v17 }
 0x2a3   : > { %v2878_v23 = vcombine.low %v2800_v12, %v2837_v45  ;;  %v1973_v49 = vunpack.c.h.bf16 %v1877_v19  ;;  %v2099_v60 = vmul.f32 %v5913_v33, %v1971_v51  ;;  %v1974_v7 = vunpack.c.l.bf16 %v1880_v46  ;;  %v5962_v19 = vpop.xlane.xlu0 %2463  ;;  %v2303_v51 = vld [vmem:[%s4291_s23 + $0x10] sm:$0xff] }
 0x2a4   : > { %v2221_v10 = vadd.f32 %v2220_v29, %v2098_v15  ;;  %v2722_v34 = vadd.f32 %v2721_v35, %v2098_v15  ;;  %v1975_v31 = vunpack.c.h.bf16 %v1880_v46  ;;  %v2685_v3 = vadd.f32 %v2684_v6, %v2097_v54  ;;  %v2304_v46 = vld [vmem:[%s4291_s23 + $0x18] sm:$0xff] }
 0x2a5   : > { %v2885_v1 = vrot.slane %v2878_v23, %v6546_v24  ;;  %v2100_v52 = vmul.f32 %v5918_v61, %v1972_v32  ;;  %v2101_v28 = vmul.f32 %v5551_v37, %v1973_v49  ;;  %v2649_v33 = vadd.f32 %v2648_v36, %v2099_v60  ;;  %v1882_v37 = vld [vmem:[%s4311_s3 + $0x174] sm:$0xff]  ;;  %v1980_v36 = vld [vmem:[%s4286_s22] sm:$0xff]  ;;  %v5981_v23 = vpop.xlane.xlu1 %2467 }
 0x2a6   : > { %2222 = vadd.xlane.f32.xlu0 %v2221_v10  ;;  %v1976_v17 = vunpack.c.l.bf16 %v1881_v18  ;;  %v2102_v22 = vmul.f32 %v5932_v57, %v1974_v7  ;;  %v2103_v39 = vmul.f32 %v3830_v59, %v1975_v31  ;;  %v6567_v43 = vrot.slane %v5617_v25, %v6546_v24  ;;  %v2302_v59 = vld [vmem:[%s4291_s23 + $0x8] sm:$0xff] }
 0x2a7   : > { %v2224_v35 = vadd.f32 %v2100_v52, %v2099_v60  ;;  %v2723_v61 = vadd.f32 %v2722_v34, %v2101_v28  ;;  %v2686_v5 = vadd.f32 %v2685_v3, %v2100_v52  ;;  %v2557_v57 = vadd.f32 %v5825_v50, %v2301_v0  ;;  %v2305_v50 = vld [vmem:[%s4291_s23 + $0x20] sm:$0xff]  ;;  %v2306_v60 = vld [vmem:[%s4291_s23 + $0x28] sm:$0xff]  ;;  %v2135_v10 = vpop.xlane.xlu0 %2134  ;;  %v1982_v52 = vld [vmem:[%s4286_s22 + $0x10] sm:$0xff] }
 0x2a8   : > { %v2893_v58 = vcombine.low %v2885_v1, %v6567_v43  ;;  %v2104_v16 = vmul.f32 %v5623_v41, %v1976_v17  ;;  %v2228_v54 = vadd.f32 %v2103_v39, %v2102_v22  ;;  %v2650_v45 = vadd.f32 %v2649_v33, %v2102_v22  ;;  %v1981_v3 = vld [vmem:[%s4286_s22 + $0x8] sm:$0xff]  ;;  %v1984_v33 = vld [vmem:[%s4286_s22 + $0x20] sm:$0xff]  ;;  %v2308_v17 = vld [vmem:[%s4291_s23 + $0x38] sm:$0xff] }
 0x2a9   : > { %v2225_v25 = vadd.f32 %v2224_v35, %v2101_v28  ;;  %v2549_v53 = vadd.f32 %v5881_v47, %v5879_v30  ;;  %v2687_v15 = vadd.f32 %v2686_v5, %v2103_v39  ;;  %2589 = vst.msk [vmem:[%s4291_s23] sm:$0xff] %vm2268_vm2, %v2557_v57  ;;  %v1977_v41 = vunpack.c.l.bf16 %v1882_v37  ;;  %v2309_v22 = vld [vmem:[%s4291_s23 + $0x40] sm:$0xff]  ;;  %v1986_v39 = vld [vmem:[%s4286_s22 + $0x30] sm:$0xff]  ;;  %v2139_v5 = vpop.xlane.xlu1 %2138 }
 0x2aa   : > { %v2900_v12 = vrot.slane %v2893_v58, %v6546_v24  ;;  %v2229_v6 = vadd.f32 %v2228_v54, %v2104_v16  ;;  %v1978_v29 = vunpack.c.h.bf16 %v1882_v37  ;;  %v2724_v30 = vadd.f32 %v2723_v61, %v2104_v16  ;;  %v2310_v37 = vld [vmem:[%s4291_s23 + $0x48] sm:$0xff]  ;;  %v2311_v16 = vld [vmem:[%s4291_s23 + $0x50] sm:$0xff] }
 0x2ab   : > { %2226 = vadd.xlane.f32.xlu1 %v2225_v25  ;;  %v2550_v47 = vadd.f32 %v2549_v53, %v5508_v44  ;;  %v1979_v32 = vunpack.c.h.bf16 %v1881_v18  ;;  %v2558_v49 = vadd.f32 %v5848_v63, %v2302_v59  ;;  %v2105_v34 = vmul.f32 %v3832_v38, %v1977_v41  ;;  %v1983_v44 = vld [vmem:[%s4286_s22 + $0x18] sm:$0xff]  ;;  %v2472_v57 = vpop.xlane.xlu0 %2471 }
 0x2ac   : > { %2902 = vst.msk [vmem:[%s739_s13] sm:$0x7] %vm5946_vm1, %v2900_v12  ;;  %2230 = vadd.xlane.f32.xlu0 %v2229_v6  ;;  %v2106_v7 = vmul.f32 %v3834_v48, %v1978_v29  ;;  %v2559_v31 = vadd.f32 %v5845_v13, %v2303_v51  ;;  %v2560_v1 = vadd.f32 %v5863_v27, %v2304_v46  ;;  %v2307_v27 = vld [vmem:[%s4291_s23 + $0x30] sm:$0xff]  ;;  %v6568_v6 = vld [vmem:[#allocation44_spill] sm:$0xff] }
 0x2ad   : > { %v2107_v63 = vmul.f32 %v5591_v8, %v1979_v32  ;;  %2590 = vst.msk [vmem:[%s4291_s23 + $0x8] sm:$0xff] %vm2268_vm2, %v2558_v49  ;;  %v2553_v38 = vadd.f32 %v5904_v42, %v5902_v2  ;;  %v2236_v48 = vadd.f32 %v5858_v20, %v1980_v36  ;;  %v2561_v13 = vadd.f32 %v5884_v21, %v2305_v50  ;;  %v1985_v2 = vld [vmem:[%s4286_s22 + $0x28] sm:$0xff]  ;;  %v2312_v41 = vld [vmem:[%s4291_s23 + $0x58] sm:$0xff]  ;;  %v1988_v50 = vld [vmem:[%s4286_s22 + $0x40] sm:$0xff] }
 0x2ae   : > { %v2232_v18 = vadd.f32 %v2106_v7, %v2105_v34  ;;  %v2651_v28 = vadd.f32 %v2650_v45, %v2105_v34  ;;  %v2688_v0 = vadd.f32 %v2687_v15, %v2106_v7  ;;  %2591 = vst.msk [vmem:[%s4291_s23 + $0x10] sm:$0xff] %vm2268_vm2, %v2559_v31  ;;  %2592 = vst.msk [vmem:[%s4291_s23 + $0x18] sm:$0xff] %vm2268_vm2, %v2560_v1 }
 0x2af   : > { %v2562_v8 = vadd.f32 %v5877_v62, %v2306_v60  ;;  %v2725_v20 = vadd.f32 %v2724_v30, %v2107_v63  ;;  %2269 = vst.msk [vmem:[%s4286_s22] sm:$0xff] %vm2268_vm2, %v2236_v48  ;;  %2593 = vst.msk [vmem:[%s4291_s23 + $0x20] sm:$0xff] %vm2268_vm2, %v2561_v13  ;;  %v2237_v21 = vadd.f32 %v5906_v11, %v1981_v3  ;;  %v1987_v11 = vld [vmem:[%s4286_s22 + $0x38] sm:$0xff]  ;;  %v2476_v30 = vpop.xlane.xlu1 %2475 }
 0x2b0   : > { %v2238_v42 = vadd.f32 %v5900_v56, %v1982_v52  ;;  %v2239_v62 = vadd.f32 %v5924_v55, %v1983_v44  ;;  %2551 = vadd.xlane.f32.xlu0 %v2550_v47  ;;  %v2233_v43 = vadd.f32 %v2232_v18, %v2107_v63  ;;  %v2652_v58 = vrot.slane %v2651_v28, 4  ;;  %v1989_v52 = vld [vmem:[%s4286_s22 + $0x48] sm:$0xff] }
 0x2b1   : > { %v2689_v35 = vrot.slane %v2688_v0, 4  ;;  %2594 = vst.msk [vmem:[%s4291_s23 + $0x28] sm:$0xff] %vm2268_vm2, %v2562_v8  ;;  %v2563_v61 = vadd.f32 %v5929_v9, %v2307_v27  ;;  %v2726_v56 = vrot.slane %v2725_v20, 4  ;;  %2270 = vst.msk [vmem:[%s4286_s22 + $0x8] sm:$0xff] %vm2268_vm2, %v2237_v21  ;;  %v2240_v55 = vadd.f32 %v5943_v4, %v1984_v33  ;;  %v2143_v49 = vpop.xlane.xlu0 %2142  ;;  %v2314_v8 = vld [vmem:[%s4291_s23 + $0x68] sm:$0xff]  ;;  %v1990_v33 = vld [vmem:[%s4286_s22 + $0x50] sm:$0xff] }
 0x2b2   : > { %2271 = vst.msk [vmem:[%s4286_s22 + $0x10] sm:$0xff] %vm2268_vm2, %v2238_v42  ;;  %2272 = vst.msk [vmem:[%s4286_s22 + $0x18] sm:$0xff] %vm2268_vm2, %v2239_v62  ;;  %v2564_v54 = vadd.f32 %v5941_v14, %v2308_v17  ;;  %v2241_v9 = vadd.f32 %v5956_v40, %v1985_v2  ;;  %v2653_v59 = vadd.f32 %v2652_v58, %v2651_v28  ;;  %2234 = vadd.xlane.f32.xlu1 %v2233_v43  ;;  %v1991_v21 = vld [vmem:[%s4286_s22 + $0x58] sm:$0xff]  ;;  %v2315_v62 = vld [vmem:[%s4291_s23 + $0x70] sm:$0xff] }
 0x2b3   : > { %v2690_v12 = vadd.f32 %v2689_v35, %v2688_v0  ;;  %2595 = vst.msk [vmem:[%s4291_s23 + $0x30] sm:$0xff] %vm2268_vm2, %v2563_v61  ;;  %v2565_v25 = vadd.f32 %v5962_v19, %v2309_v22  ;;  %v2242_v45 = vadd.f32 %v2135_v10, %v1986_v39  ;;  %v2727_v53 = vadd.f32 %v2726_v56, %v2725_v20  ;;  %v1992_v43 = vld [vmem:[%s4286_s22 + $0x60] sm:$0xff]  ;;  %v2316_v58 = vld [vmem:[%s4291_s23 + $0x78] sm:$0xff] }
 0x2b4   : > { %2273 = vst.msk [vmem:[%s4286_s22 + $0x20] sm:$0xff] %vm2268_vm2, %v2240_v55  ;;  %2596 = vst.msk [vmem:[%s4291_s23 + $0x38] sm:$0xff] %vm2268_vm2, %v2564_v54  ;;  %v2566_v14 = vadd.f32 %v5981_v23, %v2310_v37  ;;  %v2243_v4 = vadd.f32 %v2139_v5, %v1987_v11  ;;  %v2567_v40 = vadd.f32 %v2472_v57, %v2311_v16  ;;  %v2654_v51 = vrot.slane %v2653_v59, 2  ;;  %v2317_v5 = vld [vmem:[%s4291_s23 + $0x80] sm:$0xff]  ;;  %v1993_v16 = vld [vmem:[%s4286_s22 + $0x68] sm:$0xff] }
 0x2b5   : > { %2274 = vst.msk [vmem:[%s4286_s22 + $0x28] sm:$0xff] %vm2268_vm2, %v2241_v9  ;;  %v2691_v46 = vrot.slane %v2690_v12, 2  ;;  %v2554_v19 = vadd.f32 %v2553_v38, %v6568_v6  ;;  %2597 = vst.msk [vmem:[%s4291_s23 + $0x40] sm:$0xff] %vm2268_vm2, %v2565_v25  ;;  %v2728_v15 = vrot.slane %v2727_v53, 2  ;;  %v2568_v60 = vadd.f32 %v2476_v30, %v2312_v41  ;;  %v2313_v38 = vld [vmem:[%s4291_s23 + $0x60] sm:$0xff]  ;;  %v2318_v57 = vld [vmem:[%s4291_s23 + $0x88] sm:$0xff] }
 0x2b6   : > { %2275 = vst.msk [vmem:[%s4286_s22 + $0x30] sm:$0xff] %vm2268_vm2, %v2242_v45  ;;  %2598 = vst.msk [vmem:[%s4291_s23 + $0x48] sm:$0xff] %vm2268_vm2, %v2566_v14  ;;  %v2655_v29 = vadd.f32 %v2654_v51, %v2653_v59  ;;  %v2244_v34 = vadd.f32 %v2143_v49, %v1988_v50  ;;  %v1994_v25 = vld [vmem:[%s4286_s22 + $0x70] sm:$0xff]  ;;  %v1996_v41 = vld [vmem:[%s4286_s22 + $0x80] sm:$0xff] }
 0x2b7   : > { %2276 = vst.msk [vmem:[%s4286_s22 + $0x38] sm:$0xff] %vm2268_vm2, %v2243_v4  ;;  %2599 = vst.msk [vmem:[%s4291_s23 + $0x50] sm:$0xff] %vm2268_vm2, %v2567_v40  ;;  %v2692_v36 = vadd.f32 %v2691_v46, %v2690_v12  ;;  %2555 = vadd.xlane.f32.xlu1 %v2554_v19  ;;  %v2729_v23 = vadd.f32 %v2728_v15, %v2727_v53  ;;  %v2319_v14 = vld [vmem:[%s4291_s23 + $0x90] sm:$0xff]  ;;  %v1995_v4 = vld [vmem:[%s4286_s22 + $0x78] sm:$0xff] }
 0x2b8   : > { %v2656_v47 = vrot.slane %v2655_v29, 1  ;;  %2600 = vst.msk [vmem:[%s4291_s23 + $0x58] sm:$0xff] %vm2268_vm2, %v2568_v60  ;;  %2277 = vst.msk [vmem:[%s4286_s22 + $0x40] sm:$0xff] %vm2268_vm2, %v2244_v34  ;;  %v2320_v19 = vld [vmem:[%s4291_s23 + $0x98] sm:$0xff]  ;;  %v1997_v30 = vld [vmem:[%s4286_s22 + $0x88] sm:$0xff] }
 0x2b9   : > { %v2693_v32 = vrot.slane %v2692_v36, 1  ;;  %v2730_v10 = vrot.slane %v2729_v23, 1  ;;  %v2147_v48 = vpop.xlane.xlu1 %2146  ;;  %v2480_v18 = vpop.xlane.xlu0 %2479  ;;  %v1998_v34 = vld [vmem:[%s4286_s22 + $0x90] sm:$0xff] }
 0x2ba   : > { %v2657_v7 = vadd.f32 %v2656_v47, %v2655_v29  ;;  %v2245_v27 = vadd.f32 %v2147_v48, %v1989_v52  ;;  %v2569_v28 = vadd.f32 %v2480_v18, %v2313_v38  ;;  %v2323_v52 = vld [vmem:[%s4291_s23 + $0xb0] sm:$0xff]  ;;  %v2000_v18 = vld [vmem:[%s4286_s22 + $0xa0] sm:$0xff] }
 0x2bb   : > { %v2694_v31 = vadd.f32 %v2693_v32, %v2692_v36  ;;  %v2731_v1 = vadd.f32 %v2730_v10, %v2729_v23  ;;  %v2321_v23 = vld [vmem:[%s4291_s23 + $0xa0] sm:$0xff]  ;;  %v2322_v10 = vld [vmem:[%s4291_s23 + $0xa8] sm:$0xff] }
 0x2bc   : > { %2278 = vst.msk [vmem:[%s4286_s22 + $0x48] sm:$0xff] %vm2268_vm2, %v2245_v27  ;;  %2601 = vst.msk [vmem:[%s4291_s23 + $0x60] sm:$0xff] %vm2268_vm2, %v2569_v28  ;;  %v2324_v27 = vld [vmem:[%s4291_s23 + $0xb8] sm:$0xff] }
 0x2bd   : > { %v2735_v3 = vcombine.low %v2657_v7, %v2694_v31  ;;  %v2749_v63 = vrot.slane %v2731_v1, %v6546_v24 }
 0x2bf   : > { %v2742_v44 = vrot.slane %v2735_v3, %v6546_v24 }
 0x2c0   : > { %v2484_v17 = vpop.xlane.xlu1 %2483 }
 0x2c1   : > { %v2750_v13 = vcombine.low %v2742_v44, %v2749_v63  ;;  %v1999_v63 = vld [vmem:[%s4286_s22 + $0x98] sm:$0xff] }
 0x2c3   : > { %v2757_v0 = vrot.slane %v2750_v13, %v6546_v24  ;;  %v2151_v2 = vpop.xlane.xlu0 %2150  ;;  %v2570_v24 = vadd.f32 %v2484_v17, %v2314_v8  ;;  %v2325_v17 = vld [vmem:[%s4291_s23 + $0xc0] sm:$0xff] }
 0x2c4   : > { %v2246_v20 = vadd.f32 %v2151_v2, %v1990_v33  ;;  %v2001_v2 = vld [vmem:[%s4286_s22 + $0xa8] sm:$0xff] }
 0x2c5   : > { %2763 = vst.msk [vmem:[%s730_s24] sm:$0x7] %vm5946_vm1, %v2757_v0 }
 0x2c6   : > { %2602 = vst.msk [vmem:[%s4291_s23 + $0x68] sm:$0xff] %vm2268_vm2, %v2570_v24  ;;  %2279 = vst.msk [vmem:[%s4286_s22 + $0x50] sm:$0xff] %vm2268_vm2, %v2246_v20 }
 0x2c8   : > { %v2155_v26 = vpop.xlane.xlu1 %2154 }
 0x2c9   : > { %v2247_v42 = vadd.f32 %v2155_v26, %v1991_v21 }
 0x2ca   : > { %v2488_v22 = vpop.xlane.xlu0 %2487 }
 0x2cb   : > { %2280 = vst.msk [vmem:[%s4286_s22 + $0x58] sm:$0xff] %vm2268_vm2, %v2247_v42  ;;  %v2571_v39 = vadd.f32 %v2488_v22, %v2315_v62  ;;  %v2326_v42 = vld [vmem:[%s4291_s23 + $0xc8] sm:$0xff]  ;;  %v2002_v62 = vld [vmem:[%s4286_s22 + $0xb0] sm:$0xff] }
 0x2cd   : > { %2603 = vst.msk [vmem:[%s4291_s23 + $0x70] sm:$0xff] %vm2268_vm2, %v2571_v39 }
 0x2cf   : > { %v2159_v35 = vpop.xlane.xlu0 %2158  ;;  %v2492_v61 = vpop.xlane.xlu1 %2491 }
 0x2d0   : > { %v2248_v37 = vadd.f32 %v2159_v35, %v1992_v43  ;;  %v2572_v11 = vadd.f32 %v2492_v61, %v2316_v58  ;;  %v2327_v35 = vld [vmem:[%s4291_s23 + $0xd0] sm:$0xff] }
 0x2d2   : > { %2281 = vst.msk [vmem:[%s4286_s22 + $0x60] sm:$0xff] %vm2268_vm2, %v2248_v37  ;;  %2604 = vst.msk [vmem:[%s4291_s23 + $0x78] sm:$0xff] %vm2268_vm2, %v2572_v11  ;;  %v2003_v37 = vld [vmem:[%s4286_s22 + $0xb8] sm:$0xff] }
 0x2d4   : > { %v2496_v56 = vpop.xlane.xlu0 %2495 }
 0x2d5   : > { %v2573_v54 = vadd.f32 %v2496_v56, %v2317_v5  ;;  %v2328_v56 = vld [vmem:[%s4291_s23 + $0xd8] sm:$0xff] }
 0x2d7   : > { %v2163_v55 = vpop.xlane.xlu1 %2162  ;;  %2605 = vst.msk [vmem:[%s4291_s23 + $0x80] sm:$0xff] %vm2268_vm2, %v2573_v54 }
 0x2d8   : > { %v2249_v9 = vadd.f32 %v2163_v55, %v1993_v16  ;;  %v2004_v55 = vld [vmem:[%s4286_s22 + $0xc0] sm:$0xff] }
 0x2da   : > { %2282 = vst.msk [vmem:[%s4286_s22 + $0x68] sm:$0xff] %vm2268_vm2, %v2249_v9 }
 0x2db   : > { %v2500_v59 = vpop.xlane.xlu1 %2499 }
 0x2dc   : > { %v2574_v12 = vadd.f32 %v2500_v59, %v2318_v57 }
 0x2de   : > { %2606 = vst.msk [vmem:[%s4291_s23 + $0x88] sm:$0xff] %vm2268_vm2, %v2574_v12  ;;  %v2167_v45 = vpop.xlane.xlu0 %2166  ;;  %v2329_v12 = vld [vmem:[%s4291_s23 + $0xe0] sm:$0xff] }
 0x2df   : > { %v2250_v53 = vadd.f32 %v2167_v45, %v1994_v25  ;;  %v2005_v25 = vld [vmem:[%s4286_s22 + $0xc8] sm:$0xff] }
 0x2e1   : > { %2283 = vst.msk [vmem:[%s4286_s22 + $0x70] sm:$0xff] %vm2268_vm2, %v2250_v53 }
 0x2e3   : > { %v2504_v40 = vpop.xlane.xlu0 %2503  ;;  %v2171_v51 = vpop.xlane.xlu1 %2170 }
 0x2e4   : > { %v2575_v46 = vadd.f32 %v2504_v40, %v2319_v14  ;;  %v2251_v6 = vadd.f32 %v2171_v51, %v1995_v4  ;;  %v2330_v40 = vld [vmem:[%s4291_s23 + $0xe8] sm:$0xff]  ;;  %v2006_v51 = vld [vmem:[%s4286_s22 + $0xd0] sm:$0xff] }
 0x2e6   : > { %2607 = vst.msk [vmem:[%s4291_s23 + $0x90] sm:$0xff] %vm2268_vm2, %v2575_v46  ;;  %2284 = vst.msk [vmem:[%s4286_s22 + $0x78] sm:$0xff] %vm2268_vm2, %v2251_v6 }
 0x2e8   : > { %v2508_v15 = vpop.xlane.xlu1 %2507 }
 0x2e9   : > { %v2576_v29 = vadd.f32 %v2508_v15, %v2320_v19 }
 0x2eb   : > { %v2175_v36 = vpop.xlane.xlu0 %2174  ;;  %2608 = vst.msk [vmem:[%s4291_s23 + $0x98] sm:$0xff] %vm2268_vm2, %v2576_v29 }
 0x2ec   : > { %v2252_v50 = vadd.f32 %v2175_v36, %v1996_v41  ;;  %v2007_v41 = vld [vmem:[%s4286_s22 + $0xd8] sm:$0xff] }
 0x2ee   : > { %2285 = vst.msk [vmem:[%s4286_s22 + $0x80] sm:$0xff] %vm2268_vm2, %v2252_v50  ;;  %v2008_v50 = vld [vmem:[%s4286_s22 + $0xe0] sm:$0xff] }
 0x2ef   : > { %v2512_v47 = vpop.xlane.xlu0 %2511 }
 0x2f0   : > { %v2577_v32 = vadd.f32 %v2512_v47, %v2321_v23  ;;  %v2179_v49 = vpop.xlane.xlu1 %2178  ;;  %v2009_v47 = vld [vmem:[%s4286_s22 + $0xe8] sm:$0xff] }
 0x2f1   : > { %v2253_v60 = vadd.f32 %v2179_v49, %v1997_v30 }
 0x2f2   : > { %2609 = vst.msk [vmem:[%s4291_s23 + $0xa0] sm:$0xff] %vm2268_vm2, %v2577_v32  ;;  %v2010_v32 = vld [vmem:[%s4286_s22 + $0xf0] sm:$0xff] }
 0x2f3   : > { %2286 = vst.msk [vmem:[%s4286_s22 + $0x88] sm:$0xff] %vm2268_vm2, %v2253_v60 }
 0x2f5   : > { %v2516_v7 = vpop.xlane.xlu1 %2515 }
 0x2f6   : > { %v2578_v1 = vadd.f32 %v2516_v7, %v2322_v10  ;;  %v2331_v7 = vld [vmem:[%s4291_s23 + $0xf0] sm:$0xff] }
 0x2f7   : > { %v2183_v31 = vpop.xlane.xlu0 %2182 }
 0x2f8   : > { %v2254_v3 = vadd.f32 %v2183_v31, %v1998_v34  ;;  %2610 = vst.msk [vmem:[%s4291_s23 + $0xa8] sm:$0xff] %vm2268_vm2, %v2578_v1  ;;  %v2011_v1 = vld [vmem:[%s4286_s22 + $0xf8] sm:$0xff] }
 0x2fa   : > { %2287 = vst.msk [vmem:[%s4286_s22 + $0x90] sm:$0xff] %vm2268_vm2, %v2254_v3 }
 0x2fb   : > { %v2520_v44 = vpop.xlane.xlu0 %2519 }
 0x2fc   : > { %v2579_v38 = vadd.f32 %v2520_v44, %v2323_v52 }
 0x2fd   : > { %v2187_v48 = vpop.xlane.xlu1 %2186 }
 0x2fe   : > { %2611 = vst.msk [vmem:[%s4291_s23 + $0xb0] sm:$0xff] %vm2268_vm2, %v2579_v38  ;;  %v2255_v13 = vadd.f32 %v2187_v48, %v1999_v63  ;;  %v2332_v63 = vld [vmem:[%s4291_s23 + $0xf8] sm:$0xff] }
 0x300   : > { %2288 = vst.msk [vmem:[%s4286_s22 + $0x98] sm:$0xff] %vm2268_vm2, %v2255_v13 }
 0x302   : > { %v2524_v28 = vpop.xlane.xlu1 %2523 }
 0x303   : > { %v2580_v0 = vadd.f32 %v2524_v28, %v2324_v27  ;;  %v2191_v8 = vpop.xlane.xlu0 %2190 }
 0x304   : > { %v2256_v33 = vadd.f32 %v2191_v8, %v2000_v18 }
 0x305   : > { %2612 = vst.msk [vmem:[%s4291_s23 + $0xb8] sm:$0xff] %vm2268_vm2, %v2580_v0 }
 0x306   : > { %2289 = vst.msk [vmem:[%s4286_s22 + $0xa0] sm:$0xff] %vm2268_vm2, %v2256_v33 }
 0x308   : > { %v2528_v24 = vpop.xlane.xlu0 %2527 }
 0x309   : > { %v2195_v20 = vpop.xlane.xlu1 %2194  ;;  %v2581_v21 = vadd.f32 %v2528_v24, %v2325_v17 }
 0x30a   : > { %v2257_v26 = vadd.f32 %v2195_v20, %v2001_v2 }
 0x30b   : > { %2613 = vst.msk [vmem:[%s4291_s23 + $0xc0] sm:$0xff] %vm2268_vm2, %v2581_v21 }
 0x30c   : > { %2290 = vst.msk [vmem:[%s4286_s22 + $0xa8] sm:$0xff] %vm2268_vm2, %v2257_v26 }
 0x30e   : > { %v2532_v22 = vpop.xlane.xlu1 %2531 }
 0x30f   : > { %v2582_v43 = vadd.f32 %v2532_v22, %v2326_v42 }
 0x310   : > { %v2199_v39 = vpop.xlane.xlu0 %2198 }
 0x311   : > { %v2258_v58 = vadd.f32 %v2199_v39, %v2002_v62  ;;  %2614 = vst.msk [vmem:[%s4291_s23 + $0xc8] sm:$0xff] %vm2268_vm2, %v2582_v43 }
 0x313   : > { %2291 = vst.msk [vmem:[%s4286_s22 + $0xb0] sm:$0xff] %vm2268_vm2, %v2258_v58 }
 0x314   : > { %v2536_v61 = vpop.xlane.xlu0 %2535 }
 0x315   : > { %v2583_v11 = vadd.f32 %v2536_v61, %v2327_v35 }
 0x316   : > { %v2203_v5 = vpop.xlane.xlu1 %2202 }
 0x317   : > { %2615 = vst.msk [vmem:[%s4291_s23 + $0xd0] sm:$0xff] %vm2268_vm2, %v2583_v11  ;;  %v2259_v16 = vadd.f32 %v2203_v5, %v2003_v37 }
 0x319   : > { %2292 = vst.msk [vmem:[%s4286_s22 + $0xb8] sm:$0xff] %vm2268_vm2, %v2259_v16 }
 0x31b   : > { %v2540_v54 = vpop.xlane.xlu1 %2539 }
 0x31c   : > { %v2584_v9 = vadd.f32 %v2540_v54, %v2328_v56  ;;  %v2207_v57 = vpop.xlane.xlu0 %2206 }
 0x31d   : > { %v2260_v59 = vadd.f32 %v2207_v57, %v2004_v55 }
 0x31e   : > { %2616 = vst.msk [vmem:[%s4291_s23 + $0xd8] sm:$0xff] %vm2268_vm2, %v2584_v9 }
 0x31f   : > { %2293 = vst.msk [vmem:[%s4286_s22 + $0xc0] sm:$0xff] %vm2268_vm2, %v2260_v59 }
 0x321   : > { %v2544_v45 = vpop.xlane.xlu0 %2543 }
 0x322   : > { %v2585_v14 = vadd.f32 %v2544_v45, %v2329_v12 }
 0x323   : > { %v2211_v53 = vpop.xlane.xlu1 %2210 }
 0x324   : > { %v2261_v4 = vadd.f32 %v2211_v53, %v2005_v25  ;;  %2617 = vst.msk [vmem:[%s4291_s23 + $0xe0] sm:$0xff] %vm2268_vm2, %v2585_v14 }
 0x326   : > { %2294 = vst.msk [vmem:[%s4286_s22 + $0xc8] sm:$0xff] %vm2268_vm2, %v2261_v4 }
 0x327   : > { %v2548_v46 = vpop.xlane.xlu1 %2547  ;;  %v2215_v6 = vpop.xlane.xlu0 %2214 }
 0x328   : > { %v2586_v19 = vadd.f32 %v2548_v46, %v2330_v40  ;;  %v2262_v15 = vadd.f32 %v2215_v6, %v2006_v51 }
 0x32a   : > { %2618 = vst.msk [vmem:[%s4291_s23 + $0xe8] sm:$0xff] %vm2268_vm2, %v2586_v19  ;;  %2295 = vst.msk [vmem:[%s4286_s22 + $0xd0] sm:$0xff] %vm2268_vm2, %v2262_v15 }
 0x32b   : > { %v2219_v29 = vpop.xlane.xlu1 %2218 }
 0x32c   : > { %v2263_v36 = vadd.f32 %v2219_v29, %v2007_v41 }
 0x32e   : > { %2296 = vst.msk [vmem:[%s4286_s22 + $0xd8] sm:$0xff] %vm2268_vm2, %v2263_v36 }
 0x32f   : > { %v2223_v23 = vpop.xlane.xlu0 %2222 }
 0x330   : > { %v2264_v30 = vadd.f32 %v2223_v23, %v2008_v50 }
 0x332   : > { %2297 = vst.msk [vmem:[%s4286_s22 + $0xe0] sm:$0xff] %vm2268_vm2, %v2264_v30 }
 0x334   : > { %v2227_v49 = vpop.xlane.xlu1 %2226 }
 0x335   : > { %v2265_v60 = vadd.f32 %v2227_v49, %v2009_v47  ;;  %v2231_v10 = vpop.xlane.xlu0 %2230 }
 0x336   : > { %v2266_v34 = vadd.f32 %v2231_v10, %v2010_v32 }
 0x337   : > { %2298 = vst.msk [vmem:[%s4286_s22 + $0xe8] sm:$0xff] %vm2268_vm2, %v2265_v60 }
 0x338   : > { %2299 = vst.msk [vmem:[%s4286_s22 + $0xf0] sm:$0xff] %vm2268_vm2, %v2266_v34 }
 0x339   : > { %v2552_v31 = vpop.xlane.xlu0 %2551 }
 0x33a   : > { %v2587_v3 = vadd.f32 %v2552_v31, %v2331_v7 }
 0x33b   : > { %v2235_v52 = vpop.xlane.xlu1 %2234 }
 0x33c   : > { %2619 = vst.msk [vmem:[%s4291_s23 + $0xf0] sm:$0xff] %vm2268_vm2, %v2587_v3  ;;  %v2267_v44 = vadd.f32 %v2235_v52, %v2011_v1 }
 0x33e   : > { %2300 = vst.msk [vmem:[%s4286_s22 + $0xf8] sm:$0xff] %vm2268_vm2, %v2267_v44 }
 0x340   : > { %v2556_v38 = vpop.xlane.xlu1 %2555 }
 0x341   : > { %v2588_v48 = vadd.f32 %v2556_v38, %v2332_v63 }
 0x343   : > { %2620 = vst.msk [vmem:[%s4291_s23 + $0xf8] sm:$0xff] %vm2268_vm2, %v2588_v48 }
 0x344 PF: > { %s18_s30 = sadd.s32 1, %s3889_s30   ;;  %s6569_s9 = sld [smem:[#allocation4_spill]] }
 0x345   : > { %p15_p1 = scmp.ge.s32.totalorder %s18_s30, 8   ;;  %s6570_s24 = smov %s3869_s25 }
 0x346   : > { %s6571_s25 = smov %s3988_s15  ;;  %s6572_s26 = smov %s3881_s28 }
 0x347   : > { %s6573_s27 = smov %s3885_s29  ;;  %s6574_s28 = smov %s6577_s8 }
 0x348   :  { %17 = sbr.rel (!%p15_p1) target bundleno = 8 (0x8), region = 189 }
 0x34a   : > { %s6575_s29 = smov %s6569_s9 }

</bundles_post_ra>
